<compile_context>
chip_gen: v6e
topology: v6e:2x2x1
jax: 0.10.0
libtpu: 0.0.40
codegen_flags: <defaults>
</compile_context>

<pallas_src>
import math
from functools import partial

import jax
import jax.numpy as jnp
from jax.experimental import pallas as pl
from jax.experimental.pallas import tpu as pltpu

PRIMITIVES = ('none', 'max_pool_3x3', 'avg_pool_3x3', 'skip_connect',
              'sep_conv_3x3', 'sep_conv_5x5', 'dil_conv_3x3', 'dil_conv_5x5')
NUM_OPS = len(PRIMITIVES)
BN_EPS = 1e-5


# ----------------------------------------------------------------------------
# In-kernel helpers
# ----------------------------------------------------------------------------

def _bn_apply(y, gamma, beta):
    """Train-mode BatchNorm over rows (M = N*H*W) of an (M, C) block."""
    mean = jnp.mean(y, axis=0, keepdims=True)
    var = jnp.mean(jnp.square(y - mean), axis=0, keepdims=True)
    inv = jax.lax.rsqrt(var + BN_EPS)
    return (y - mean) * inv * gamma + beta


def _full(shape):
    """Full-array BlockSpec for a grid=(1,) single-block kernel."""
    n = len(shape)
    return pl.BlockSpec(shape, lambda i: (0,) * n)


# ----------------------------------------------------------------------------
# Pallas kernels
# ----------------------------------------------------------------------------

def _mm_bn_kernel(a_ref, w_ref, g_ref, b_ref, o_ref, *, relu_a):
    a = a_ref[...]
    if relu_a:
        a = jnp.maximum(a, 0.0)
    y = jnp.dot(a, w_ref[...], preferred_element_type=jnp.float32)
    o_ref[...] = _bn_apply(y, g_ref[...], b_ref[...])


def _dw_pw_bn_kernel(p_ref, dw_ref, pw_ref, g_ref, b_ref, o_ref):
    # depthwise tap-accumulate on the VPU, pointwise 1x1 on the MXU, BN epilogue
    dw = jnp.sum(p_ref[...] * dw_ref[...][None, :, :], axis=1)        # (M, C)
    y = jnp.dot(dw, pw_ref[...], preferred_element_type=jnp.float32)  # (M, Cout)
    o_ref[...] = _bn_apply(y, g_ref[...], b_ref[...])


def _fr_kernel(a1_ref, a2_ref, w1_ref, w2_ref, g1_ref, b1_ref, g2_ref, b2_ref,
               o_ref):
    a1 = jnp.maximum(a1_ref[...], 0.0)
    a2 = jnp.maximum(a2_ref[...], 0.0)
    y1 = jnp.dot(a1, w1_ref[...], preferred_element_type=jnp.float32)
    y2 = jnp.dot(a2, w2_ref[...], preferred_element_type=jnp.float32)
    # BN is per-channel, so normalizing each concat half separately is exact.
    o_ref[0, :, :] = _bn_apply(y1, g1_ref[...], b1_ref[...])
    o_ref[1, :, :] = _bn_apply(y2, g2_ref[...], b2_ref[...])


def _maxpool_kernel(p_ref, o_ref):
    o_ref[...] = jnp.max(p_ref[...], axis=1)


def _avgpool_kernel(p_ref, cnt_ref, o_ref):
    o_ref[...] = jnp.sum(p_ref[...], axis=1) / cnt_ref[...]


def _wsum_kernel(*refs, num):
    w_ref = refs[0]                       # (num,) in SMEM
    o_ref = refs[-1]
    acc = w_ref[0] * refs[1][...]
    for k in range(1, num):
        acc = acc + w_ref[k] * refs[1 + k][...]
    o_ref[...] = acc


def _head_kernel(x_ref, w_ref, b_ref, o_ref):
    pooled = jnp.mean(x_ref[...], axis=1)                        # global avg pool
    o_ref[...] = (jnp.dot(pooled, w_ref[...],
                          preferred_element_type=jnp.float32) + b_ref[...])


# ----------------------------------------------------------------------------
# im2col glue (plain JAX, fused by XLA under the single outer jit)
# ----------------------------------------------------------------------------

def _extract_patches(x, k, stride, padding, dilation=1, pad_value=0.0):
    N, H, W, C = x.shape
    xp = jnp.pad(x, ((0, 0), (padding, padding), (padding, padding), (0, 0)),
                 constant_values=pad_value)
    Ho = (H + 2 * padding - dilation * (k - 1) - 1) // stride + 1
    Wo = (W + 2 * padding - dilation * (k - 1) - 1) // stride + 1
    cols = []
    for ky in range(k):
        for kx in range(k):
            sl = xp[:, ky * dilation: ky * dilation + (Ho - 1) * stride + 1: stride,
                       kx * dilation: kx * dilation + (Wo - 1) * stride + 1: stride, :]
            cols.append(sl)
    patches = jnp.stack(cols, axis=3)     # (N, Ho, Wo, k*k, C)
    return patches, Ho, Wo


def _flat2d(shape):
    """Lane-dense 2D view of an NHWC tensor when the size allows it."""
    total = math.prod(shape)
    if total % 128 == 0:
        return (total // 128, 128)
    return (math.prod(shape[:-1]), shape[-1])


# ----------------------------------------------------------------------------
# Fused building-block wrappers
# ----------------------------------------------------------------------------

def _mm_bn(a, w, gamma, beta, relu_a):
    M, K = a.shape
    N = w.shape[1]
    return pl.pallas_call(
        partial(_mm_bn_kernel, relu_a=relu_a),
        grid=(1,),
        in_specs=[_full((M, K)), _full((K, N)), _full((1, N)), _full((1, N))],
        out_specs=_full((M, N)),
        out_shape=jax.ShapeDtypeStruct((M, N), jnp.float32),
    )(a, w, gamma.reshape(1, N), beta.reshape(1, N))


def conv_bn(x, w, bn_p, *, stride=1, padding=0, relu_in=False):
    """(optional ReLU) -> Conv2d(bias=False) -> BatchNorm, one Pallas kernel."""
    cout, cin, kh, kw = w.shape
    N = x.shape[0]
    if kh == 1 and kw == 1 and stride == 1 and padding == 0:
        Ho, Wo = x.shape[1], x.shape[2]
        a = x.reshape(N * Ho * Wo, cin)
    else:
        patches, Ho, Wo = _extract_patches(x, kh, stride, padding)
        a = patches.reshape(N * Ho * Wo, kh * kw * cin)
    wm = jnp.transpose(w, (2, 3, 1, 0)).reshape(kh * kw * cin, cout)
    y = _mm_bn(a, wm, bn_p['gamma'], bn_p['beta'], relu_in)
    return y.reshape(N, Ho, Wo, cout)


def sep_unit(x, dw_w, pw_w, bn_p, *, stride, dilation=1):
    """ReLU -> depthwise kxk (VPU) -> pointwise 1x1 (MXU) -> BN, one kernel."""
    x = jnp.maximum(x, 0.0)               # fused by XLA into the im2col gather
    N, H, W, C = x.shape
    k = dw_w.shape[-1]
    pad = (k // 2) * dilation
    patches, Ho, Wo = _extract_patches(x, k, stride, pad, dilation)
    M = N * Ho * Wo
    p = patches.reshape(M, k * k, C)
    wk = jnp.transpose(dw_w[:, 0], (1, 2, 0)).reshape(k * k, C)
    cout = pw_w.shape[0]
    wp = jnp.transpose(pw_w, (2, 3, 1, 0)).reshape(C, cout)
    y = pl.pallas_call(
        _dw_pw_bn_kernel,
        grid=(1,),
        in_specs=[_full((M, k * k, C)), _full((k * k, C)), _full((C, cout)),
                  _full((1, cout)), _full((1, cout))],
        out_specs=_full((M, cout)),
        out_shape=jax.ShapeDtypeStruct((M, cout), jnp.float32),
    )(p, wk, wp, bn_p['gamma'].reshape(1, cout), bn_p['beta'].reshape(1, cout))
    return y.reshape(N, Ho, Wo, cout)


def sep_conv(p, x, stride):
    y = sep_unit(x, p['dw1'], p['pw1'], p['bn1'], stride=stride, dilation=1)
    y = sep_unit(y, p['dw2'], p['pw2'], p['bn2'], stride=1, dilation=1)
    return y


def dil_conv(p, x, stride):
    return sep_unit(x, p['dw'], p['pw'], p['bn'], stride=stride, dilation=2)


def relu_conv_bn(p, x):
    return conv_bn(x, p['w'], p['bn'], stride=1, padding=0, relu_in=True)


def factorized_reduce(p, x):
    """ReLU -> two strided 1x1 convs -> channel concat -> BN, one kernel."""
    N, H, W, C = x.shape
    a1 = x[:, ::2, ::2, :]                  # conv_1 path (stride-2 sampling)
    a2 = x[:, 1::2, 1::2, :]                # conv_2 path on x[:, :, 1:, 1:]
    Ho, Wo = a1.shape[1], a1.shape[2]
    half = p['w1'].shape[0]
    M = N * Ho * Wo
    w1 = jnp.transpose(p['w1'], (2, 3, 1, 0)).reshape(C, half)
    w2 = jnp.transpose(p['w2'], (2, 3, 1, 0)).reshape(C, half)
    g, b = p['bn']['gamma'], p['bn']['beta']
    out = pl.pallas_call(
        _fr_kernel,
        grid=(1,),
        in_specs=[_full((M, C)), _full((M, C)),
                  _full((C, half)), _full((C, half)),
                  _full((1, half)), _full((1, half)),
                  _full((1, half)), _full((1, half))],
        out_specs=_full((2, M, half)),
        out_shape=jax.ShapeDtypeStruct((2, M, half), jnp.float32),
    )(a1.reshape(M, C), a2.reshape(M, C), w1, w2,
      g[:half].reshape(1, half), b[:half].reshape(1, half),
      g[half:].reshape(1, half), b[half:].reshape(1, half))
    y = jnp.concatenate([out[0], out[1]], axis=-1)     # (M, 2*half)
    return y.reshape(N, Ho, Wo, 2 * half)


def max_pool_3x3(x, stride):
    N, H, W, C = x.shape
    patches, Ho, Wo = _extract_patches(x, 3, stride, 1, pad_value=-1e30)
    M = N * Ho * Wo
    p = patches.reshape(M, 9, C)
    y = pl.pallas_call(
        _maxpool_kernel,
        grid=(1,),
        in_specs=[_full((M, 9, C))],
        out_specs=_full((M, C)),
        out_shape=jax.ShapeDtypeStruct((M, C), jnp.float32),
    )(p)
    return y.reshape(N, Ho, Wo, C)


def avg_pool_3x3(x, stride):
    # count_include_pad=False: divide by the number of valid taps (analytic).
    N, H, W, C = x.shape
    patches, Ho, Wo = _extract_patches(x, 3, stride, 1, pad_value=0.0)
    M = N * Ho * Wo
    p = patches.reshape(M, 9, C)
    oy = jnp.arange(Ho) * stride - 1
    ox = jnp.arange(Wo) * stride - 1
    ry = jnp.minimum(oy + 3, H) - jnp.maximum(oy, 0)
    rx = jnp.minimum(ox + 3, W) - jnp.maximum(ox, 0)
    cnt = (ry[:, None] * rx[None, :]).astype(jnp.float32)       # (Ho, Wo)
    cnt = jnp.broadcast_to(cnt[None], (N, Ho, Wo)).reshape(M, 1)
    y = pl.pallas_call(
        _avgpool_kernel,
        grid=(1,),
        in_specs=[_full((M, 9, C)), _full((M, 1))],
        out_specs=_full((M, C)),
        out_shape=jax.ShapeDtypeStruct((M, C), jnp.float32),
    )(p, cnt)
    return y.reshape(N, Ho, Wo, C)


def pallas_weighted_sum(xs, w):
    """sum_k w[k] * xs[k], branch outputs read as separate refs (no stack)."""
    shape = xs[0].shape
    slab = _flat2d(shape)                 # lane-dense (rows, 128) when possible
    num = len(xs)
    out = pl.pallas_call(
        partial(_wsum_kernel, num=num),
        grid=(1,),
        in_specs=([pl.BlockSpec(memory_space=pltpu.MemorySpace.SMEM)]
                  + [_full(slab) for _ in range(num)]),
        out_specs=_full(slab),
        out_shape=jax.ShapeDtypeStruct(slab, jnp.float32),
    )(w.astype(jnp.float32), *[x.reshape(slab) for x in xs])
    return out.reshape(shape)


def classifier_head(x, w, b):
    """GlobalAvgPool + Linear, one kernel."""
    N, H, W, C = x.shape
    HW = H * W
    NC = w.shape[1]
    return pl.pallas_call(
        _head_kernel,
        grid=(1,),
        in_specs=[_full((N, HW, C)), _full((C, NC)), _full((1, NC))],
        out_specs=_full((N, NC)),
        out_shape=jax.ShapeDtypeStruct((N, NC), jnp.float32),
    )(x.reshape(N, HW, C), w, b.reshape(1, NC))


# ----------------------------------------------------------------------------
# DARTS forward (MixedOp / Cell / Network)
# ----------------------------------------------------------------------------

def mixed_op(op_p, stride, x, weights_row):
    outs = []
    for prim in PRIMITIVES:
        if prim == 'none':
            continue                                   # contributes exactly zero
        if prim == 'max_pool_3x3':
            outs.append(max_pool_3x3(x, stride))
        elif prim == 'avg_pool_3x3':
            outs.append(avg_pool_3x3(x, stride))
        elif prim == 'skip_connect':
            outs.append(x if stride == 1 else factorized_reduce(op_p['skip'], x))
        elif prim == 'sep_conv_3x3':
            outs.append(sep_conv(op_p['sep3'], x, stride))
        elif prim == 'sep_conv_5x5':
            outs.append(sep_conv(op_p['sep5'], x, stride))
        elif prim == 'dil_conv_3x3':
            outs.append(dil_conv(op_p['dil3'], x, stride))
        else:  # 'dil_conv_5x5'
            outs.append(dil_conv(op_p['dil5'], x, stride))
    return pallas_weighted_sum(outs, weights_row[1:])  # drop the 'none' weight


def cell_forward(p, cc, s0, s1, weights, steps, multiplier):
    if cc['reduction_prev']:
        s0 = factorized_reduce(p['pre0'], s0)
    else:
        s0 = relu_conv_bn(p['pre0'], s0)
    s1 = relu_conv_bn(p['pre1'], s1)
    states = [s0, s1]
    offset = 0
    for _ in range(steps):
        contribs = [mixed_op(p['ops'][offset + j], cc['op_strides'][offset + j],
                             h, weights[offset + j])
                    for j, h in enumerate(states)]
        s = contribs[0]
        for c in contribs[1:]:
            s = s + c                       # plain add; fused by XLA
        offset += len(states)
        states.append(s)
    return jnp.concatenate(states[-multiplier:], axis=-1)


def network_forward(params, x_nchw, cfg):
    steps, multiplier = cfg['steps'], cfg['multiplier']
    x = jnp.transpose(x_nchw, (0, 2, 3, 1)).astype(jnp.float32)   # NCHW -> NHWC

    # stem: Conv3x3(pad=1, bias=False) + BatchNorm (fused kernel)
    s = conv_bn(x, params['stem_w'], params['stem_bn'],
                stride=1, padding=1, relu_in=False)
    s0 = s1 = s

    w_normal = jax.nn.softmax(params['alphas_normal'], axis=1)
    w_reduce = jax.nn.softmax(params['alphas_reduce'], axis=1)

    for cp, cc in zip(params['cells'], cfg['cells']):
        w = w_reduce if cc['reduction'] else w_normal
        s0, s1 = s1, cell_forward(cp, cc, s0, s1, w, steps, multiplier)

    return classifier_head(s1, params['cls_w'], params['cls_b'])


# ----------------------------------------------------------------------------
# Deterministic parameter initialization (mirrors Network.__init__ shapes).
# Static architecture metadata (strides / reduction flags) lives in `cfg`, so
# the jitted forward closes over it and `params` is a pure array pytree.
# ----------------------------------------------------------------------------

class _Init:
    def __init__(self, key):
        self._key = key

    def normal(self, shape, scale):
        self._key, sub = jax.random.split(self._key)
        return scale * jax.random.normal(sub, shape, dtype=jnp.float32)

    def conv(self, cout, cin, k):
        return self.normal((cout, cin, k, k), 1.0 / math.sqrt(cin * k * k))

    def dw(self, c, k):
        return self.normal((c, 1, k, k), 1.0 / math.sqrt(k * k))

    @staticmethod
    def bn(c):
        return {'gamma': jnp.ones((c,), jnp.float32),
                'beta': jnp.zeros((c,), jnp.float32)}


def init_mixed_op(rng, C, stride):
    p = {}
    for name, k in (('sep3', 3), ('sep5', 5)):
        p[name] = {'dw1': rng.dw(C, k), 'pw1': rng.conv(C, C, 1), 'bn1': rng.bn(C),
                   'dw2': rng.dw(C, k), 'pw2': rng.conv(C, C, 1), 'bn2': rng.bn(C)}
    for name, k in (('dil3', 3), ('dil5', 5)):
        p[name] = {'dw': rng.dw(C, k), 'pw': rng.conv(C, C, 1), 'bn': rng.bn(C)}
    if stride == 2:
        p['skip'] = {'w1': rng.conv(C // 2, C, 1), 'w2': rng.conv(C // 2, C, 1),
                     'bn': rng.bn(C)}
    return p


def init_cell(rng, steps, C_pp, C_p, C, reduction, reduction_prev):
    p = {}
    if reduction_prev:
        p['pre0'] = {'w1': rng.conv(C // 2, C_pp, 1), 'w2': rng.conv(C // 2, C_pp, 1),
                     'bn': rng.bn(C)}
    else:
        p['pre0'] = {'w': rng.conv(C, C_pp, 1), 'bn': rng.bn(C)}
    p['pre1'] = {'w': rng.conv(C, C_p, 1), 'bn': rng.bn(C)}
    ops, strides = [], []
    for i in range(steps):
        for j in range(2 + i):
            stride = 2 if reduction and j < 2 else 1
            ops.append(init_mixed_op(rng, C, stride))
            strides.append(stride)
    p['ops'] = ops
    cfg = {'reduction': reduction, 'reduction_prev': reduction_prev,
           'op_strides': tuple(strides)}
    return p, cfg


def init_network(key, C=4, layers=2, steps=2, multiplier=2, stem_multiplier=3,
                 num_classes=10):
    rng = _Init(key)
    C_curr = stem_multiplier * C
    params = {'stem_w': rng.conv(C_curr, 3, 3), 'stem_bn': rng.bn(C_curr)}
    cfg = {'steps': steps, 'multiplier': multiplier, 'cells': []}
    C_pp, C_p, C_curr = C_curr, C_curr, C
    cells = []
    reduction_prev = False
    for i in range(layers):
        if i in [layers // 3, 2 * layers // 3]:
            C_curr *= 2
            reduction = True
        else:
            reduction = False
        cp, cc = init_cell(rng, steps, C_pp, C_p, C_curr, reduction, reduction_prev)
        cells.append(cp)
        cfg['cells'].append(cc)
        reduction_prev = reduction
        C_pp, C_p = C_p, multiplier * C_curr
    params['cells'] = cells
    k = sum(2 + i for i in range(steps))
    params['alphas_normal'] = rng.normal((k, NUM_OPS), 0.001)
    params['alphas_reduce'] = rng.normal((k, NUM_OPS), 0.001)
    params['cls_w'] = rng.normal((C_p, num_classes), 1.0 / math.sqrt(C_p))
    params['cls_b'] = jnp.zeros((num_classes,), jnp.float32)
    return params, cfg


# TODO(synk): BatchNorm running-statistics update (training bookkeeping) is not
# modeled; forward uses train-mode batch statistics, matching the reference math.

if __name__ == "__main__":
    key = jax.random.PRNGKey(0)
    pkey, xkey = jax.random.split(key)
    # small config: C=4, layers=2, steps=2, multiplier=2, stem_multiplier=3
    params, cfg = init_network(pkey, C=4, layers=2, steps=2, multiplier=2,
                               stem_multiplier=3, num_classes=10)
    x = jax.random.normal(xkey, (2, 3, 8, 8), jnp.float32)   # NCHW like PyTorch

    fwd = jax.jit(lambda p, xx: network_forward(p, xx, cfg))   # ONE jit for the
    logits = jax.block_until_ready(fwd(params, x))             # whole forward
    assert logits.shape == (2, 10), logits.shape
    assert bool(jnp.all(jnp.isfinite(logits)))
    print("KERNEL_OK")
</pallas_src>

<mosaic_0001>
module attributes {stable_mosaic.version = 11 : i64} {
  func.func @_mm_bn_kernel(%arg0: i32, %arg1: memref<128x27xf32, #tpu.memory_space<vmem>>, %arg2: memref<27x12xf32, #tpu.memory_space<vmem>>, %arg3: memref<1x12xf32, #tpu.memory_space<vmem>>, %arg4: memref<1x12xf32, #tpu.memory_space<vmem>>, %arg5: memref<128x12xf32, #tpu.memory_space<vmem>>) attributes {dimension_semantics = [#tpu.dimension_semantics<arbitrary>], iteration_bounds = array<i64: 1>, scalar_prefetch = 0 : i64, scratch_operands = 0 : i64, tpu.core_type = #tpu.core_type<tc>, window_params = [{pipeline_mode = #tpu.pipeline_mode<synchronous>, transform_indices = @transform_0, window_bounds = array<i64: 128, 27>}, {pipeline_mode = #tpu.pipeline_mode<synchronous>, transform_indices = @transform_1, window_bounds = array<i64: 27, 12>}, {pipeline_mode = #tpu.pipeline_mode<synchronous>, transform_indices = @transform_2, window_bounds = array<i64: 1, 12>}, {pipeline_mode = #tpu.pipeline_mode<synchronous>, transform_indices = @transform_3, window_bounds = array<i64: 1, 12>}, {pipeline_mode = #tpu.pipeline_mode<synchronous>, transform_indices = @transform_4, window_bounds = array<i64: 128, 12>}]} {
    %c0 = arith.constant 0 : index
    %c0_0 = arith.constant 0 : index
    %0 = vector.load %arg1[%c0, %c0_0] : memref<128x27xf32, #tpu.memory_space<vmem>>, vector<128x27xf32>
    %c0_1 = arith.constant 0 : index
    %c0_2 = arith.constant 0 : index
    %1 = vector.load %arg2[%c0_1, %c0_2] : memref<27x12xf32, #tpu.memory_space<vmem>>, vector<27x12xf32>
    %cst = arith.constant dense<0.000000e+00> : vector<128x12xf32>
    %2 = tpu.matmul %0, %1, %cst {dimension_numbers = #tpu.dot_dimension_numbers<[1], [0], [0], [1], [0, 0, 1, 1], [], []>} : vector<128x27xf32>, vector<27x12xf32>, vector<128x12xf32> -> vector<128x12xf32>
    %c0_3 = arith.constant 0 : index
    %c0_4 = arith.constant 0 : index
    %3 = vector.load %arg3[%c0_3, %c0_4] : memref<1x12xf32, #tpu.memory_space<vmem>>, vector<1x12xf32>
    %c0_5 = arith.constant 0 : index
    %c0_6 = arith.constant 0 : index
    %4 = vector.load %arg4[%c0_5, %c0_6] : memref<1x12xf32, #tpu.memory_space<vmem>>, vector<1x12xf32>
    %cst_7 = arith.constant dense<0.000000e+00> : vector<12xf32>
    %5 = vector.multi_reduction <add>, %2, %cst_7 [0] : vector<128x12xf32> to vector<12xf32>
    %6 = vector.shape_cast %5 : vector<12xf32> to vector<1x12xf32>
    %cst_8 = arith.constant 1.280000e+02 : f32
    %7 = vector.broadcast %cst_8 : f32 to vector<1x12xf32>
    %8 = arith.divf %6, %7 : vector<1x12xf32>
    %9 = vector.broadcast %8 : vector<1x12xf32> to vector<128x12xf32>
    %10 = arith.subf %2, %9 : vector<128x12xf32>
    %11 = arith.mulf %10, %10 : vector<128x12xf32>
    %cst_9 = arith.constant dense<0.000000e+00> : vector<12xf32>
    %12 = vector.multi_reduction <add>, %11, %cst_9 [0] : vector<128x12xf32> to vector<12xf32>
    %13 = vector.shape_cast %12 : vector<12xf32> to vector<1x12xf32>
    %cst_10 = arith.constant 1.280000e+02 : f32
    %14 = vector.broadcast %cst_10 : f32 to vector<1x12xf32>
    %15 = arith.divf %13, %14 : vector<1x12xf32>
    %cst_11 = arith.constant 9.99999974E-6 : f32
    %16 = vector.broadcast %cst_11 : f32 to vector<1x12xf32>
    %17 = arith.addf %15, %16 : vector<1x12xf32>
    %18 = math.rsqrt %17 : vector<1x12xf32>
    %19 = vector.broadcast %8 : vector<1x12xf32> to vector<128x12xf32>
    %20 = arith.subf %2, %19 : vector<128x12xf32>
    %21 = vector.broadcast %18 : vector<1x12xf32> to vector<128x12xf32>
    %22 = arith.mulf %20, %21 : vector<128x12xf32>
    %23 = vector.broadcast %3 : vector<1x12xf32> to vector<128x12xf32>
    %24 = arith.mulf %22, %23 : vector<128x12xf32>
    %25 = vector.broadcast %4 : vector<1x12xf32> to vector<128x12xf32>
    %26 = arith.addf %24, %25 : vector<128x12xf32>
    %c0_12 = arith.constant 0 : index
    %c0_13 = arith.constant 0 : index
    %27 = vector.load %arg5[%c0_12, %c0_13] : memref<128x12xf32, #tpu.memory_space<vmem>>, vector<128x12xf32>
    tpu.vector_store %arg5[%c0_12, %c0_13], %26 {strides = array<i32>} : memref<128x12xf32, #tpu.memory_space<vmem>>, vector<128x12xf32>,
    return
  }
  func.func @transform_0(%arg0: i32) -> (i32, i32) {
    %c0_i32 = arith.constant 0 : i32
    %c0_i32_0 = arith.constant 0 : i32
    %c0_i32_1 = arith.constant 0 : i32
    return %c0_i32, %c0_i32_0 : i32, i32
  }
  func.func @transform_1(%arg0: i32) -> (i32, i32) {
    %c0_i32 = arith.constant 0 : i32
    %c0_i32_0 = arith.constant 0 : i32
    %c0_i32_1 = arith.constant 0 : i32
    return %c0_i32, %c0_i32_0 : i32, i32
  }
  func.func @transform_2(%arg0: i32) -> (i32, i32) {
    %c0_i32 = arith.constant 0 : i32
    %c0_i32_0 = arith.constant 0 : i32
    %c0_i32_1 = arith.constant 0 : i32
    return %c0_i32, %c0_i32_0 : i32, i32
  }
  func.func @transform_3(%arg0: i32) -> (i32, i32) {
    %c0_i32 = arith.constant 0 : i32
    %c0_i32_0 = arith.constant 0 : i32
    %c0_i32_1 = arith.constant 0 : i32
    return %c0_i32, %c0_i32_0 : i32, i32
  }
  func.func @transform_4(%arg0: i32) -> (i32, i32) {
    %c0_i32 = arith.constant 0 : i32
    %c0_i32_0 = arith.constant 0 : i32
    %c0_i32_1 = arith.constant 0 : i32
    return %c0_i32, %c0_i32_0 : i32, i32
  }
}

module attributes {stable_mosaic.version = 11 : i64} {
  func.func @_fr_kernel(%arg0: i32, %arg1: memref<32x12xf32, #tpu.memory_space<vmem>>, %arg2: memref<32x12xf32, #tpu.memory_space<vmem>>, %arg3: memref<12x8xf32, #tpu.memory_space<vmem>>, %arg4: memref<12x8xf32, #tpu.memory_space<vmem>>, %arg5: memref<1x8xf32, #tpu.memory_space<vmem>>, %arg6: memref<1x8xf32, #tpu.memory_space<vmem>>, %arg7: memref<1x8xf32, #tpu.memory_space<vmem>>, %arg8: memref<1x8xf32, #tpu.memory_space<vmem>>, %arg9: memref<2x32x8xf32, #tpu.memory_space<vmem>>) attributes {dimension_semantics = [#tpu.dimension_semantics<arbitrary>], iteration_bounds = array<i64: 1>, scalar_prefetch = 0 : i64, scratch_operands = 0 : i64, tpu.core_type = #tpu.core_type<tc>, window_params = [{pipeline_mode = #tpu.pipeline_mode<synchronous>, transform_indices = @transform_0, window_bounds = array<i64: 32, 12>}, {pipeline_mode = #tpu.pipeline_mode<synchronous>, transform_indices = @transform_1, window_bounds = array<i64: 32, 12>}, {pipeline_mode = #tpu.pipeline_mode<synchronous>, transform_indices = @transform_2, window_bounds = array<i64: 12, 8>}, {pipeline_mode = #tpu.pipeline_mode<synchronous>, transform_indices = @transform_3, window_bounds = array<i64: 12, 8>}, {pipeline_mode = #tpu.pipeline_mode<synchronous>, transform_indices = @transform_4, window_bounds = array<i64: 1, 8>}, {pipeline_mode = #tpu.pipeline_mode<synchronous>, transform_indices = @transform_5, window_bounds = array<i64: 1, 8>}, {pipeline_mode = #tpu.pipeline_mode<synchronous>, transform_indices = @transform_6, window_bounds = array<i64: 1, 8>}, {pipeline_mode = #tpu.pipeline_mode<synchronous>, transform_indices = @transform_7, window_bounds = array<i64: 1, 8>}, {pipeline_mode = #tpu.pipeline_mode<synchronous>, transform_indices = @transform_8, window_bounds = array<i64: 2, 32, 8>}]} {
    %c0 = arith.constant 0 : index
    %c0_0 = arith.constant 0 : index
    %0 = vector.load %arg1[%c0, %c0_0] : memref<32x12xf32, #tpu.memory_space<vmem>>, vector<32x12xf32>
    %cst = arith.constant 0.000000e+00 : f32
    %1 = vector.broadcast %cst : f32 to vector<32x12xf32>
    %2 = arith.maximumf %0, %1 : vector<32x12xf32>
    %c0_1 = arith.constant 0 : index
    %c0_2 = arith.constant 0 : index
    %3 = vector.load %arg2[%c0_1, %c0_2] : memref<32x12xf32, #tpu.memory_space<vmem>>, vector<32x12xf32>
    %cst_3 = arith.constant 0.000000e+00 : f32
    %4 = vector.broadcast %cst_3 : f32 to vector<32x12xf32>
    %5 = arith.maximumf %3, %4 : vector<32x12xf32>
    %c0_4 = arith.constant 0 : index
    %c0_5 = arith.constant 0 : index
    %6 = vector.load %arg3[%c0_4, %c0_5] : memref<12x8xf32, #tpu.memory_space<vmem>>, vector<12x8xf32>
    %cst_6 = arith.constant dense<0.000000e+00> : vector<32x8xf32>
    %7 = tpu.matmul %2, %6, %cst_6 {dimension_numbers = #tpu.dot_dimension_numbers<[1], [0], [0], [1], [0, 0, 1, 1], [], []>} : vector<32x12xf32>, vector<12x8xf32>, vector<32x8xf32> -> vector<32x8xf32>
    %c0_7 = arith.constant 0 : index
    %c0_8 = arith.constant 0 : index
    %8 = vector.load %arg4[%c0_7, %c0_8] : memref<12x8xf32, #tpu.memory_space<vmem>>, vector<12x8xf32>
    %cst_9 = arith.constant dense<0.000000e+00> : vector<32x8xf32>
    %9 = tpu.matmul %5, %8, %cst_9 {dimension_numbers = #tpu.dot_dimension_numbers<[1], [0], [0], [1], [0, 0, 1, 1], [], []>} : vector<32x12xf32>, vector<12x8xf32>, vector<32x8xf32> -> vector<32x8xf32>
    %c0_10 = arith.constant 0 : index
    %c0_11 = arith.constant 0 : index
    %10 = vector.load %arg5[%c0_10, %c0_11] : memref<1x8xf32, #tpu.memory_space<vmem>>, vector<1x8xf32>
    %c0_12 = arith.constant 0 : index
    %c0_13 = arith.constant 0 : index
    %11 = vector.load %arg6[%c0_12, %c0_13] : memref<1x8xf32, #tpu.memory_space<vmem>>, vector<1x8xf32>
    %cst_14 = arith.constant dense<0.000000e+00> : vector<8xf32>
    %12 = vector.multi_reduction <add>, %7, %cst_14 [0] : vector<32x8xf32> to vector<8xf32>
    %13 = vector.shape_cast %12 : vector<8xf32> to vector<1x8xf32>
    %cst_15 = arith.constant 3.200000e+01 : f32
    %14 = vector.broadcast %cst_15 : f32 to vector<1x8xf32>
    %15 = arith.divf %13, %14 : vector<1x8xf32>
    %16 = vector.broadcast %15 : vector<1x8xf32> to vector<32x8xf32>
    %17 = arith.subf %7, %16 : vector<32x8xf32>
    %18 = arith.mulf %17, %17 : vector<32x8xf32>
    %cst_16 = arith.constant dense<0.000000e+00> : vector<8xf32>
    %19 = vector.multi_reduction <add>, %18, %cst_16 [0] : vector<32x8xf32> to vector<8xf32>
    %20 = vector.shape_cast %19 : vector<8xf32> to vector<1x8xf32>
    %cst_17 = arith.constant 3.200000e+01 : f32
    %21 = vector.broadcast %cst_17 : f32 to vector<1x8xf32>
    %22 = arith.divf %20, %21 : vector<1x8xf32>
    %cst_18 = arith.constant 9.99999974E-6 : f32
    %23 = vector.broadcast %cst_18 : f32 to vector<1x8xf32>
    %24 = arith.addf %22, %23 : vector<1x8xf32>
    %25 = math.rsqrt %24 : vector<1x8xf32>
    %26 = vector.broadcast %15 : vector<1x8xf32> to vector<32x8xf32>
    %27 = arith.subf %7, %26 : vector<32x8xf32>
    %28 = vector.broadcast %25 : vector<1x8xf32> to vector<32x8xf32>
    %29 = arith.mulf %27, %28 : vector<32x8xf32>
    %30 = vector.broadcast %10 : vector<1x8xf32> to vector<32x8xf32>
    %31 = arith.mulf %29, %30 : vector<32x8xf32>
    %32 = vector.broadcast %11 : vector<1x8xf32> to vector<32x8xf32>
    %33 = arith.addf %31, %32 : vector<32x8xf32>
    %c0_19 = arith.constant 0 : index
    %c0_20 = arith.constant 0 : index
    %c0_21 = arith.constant 0 : index
    %34 = vector.load %arg9[%c0_19, %c0_20, %c0_21] : memref<2x32x8xf32, #tpu.memory_space<vmem>>, vector<1x32x8xf32>
    %35 = vector.shape_cast %34 : vector<1x32x8xf32> to vector<32x8xf32>
    %36 = vector.shape_cast %33 : vector<32x8xf32> to vector<1x32x8xf32>
    tpu.vector_store %arg9[%c0_19, %c0_20, %c0_21], %36 {strides = array<i32>} : memref<2x32x8xf32, #tpu.memory_space<vmem>>, vector<1x32x8xf32>,
    %c0_22 = arith.constant 0 : index
    %c0_23 = arith.constant 0 : index
    %37 = vector.load %arg7[%c0_22, %c0_23] : memref<1x8xf32, #tpu.memory_space<vmem>>, vector<1x8xf32>
    %c0_24 = arith.constant 0 : index
    %c0_25 = arith.constant 0 : index
    %38 = vector.load %arg8[%c0_24, %c0_25] : memref<1x8xf32, #tpu.memory_space<vmem>>, vector<1x8xf32>
    %cst_26 = arith.constant dense<0.000000e+00> : vector<8xf32>
    %39 = vector.multi_reduction <add>, %9, %cst_26 [0] : vector<32x8xf32> to vector<8xf32>
    %40 = vector.shape_cast %39 : vector<8xf32> to vector<1x8xf32>
    %cst_27 = arith.constant 3.200000e+01 : f32
    %41 = vector.broadcast %cst_27 : f32 to vector<1x8xf32>
    %42 = arith.divf %40, %41 : vector<1x8xf32>
    %43 = vector.broadcast %42 : vector<1x8xf32> to vector<32x8xf32>
    %44 = arith.subf %9, %43 : vector<32x8xf32>
    %45 = arith.mulf %44, %44 : vector<32x8xf32>
    %cst_28 = arith.constant dense<0.000000e+00> : vector<8xf32>
    %46 = vector.multi_reduction <add>, %45, %cst_28 [0] : vector<32x8xf32> to vector<8xf32>
    %47 = vector.shape_cast %46 : vector<8xf32> to vector<1x8xf32>
    %cst_29 = arith.constant 3.200000e+01 : f32
    %48 = vector.broadcast %cst_29 : f32 to vector<1x8xf32>
    %49 = arith.divf %47, %48 : vector<1x8xf32>
    %cst_30 = arith.constant 9.99999974E-6 : f32
    %50 = vector.broadcast %cst_30 : f32 to vector<1x8xf32>
    %51 = arith.addf %49, %50 : vector<1x8xf32>
    %52 = math.rsqrt %51 : vector<1x8xf32>
    %53 = vector.broadcast %42 : vector<1x8xf32> to vector<32x8xf32>
    %54 = arith.subf %9, %53 : vector<32x8xf32>
    %55 = vector.broadcast %52 : vector<1x8xf32> to vector<32x8xf32>
    %56 = arith.mulf %54, %55 : vector<32x8xf32>
    %57 = vector.broadcast %37 : vector<1x8xf32> to vector<32x8xf32>
    %58 = arith.mulf %56, %57 : vector<32x8xf32>
    %59 = vector.broadcast %38 : vector<1x8xf32> to vector<32x8xf32>
    %60 = arith.addf %58, %59 : vector<32x8xf32>
    %c1 = arith.constant 1 : index
    %c0_31 = arith.constant 0 : index
    %c0_32 = arith.constant 0 : index
    %61 = vector.load %arg9[%c1, %c0_31, %c0_32] : memref<2x32x8xf32, #tpu.memory_space<vmem>>, vector<1x32x8xf32>
    %62 = vector.shape_cast %61 : vector<1x32x8xf32> to vector<32x8xf32>
    %63 = vector.shape_cast %60 : vector<32x8xf32> to vector<1x32x8xf32>
    tpu.vector_store %arg9[%c1, %c0_31, %c0_32], %63 {strides = array<i32>} : memref<2x32x8xf32, #tpu.memory_space<vmem>>, vector<1x32x8xf32>,
    return
  }
  func.func @transform_0(%arg0: i32) -> (i32, i32) {
    %c0_i32 = arith.constant 0 : i32
    %c0_i32_0 = arith.constant 0 : i32
    %c0_i32_1 = arith.constant 0 : i32
    return %c0_i32, %c0_i32_0 : i32, i32
  }
  func.func @transform_1(%arg0: i32) -> (i32, i32) {
    %c0_i32 = arith.constant 0 : i32
    %c0_i32_0 = arith.constant 0 : i32
    %c0_i32_1 = arith.constant 0 : i32
    return %c0_i32, %c0_i32_0 : i32, i32
  }
  func.func @transform_2(%arg0: i32) -> (i32, i32) {
    %c0_i32 = arith.constant 0 : i32
    %c0_i32_0 = arith.constant 0 : i32
    %c0_i32_1 = arith.constant 0 : i32
    return %c0_i32, %c0_i32_0 : i32, i32
  }
  func.func @transform_3(%arg0: i32) -> (i32, i32) {
    %c0_i32 = arith.constant 0 : i32
    %c0_i32_0 = arith.constant 0 : i32
    %c0_i32_1 = arith.constant 0 : i32
    return %c0_i32, %c0_i32_0 : i32, i32
  }
  func.func @transform_4(%arg0: i32) -> (i32, i32) {
    %c0_i32 = arith.constant 0 : i32
    %c0_i32_0 = arith.constant 0 : i32
    %c0_i32_1 = arith.constant 0 : i32
    return %c0_i32, %c0_i32_0 : i32, i32
  }
  func.func @transform_5(%arg0: i32) -> (i32, i32) {
    %c0_i32 = arith.constant 0 : i32
    %c0_i32_0 = arith.constant 0 : i32
    %c0_i32_1 = arith.constant 0 : i32
    return %c0_i32, %c0_i32_0 : i32, i32
  }
  func.func @transform_6(%arg0: i32) -> (i32, i32) {
    %c0_i32 = arith.constant 0 : i32
    %c0_i32_0 = arith.constant 0 : i32
    %c0_i32_1 = arith.constant 0 : i32
    return %c0_i32, %c0_i32_0 : i32, i32
  }
  func.func @transform_7(%arg0: i32) -> (i32, i32) {
    %c0_i32 = arith.constant 0 : i32
    %c0_i32_0 = arith.constant 0 : i32
    %c0_i32_1 = arith.constant 0 : i32
    return %c0_i32, %c0_i32_0 : i32, i32
  }
  func.func @transform_8(%arg0: i32) -> (i32, i32, i32) {
    %c0_i32 = arith.constant 0 : i32
    %c0_i32_0 = arith.constant 0 : i32
    %c0_i32_1 = arith.constant 0 : i32
    %c0_i32_2 = arith.constant 0 : i32
    return %c0_i32, %c0_i32_0, %c0_i32_1 : i32, i32, i32
  }
}

module attributes {stable_mosaic.version = 11 : i64} {
  func.func @_fr_kernel(%arg0: i32, %arg1: memref<8x16xf32, #tpu.memory_space<vmem>>, %arg2: memref<8x16xf32, #tpu.memory_space<vmem>>, %arg3: memref<16x8xf32, #tpu.memory_space<vmem>>, %arg4: memref<16x8xf32, #tpu.memory_space<vmem>>, %arg5: memref<1x8xf32, #tpu.memory_space<vmem>>, %arg6: memref<1x8xf32, #tpu.memory_space<vmem>>, %arg7: memref<1x8xf32, #tpu.memory_space<vmem>>, %arg8: memref<1x8xf32, #tpu.memory_space<vmem>>, %arg9: memref<2x8x8xf32, #tpu.memory_space<vmem>>) attributes {dimension_semantics = [#tpu.dimension_semantics<arbitrary>], iteration_bounds = array<i64: 1>, scalar_prefetch = 0 : i64, scratch_operands = 0 : i64, tpu.core_type = #tpu.core_type<tc>, window_params = [{pipeline_mode = #tpu.pipeline_mode<synchronous>, transform_indices = @transform_0, window_bounds = array<i64: 8, 16>}, {pipeline_mode = #tpu.pipeline_mode<synchronous>, transform_indices = @transform_1, window_bounds = array<i64: 8, 16>}, {pipeline_mode = #tpu.pipeline_mode<synchronous>, transform_indices = @transform_2, window_bounds = array<i64: 16, 8>}, {pipeline_mode = #tpu.pipeline_mode<synchronous>, transform_indices = @transform_3, window_bounds = array<i64: 16, 8>}, {pipeline_mode = #tpu.pipeline_mode<synchronous>, transform_indices = @transform_4, window_bounds = array<i64: 1, 8>}, {pipeline_mode = #tpu.pipeline_mode<synchronous>, transform_indices = @transform_5, window_bounds = array<i64: 1, 8>}, {pipeline_mode = #tpu.pipeline_mode<synchronous>, transform_indices = @transform_6, window_bounds = array<i64: 1, 8>}, {pipeline_mode = #tpu.pipeline_mode<synchronous>, transform_indices = @transform_7, window_bounds = array<i64: 1, 8>}, {pipeline_mode = #tpu.pipeline_mode<synchronous>, transform_indices = @transform_8, window_bounds = array<i64: 2, 8, 8>}]} {
    %c0 = arith.constant 0 : index
    %c0_0 = arith.constant 0 : index
    %0 = vector.load %arg1[%c0, %c0_0] : memref<8x16xf32, #tpu.memory_space<vmem>>, vector<8x16xf32>
    %cst = arith.constant 0.000000e+00 : f32
    %1 = vector.broadcast %cst : f32 to vector<8x16xf32>
    %2 = arith.maximumf %0, %1 : vector<8x16xf32>
    %c0_1 = arith.constant 0 : index
    %c0_2 = arith.constant 0 : index
    %3 = vector.load %arg2[%c0_1, %c0_2] : memref<8x16xf32, #tpu.memory_space<vmem>>, vector<8x16xf32>
    %cst_3 = arith.constant 0.000000e+00 : f32
    %4 = vector.broadcast %cst_3 : f32 to vector<8x16xf32>
    %5 = arith.maximumf %3, %4 : vector<8x16xf32>
    %c0_4 = arith.constant 0 : index
    %c0_5 = arith.constant 0 : index
    %6 = vector.load %arg3[%c0_4, %c0_5] : memref<16x8xf32, #tpu.memory_space<vmem>>, vector<16x8xf32>
    %cst_6 = arith.constant dense<0.000000e+00> : vector<8x8xf32>
    %7 = tpu.matmul %2, %6, %cst_6 {dimension_numbers = #tpu.dot_dimension_numbers<[1], [0], [0], [1], [0, 0, 1, 1], [], []>} : vector<8x16xf32>, vector<16x8xf32>, vector<8x8xf32> -> vector<8x8xf32>
    %c0_7 = arith.constant 0 : index
    %c0_8 = arith.constant 0 : index
    %8 = vector.load %arg4[%c0_7, %c0_8] : memref<16x8xf32, #tpu.memory_space<vmem>>, vector<16x8xf32>
    %cst_9 = arith.constant dense<0.000000e+00> : vector<8x8xf32>
    %9 = tpu.matmul %5, %8, %cst_9 {dimension_numbers = #tpu.dot_dimension_numbers<[1], [0], [0], [1], [0, 0, 1, 1], [], []>} : vector<8x16xf32>, vector<16x8xf32>, vector<8x8xf32> -> vector<8x8xf32>
    %c0_10 = arith.constant 0 : index
    %c0_11 = arith.constant 0 : index
    %10 = vector.load %arg5[%c0_10, %c0_11] : memref<1x8xf32, #tpu.memory_space<vmem>>, vector<1x8xf32>
    %c0_12 = arith.constant 0 : index
    %c0_13 = arith.constant 0 : index
    %11 = vector.load %arg6[%c0_12, %c0_13] : memref<1x8xf32, #tpu.memory_space<vmem>>, vector<1x8xf32>
    %cst_14 = arith.constant dense<0.000000e+00> : vector<8xf32>
    %12 = vector.multi_reduction <add>, %7, %cst_14 [0] : vector<8x8xf32> to vector<8xf32>
    %13 = vector.shape_cast %12 : vector<8xf32> to vector<1x8xf32>
    %cst_15 = arith.constant 8.000000e+00 : f32
    %14 = vector.broadcast %cst_15 : f32 to vector<1x8xf32>
    %15 = arith.divf %13, %14 : vector<1x8xf32>
    %16 = vector.broadcast %15 : vector<1x8xf32> to vector<8x8xf32>
    %17 = arith.subf %7, %16 : vector<8x8xf32>
    %18 = arith.mulf %17, %17 : vector<8x8xf32>
    %cst_16 = arith.constant dense<0.000000e+00> : vector<8xf32>
    %19 = vector.multi_reduction <add>, %18, %cst_16 [0] : vector<8x8xf32> to vector<8xf32>
    %20 = vector.shape_cast %19 : vector<8xf32> to vector<1x8xf32>
    %cst_17 = arith.constant 8.000000e+00 : f32
    %21 = vector.broadcast %cst_17 : f32 to vector<1x8xf32>
    %22 = arith.divf %20, %21 : vector<1x8xf32>
    %cst_18 = arith.constant 9.99999974E-6 : f32
    %23 = vector.broadcast %cst_18 : f32 to vector<1x8xf32>
    %24 = arith.addf %22, %23 : vector<1x8xf32>
    %25 = math.rsqrt %24 : vector<1x8xf32>
    %26 = vector.broadcast %15 : vector<1x8xf32> to vector<8x8xf32>
    %27 = arith.subf %7, %26 : vector<8x8xf32>
    %28 = vector.broadcast %25 : vector<1x8xf32> to vector<8x8xf32>
    %29 = arith.mulf %27, %28 : vector<8x8xf32>
    %30 = vector.broadcast %10 : vector<1x8xf32> to vector<8x8xf32>
    %31 = arith.mulf %29, %30 : vector<8x8xf32>
    %32 = vector.broadcast %11 : vector<1x8xf32> to vector<8x8xf32>
    %33 = arith.addf %31, %32 : vector<8x8xf32>
    %c0_19 = arith.constant 0 : index
    %c0_20 = arith.constant 0 : index
    %c0_21 = arith.constant 0 : index
    %34 = vector.load %arg9[%c0_19, %c0_20, %c0_21] : memref<2x8x8xf32, #tpu.memory_space<vmem>>, vector<1x8x8xf32>
    %35 = vector.shape_cast %34 : vector<1x8x8xf32> to vector<8x8xf32>
    %36 = vector.shape_cast %33 : vector<8x8xf32> to vector<1x8x8xf32>
    tpu.vector_store %arg9[%c0_19, %c0_20, %c0_21], %36 {strides = array<i32>} : memref<2x8x8xf32, #tpu.memory_space<vmem>>, vector<1x8x8xf32>,
    %c0_22 = arith.constant 0 : index
    %c0_23 = arith.constant 0 : index
    %37 = vector.load %arg7[%c0_22, %c0_23] : memref<1x8xf32, #tpu.memory_space<vmem>>, vector<1x8xf32>
    %c0_24 = arith.constant 0 : index
    %c0_25 = arith.constant 0 : index
    %38 = vector.load %arg8[%c0_24, %c0_25] : memref<1x8xf32, #tpu.memory_space<vmem>>, vector<1x8xf32>
    %cst_26 = arith.constant dense<0.000000e+00> : vector<8xf32>
    %39 = vector.multi_reduction <add>, %9, %cst_26 [0] : vector<8x8xf32> to vector<8xf32>
    %40 = vector.shape_cast %39 : vector<8xf32> to vector<1x8xf32>
    %cst_27 = arith.constant 8.000000e+00 : f32
    %41 = vector.broadcast %cst_27 : f32 to vector<1x8xf32>
    %42 = arith.divf %40, %41 : vector<1x8xf32>
    %43 = vector.broadcast %42 : vector<1x8xf32> to vector<8x8xf32>
    %44 = arith.subf %9, %43 : vector<8x8xf32>
    %45 = arith.mulf %44, %44 : vector<8x8xf32>
    %cst_28 = arith.constant dense<0.000000e+00> : vector<8xf32>
    %46 = vector.multi_reduction <add>, %45, %cst_28 [0] : vector<8x8xf32> to vector<8xf32>
    %47 = vector.shape_cast %46 : vector<8xf32> to vector<1x8xf32>
    %cst_29 = arith.constant 8.000000e+00 : f32
    %48 = vector.broadcast %cst_29 : f32 to vector<1x8xf32>
    %49 = arith.divf %47, %48 : vector<1x8xf32>
    %cst_30 = arith.constant 9.99999974E-6 : f32
    %50 = vector.broadcast %cst_30 : f32 to vector<1x8xf32>
    %51 = arith.addf %49, %50 : vector<1x8xf32>
    %52 = math.rsqrt %51 : vector<1x8xf32>
    %53 = vector.broadcast %42 : vector<1x8xf32> to vector<8x8xf32>
    %54 = arith.subf %9, %53 : vector<8x8xf32>
    %55 = vector.broadcast %52 : vector<1x8xf32> to vector<8x8xf32>
    %56 = arith.mulf %54, %55 : vector<8x8xf32>
    %57 = vector.broadcast %37 : vector<1x8xf32> to vector<8x8xf32>
    %58 = arith.mulf %56, %57 : vector<8x8xf32>
    %59 = vector.broadcast %38 : vector<1x8xf32> to vector<8x8xf32>
    %60 = arith.addf %58, %59 : vector<8x8xf32>
    %c1 = arith.constant 1 : index
    %c0_31 = arith.constant 0 : index
    %c0_32 = arith.constant 0 : index
    %61 = vector.load %arg9[%c1, %c0_31, %c0_32] : memref<2x8x8xf32, #tpu.memory_space<vmem>>, vector<1x8x8xf32>
    %62 = vector.shape_cast %61 : vector<1x8x8xf32> to vector<8x8xf32>
    %63 = vector.shape_cast %60 : vector<8x8xf32> to vector<1x8x8xf32>
    tpu.vector_store %arg9[%c1, %c0_31, %c0_32], %63 {strides = array<i32>} : memref<2x8x8xf32, #tpu.memory_space<vmem>>, vector<1x8x8xf32>,
    return
  }
  func.func @transform_0(%arg0: i32) -> (i32, i32) {
    %c0_i32 = arith.constant 0 : i32
    %c0_i32_0 = arith.constant 0 : i32
    %c0_i32_1 = arith.constant 0 : i32
    return %c0_i32, %c0_i32_0 : i32, i32
  }
  func.func @transform_1(%arg0: i32) -> (i32, i32) {
    %c0_i32 = arith.constant 0 : i32
    %c0_i32_0 = arith.constant 0 : i32
    %c0_i32_1 = arith.constant 0 : i32
    return %c0_i32, %c0_i32_0 : i32, i32
  }
  func.func @transform_2(%arg0: i32) -> (i32, i32) {
    %c0_i32 = arith.constant 0 : i32
    %c0_i32_0 = arith.constant 0 : i32
    %c0_i32_1 = arith.constant 0 : i32
    return %c0_i32, %c0_i32_0 : i32, i32
  }
  func.func @transform_3(%arg0: i32) -> (i32, i32) {
    %c0_i32 = arith.constant 0 : i32
    %c0_i32_0 = arith.constant 0 : i32
    %c0_i32_1 = arith.constant 0 : i32
    return %c0_i32, %c0_i32_0 : i32, i32
  }
  func.func @transform_4(%arg0: i32) -> (i32, i32) {
    %c0_i32 = arith.constant 0 : i32
    %c0_i32_0 = arith.constant 0 : i32
    %c0_i32_1 = arith.constant 0 : i32
    return %c0_i32, %c0_i32_0 : i32, i32
  }
  func.func @transform_5(%arg0: i32) -> (i32, i32) {
    %c0_i32 = arith.constant 0 : i32
    %c0_i32_0 = arith.constant 0 : i32
    %c0_i32_1 = arith.constant 0 : i32
    return %c0_i32, %c0_i32_0 : i32, i32
  }
  func.func @transform_6(%arg0: i32) -> (i32, i32) {
    %c0_i32 = arith.constant 0 : i32
    %c0_i32_0 = arith.constant 0 : i32
    %c0_i32_1 = arith.constant 0 : i32
    return %c0_i32, %c0_i32_0 : i32, i32
  }
  func.func @transform_7(%arg0: i32) -> (i32, i32) {
    %c0_i32 = arith.constant 0 : i32
    %c0_i32_0 = arith.constant 0 : i32
    %c0_i32_1 = arith.constant 0 : i32
    return %c0_i32, %c0_i32_0 : i32, i32
  }
  func.func @transform_8(%arg0: i32) -> (i32, i32, i32) {
    %c0_i32 = arith.constant 0 : i32
    %c0_i32_0 = arith.constant 0 : i32
    %c0_i32_1 = arith.constant 0 : i32
    %c0_i32_2 = arith.constant 0 : i32
    return %c0_i32, %c0_i32_0, %c0_i32_1 : i32, i32, i32
  }
}

module attributes {stable_mosaic.version = 11 : i64} {
  func.func @_mm_bn_kernel(%arg0: i32, %arg1: memref<128x12xf32, #tpu.memory_space<vmem>>, %arg2: memref<12x8xf32, #tpu.memory_space<vmem>>, %arg3: memref<1x8xf32, #tpu.memory_space<vmem>>, %arg4: memref<1x8xf32, #tpu.memory_space<vmem>>, %arg5: memref<128x8xf32, #tpu.memory_space<vmem>>) attributes {dimension_semantics = [#tpu.dimension_semantics<arbitrary>], iteration_bounds = array<i64: 1>, scalar_prefetch = 0 : i64, scratch_operands = 0 : i64, tpu.core_type = #tpu.core_type<tc>, window_params = [{pipeline_mode = #tpu.pipeline_mode<synchronous>, transform_indices = @transform_0, window_bounds = array<i64: 128, 12>}, {pipeline_mode = #tpu.pipeline_mode<synchronous>, transform_indices = @transform_1, window_bounds = array<i64: 12, 8>}, {pipeline_mode = #tpu.pipeline_mode<synchronous>, transform_indices = @transform_2, window_bounds = array<i64: 1, 8>}, {pipeline_mode = #tpu.pipeline_mode<synchronous>, transform_indices = @transform_3, window_bounds = array<i64: 1, 8>}, {pipeline_mode = #tpu.pipeline_mode<synchronous>, transform_indices = @transform_4, window_bounds = array<i64: 128, 8>}]} {
    %c0 = arith.constant 0 : index
    %c0_0 = arith.constant 0 : index
    %0 = vector.load %arg1[%c0, %c0_0] : memref<128x12xf32, #tpu.memory_space<vmem>>, vector<128x12xf32>
    %cst = arith.constant 0.000000e+00 : f32
    %1 = vector.broadcast %cst : f32 to vector<128x12xf32>
    %2 = arith.maximumf %0, %1 : vector<128x12xf32>
    %c0_1 = arith.constant 0 : index
    %c0_2 = arith.constant 0 : index
    %3 = vector.load %arg2[%c0_1, %c0_2] : memref<12x8xf32, #tpu.memory_space<vmem>>, vector<12x8xf32>
    %cst_3 = arith.constant dense<0.000000e+00> : vector<128x8xf32>
    %4 = tpu.matmul %2, %3, %cst_3 {dimension_numbers = #tpu.dot_dimension_numbers<[1], [0], [0], [1], [0, 0, 1, 1], [], []>} : vector<128x12xf32>, vector<12x8xf32>, vector<128x8xf32> -> vector<128x8xf32>
    %c0_4 = arith.constant 0 : index
    %c0_5 = arith.constant 0 : index
    %5 = vector.load %arg3[%c0_4, %c0_5] : memref<1x8xf32, #tpu.memory_space<vmem>>, vector<1x8xf32>
    %c0_6 = arith.constant 0 : index
    %c0_7 = arith.constant 0 : index
    %6 = vector.load %arg4[%c0_6, %c0_7] : memref<1x8xf32, #tpu.memory_space<vmem>>, vector<1x8xf32>
    %cst_8 = arith.constant dense<0.000000e+00> : vector<8xf32>
    %7 = vector.multi_reduction <add>, %4, %cst_8 [0] : vector<128x8xf32> to vector<8xf32>
    %8 = vector.shape_cast %7 : vector<8xf32> to vector<1x8xf32>
    %cst_9 = arith.constant 1.280000e+02 : f32
    %9 = vector.broadcast %cst_9 : f32 to vector<1x8xf32>
    %10 = arith.divf %8, %9 : vector<1x8xf32>
    %11 = vector.broadcast %10 : vector<1x8xf32> to vector<128x8xf32>
    %12 = arith.subf %4, %11 : vector<128x8xf32>
    %13 = arith.mulf %12, %12 : vector<128x8xf32>
    %cst_10 = arith.constant dense<0.000000e+00> : vector<8xf32>
    %14 = vector.multi_reduction <add>, %13, %cst_10 [0] : vector<128x8xf32> to vector<8xf32>
    %15 = vector.shape_cast %14 : vector<8xf32> to vector<1x8xf32>
    %cst_11 = arith.constant 1.280000e+02 : f32
    %16 = vector.broadcast %cst_11 : f32 to vector<1x8xf32>
    %17 = arith.divf %15, %16 : vector<1x8xf32>
    %cst_12 = arith.constant 9.99999974E-6 : f32
    %18 = vector.broadcast %cst_12 : f32 to vector<1x8xf32>
    %19 = arith.addf %17, %18 : vector<1x8xf32>
    %20 = math.rsqrt %19 : vector<1x8xf32>
    %21 = vector.broadcast %10 : vector<1x8xf32> to vector<128x8xf32>
    %22 = arith.subf %4, %21 : vector<128x8xf32>
    %23 = vector.broadcast %20 : vector<1x8xf32> to vector<128x8xf32>
    %24 = arith.mulf %22, %23 : vector<128x8xf32>
    %25 = vector.broadcast %5 : vector<1x8xf32> to vector<128x8xf32>
    %26 = arith.mulf %24, %25 : vector<128x8xf32>
    %27 = vector.broadcast %6 : vector<1x8xf32> to vector<128x8xf32>
    %28 = arith.addf %26, %27 : vector<128x8xf32>
    %c0_13 = arith.constant 0 : index
    %c0_14 = arith.constant 0 : index
    %29 = vector.load %arg5[%c0_13, %c0_14] : memref<128x8xf32, #tpu.memory_space<vmem>>, vector<128x8xf32>
    tpu.vector_store %arg5[%c0_13, %c0_14], %28 {strides = array<i32>} : memref<128x8xf32, #tpu.memory_space<vmem>>, vector<128x8xf32>,
    return
  }
  func.func @transform_0(%arg0: i32) -> (i32, i32) {
    %c0_i32 = arith.constant 0 : i32
    %c0_i32_0 = arith.constant 0 : i32
    %c0_i32_1 = arith.constant 0 : i32
    return %c0_i32, %c0_i32_0 : i32, i32
  }
  func.func @transform_1(%arg0: i32) -> (i32, i32) {
    %c0_i32 = arith.constant 0 : i32
    %c0_i32_0 = arith.constant 0 : i32
    %c0_i32_1 = arith.constant 0 : i32
    return %c0_i32, %c0_i32_0 : i32, i32
  }
  func.func @transform_2(%arg0: i32) -> (i32, i32) {
    %c0_i32 = arith.constant 0 : i32
    %c0_i32_0 = arith.constant 0 : i32
    %c0_i32_1 = arith.constant 0 : i32
    return %c0_i32, %c0_i32_0 : i32, i32
  }
  func.func @transform_3(%arg0: i32) -> (i32, i32) {
    %c0_i32 = arith.constant 0 : i32
    %c0_i32_0 = arith.constant 0 : i32
    %c0_i32_1 = arith.constant 0 : i32
    return %c0_i32, %c0_i32_0 : i32, i32
  }
  func.func @transform_4(%arg0: i32) -> (i32, i32) {
    %c0_i32 = arith.constant 0 : i32
    %c0_i32_0 = arith.constant 0 : i32
    %c0_i32_1 = arith.constant 0 : i32
    return %c0_i32, %c0_i32_0 : i32, i32
  }
}

module attributes {stable_mosaic.version = 11 : i64} {
  func.func @_dw_pw_bn_kernel(%arg0: i32, %arg1: memref<8x9x16xf32, #tpu.memory_space<vmem>>, %arg2: memref<9x16xf32, #tpu.memory_space<vmem>>, %arg3: memref<16x16xf32, #tpu.memory_space<vmem>>, %arg4: memref<1x16xf32, #tpu.memory_space<vmem>>, %arg5: memref<1x16xf32, #tpu.memory_space<vmem>>, %arg6: memref<8x16xf32, #tpu.memory_space<vmem>>) attributes {dimension_semantics = [#tpu.dimension_semantics<arbitrary>], iteration_bounds = array<i64: 1>, scalar_prefetch = 0 : i64, scratch_operands = 0 : i64, tpu.core_type = #tpu.core_type<tc>, window_params = [{pipeline_mode = #tpu.pipeline_mode<synchronous>, transform_indices = @transform_0, window_bounds = array<i64: 8, 9, 16>}, {pipeline_mode = #tpu.pipeline_mode<synchronous>, transform_indices = @transform_1, window_bounds = array<i64: 9, 16>}, {pipeline_mode = #tpu.pipeline_mode<synchronous>, transform_indices = @transform_2, window_bounds = array<i64: 16, 16>}, {pipeline_mode = #tpu.pipeline_mode<synchronous>, transform_indices = @transform_3, window_bounds = array<i64: 1, 16>}, {pipeline_mode = #tpu.pipeline_mode<synchronous>, transform_indices = @transform_4, window_bounds = array<i64: 1, 16>}, {pipeline_mode = #tpu.pipeline_mode<synchronous>, transform_indices = @transform_5, window_bounds = array<i64: 8, 16>}]} {
    %c0 = arith.constant 0 : index
    %c0_0 = arith.constant 0 : index
    %c0_1 = arith.constant 0 : index
    %0 = vector.load %arg1[%c0, %c0_0, %c0_1] : memref<8x9x16xf32, #tpu.memory_space<vmem>>, vector<8x9x16xf32>
    %c0_2 = arith.constant 0 : index
    %c0_3 = arith.constant 0 : index
    %1 = vector.load %arg2[%c0_2, %c0_3] : memref<9x16xf32, #tpu.memory_space<vmem>>, vector<9x16xf32>
    %2 = vector.shape_cast %1 : vector<9x16xf32> to vector<1x9x16xf32>
    %3 = vector.broadcast %2 : vector<1x9x16xf32> to vector<8x9x16xf32>
    %4 = arith.mulf %0, %3 : vector<8x9x16xf32>
    %cst = arith.constant dense<0.000000e+00> : vector<8x16xf32>
    %5 = vector.multi_reduction <add>, %4, %cst [1] : vector<8x9x16xf32> to vector<8x16xf32>
    %c0_4 = arith.constant 0 : index
    %c0_5 = arith.constant 0 : index
    %6 = vector.load %arg3[%c0_4, %c0_5] : memref<16x16xf32, #tpu.memory_space<vmem>>, vector<16x16xf32>
    %cst_6 = arith.constant dense<0.000000e+00> : vector<8x16xf32>
    %7 = tpu.matmul %5, %6, %cst_6 {dimension_numbers = #tpu.dot_dimension_numbers<[1], [0], [0], [1], [0, 0, 1, 1], [], []>} : vector<8x16xf32>, vector<16x16xf32>, vector<8x16xf32> -> vector<8x16xf32>
    %c0_7 = arith.constant 0 : index
    %c0_8 = arith.constant 0 : index
    %8 = vector.load %arg4[%c0_7, %c0_8] : memref<1x16xf32, #tpu.memory_space<vmem>>, vector<1x16xf32>
    %c0_9 = arith.constant 0 : index
    %c0_10 = arith.constant 0 : index
    %9 = vector.load %arg5[%c0_9, %c0_10] : memref<1x16xf32, #tpu.memory_space<vmem>>, vector<1x16xf32>
    %cst_11 = arith.constant dense<0.000000e+00> : vector<16xf32>
    %10 = vector.multi_reduction <add>, %7, %cst_11 [0] : vector<8x16xf32> to vector<16xf32>
    %11 = vector.shape_cast %10 : vector<16xf32> to vector<1x16xf32>
    %cst_12 = arith.constant 8.000000e+00 : f32
    %12 = vector.broadcast %cst_12 : f32 to vector<1x16xf32>
    %13 = arith.divf %11, %12 : vector<1x16xf32>
    %14 = vector.broadcast %13 : vector<1x16xf32> to vector<8x16xf32>
    %15 = arith.subf %7, %14 : vector<8x16xf32>
    %16 = arith.mulf %15, %15 : vector<8x16xf32>
    %cst_13 = arith.constant dense<0.000000e+00> : vector<16xf32>
    %17 = vector.multi_reduction <add>, %16, %cst_13 [0] : vector<8x16xf32> to vector<16xf32>
    %18 = vector.shape_cast %17 : vector<16xf32> to vector<1x16xf32>
    %cst_14 = arith.constant 8.000000e+00 : f32
    %19 = vector.broadcast %cst_14 : f32 to vector<1x16xf32>
    %20 = arith.divf %18, %19 : vector<1x16xf32>
    %cst_15 = arith.constant 9.99999974E-6 : f32
    %21 = vector.broadcast %cst_15 : f32 to vector<1x16xf32>
    %22 = arith.addf %20, %21 : vector<1x16xf32>
    %23 = math.rsqrt %22 : vector<1x16xf32>
    %24 = vector.broadcast %13 : vector<1x16xf32> to vector<8x16xf32>
    %25 = arith.subf %7, %24 : vector<8x16xf32>
    %26 = vector.broadcast %23 : vector<1x16xf32> to vector<8x16xf32>
    %27 = arith.mulf %25, %26 : vector<8x16xf32>
    %28 = vector.broadcast %8 : vector<1x16xf32> to vector<8x16xf32>
    %29 = arith.mulf %27, %28 : vector<8x16xf32>
    %30 = vector.broadcast %9 : vector<1x16xf32> to vector<8x16xf32>
    %31 = arith.addf %29, %30 : vector<8x16xf32>
    %c0_16 = arith.constant 0 : index
    %c0_17 = arith.constant 0 : index
    %32 = vector.load %arg6[%c0_16, %c0_17] : memref<8x16xf32, #tpu.memory_space<vmem>>, vector<8x16xf32>
    tpu.vector_store %arg6[%c0_16, %c0_17], %31 {strides = array<i32>} : memref<8x16xf32, #tpu.memory_space<vmem>>, vector<8x16xf32>,
    return
  }
  func.func @transform_0(%arg0: i32) -> (i32, i32, i32) {
    %c0_i32 = arith.constant 0 : i32
    %c0_i32_0 = arith.constant 0 : i32
    %c0_i32_1 = arith.constant 0 : i32
    %c0_i32_2 = arith.constant 0 : i32
    return %c0_i32, %c0_i32_0, %c0_i32_1 : i32, i32, i32
  }
  func.func @transform_1(%arg0: i32) -> (i32, i32) {
    %c0_i32 = arith.constant 0 : i32
    %c0_i32_0 = arith.constant 0 : i32
    %c0_i32_1 = arith.constant 0 : i32
    return %c0_i32, %c0_i32_0 : i32, i32
  }
  func.func @transform_2(%arg0: i32) -> (i32, i32) {
    %c0_i32 = arith.constant 0 : i32
    %c0_i32_0 = arith.constant 0 : i32
    %c0_i32_1 = arith.constant 0 : i32
    return %c0_i32, %c0_i32_0 : i32, i32
  }
  func.func @transform_3(%arg0: i32) -> (i32, i32) {
    %c0_i32 = arith.constant 0 : i32
    %c0_i32_0 = arith.constant 0 : i32
    %c0_i32_1 = arith.constant 0 : i32
    return %c0_i32, %c0_i32_0 : i32, i32
  }
  func.func @transform_4(%arg0: i32) -> (i32, i32) {
    %c0_i32 = arith.constant 0 : i32
    %c0_i32_0 = arith.constant 0 : i32
    %c0_i32_1 = arith.constant 0 : i32
    return %c0_i32, %c0_i32_0 : i32, i32
  }
  func.func @transform_5(%arg0: i32) -> (i32, i32) {
    %c0_i32 = arith.constant 0 : i32
    %c0_i32_0 = arith.constant 0 : i32
    %c0_i32_1 = arith.constant 0 : i32
    return %c0_i32, %c0_i32_0 : i32, i32
  }
}

module attributes {stable_mosaic.version = 11 : i64} {
  func.func @_fr_kernel(%arg0: i32, %arg1: memref<32x8xf32, #tpu.memory_space<vmem>>, %arg2: memref<32x8xf32, #tpu.memory_space<vmem>>, %arg3: memref<8x4xf32, #tpu.memory_space<vmem>>, %arg4: memref<8x4xf32, #tpu.memory_space<vmem>>, %arg5: memref<1x4xf32, #tpu.memory_space<vmem>>, %arg6: memref<1x4xf32, #tpu.memory_space<vmem>>, %arg7: memref<1x4xf32, #tpu.memory_space<vmem>>, %arg8: memref<1x4xf32, #tpu.memory_space<vmem>>, %arg9: memref<2x32x4xf32, #tpu.memory_space<vmem>>) attributes {dimension_semantics = [#tpu.dimension_semantics<arbitrary>], iteration_bounds = array<i64: 1>, scalar_prefetch = 0 : i64, scratch_operands = 0 : i64, tpu.core_type = #tpu.core_type<tc>, window_params = [{pipeline_mode = #tpu.pipeline_mode<synchronous>, transform_indices = @transform_0, window_bounds = array<i64: 32, 8>}, {pipeline_mode = #tpu.pipeline_mode<synchronous>, transform_indices = @transform_1, window_bounds = array<i64: 32, 8>}, {pipeline_mode = #tpu.pipeline_mode<synchronous>, transform_indices = @transform_2, window_bounds = array<i64: 8, 4>}, {pipeline_mode = #tpu.pipeline_mode<synchronous>, transform_indices = @transform_3, window_bounds = array<i64: 8, 4>}, {pipeline_mode = #tpu.pipeline_mode<synchronous>, transform_indices = @transform_4, window_bounds = array<i64: 1, 4>}, {pipeline_mode = #tpu.pipeline_mode<synchronous>, transform_indices = @transform_5, window_bounds = array<i64: 1, 4>}, {pipeline_mode = #tpu.pipeline_mode<synchronous>, transform_indices = @transform_6, window_bounds = array<i64: 1, 4>}, {pipeline_mode = #tpu.pipeline_mode<synchronous>, transform_indices = @transform_7, window_bounds = array<i64: 1, 4>}, {pipeline_mode = #tpu.pipeline_mode<synchronous>, transform_indices = @transform_8, window_bounds = array<i64: 2, 32, 4>}]} {
    %c0 = arith.constant 0 : index
    %c0_0 = arith.constant 0 : index
    %0 = vector.load %arg1[%c0, %c0_0] : memref<32x8xf32, #tpu.memory_space<vmem>>, vector<32x8xf32>
    %cst = arith.constant 0.000000e+00 : f32
    %1 = vector.broadcast %cst : f32 to vector<32x8xf32>
    %2 = arith.maximumf %0, %1 : vector<32x8xf32>
    %c0_1 = arith.constant 0 : index
    %c0_2 = arith.constant 0 : index
    %3 = vector.load %arg2[%c0_1, %c0_2] : memref<32x8xf32, #tpu.memory_space<vmem>>, vector<32x8xf32>
    %cst_3 = arith.constant 0.000000e+00 : f32
    %4 = vector.broadcast %cst_3 : f32 to vector<32x8xf32>
    %5 = arith.maximumf %3, %4 : vector<32x8xf32>
    %c0_4 = arith.constant 0 : index
    %c0_5 = arith.constant 0 : index
    %6 = vector.load %arg3[%c0_4, %c0_5] : memref<8x4xf32, #tpu.memory_space<vmem>>, vector<8x4xf32>
    %cst_6 = arith.constant dense<0.000000e+00> : vector<32x4xf32>
    %7 = tpu.matmul %2, %6, %cst_6 {dimension_numbers = #tpu.dot_dimension_numbers<[1], [0], [0], [1], [0, 0, 1, 1], [], []>} : vector<32x8xf32>, vector<8x4xf32>, vector<32x4xf32> -> vector<32x4xf32>
    %c0_7 = arith.constant 0 : index
    %c0_8 = arith.constant 0 : index
    %8 = vector.load %arg4[%c0_7, %c0_8] : memref<8x4xf32, #tpu.memory_space<vmem>>, vector<8x4xf32>
    %cst_9 = arith.constant dense<0.000000e+00> : vector<32x4xf32>
    %9 = tpu.matmul %5, %8, %cst_9 {dimension_numbers = #tpu.dot_dimension_numbers<[1], [0], [0], [1], [0, 0, 1, 1], [], []>} : vector<32x8xf32>, vector<8x4xf32>, vector<32x4xf32> -> vector<32x4xf32>
    %c0_10 = arith.constant 0 : index
    %c0_11 = arith.constant 0 : index
    %10 = vector.load %arg5[%c0_10, %c0_11] : memref<1x4xf32, #tpu.memory_space<vmem>>, vector<1x4xf32>
    %c0_12 = arith.constant 0 : index
    %c0_13 = arith.constant 0 : index
    %11 = vector.load %arg6[%c0_12, %c0_13] : memref<1x4xf32, #tpu.memory_space<vmem>>, vector<1x4xf32>
    %cst_14 = arith.constant dense<0.000000e+00> : vector<4xf32>
    %12 = vector.multi_reduction <add>, %7, %cst_14 [0] : vector<32x4xf32> to vector<4xf32>
    %13 = vector.shape_cast %12 : vector<4xf32> to vector<1x4xf32>
    %cst_15 = arith.constant 3.200000e+01 : f32
    %14 = vector.broadcast %cst_15 : f32 to vector<1x4xf32>
    %15 = arith.divf %13, %14 : vector<1x4xf32>
    %16 = vector.broadcast %15 : vector<1x4xf32> to vector<32x4xf32>
    %17 = arith.subf %7, %16 : vector<32x4xf32>
    %18 = arith.mulf %17, %17 : vector<32x4xf32>
    %cst_16 = arith.constant dense<0.000000e+00> : vector<4xf32>
    %19 = vector.multi_reduction <add>, %18, %cst_16 [0] : vector<32x4xf32> to vector<4xf32>
    %20 = vector.shape_cast %19 : vector<4xf32> to vector<1x4xf32>
    %cst_17 = arith.constant 3.200000e+01 : f32
    %21 = vector.broadcast %cst_17 : f32 to vector<1x4xf32>
    %22 = arith.divf %20, %21 : vector<1x4xf32>
    %cst_18 = arith.constant 9.99999974E-6 : f32
    %23 = vector.broadcast %cst_18 : f32 to vector<1x4xf32>
    %24 = arith.addf %22, %23 : vector<1x4xf32>
    %25 = math.rsqrt %24 : vector<1x4xf32>
    %26 = vector.broadcast %15 : vector<1x4xf32> to vector<32x4xf32>
    %27 = arith.subf %7, %26 : vector<32x4xf32>
    %28 = vector.broadcast %25 : vector<1x4xf32> to vector<32x4xf32>
    %29 = arith.mulf %27, %28 : vector<32x4xf32>
    %30 = vector.broadcast %10 : vector<1x4xf32> to vector<32x4xf32>
    %31 = arith.mulf %29, %30 : vector<32x4xf32>
    %32 = vector.broadcast %11 : vector<1x4xf32> to vector<32x4xf32>
    %33 = arith.addf %31, %32 : vector<32x4xf32>
    %c0_19 = arith.constant 0 : index
    %c0_20 = arith.constant 0 : index
    %c0_21 = arith.constant 0 : index
    %34 = vector.load %arg9[%c0_19, %c0_20, %c0_21] : memref<2x32x4xf32, #tpu.memory_space<vmem>>, vector<1x32x4xf32>
    %35 = vector.shape_cast %34 : vector<1x32x4xf32> to vector<32x4xf32>
    %36 = vector.shape_cast %33 : vector<32x4xf32> to vector<1x32x4xf32>
    tpu.vector_store %arg9[%c0_19, %c0_20, %c0_21], %36 {strides = array<i32>} : memref<2x32x4xf32, #tpu.memory_space<vmem>>, vector<1x32x4xf32>,
    %c0_22 = arith.constant 0 : index
    %c0_23 = arith.constant 0 : index
    %37 = vector.load %arg7[%c0_22, %c0_23] : memref<1x4xf32, #tpu.memory_space<vmem>>, vector<1x4xf32>
    %c0_24 = arith.constant 0 : index
    %c0_25 = arith.constant 0 : index
    %38 = vector.load %arg8[%c0_24, %c0_25] : memref<1x4xf32, #tpu.memory_space<vmem>>, vector<1x4xf32>
    %cst_26 = arith.constant dense<0.000000e+00> : vector<4xf32>
    %39 = vector.multi_reduction <add>, %9, %cst_26 [0] : vector<32x4xf32> to vector<4xf32>
    %40 = vector.shape_cast %39 : vector<4xf32> to vector<1x4xf32>
    %cst_27 = arith.constant 3.200000e+01 : f32
    %41 = vector.broadcast %cst_27 : f32 to vector<1x4xf32>
    %42 = arith.divf %40, %41 : vector<1x4xf32>
    %43 = vector.broadcast %42 : vector<1x4xf32> to vector<32x4xf32>
    %44 = arith.subf %9, %43 : vector<32x4xf32>
    %45 = arith.mulf %44, %44 : vector<32x4xf32>
    %cst_28 = arith.constant dense<0.000000e+00> : vector<4xf32>
    %46 = vector.multi_reduction <add>, %45, %cst_28 [0] : vector<32x4xf32> to vector<4xf32>
    %47 = vector.shape_cast %46 : vector<4xf32> to vector<1x4xf32>
    %cst_29 = arith.constant 3.200000e+01 : f32
    %48 = vector.broadcast %cst_29 : f32 to vector<1x4xf32>
    %49 = arith.divf %47, %48 : vector<1x4xf32>
    %cst_30 = arith.constant 9.99999974E-6 : f32
    %50 = vector.broadcast %cst_30 : f32 to vector<1x4xf32>
    %51 = arith.addf %49, %50 : vector<1x4xf32>
    %52 = math.rsqrt %51 : vector<1x4xf32>
    %53 = vector.broadcast %42 : vector<1x4xf32> to vector<32x4xf32>
    %54 = arith.subf %9, %53 : vector<32x4xf32>
    %55 = vector.broadcast %52 : vector<1x4xf32> to vector<32x4xf32>
    %56 = arith.mulf %54, %55 : vector<32x4xf32>
    %57 = vector.broadcast %37 : vector<1x4xf32> to vector<32x4xf32>
    %58 = arith.mulf %56, %57 : vector<32x4xf32>
    %59 = vector.broadcast %38 : vector<1x4xf32> to vector<32x4xf32>
    %60 = arith.addf %58, %59 : vector<32x4xf32>
    %c1 = arith.constant 1 : index
    %c0_31 = arith.constant 0 : index
    %c0_32 = arith.constant 0 : index
    %61 = vector.load %arg9[%c1, %c0_31, %c0_32] : memref<2x32x4xf32, #tpu.memory_space<vmem>>, vector<1x32x4xf32>
    %62 = vector.shape_cast %61 : vector<1x32x4xf32> to vector<32x4xf32>
    %63 = vector.shape_cast %60 : vector<32x4xf32> to vector<1x32x4xf32>
    tpu.vector_store %arg9[%c1, %c0_31, %c0_32], %63 {strides = array<i32>} : memref<2x32x4xf32, #tpu.memory_space<vmem>>, vector<1x32x4xf32>,
    return
  }
  func.func @transform_0(%arg0: i32) -> (i32, i32) {
    %c0_i32 = arith.constant 0 : i32
    %c0_i32_0 = arith.constant 0 : i32
    %c0_i32_1 = arith.constant 0 : i32
    return %c0_i32, %c0_i32_0 : i32, i32
  }
  func.func @transform_1(%arg0: i32) -> (i32, i32) {
    %c0_i32 = arith.constant 0 : i32
    %c0_i32_0 = arith.constant 0 : i32
    %c0_i32_1 = arith.constant 0 : i32
    return %c0_i32, %c0_i32_0 : i32, i32
  }
  func.func @transform_2(%arg0: i32) -> (i32, i32) {
    %c0_i32 = arith.constant 0 : i32
    %c0_i32_0 = arith.constant 0 : i32
    %c0_i32_1 = arith.constant 0 : i32
    return %c0_i32, %c0_i32_0 : i32, i32
  }
  func.func @transform_3(%arg0: i32) -> (i32, i32) {
    %c0_i32 = arith.constant 0 : i32
    %c0_i32_0 = arith.constant 0 : i32
    %c0_i32_1 = arith.constant 0 : i32
    return %c0_i32, %c0_i32_0 : i32, i32
  }
  func.func @transform_4(%arg0: i32) -> (i32, i32) {
    %c0_i32 = arith.constant 0 : i32
    %c0_i32_0 = arith.constant 0 : i32
    %c0_i32_1 = arith.constant 0 : i32
    return %c0_i32, %c0_i32_0 : i32, i32
  }
  func.func @transform_5(%arg0: i32) -> (i32, i32) {
    %c0_i32 = arith.constant 0 : i32
    %c0_i32_0 = arith.constant 0 : i32
    %c0_i32_1 = arith.constant 0 : i32
    return %c0_i32, %c0_i32_0 : i32, i32
  }
  func.func @transform_6(%arg0: i32) -> (i32, i32) {
    %c0_i32 = arith.constant 0 : i32
    %c0_i32_0 = arith.constant 0 : i32
    %c0_i32_1 = arith.constant 0 : i32
    return %c0_i32, %c0_i32_0 : i32, i32
  }
  func.func @transform_7(%arg0: i32) -> (i32, i32) {
    %c0_i32 = arith.constant 0 : i32
    %c0_i32_0 = arith.constant 0 : i32
    %c0_i32_1 = arith.constant 0 : i32
    return %c0_i32, %c0_i32_0 : i32, i32
  }
  func.func @transform_8(%arg0: i32) -> (i32, i32, i32) {
    %c0_i32 = arith.constant 0 : i32
    %c0_i32_0 = arith.constant 0 : i32
    %c0_i32_1 = arith.constant 0 : i32
    %c0_i32_2 = arith.constant 0 : i32
    return %c0_i32, %c0_i32_0, %c0_i32_1 : i32, i32, i32
  }
}

module attributes {stable_mosaic.version = 11 : i64} {
  func.func @_maxpool_kernel(%arg0: i32, %arg1: memref<8x9x16xf32, #tpu.memory_space<vmem>>, %arg2: memref<8x16xf32, #tpu.memory_space<vmem>>) attributes {dimension_semantics = [#tpu.dimension_semantics<arbitrary>], iteration_bounds = array<i64: 1>, scalar_prefetch = 0 : i64, scratch_operands = 0 : i64, tpu.core_type = #tpu.core_type<tc>, window_params = [{pipeline_mode = #tpu.pipeline_mode<synchronous>, transform_indices = @transform_0, window_bounds = array<i64: 8, 9, 16>}, {pipeline_mode = #tpu.pipeline_mode<synchronous>, transform_indices = @transform_1, window_bounds = array<i64: 8, 16>}]} {
    %c0 = arith.constant 0 : index
    %c0_0 = arith.constant 0 : index
    %c0_1 = arith.constant 0 : index
    %0 = vector.load %arg1[%c0, %c0_0, %c0_1] : memref<8x9x16xf32, #tpu.memory_space<vmem>>, vector<8x9x16xf32>
    %cst = arith.constant dense<0xFF800000> : vector<8x16xf32>
    %1 = vector.multi_reduction <maximumf>, %0, %cst [1] : vector<8x9x16xf32> to vector<8x16xf32>
    %c0_2 = arith.constant 0 : index
    %c0_3 = arith.constant 0 : index
    %2 = vector.load %arg2[%c0_2, %c0_3] : memref<8x16xf32, #tpu.memory_space<vmem>>, vector<8x16xf32>
    tpu.vector_store %arg2[%c0_2, %c0_3], %1 {strides = array<i32>} : memref<8x16xf32, #tpu.memory_space<vmem>>, vector<8x16xf32>,
    return
  }
  func.func @transform_0(%arg0: i32) -> (i32, i32, i32) {
    %c0_i32 = arith.constant 0 : i32
    %c0_i32_0 = arith.constant 0 : i32
    %c0_i32_1 = arith.constant 0 : i32
    %c0_i32_2 = arith.constant 0 : i32
    return %c0_i32, %c0_i32_0, %c0_i32_1 : i32, i32, i32
  }
  func.func @transform_1(%arg0: i32) -> (i32, i32) {
    %c0_i32 = arith.constant 0 : i32
    %c0_i32_0 = arith.constant 0 : i32
    %c0_i32_1 = arith.constant 0 : i32
    return %c0_i32, %c0_i32_0 : i32, i32
  }
}

module attributes {stable_mosaic.version = 11 : i64} {
  func.func @_dw_pw_bn_kernel(%arg0: i32, %arg1: memref<8x25x16xf32, #tpu.memory_space<vmem>>, %arg2: memref<25x16xf32, #tpu.memory_space<vmem>>, %arg3: memref<16x16xf32, #tpu.memory_space<vmem>>, %arg4: memref<1x16xf32, #tpu.memory_space<vmem>>, %arg5: memref<1x16xf32, #tpu.memory_space<vmem>>, %arg6: memref<8x16xf32, #tpu.memory_space<vmem>>) attributes {dimension_semantics = [#tpu.dimension_semantics<arbitrary>], iteration_bounds = array<i64: 1>, scalar_prefetch = 0 : i64, scratch_operands = 0 : i64, tpu.core_type = #tpu.core_type<tc>, window_params = [{pipeline_mode = #tpu.pipeline_mode<synchronous>, transform_indices = @transform_0, window_bounds = array<i64: 8, 25, 16>}, {pipeline_mode = #tpu.pipeline_mode<synchronous>, transform_indices = @transform_1, window_bounds = array<i64: 25, 16>}, {pipeline_mode = #tpu.pipeline_mode<synchronous>, transform_indices = @transform_2, window_bounds = array<i64: 16, 16>}, {pipeline_mode = #tpu.pipeline_mode<synchronous>, transform_indices = @transform_3, window_bounds = array<i64: 1, 16>}, {pipeline_mode = #tpu.pipeline_mode<synchronous>, transform_indices = @transform_4, window_bounds = array<i64: 1, 16>}, {pipeline_mode = #tpu.pipeline_mode<synchronous>, transform_indices = @transform_5, window_bounds = array<i64: 8, 16>}]} {
    %c0 = arith.constant 0 : index
    %c0_0 = arith.constant 0 : index
    %c0_1 = arith.constant 0 : index
    %0 = vector.load %arg1[%c0, %c0_0, %c0_1] : memref<8x25x16xf32, #tpu.memory_space<vmem>>, vector<8x25x16xf32>
    %c0_2 = arith.constant 0 : index
    %c0_3 = arith.constant 0 : index
    %1 = vector.load %arg2[%c0_2, %c0_3] : memref<25x16xf32, #tpu.memory_space<vmem>>, vector<25x16xf32>
    %2 = vector.shape_cast %1 : vector<25x16xf32> to vector<1x25x16xf32>
    %3 = vector.broadcast %2 : vector<1x25x16xf32> to vector<8x25x16xf32>
    %4 = arith.mulf %0, %3 : vector<8x25x16xf32>
    %cst = arith.constant dense<0.000000e+00> : vector<8x16xf32>
    %5 = vector.multi_reduction <add>, %4, %cst [1] : vector<8x25x16xf32> to vector<8x16xf32>
    %c0_4 = arith.constant 0 : index
    %c0_5 = arith.constant 0 : index
    %6 = vector.load %arg3[%c0_4, %c0_5] : memref<16x16xf32, #tpu.memory_space<vmem>>, vector<16x16xf32>
    %cst_6 = arith.constant dense<0.000000e+00> : vector<8x16xf32>
    %7 = tpu.matmul %5, %6, %cst_6 {dimension_numbers = #tpu.dot_dimension_numbers<[1], [0], [0], [1], [0, 0, 1, 1], [], []>} : vector<8x16xf32>, vector<16x16xf32>, vector<8x16xf32> -> vector<8x16xf32>
    %c0_7 = arith.constant 0 : index
    %c0_8 = arith.constant 0 : index
    %8 = vector.load %arg4[%c0_7, %c0_8] : memref<1x16xf32, #tpu.memory_space<vmem>>, vector<1x16xf32>
    %c0_9 = arith.constant 0 : index
    %c0_10 = arith.constant 0 : index
    %9 = vector.load %arg5[%c0_9, %c0_10] : memref<1x16xf32, #tpu.memory_space<vmem>>, vector<1x16xf32>
    %cst_11 = arith.constant dense<0.000000e+00> : vector<16xf32>
    %10 = vector.multi_reduction <add>, %7, %cst_11 [0] : vector<8x16xf32> to vector<16xf32>
    %11 = vector.shape_cast %10 : vector<16xf32> to vector<1x16xf32>
    %cst_12 = arith.constant 8.000000e+00 : f32
    %12 = vector.broadcast %cst_12 : f32 to vector<1x16xf32>
    %13 = arith.divf %11, %12 : vector<1x16xf32>
    %14 = vector.broadcast %13 : vector<1x16xf32> to vector<8x16xf32>
    %15 = arith.subf %7, %14 : vector<8x16xf32>
    %16 = arith.mulf %15, %15 : vector<8x16xf32>
    %cst_13 = arith.constant dense<0.000000e+00> : vector<16xf32>
    %17 = vector.multi_reduction <add>, %16, %cst_13 [0] : vector<8x16xf32> to vector<16xf32>
    %18 = vector.shape_cast %17 : vector<16xf32> to vector<1x16xf32>
    %cst_14 = arith.constant 8.000000e+00 : f32
    %19 = vector.broadcast %cst_14 : f32 to vector<1x16xf32>
    %20 = arith.divf %18, %19 : vector<1x16xf32>
    %cst_15 = arith.constant 9.99999974E-6 : f32
    %21 = vector.broadcast %cst_15 : f32 to vector<1x16xf32>
    %22 = arith.addf %20, %21 : vector<1x16xf32>
    %23 = math.rsqrt %22 : vector<1x16xf32>
    %24 = vector.broadcast %13 : vector<1x16xf32> to vector<8x16xf32>
    %25 = arith.subf %7, %24 : vector<8x16xf32>
    %26 = vector.broadcast %23 : vector<1x16xf32> to vector<8x16xf32>
    %27 = arith.mulf %25, %26 : vector<8x16xf32>
    %28 = vector.broadcast %8 : vector<1x16xf32> to vector<8x16xf32>
    %29 = arith.mulf %27, %28 : vector<8x16xf32>
    %30 = vector.broadcast %9 : vector<1x16xf32> to vector<8x16xf32>
    %31 = arith.addf %29, %30 : vector<8x16xf32>
    %c0_16 = arith.constant 0 : index
    %c0_17 = arith.constant 0 : index
    %32 = vector.load %arg6[%c0_16, %c0_17] : memref<8x16xf32, #tpu.memory_space<vmem>>, vector<8x16xf32>
    tpu.vector_store %arg6[%c0_16, %c0_17], %31 {strides = array<i32>} : memref<8x16xf32, #tpu.memory_space<vmem>>, vector<8x16xf32>,
    return
  }
  func.func @transform_0(%arg0: i32) -> (i32, i32, i32) {
    %c0_i32 = arith.constant 0 : i32
    %c0_i32_0 = arith.constant 0 : i32
    %c0_i32_1 = arith.constant 0 : i32
    %c0_i32_2 = arith.constant 0 : i32
    return %c0_i32, %c0_i32_0, %c0_i32_1 : i32, i32, i32
  }
  func.func @transform_1(%arg0: i32) -> (i32, i32) {
    %c0_i32 = arith.constant 0 : i32
    %c0_i32_0 = arith.constant 0 : i32
    %c0_i32_1 = arith.constant 0 : i32
    return %c0_i32, %c0_i32_0 : i32, i32
  }
  func.func @transform_2(%arg0: i32) -> (i32, i32) {
    %c0_i32 = arith.constant 0 : i32
    %c0_i32_0 = arith.constant 0 : i32
    %c0_i32_1 = arith.constant 0 : i32
    return %c0_i32, %c0_i32_0 : i32, i32
  }
  func.func @transform_3(%arg0: i32) -> (i32, i32) {
    %c0_i32 = arith.constant 0 : i32
    %c0_i32_0 = arith.constant 0 : i32
    %c0_i32_1 = arith.constant 0 : i32
    return %c0_i32, %c0_i32_0 : i32, i32
  }
  func.func @transform_4(%arg0: i32) -> (i32, i32) {
    %c0_i32 = arith.constant 0 : i32
    %c0_i32_0 = arith.constant 0 : i32
    %c0_i32_1 = arith.constant 0 : i32
    return %c0_i32, %c0_i32_0 : i32, i32
  }
  func.func @transform_5(%arg0: i32) -> (i32, i32) {
    %c0_i32 = arith.constant 0 : i32
    %c0_i32_0 = arith.constant 0 : i32
    %c0_i32_1 = arith.constant 0 : i32
    return %c0_i32, %c0_i32_0 : i32, i32
  }
}

module attributes {stable_mosaic.version = 11 : i64} {
  func.func @_avgpool_kernel(%arg0: i32, %arg1: memref<8x9x16xf32, #tpu.memory_space<vmem>>, %arg2: memref<8x1xf32, #tpu.memory_space<vmem>>, %arg3: memref<8x16xf32, #tpu.memory_space<vmem>>) attributes {dimension_semantics = [#tpu.dimension_semantics<arbitrary>], iteration_bounds = array<i64: 1>, scalar_prefetch = 0 : i64, scratch_operands = 0 : i64, tpu.core_type = #tpu.core_type<tc>, window_params = [{pipeline_mode = #tpu.pipeline_mode<synchronous>, transform_indices = @transform_0, window_bounds = array<i64: 8, 9, 16>}, {pipeline_mode = #tpu.pipeline_mode<synchronous>, transform_indices = @transform_1, window_bounds = array<i64: 8, 1>}, {pipeline_mode = #tpu.pipeline_mode<synchronous>, transform_indices = @transform_2, window_bounds = array<i64: 8, 16>}]} {
    %c0 = arith.constant 0 : index
    %c0_0 = arith.constant 0 : index
    %c0_1 = arith.constant 0 : index
    %0 = vector.load %arg1[%c0, %c0_0, %c0_1] : memref<8x9x16xf32, #tpu.memory_space<vmem>>, vector<8x9x16xf32>
    %cst = arith.constant dense<0.000000e+00> : vector<8x16xf32>
    %1 = vector.multi_reduction <add>, %0, %cst [1] : vector<8x9x16xf32> to vector<8x16xf32>
    %c0_2 = arith.constant 0 : index
    %c0_3 = arith.constant 0 : index
    %2 = vector.load %arg2[%c0_2, %c0_3] : memref<8x1xf32, #tpu.memory_space<vmem>>, vector<8x1xf32>
    %3 = vector.broadcast %2 : vector<8x1xf32> to vector<8x16xf32>
    %4 = arith.divf %1, %3 : vector<8x16xf32>
    %c0_4 = arith.constant 0 : index
    %c0_5 = arith.constant 0 : index
    %5 = vector.load %arg3[%c0_4, %c0_5] : memref<8x16xf32, #tpu.memory_space<vmem>>, vector<8x16xf32>
    tpu.vector_store %arg3[%c0_4, %c0_5], %4 {strides = array<i32>} : memref<8x16xf32, #tpu.memory_space<vmem>>, vector<8x16xf32>,
    return
  }
  func.func @transform_0(%arg0: i32) -> (i32, i32, i32) {
    %c0_i32 = arith.constant 0 : i32
    %c0_i32_0 = arith.constant 0 : i32
    %c0_i32_1 = arith.constant 0 : i32
    %c0_i32_2 = arith.constant 0 : i32
    return %c0_i32, %c0_i32_0, %c0_i32_1 : i32, i32, i32
  }
  func.func @transform_1(%arg0: i32) -> (i32, i32) {
    %c0_i32 = arith.constant 0 : i32
    %c0_i32_0 = arith.constant 0 : i32
    %c0_i32_1 = arith.constant 0 : i32
    return %c0_i32, %c0_i32_0 : i32, i32
  }
  func.func @transform_2(%arg0: i32) -> (i32, i32) {
    %c0_i32 = arith.constant 0 : i32
    %c0_i32_0 = arith.constant 0 : i32
    %c0_i32_1 = arith.constant 0 : i32
    return %c0_i32, %c0_i32_0 : i32, i32
  }
}

module attributes {stable_mosaic.version = 11 : i64} {
  func.func @_dw_pw_bn_kernel(%arg0: i32, %arg1: memref<32x9x8xf32, #tpu.memory_space<vmem>>, %arg2: memref<9x8xf32, #tpu.memory_space<vmem>>, %arg3: memref<8x8xf32, #tpu.memory_space<vmem>>, %arg4: memref<1x8xf32, #tpu.memory_space<vmem>>, %arg5: memref<1x8xf32, #tpu.memory_space<vmem>>, %arg6: memref<32x8xf32, #tpu.memory_space<vmem>>) attributes {dimension_semantics = [#tpu.dimension_semantics<arbitrary>], iteration_bounds = array<i64: 1>, scalar_prefetch = 0 : i64, scratch_operands = 0 : i64, tpu.core_type = #tpu.core_type<tc>, window_params = [{pipeline_mode = #tpu.pipeline_mode<synchronous>, transform_indices = @transform_0, window_bounds = array<i64: 32, 9, 8>}, {pipeline_mode = #tpu.pipeline_mode<synchronous>, transform_indices = @transform_1, window_bounds = array<i64: 9, 8>}, {pipeline_mode = #tpu.pipeline_mode<synchronous>, transform_indices = @transform_2, window_bounds = array<i64: 8, 8>}, {pipeline_mode = #tpu.pipeline_mode<synchronous>, transform_indices = @transform_3, window_bounds = array<i64: 1, 8>}, {pipeline_mode = #tpu.pipeline_mode<synchronous>, transform_indices = @transform_4, window_bounds = array<i64: 1, 8>}, {pipeline_mode = #tpu.pipeline_mode<synchronous>, transform_indices = @transform_5, window_bounds = array<i64: 32, 8>}]} {
    %c0 = arith.constant 0 : index
    %c0_0 = arith.constant 0 : index
    %c0_1 = arith.constant 0 : index
    %0 = vector.load %arg1[%c0, %c0_0, %c0_1] : memref<32x9x8xf32, #tpu.memory_space<vmem>>, vector<32x9x8xf32>
    %c0_2 = arith.constant 0 : index
    %c0_3 = arith.constant 0 : index
    %1 = vector.load %arg2[%c0_2, %c0_3] : memref<9x8xf32, #tpu.memory_space<vmem>>, vector<9x8xf32>
    %2 = vector.shape_cast %1 : vector<9x8xf32> to vector<1x9x8xf32>
    %3 = vector.broadcast %2 : vector<1x9x8xf32> to vector<32x9x8xf32>
    %4 = arith.mulf %0, %3 : vector<32x9x8xf32>
    %cst = arith.constant dense<0.000000e+00> : vector<32x8xf32>
    %5 = vector.multi_reduction <add>, %4, %cst [1] : vector<32x9x8xf32> to vector<32x8xf32>
    %c0_4 = arith.constant 0 : index
    %c0_5 = arith.constant 0 : index
    %6 = vector.load %arg3[%c0_4, %c0_5] : memref<8x8xf32, #tpu.memory_space<vmem>>, vector<8x8xf32>
    %cst_6 = arith.constant dense<0.000000e+00> : vector<32x8xf32>
    %7 = tpu.matmul %5, %6, %cst_6 {dimension_numbers = #tpu.dot_dimension_numbers<[1], [0], [0], [1], [0, 0, 1, 1], [], []>} : vector<32x8xf32>, vector<8x8xf32>, vector<32x8xf32> -> vector<32x8xf32>
    %c0_7 = arith.constant 0 : index
    %c0_8 = arith.constant 0 : index
    %8 = vector.load %arg4[%c0_7, %c0_8] : memref<1x8xf32, #tpu.memory_space<vmem>>, vector<1x8xf32>
    %c0_9 = arith.constant 0 : index
    %c0_10 = arith.constant 0 : index
    %9 = vector.load %arg5[%c0_9, %c0_10] : memref<1x8xf32, #tpu.memory_space<vmem>>, vector<1x8xf32>
    %cst_11 = arith.constant dense<0.000000e+00> : vector<8xf32>
    %10 = vector.multi_reduction <add>, %7, %cst_11 [0] : vector<32x8xf32> to vector<8xf32>
    %11 = vector.shape_cast %10 : vector<8xf32> to vector<1x8xf32>
    %cst_12 = arith.constant 3.200000e+01 : f32
    %12 = vector.broadcast %cst_12 : f32 to vector<1x8xf32>
    %13 = arith.divf %11, %12 : vector<1x8xf32>
    %14 = vector.broadcast %13 : vector<1x8xf32> to vector<32x8xf32>
    %15 = arith.subf %7, %14 : vector<32x8xf32>
    %16 = arith.mulf %15, %15 : vector<32x8xf32>
    %cst_13 = arith.constant dense<0.000000e+00> : vector<8xf32>
    %17 = vector.multi_reduction <add>, %16, %cst_13 [0] : vector<32x8xf32> to vector<8xf32>
    %18 = vector.shape_cast %17 : vector<8xf32> to vector<1x8xf32>
    %cst_14 = arith.constant 3.200000e+01 : f32
    %19 = vector.broadcast %cst_14 : f32 to vector<1x8xf32>
    %20 = arith.divf %18, %19 : vector<1x8xf32>
    %cst_15 = arith.constant 9.99999974E-6 : f32
    %21 = vector.broadcast %cst_15 : f32 to vector<1x8xf32>
    %22 = arith.addf %20, %21 : vector<1x8xf32>
    %23 = math.rsqrt %22 : vector<1x8xf32>
    %24 = vector.broadcast %13 : vector<1x8xf32> to vector<32x8xf32>
    %25 = arith.subf %7, %24 : vector<32x8xf32>
    %26 = vector.broadcast %23 : vector<1x8xf32> to vector<32x8xf32>
    %27 = arith.mulf %25, %26 : vector<32x8xf32>
    %28 = vector.broadcast %8 : vector<1x8xf32> to vector<32x8xf32>
    %29 = arith.mulf %27, %28 : vector<32x8xf32>
    %30 = vector.broadcast %9 : vector<1x8xf32> to vector<32x8xf32>
    %31 = arith.addf %29, %30 : vector<32x8xf32>
    %c0_16 = arith.constant 0 : index
    %c0_17 = arith.constant 0 : index
    %32 = vector.load %arg6[%c0_16, %c0_17] : memref<32x8xf32, #tpu.memory_space<vmem>>, vector<32x8xf32>
    tpu.vector_store %arg6[%c0_16, %c0_17], %31 {strides = array<i32>} : memref<32x8xf32, #tpu.memory_space<vmem>>, vector<32x8xf32>,
    return
  }
  func.func @transform_0(%arg0: i32) -> (i32, i32, i32) {
    %c0_i32 = arith.constant 0 : i32
    %c0_i32_0 = arith.constant 0 : i32
    %c0_i32_1 = arith.constant 0 : i32
    %c0_i32_2 = arith.constant 0 : i32
    return %c0_i32, %c0_i32_0, %c0_i32_1 : i32, i32, i32
  }
  func.func @transform_1(%arg0: i32) -> (i32, i32) {
    %c0_i32 = arith.constant 0 : i32
    %c0_i32_0 = arith.constant 0 : i32
    %c0_i32_1 = arith.constant 0 : i32
    return %c0_i32, %c0_i32_0 : i32, i32
  }
  func.func @transform_2(%arg0: i32) -> (i32, i32) {
    %c0_i32 = arith.constant 0 : i32
    %c0_i32_0 = arith.constant 0 : i32
    %c0_i32_1 = arith.constant 0 : i32
    return %c0_i32, %c0_i32_0 : i32, i32
  }
  func.func @transform_3(%arg0: i32) -> (i32, i32) {
    %c0_i32 = arith.constant 0 : i32
    %c0_i32_0 = arith.constant 0 : i32
    %c0_i32_1 = arith.constant 0 : i32
    return %c0_i32, %c0_i32_0 : i32, i32
  }
  func.func @transform_4(%arg0: i32) -> (i32, i32) {
    %c0_i32 = arith.constant 0 : i32
    %c0_i32_0 = arith.constant 0 : i32
    %c0_i32_1 = arith.constant 0 : i32
    return %c0_i32, %c0_i32_0 : i32, i32
  }
  func.func @transform_5(%arg0: i32) -> (i32, i32) {
    %c0_i32 = arith.constant 0 : i32
    %c0_i32_0 = arith.constant 0 : i32
    %c0_i32_1 = arith.constant 0 : i32
    return %c0_i32, %c0_i32_0 : i32, i32
  }
}

module attributes {stable_mosaic.version = 11 : i64} {
  func.func @_wsum_kernel(%arg0: i32, %arg1: memref<7xf32, #tpu.memory_space<smem>>, %arg2: memref<1x128xf32, #tpu.memory_space<vmem>>, %arg3: memref<1x128xf32, #tpu.memory_space<vmem>>, %arg4: memref<1x128xf32, #tpu.memory_space<vmem>>, %arg5: memref<1x128xf32, #tpu.memory_space<vmem>>, %arg6: memref<1x128xf32, #tpu.memory_space<vmem>>, %arg7: memref<1x128xf32, #tpu.memory_space<vmem>>, %arg8: memref<1x128xf32, #tpu.memory_space<vmem>>, %arg9: memref<1x128xf32, #tpu.memory_space<vmem>>) attributes {dimension_semantics = [#tpu.dimension_semantics<arbitrary>], iteration_bounds = array<i64: 1>, scalar_prefetch = 0 : i64, scratch_operands = 0 : i64, tpu.core_type = #tpu.core_type<tc>, window_params = [{transform_indices = @transform_0, window_bounds = array<i64: 7>}, {pipeline_mode = #tpu.pipeline_mode<synchronous>, transform_indices = @transform_1, window_bounds = array<i64: 1, 128>}, {pipeline_mode = #tpu.pipeline_mode<synchronous>, transform_indices = @transform_2, window_bounds = array<i64: 1, 128>}, {pipeline_mode = #tpu.pipeline_mode<synchronous>, transform_indices = @transform_3, window_bounds = array<i64: 1, 128>}, {pipeline_mode = #tpu.pipeline_mode<synchronous>, transform_indices = @transform_4, window_bounds = array<i64: 1, 128>}, {pipeline_mode = #tpu.pipeline_mode<synchronous>, transform_indices = @transform_5, window_bounds = array<i64: 1, 128>}, {pipeline_mode = #tpu.pipeline_mode<synchronous>, transform_indices = @transform_6, window_bounds = array<i64: 1, 128>}, {pipeline_mode = #tpu.pipeline_mode<synchronous>, transform_indices = @transform_7, window_bounds = array<i64: 1, 128>}, {pipeline_mode = #tpu.pipeline_mode<synchronous>, transform_indices = @transform_8, window_bounds = array<i64: 1, 128>}]} {
    %c0 = arith.constant 0 : index
    %0 = memref.load %arg1[%c0] : memref<7xf32, #tpu.memory_space<smem>>
    %c0_0 = arith.constant 0 : index
    %c0_1 = arith.constant 0 : index
    %1 = vector.load %arg2[%c0_0, %c0_1] : memref<1x128xf32, #tpu.memory_space<vmem>>, vector<1x128xf32>
    %2 = vector.broadcast %0 : f32 to vector<1x128xf32>
    %3 = arith.mulf %2, %1 : vector<1x128xf32>
    %c1 = arith.constant 1 : index
    %4 = memref.load %arg1[%c1] : memref<7xf32, #tpu.memory_space<smem>>
    %c0_2 = arith.constant 0 : index
    %c0_3 = arith.constant 0 : index
    %5 = vector.load %arg3[%c0_2, %c0_3] : memref<1x128xf32, #tpu.memory_space<vmem>>, vector<1x128xf32>
    %6 = vector.broadcast %4 : f32 to vector<1x128xf32>
    %7 = arith.mulf %6, %5 : vector<1x128xf32>
    %8 = arith.addf %3, %7 : vector<1x128xf32>
    %c2 = arith.constant 2 : index
    %9 = memref.load %arg1[%c2] : memref<7xf32, #tpu.memory_space<smem>>
    %c0_4 = arith.constant 0 : index
    %c0_5 = arith.constant 0 : index
    %10 = vector.load %arg4[%c0_4, %c0_5] : memref<1x128xf32, #tpu.memory_space<vmem>>, vector<1x128xf32>
    %11 = vector.broadcast %9 : f32 to vector<1x128xf32>
    %12 = arith.mulf %11, %10 : vector<1x128xf32>
    %13 = arith.addf %8, %12 : vector<1x128xf32>
    %c3 = arith.constant 3 : index
    %14 = memref.load %arg1[%c3] : memref<7xf32, #tpu.memory_space<smem>>
    %c0_6 = arith.constant 0 : index
    %c0_7 = arith.constant 0 : index
    %15 = vector.load %arg5[%c0_6, %c0_7] : memref<1x128xf32, #tpu.memory_space<vmem>>, vector<1x128xf32>
    %16 = vector.broadcast %14 : f32 to vector<1x128xf32>
    %17 = arith.mulf %16, %15 : vector<1x128xf32>
    %18 = arith.addf %13, %17 : vector<1x128xf32>
    %c4 = arith.constant 4 : index
    %19 = memref.load %arg1[%c4] : memref<7xf32, #tpu.memory_space<smem>>
    %c0_8 = arith.constant 0 : index
    %c0_9 = arith.constant 0 : index
    %20 = vector.load %arg6[%c0_8, %c0_9] : memref<1x128xf32, #tpu.memory_space<vmem>>, vector<1x128xf32>
    %21 = vector.broadcast %19 : f32 to vector<1x128xf32>
    %22 = arith.mulf %21, %20 : vector<1x128xf32>
    %23 = arith.addf %18, %22 : vector<1x128xf32>
    %c5 = arith.constant 5 : index
    %24 = memref.load %arg1[%c5] : memref<7xf32, #tpu.memory_space<smem>>
    %c0_10 = arith.constant 0 : index
    %c0_11 = arith.constant 0 : index
    %25 = vector.load %arg7[%c0_10, %c0_11] : memref<1x128xf32, #tpu.memory_space<vmem>>, vector<1x128xf32>
    %26 = vector.broadcast %24 : f32 to vector<1x128xf32>
    %27 = arith.mulf %26, %25 : vector<1x128xf32>
    %28 = arith.addf %23, %27 : vector<1x128xf32>
    %c6 = arith.constant 6 : index
    %29 = memref.load %arg1[%c6] : memref<7xf32, #tpu.memory_space<smem>>
    %c0_12 = arith.constant 0 : index
    %c0_13 = arith.constant 0 : index
    %30 = vector.load %arg8[%c0_12, %c0_13] : memref<1x128xf32, #tpu.memory_space<vmem>>, vector<1x128xf32>
    %31 = vector.broadcast %29 : f32 to vector<1x128xf32>
    %32 = arith.mulf %31, %30 : vector<1x128xf32>
    %33 = arith.addf %28, %32 : vector<1x128xf32>
    %c0_14 = arith.constant 0 : index
    %c0_15 = arith.constant 0 : index
    %34 = vector.load %arg9[%c0_14, %c0_15] : memref<1x128xf32, #tpu.memory_space<vmem>>, vector<1x128xf32>
    tpu.vector_store %arg9[%c0_14, %c0_15], %33 {strides = array<i32>} : memref<1x128xf32, #tpu.memory_space<vmem>>, vector<1x128xf32>,
    return
  }
  func.func @transform_0(%arg0: i32) -> i32 {
    %c0_i32 = arith.constant 0 : i32
    %c0_i32_0 = arith.constant 0 : i32
    return %c0_i32 : i32
  }
  func.func @transform_1(%arg0: i32) -> (i32, i32) {
    %c0_i32 = arith.constant 0 : i32
    %c0_i32_0 = arith.constant 0 : i32
    %c0_i32_1 = arith.constant 0 : i32
    return %c0_i32, %c0_i32_0 : i32, i32
  }
  func.func @transform_2(%arg0: i32) -> (i32, i32) {
    %c0_i32 = arith.constant 0 : i32
    %c0_i32_0 = arith.constant 0 : i32
    %c0_i32_1 = arith.constant 0 : i32
    return %c0_i32, %c0_i32_0 : i32, i32
  }
  func.func @transform_3(%arg0: i32) -> (i32, i32) {
    %c0_i32 = arith.constant 0 : i32
    %c0_i32_0 = arith.constant 0 : i32
    %c0_i32_1 = arith.constant 0 : i32
    return %c0_i32, %c0_i32_0 : i32, i32
  }
  func.func @transform_4(%arg0: i32) -> (i32, i32) {
    %c0_i32 = arith.constant 0 : i32
    %c0_i32_0 = arith.constant 0 : i32
    %c0_i32_1 = arith.constant 0 : i32
    return %c0_i32, %c0_i32_0 : i32, i32
  }
  func.func @transform_5(%arg0: i32) -> (i32, i32) {
    %c0_i32 = arith.constant 0 : i32
    %c0_i32_0 = arith.constant 0 : i32
    %c0_i32_1 = arith.constant 0 : i32
    return %c0_i32, %c0_i32_0 : i32, i32
  }
  func.func @transform_6(%arg0: i32) -> (i32, i32) {
    %c0_i32 = arith.constant 0 : i32
    %c0_i32_0 = arith.constant 0 : i32
    %c0_i32_1 = arith.constant 0 : i32
    return %c0_i32, %c0_i32_0 : i32, i32
  }
  func.func @transform_7(%arg0: i32) -> (i32, i32) {
    %c0_i32 = arith.constant 0 : i32
    %c0_i32_0 = arith.constant 0 : i32
    %c0_i32_1 = arith.constant 0 : i32
    return %c0_i32, %c0_i32_0 : i32, i32
  }
  func.func @transform_8(%arg0: i32) -> (i32, i32) {
    %c0_i32 = arith.constant 0 : i32
    %c0_i32_0 = arith.constant 0 : i32
    %c0_i32_1 = arith.constant 0 : i32
    return %c0_i32, %c0_i32_0 : i32, i32
  }
}

module attributes {stable_mosaic.version = 11 : i64} {
  func.func @_dw_pw_bn_kernel(%arg0: i32, %arg1: memref<32x25x8xf32, #tpu.memory_space<vmem>>, %arg2: memref<25x8xf32, #tpu.memory_space<vmem>>, %arg3: memref<8x8xf32, #tpu.memory_space<vmem>>, %arg4: memref<1x8xf32, #tpu.memory_space<vmem>>, %arg5: memref<1x8xf32, #tpu.memory_space<vmem>>, %arg6: memref<32x8xf32, #tpu.memory_space<vmem>>) attributes {dimension_semantics = [#tpu.dimension_semantics<arbitrary>], iteration_bounds = array<i64: 1>, scalar_prefetch = 0 : i64, scratch_operands = 0 : i64, tpu.core_type = #tpu.core_type<tc>, window_params = [{pipeline_mode = #tpu.pipeline_mode<synchronous>, transform_indices = @transform_0, window_bounds = array<i64: 32, 25, 8>}, {pipeline_mode = #tpu.pipeline_mode<synchronous>, transform_indices = @transform_1, window_bounds = array<i64: 25, 8>}, {pipeline_mode = #tpu.pipeline_mode<synchronous>, transform_indices = @transform_2, window_bounds = array<i64: 8, 8>}, {pipeline_mode = #tpu.pipeline_mode<synchronous>, transform_indices = @transform_3, window_bounds = array<i64: 1, 8>}, {pipeline_mode = #tpu.pipeline_mode<synchronous>, transform_indices = @transform_4, window_bounds = array<i64: 1, 8>}, {pipeline_mode = #tpu.pipeline_mode<synchronous>, transform_indices = @transform_5, window_bounds = array<i64: 32, 8>}]} {
    %c0 = arith.constant 0 : index
    %c0_0 = arith.constant 0 : index
    %c0_1 = arith.constant 0 : index
    %0 = vector.load %arg1[%c0, %c0_0, %c0_1] : memref<32x25x8xf32, #tpu.memory_space<vmem>>, vector<32x25x8xf32>
    %c0_2 = arith.constant 0 : index
    %c0_3 = arith.constant 0 : index
    %1 = vector.load %arg2[%c0_2, %c0_3] : memref<25x8xf32, #tpu.memory_space<vmem>>, vector<25x8xf32>
    %2 = vector.shape_cast %1 : vector<25x8xf32> to vector<1x25x8xf32>
    %3 = vector.broadcast %2 : vector<1x25x8xf32> to vector<32x25x8xf32>
    %4 = arith.mulf %0, %3 : vector<32x25x8xf32>
    %cst = arith.constant dense<0.000000e+00> : vector<32x8xf32>
    %5 = vector.multi_reduction <add>, %4, %cst [1] : vector<32x25x8xf32> to vector<32x8xf32>
    %c0_4 = arith.constant 0 : index
    %c0_5 = arith.constant 0 : index
    %6 = vector.load %arg3[%c0_4, %c0_5] : memref<8x8xf32, #tpu.memory_space<vmem>>, vector<8x8xf32>
    %cst_6 = arith.constant dense<0.000000e+00> : vector<32x8xf32>
    %7 = tpu.matmul %5, %6, %cst_6 {dimension_numbers = #tpu.dot_dimension_numbers<[1], [0], [0], [1], [0, 0, 1, 1], [], []>} : vector<32x8xf32>, vector<8x8xf32>, vector<32x8xf32> -> vector<32x8xf32>
    %c0_7 = arith.constant 0 : index
    %c0_8 = arith.constant 0 : index
    %8 = vector.load %arg4[%c0_7, %c0_8] : memref<1x8xf32, #tpu.memory_space<vmem>>, vector<1x8xf32>
    %c0_9 = arith.constant 0 : index
    %c0_10 = arith.constant 0 : index
    %9 = vector.load %arg5[%c0_9, %c0_10] : memref<1x8xf32, #tpu.memory_space<vmem>>, vector<1x8xf32>
    %cst_11 = arith.constant dense<0.000000e+00> : vector<8xf32>
    %10 = vector.multi_reduction <add>, %7, %cst_11 [0] : vector<32x8xf32> to vector<8xf32>
    %11 = vector.shape_cast %10 : vector<8xf32> to vector<1x8xf32>
    %cst_12 = arith.constant 3.200000e+01 : f32
    %12 = vector.broadcast %cst_12 : f32 to vector<1x8xf32>
    %13 = arith.divf %11, %12 : vector<1x8xf32>
    %14 = vector.broadcast %13 : vector<1x8xf32> to vector<32x8xf32>
    %15 = arith.subf %7, %14 : vector<32x8xf32>
    %16 = arith.mulf %15, %15 : vector<32x8xf32>
    %cst_13 = arith.constant dense<0.000000e+00> : vector<8xf32>
    %17 = vector.multi_reduction <add>, %16, %cst_13 [0] : vector<32x8xf32> to vector<8xf32>
    %18 = vector.shape_cast %17 : vector<8xf32> to vector<1x8xf32>
    %cst_14 = arith.constant 3.200000e+01 : f32
    %19 = vector.broadcast %cst_14 : f32 to vector<1x8xf32>
    %20 = arith.divf %18, %19 : vector<1x8xf32>
    %cst_15 = arith.constant 9.99999974E-6 : f32
    %21 = vector.broadcast %cst_15 : f32 to vector<1x8xf32>
    %22 = arith.addf %20, %21 : vector<1x8xf32>
    %23 = math.rsqrt %22 : vector<1x8xf32>
    %24 = vector.broadcast %13 : vector<1x8xf32> to vector<32x8xf32>
    %25 = arith.subf %7, %24 : vector<32x8xf32>
    %26 = vector.broadcast %23 : vector<1x8xf32> to vector<32x8xf32>
    %27 = arith.mulf %25, %26 : vector<32x8xf32>
    %28 = vector.broadcast %8 : vector<1x8xf32> to vector<32x8xf32>
    %29 = arith.mulf %27, %28 : vector<32x8xf32>
    %30 = vector.broadcast %9 : vector<1x8xf32> to vector<32x8xf32>
    %31 = arith.addf %29, %30 : vector<32x8xf32>
    %c0_16 = arith.constant 0 : index
    %c0_17 = arith.constant 0 : index
    %32 = vector.load %arg6[%c0_16, %c0_17] : memref<32x8xf32, #tpu.memory_space<vmem>>, vector<32x8xf32>
    tpu.vector_store %arg6[%c0_16, %c0_17], %31 {strides = array<i32>} : memref<32x8xf32, #tpu.memory_space<vmem>>, vector<32x8xf32>,
    return
  }
  func.func @transform_0(%arg0: i32) -> (i32, i32, i32) {
    %c0_i32 = arith.constant 0 : i32
    %c0_i32_0 = arith.constant 0 : i32
    %c0_i32_1 = arith.constant 0 : i32
    %c0_i32_2 = arith.constant 0 : i32
    return %c0_i32, %c0_i32_0, %c0_i32_1 : i32, i32, i32
  }
  func.func @transform_1(%arg0: i32) -> (i32, i32) {
    %c0_i32 = arith.constant 0 : i32
    %c0_i32_0 = arith.constant 0 : i32
    %c0_i32_1 = arith.constant 0 : i32
    return %c0_i32, %c0_i32_0 : i32, i32
  }
  func.func @transform_2(%arg0: i32) -> (i32, i32) {
    %c0_i32 = arith.constant 0 : i32
    %c0_i32_0 = arith.constant 0 : i32
    %c0_i32_1 = arith.constant 0 : i32
    return %c0_i32, %c0_i32_0 : i32, i32
  }
  func.func @transform_3(%arg0: i32) -> (i32, i32) {
    %c0_i32 = arith.constant 0 : i32
    %c0_i32_0 = arith.constant 0 : i32
    %c0_i32_1 = arith.constant 0 : i32
    return %c0_i32, %c0_i32_0 : i32, i32
  }
  func.func @transform_4(%arg0: i32) -> (i32, i32) {
    %c0_i32 = arith.constant 0 : i32
    %c0_i32_0 = arith.constant 0 : i32
    %c0_i32_1 = arith.constant 0 : i32
    return %c0_i32, %c0_i32_0 : i32, i32
  }
  func.func @transform_5(%arg0: i32) -> (i32, i32) {
    %c0_i32 = arith.constant 0 : i32
    %c0_i32_0 = arith.constant 0 : i32
    %c0_i32_1 = arith.constant 0 : i32
    return %c0_i32, %c0_i32_0 : i32, i32
  }
}

module attributes {stable_mosaic.version = 11 : i64} {
  func.func @_maxpool_kernel(%arg0: i32, %arg1: memref<32x9x8xf32, #tpu.memory_space<vmem>>, %arg2: memref<32x8xf32, #tpu.memory_space<vmem>>) attributes {dimension_semantics = [#tpu.dimension_semantics<arbitrary>], iteration_bounds = array<i64: 1>, scalar_prefetch = 0 : i64, scratch_operands = 0 : i64, tpu.core_type = #tpu.core_type<tc>, window_params = [{pipeline_mode = #tpu.pipeline_mode<synchronous>, transform_indices = @transform_0, window_bounds = array<i64: 32, 9, 8>}, {pipeline_mode = #tpu.pipeline_mode<synchronous>, transform_indices = @transform_1, window_bounds = array<i64: 32, 8>}]} {
    %c0 = arith.constant 0 : index
    %c0_0 = arith.constant 0 : index
    %c0_1 = arith.constant 0 : index
    %0 = vector.load %arg1[%c0, %c0_0, %c0_1] : memref<32x9x8xf32, #tpu.memory_space<vmem>>, vector<32x9x8xf32>
    %cst = arith.constant dense<0xFF800000> : vector<32x8xf32>
    %1 = vector.multi_reduction <maximumf>, %0, %cst [1] : vector<32x9x8xf32> to vector<32x8xf32>
    %c0_2 = arith.constant 0 : index
    %c0_3 = arith.constant 0 : index
    %2 = vector.load %arg2[%c0_2, %c0_3] : memref<32x8xf32, #tpu.memory_space<vmem>>, vector<32x8xf32>
    tpu.vector_store %arg2[%c0_2, %c0_3], %1 {strides = array<i32>} : memref<32x8xf32, #tpu.memory_space<vmem>>, vector<32x8xf32>,
    return
  }
  func.func @transform_0(%arg0: i32) -> (i32, i32, i32) {
    %c0_i32 = arith.constant 0 : i32
    %c0_i32_0 = arith.constant 0 : i32
    %c0_i32_1 = arith.constant 0 : i32
    %c0_i32_2 = arith.constant 0 : i32
    return %c0_i32, %c0_i32_0, %c0_i32_1 : i32, i32, i32
  }
  func.func @transform_1(%arg0: i32) -> (i32, i32) {
    %c0_i32 = arith.constant 0 : i32
    %c0_i32_0 = arith.constant 0 : i32
    %c0_i32_1 = arith.constant 0 : i32
    return %c0_i32, %c0_i32_0 : i32, i32
  }
}

module attributes {stable_mosaic.version = 11 : i64} {
  func.func @_avgpool_kernel(%arg0: i32, %arg1: memref<32x9x8xf32, #tpu.memory_space<vmem>>, %arg2: memref<32x1xf32, #tpu.memory_space<vmem>>, %arg3: memref<32x8xf32, #tpu.memory_space<vmem>>) attributes {dimension_semantics = [#tpu.dimension_semantics<arbitrary>], iteration_bounds = array<i64: 1>, scalar_prefetch = 0 : i64, scratch_operands = 0 : i64, tpu.core_type = #tpu.core_type<tc>, window_params = [{pipeline_mode = #tpu.pipeline_mode<synchronous>, transform_indices = @transform_0, window_bounds = array<i64: 32, 9, 8>}, {pipeline_mode = #tpu.pipeline_mode<synchronous>, transform_indices = @transform_1, window_bounds = array<i64: 32, 1>}, {pipeline_mode = #tpu.pipeline_mode<synchronous>, transform_indices = @transform_2, window_bounds = array<i64: 32, 8>}]} {
    %c0 = arith.constant 0 : index
    %c0_0 = arith.constant 0 : index
    %c0_1 = arith.constant 0 : index
    %0 = vector.load %arg1[%c0, %c0_0, %c0_1] : memref<32x9x8xf32, #tpu.memory_space<vmem>>, vector<32x9x8xf32>
    %cst = arith.constant dense<0.000000e+00> : vector<32x8xf32>
    %1 = vector.multi_reduction <add>, %0, %cst [1] : vector<32x9x8xf32> to vector<32x8xf32>
    %c0_2 = arith.constant 0 : index
    %c0_3 = arith.constant 0 : index
    %2 = vector.load %arg2[%c0_2, %c0_3] : memref<32x1xf32, #tpu.memory_space<vmem>>, vector<32x1xf32>
    %3 = vector.broadcast %2 : vector<32x1xf32> to vector<32x8xf32>
    %4 = arith.divf %1, %3 : vector<32x8xf32>
    %c0_4 = arith.constant 0 : index
    %c0_5 = arith.constant 0 : index
    %5 = vector.load %arg3[%c0_4, %c0_5] : memref<32x8xf32, #tpu.memory_space<vmem>>, vector<32x8xf32>
    tpu.vector_store %arg3[%c0_4, %c0_5], %4 {strides = array<i32>} : memref<32x8xf32, #tpu.memory_space<vmem>>, vector<32x8xf32>,
    return
  }
  func.func @transform_0(%arg0: i32) -> (i32, i32, i32) {
    %c0_i32 = arith.constant 0 : i32
    %c0_i32_0 = arith.constant 0 : i32
    %c0_i32_1 = arith.constant 0 : i32
    %c0_i32_2 = arith.constant 0 : i32
    return %c0_i32, %c0_i32_0, %c0_i32_1 : i32, i32, i32
  }
  func.func @transform_1(%arg0: i32) -> (i32, i32) {
    %c0_i32 = arith.constant 0 : i32
    %c0_i32_0 = arith.constant 0 : i32
    %c0_i32_1 = arith.constant 0 : i32
    return %c0_i32, %c0_i32_0 : i32, i32
  }
  func.func @transform_2(%arg0: i32) -> (i32, i32) {
    %c0_i32 = arith.constant 0 : i32
    %c0_i32_0 = arith.constant 0 : i32
    %c0_i32_1 = arith.constant 0 : i32
    return %c0_i32, %c0_i32_0 : i32, i32
  }
}

module attributes {stable_mosaic.version = 11 : i64} {
  func.func @_wsum_kernel(%arg0: i32, %arg1: memref<7xf32, #tpu.memory_space<smem>>, %arg2: memref<2x128xf32, #tpu.memory_space<vmem>>, %arg3: memref<2x128xf32, #tpu.memory_space<vmem>>, %arg4: memref<2x128xf32, #tpu.memory_space<vmem>>, %arg5: memref<2x128xf32, #tpu.memory_space<vmem>>, %arg6: memref<2x128xf32, #tpu.memory_space<vmem>>, %arg7: memref<2x128xf32, #tpu.memory_space<vmem>>, %arg8: memref<2x128xf32, #tpu.memory_space<vmem>>, %arg9: memref<2x128xf32, #tpu.memory_space<vmem>>) attributes {dimension_semantics = [#tpu.dimension_semantics<arbitrary>], iteration_bounds = array<i64: 1>, scalar_prefetch = 0 : i64, scratch_operands = 0 : i64, tpu.core_type = #tpu.core_type<tc>, window_params = [{transform_indices = @transform_0, window_bounds = array<i64: 7>}, {pipeline_mode = #tpu.pipeline_mode<synchronous>, transform_indices = @transform_1, window_bounds = array<i64: 2, 128>}, {pipeline_mode = #tpu.pipeline_mode<synchronous>, transform_indices = @transform_2, window_bounds = array<i64: 2, 128>}, {pipeline_mode = #tpu.pipeline_mode<synchronous>, transform_indices = @transform_3, window_bounds = array<i64: 2, 128>}, {pipeline_mode = #tpu.pipeline_mode<synchronous>, transform_indices = @transform_4, window_bounds = array<i64: 2, 128>}, {pipeline_mode = #tpu.pipeline_mode<synchronous>, transform_indices = @transform_5, window_bounds = array<i64: 2, 128>}, {pipeline_mode = #tpu.pipeline_mode<synchronous>, transform_indices = @transform_6, window_bounds = array<i64: 2, 128>}, {pipeline_mode = #tpu.pipeline_mode<synchronous>, transform_indices = @transform_7, window_bounds = array<i64: 2, 128>}, {pipeline_mode = #tpu.pipeline_mode<synchronous>, transform_indices = @transform_8, window_bounds = array<i64: 2, 128>}]} {
    %c0 = arith.constant 0 : index
    %0 = memref.load %arg1[%c0] : memref<7xf32, #tpu.memory_space<smem>>
    %c0_0 = arith.constant 0 : index
    %c0_1 = arith.constant 0 : index
    %1 = vector.load %arg2[%c0_0, %c0_1] : memref<2x128xf32, #tpu.memory_space<vmem>>, vector<2x128xf32>
    %2 = vector.broadcast %0 : f32 to vector<2x128xf32>
    %3 = arith.mulf %2, %1 : vector<2x128xf32>
    %c1 = arith.constant 1 : index
    %4 = memref.load %arg1[%c1] : memref<7xf32, #tpu.memory_space<smem>>
    %c0_2 = arith.constant 0 : index
    %c0_3 = arith.constant 0 : index
    %5 = vector.load %arg3[%c0_2, %c0_3] : memref<2x128xf32, #tpu.memory_space<vmem>>, vector<2x128xf32>
    %6 = vector.broadcast %4 : f32 to vector<2x128xf32>
    %7 = arith.mulf %6, %5 : vector<2x128xf32>
    %8 = arith.addf %3, %7 : vector<2x128xf32>
    %c2 = arith.constant 2 : index
    %9 = memref.load %arg1[%c2] : memref<7xf32, #tpu.memory_space<smem>>
    %c0_4 = arith.constant 0 : index
    %c0_5 = arith.constant 0 : index
    %10 = vector.load %arg4[%c0_4, %c0_5] : memref<2x128xf32, #tpu.memory_space<vmem>>, vector<2x128xf32>
    %11 = vector.broadcast %9 : f32 to vector<2x128xf32>
    %12 = arith.mulf %11, %10 : vector<2x128xf32>
    %13 = arith.addf %8, %12 : vector<2x128xf32>
    %c3 = arith.constant 3 : index
    %14 = memref.load %arg1[%c3] : memref<7xf32, #tpu.memory_space<smem>>
    %c0_6 = arith.constant 0 : index
    %c0_7 = arith.constant 0 : index
    %15 = vector.load %arg5[%c0_6, %c0_7] : memref<2x128xf32, #tpu.memory_space<vmem>>, vector<2x128xf32>
    %16 = vector.broadcast %14 : f32 to vector<2x128xf32>
    %17 = arith.mulf %16, %15 : vector<2x128xf32>
    %18 = arith.addf %13, %17 : vector<2x128xf32>
    %c4 = arith.constant 4 : index
    %19 = memref.load %arg1[%c4] : memref<7xf32, #tpu.memory_space<smem>>
    %c0_8 = arith.constant 0 : index
    %c0_9 = arith.constant 0 : index
    %20 = vector.load %arg6[%c0_8, %c0_9] : memref<2x128xf32, #tpu.memory_space<vmem>>, vector<2x128xf32>
    %21 = vector.broadcast %19 : f32 to vector<2x128xf32>
    %22 = arith.mulf %21, %20 : vector<2x128xf32>
    %23 = arith.addf %18, %22 : vector<2x128xf32>
    %c5 = arith.constant 5 : index
    %24 = memref.load %arg1[%c5] : memref<7xf32, #tpu.memory_space<smem>>
    %c0_10 = arith.constant 0 : index
    %c0_11 = arith.constant 0 : index
    %25 = vector.load %arg7[%c0_10, %c0_11] : memref<2x128xf32, #tpu.memory_space<vmem>>, vector<2x128xf32>
    %26 = vector.broadcast %24 : f32 to vector<2x128xf32>
    %27 = arith.mulf %26, %25 : vector<2x128xf32>
    %28 = arith.addf %23, %27 : vector<2x128xf32>
    %c6 = arith.constant 6 : index
    %29 = memref.load %arg1[%c6] : memref<7xf32, #tpu.memory_space<smem>>
    %c0_12 = arith.constant 0 : index
    %c0_13 = arith.constant 0 : index
    %30 = vector.load %arg8[%c0_12, %c0_13] : memref<2x128xf32, #tpu.memory_space<vmem>>, vector<2x128xf32>
    %31 = vector.broadcast %29 : f32 to vector<2x128xf32>
    %32 = arith.mulf %31, %30 : vector<2x128xf32>
    %33 = arith.addf %28, %32 : vector<2x128xf32>
    %c0_14 = arith.constant 0 : index
    %c0_15 = arith.constant 0 : index
    %34 = vector.load %arg9[%c0_14, %c0_15] : memref<2x128xf32, #tpu.memory_space<vmem>>, vector<2x128xf32>
    tpu.vector_store %arg9[%c0_14, %c0_15], %33 {strides = array<i32>} : memref<2x128xf32, #tpu.memory_space<vmem>>, vector<2x128xf32>,
    return
  }
  func.func @transform_0(%arg0: i32) -> i32 {
    %c0_i32 = arith.constant 0 : i32
    %c0_i32_0 = arith.constant 0 : i32
    return %c0_i32 : i32
  }
  func.func @transform_1(%arg0: i32) -> (i32, i32) {
    %c0_i32 = arith.constant 0 : i32
    %c0_i32_0 = arith.constant 0 : i32
    %c0_i32_1 = arith.constant 0 : i32
    return %c0_i32, %c0_i32_0 : i32, i32
  }
  func.func @transform_2(%arg0: i32) -> (i32, i32) {
    %c0_i32 = arith.constant 0 : i32
    %c0_i32_0 = arith.constant 0 : i32
    %c0_i32_1 = arith.constant 0 : i32
    return %c0_i32, %c0_i32_0 : i32, i32
  }
  func.func @transform_3(%arg0: i32) -> (i32, i32) {
    %c0_i32 = arith.constant 0 : i32
    %c0_i32_0 = arith.constant 0 : i32
    %c0_i32_1 = arith.constant 0 : i32
    return %c0_i32, %c0_i32_0 : i32, i32
  }
  func.func @transform_4(%arg0: i32) -> (i32, i32) {
    %c0_i32 = arith.constant 0 : i32
    %c0_i32_0 = arith.constant 0 : i32
    %c0_i32_1 = arith.constant 0 : i32
    return %c0_i32, %c0_i32_0 : i32, i32
  }
  func.func @transform_5(%arg0: i32) -> (i32, i32) {
    %c0_i32 = arith.constant 0 : i32
    %c0_i32_0 = arith.constant 0 : i32
    %c0_i32_1 = arith.constant 0 : i32
    return %c0_i32, %c0_i32_0 : i32, i32
  }
  func.func @transform_6(%arg0: i32) -> (i32, i32) {
    %c0_i32 = arith.constant 0 : i32
    %c0_i32_0 = arith.constant 0 : i32
    %c0_i32_1 = arith.constant 0 : i32
    return %c0_i32, %c0_i32_0 : i32, i32
  }
  func.func @transform_7(%arg0: i32) -> (i32, i32) {
    %c0_i32 = arith.constant 0 : i32
    %c0_i32_0 = arith.constant 0 : i32
    %c0_i32_1 = arith.constant 0 : i32
    return %c0_i32, %c0_i32_0 : i32, i32
  }
  func.func @transform_8(%arg0: i32) -> (i32, i32) {
    %c0_i32 = arith.constant 0 : i32
    %c0_i32_0 = arith.constant 0 : i32
    %c0_i32_1 = arith.constant 0 : i32
    return %c0_i32, %c0_i32_0 : i32, i32
  }
}

module attributes {stable_mosaic.version = 11 : i64} {
  func.func @_mm_bn_kernel(%arg0: i32, %arg1: memref<32x16xf32, #tpu.memory_space<vmem>>, %arg2: memref<16x16xf32, #tpu.memory_space<vmem>>, %arg3: memref<1x16xf32, #tpu.memory_space<vmem>>, %arg4: memref<1x16xf32, #tpu.memory_space<vmem>>, %arg5: memref<32x16xf32, #tpu.memory_space<vmem>>) attributes {dimension_semantics = [#tpu.dimension_semantics<arbitrary>], iteration_bounds = array<i64: 1>, scalar_prefetch = 0 : i64, scratch_operands = 0 : i64, tpu.core_type = #tpu.core_type<tc>, window_params = [{pipeline_mode = #tpu.pipeline_mode<synchronous>, transform_indices = @transform_0, window_bounds = array<i64: 32, 16>}, {pipeline_mode = #tpu.pipeline_mode<synchronous>, transform_indices = @transform_1, window_bounds = array<i64: 16, 16>}, {pipeline_mode = #tpu.pipeline_mode<synchronous>, transform_indices = @transform_2, window_bounds = array<i64: 1, 16>}, {pipeline_mode = #tpu.pipeline_mode<synchronous>, transform_indices = @transform_3, window_bounds = array<i64: 1, 16>}, {pipeline_mode = #tpu.pipeline_mode<synchronous>, transform_indices = @transform_4, window_bounds = array<i64: 32, 16>}]} {
    %c0 = arith.constant 0 : index
    %c0_0 = arith.constant 0 : index
    %0 = vector.load %arg1[%c0, %c0_0] : memref<32x16xf32, #tpu.memory_space<vmem>>, vector<32x16xf32>
    %cst = arith.constant 0.000000e+00 : f32
    %1 = vector.broadcast %cst : f32 to vector<32x16xf32>
    %2 = arith.maximumf %0, %1 : vector<32x16xf32>
    %c0_1 = arith.constant 0 : index
    %c0_2 = arith.constant 0 : index
    %3 = vector.load %arg2[%c0_1, %c0_2] : memref<16x16xf32, #tpu.memory_space<vmem>>, vector<16x16xf32>
    %cst_3 = arith.constant dense<0.000000e+00> : vector<32x16xf32>
    %4 = tpu.matmul %2, %3, %cst_3 {dimension_numbers = #tpu.dot_dimension_numbers<[1], [0], [0], [1], [0, 0, 1, 1], [], []>} : vector<32x16xf32>, vector<16x16xf32>, vector<32x16xf32> -> vector<32x16xf32>
    %c0_4 = arith.constant 0 : index
    %c0_5 = arith.constant 0 : index
    %5 = vector.load %arg3[%c0_4, %c0_5] : memref<1x16xf32, #tpu.memory_space<vmem>>, vector<1x16xf32>
    %c0_6 = arith.constant 0 : index
    %c0_7 = arith.constant 0 : index
    %6 = vector.load %arg4[%c0_6, %c0_7] : memref<1x16xf32, #tpu.memory_space<vmem>>, vector<1x16xf32>
    %cst_8 = arith.constant dense<0.000000e+00> : vector<16xf32>
    %7 = vector.multi_reduction <add>, %4, %cst_8 [0] : vector<32x16xf32> to vector<16xf32>
    %8 = vector.shape_cast %7 : vector<16xf32> to vector<1x16xf32>
    %cst_9 = arith.constant 3.200000e+01 : f32
    %9 = vector.broadcast %cst_9 : f32 to vector<1x16xf32>
    %10 = arith.divf %8, %9 : vector<1x16xf32>
    %11 = vector.broadcast %10 : vector<1x16xf32> to vector<32x16xf32>
    %12 = arith.subf %4, %11 : vector<32x16xf32>
    %13 = arith.mulf %12, %12 : vector<32x16xf32>
    %cst_10 = arith.constant dense<0.000000e+00> : vector<16xf32>
    %14 = vector.multi_reduction <add>, %13, %cst_10 [0] : vector<32x16xf32> to vector<16xf32>
    %15 = vector.shape_cast %14 : vector<16xf32> to vector<1x16xf32>
    %cst_11 = arith.constant 3.200000e+01 : f32
    %16 = vector.broadcast %cst_11 : f32 to vector<1x16xf32>
    %17 = arith.divf %15, %16 : vector<1x16xf32>
    %cst_12 = arith.constant 9.99999974E-6 : f32
    %18 = vector.broadcast %cst_12 : f32 to vector<1x16xf32>
    %19 = arith.addf %17, %18 : vector<1x16xf32>
    %20 = math.rsqrt %19 : vector<1x16xf32>
    %21 = vector.broadcast %10 : vector<1x16xf32> to vector<32x16xf32>
    %22 = arith.subf %4, %21 : vector<32x16xf32>
    %23 = vector.broadcast %20 : vector<1x16xf32> to vector<32x16xf32>
    %24 = arith.mulf %22, %23 : vector<32x16xf32>
    %25 = vector.broadcast %5 : vector<1x16xf32> to vector<32x16xf32>
    %26 = arith.mulf %24, %25 : vector<32x16xf32>
    %27 = vector.broadcast %6 : vector<1x16xf32> to vector<32x16xf32>
    %28 = arith.addf %26, %27 : vector<32x16xf32>
    %c0_13 = arith.constant 0 : index
    %c0_14 = arith.constant 0 : index
    %29 = vector.load %arg5[%c0_13, %c0_14] : memref<32x16xf32, #tpu.memory_space<vmem>>, vector<32x16xf32>
    tpu.vector_store %arg5[%c0_13, %c0_14], %28 {strides = array<i32>} : memref<32x16xf32, #tpu.memory_space<vmem>>, vector<32x16xf32>,
    return
  }
  func.func @transform_0(%arg0: i32) -> (i32, i32) {
    %c0_i32 = arith.constant 0 : i32
    %c0_i32_0 = arith.constant 0 : i32
    %c0_i32_1 = arith.constant 0 : i32
    return %c0_i32, %c0_i32_0 : i32, i32
  }
  func.func @transform_1(%arg0: i32) -> (i32, i32) {
    %c0_i32 = arith.constant 0 : i32
    %c0_i32_0 = arith.constant 0 : i32
    %c0_i32_1 = arith.constant 0 : i32
    return %c0_i32, %c0_i32_0 : i32, i32
  }
  func.func @transform_2(%arg0: i32) -> (i32, i32) {
    %c0_i32 = arith.constant 0 : i32
    %c0_i32_0 = arith.constant 0 : i32
    %c0_i32_1 = arith.constant 0 : i32
    return %c0_i32, %c0_i32_0 : i32, i32
  }
  func.func @transform_3(%arg0: i32) -> (i32, i32) {
    %c0_i32 = arith.constant 0 : i32
    %c0_i32_0 = arith.constant 0 : i32
    %c0_i32_1 = arith.constant 0 : i32
    return %c0_i32, %c0_i32_0 : i32, i32
  }
  func.func @transform_4(%arg0: i32) -> (i32, i32) {
    %c0_i32 = arith.constant 0 : i32
    %c0_i32_0 = arith.constant 0 : i32
    %c0_i32_1 = arith.constant 0 : i32
    return %c0_i32, %c0_i32_0 : i32, i32
  }
}

module attributes {stable_mosaic.version = 11 : i64} {
  func.func @_head_kernel(%arg0: i32, %arg1: memref<2x4x32xf32, #tpu.memory_space<vmem>>, %arg2: memref<32x10xf32, #tpu.memory_space<vmem>>, %arg3: memref<1x10xf32, #tpu.memory_space<vmem>>, %arg4: memref<2x10xf32, #tpu.memory_space<vmem>>) attributes {dimension_semantics = [#tpu.dimension_semantics<arbitrary>], iteration_bounds = array<i64: 1>, scalar_prefetch = 0 : i64, scratch_operands = 0 : i64, tpu.core_type = #tpu.core_type<tc>, window_params = [{pipeline_mode = #tpu.pipeline_mode<synchronous>, transform_indices = @transform_0, window_bounds = array<i64: 2, 4, 32>}, {pipeline_mode = #tpu.pipeline_mode<synchronous>, transform_indices = @transform_1, window_bounds = array<i64: 32, 10>}, {pipeline_mode = #tpu.pipeline_mode<synchronous>, transform_indices = @transform_2, window_bounds = array<i64: 1, 10>}, {pipeline_mode = #tpu.pipeline_mode<synchronous>, transform_indices = @transform_3, window_bounds = array<i64: 2, 10>}]} {
    %c0 = arith.constant 0 : index
    %c0_0 = arith.constant 0 : index
    %c0_1 = arith.constant 0 : index
    %0 = vector.load %arg1[%c0, %c0_0, %c0_1] : memref<2x4x32xf32, #tpu.memory_space<vmem>>, vector<2x4x32xf32>
    %cst = arith.constant dense<0.000000e+00> : vector<2x32xf32>
    %1 = vector.multi_reduction <add>, %0, %cst [1] : vector<2x4x32xf32> to vector<2x32xf32>
    %cst_2 = arith.constant 4.000000e+00 : f32
    %2 = vector.broadcast %cst_2 : f32 to vector<2x32xf32>
    %3 = arith.divf %1, %2 : vector<2x32xf32>
    %c0_3 = arith.constant 0 : index
    %c0_4 = arith.constant 0 : index
    %4 = vector.load %arg2[%c0_3, %c0_4] : memref<32x10xf32, #tpu.memory_space<vmem>>, vector<32x10xf32>
    %cst_5 = arith.constant dense<0.000000e+00> : vector<2x10xf32>
    %5 = tpu.matmul %3, %4, %cst_5 {dimension_numbers = #tpu.dot_dimension_numbers<[1], [0], [0], [1], [0, 0, 1, 1], [], []>} : vector<2x32xf32>, vector<32x10xf32>, vector<2x10xf32> -> vector<2x10xf32>
    %c0_6 = arith.constant 0 : index
    %c0_7 = arith.constant 0 : index
    %6 = vector.load %arg3[%c0_6, %c0_7] : memref<1x10xf32, #tpu.memory_space<vmem>>, vector<1x10xf32>
    %7 = vector.broadcast %6 : vector<1x10xf32> to vector<2x10xf32>
    %8 = arith.addf %5, %7 : vector<2x10xf32>
    %c0_8 = arith.constant 0 : index
    %c0_9 = arith.constant 0 : index
    %9 = vector.load %arg4[%c0_8, %c0_9] : memref<2x10xf32, #tpu.memory_space<vmem>>, vector<2x10xf32>
    tpu.vector_store %arg4[%c0_8, %c0_9], %8 {strides = array<i32>} : memref<2x10xf32, #tpu.memory_space<vmem>>, vector<2x10xf32>,
    return
  }
  func.func @transform_0(%arg0: i32) -> (i32, i32, i32) {
    %c0_i32 = arith.constant 0 : i32
    %c0_i32_0 = arith.constant 0 : i32
    %c0_i32_1 = arith.constant 0 : i32
    %c0_i32_2 = arith.constant 0 : i32
    return %c0_i32, %c0_i32_0, %c0_i32_1 : i32, i32, i32
  }
  func.func @transform_1(%arg0: i32) -> (i32, i32) {
    %c0_i32 = arith.constant 0 : i32
    %c0_i32_0 = arith.constant 0 : i32
    %c0_i32_1 = arith.constant 0 : i32
    return %c0_i32, %c0_i32_0 : i32, i32
  }
  func.func @transform_2(%arg0: i32) -> (i32, i32) {
    %c0_i32 = arith.constant 0 : i32
    %c0_i32_0 = arith.constant 0 : i32
    %c0_i32_1 = arith.constant 0 : i32
    return %c0_i32, %c0_i32_0 : i32, i32
  }
  func.func @transform_3(%arg0: i32) -> (i32, i32) {
    %c0_i32 = arith.constant 0 : i32
    %c0_i32_0 = arith.constant 0 : i32
    %c0_i32_1 = arith.constant 0 : i32
    return %c0_i32, %c0_i32_0 : i32, i32
  }
}

</mosaic_0001>

<bundles_post_ra>
// kernel: _lambda_.152
= control target key start
LH: loop header
LB: loop body
LE: loop exit
PB: predicated region body
PF: predicated region fallthrough
CT: control target
= control target key end

     0   :  { %vm60_vm0 = vcmask 1043456   ;;  %vm47_vm1 = vcmask 97280   ;;  %vm253_vm2 = vcmask 64512   ;;  %s597_s2 = inlined_call_operand.vmem [shape: f32[12,8], index: 2, kind: input, shape index: {}]   ;;  %s598_s3 = inlined_call_operand.vmem [shape: f32[12,8], index: 3, kind: input, shape index: {}]   ;;  %s599_s0 = inlined_call_operand.vmem [shape: f32[32,12], index: 0, kind: input, shape index: {}]   ;;  %s600_s1 = inlined_call_operand.vmem [shape: f32[32,12], index: 1, kind: input, shape index: {}]   ;;  %s601_s4 = inlined_call_operand.vmem [shape: f32[1,8], index: 4, kind: input, shape index: {}]   ;;  %s602_s6 = inlined_call_operand.vmem [shape: f32[1,8], index: 6, kind: input, shape index: {}]   ;;  %s603_s5 = inlined_call_operand.vmem [shape: f32[1,8], index: 5, kind: input, shape index: {}]   ;;  %s604_s7 = inlined_call_operand.vmem [shape: f32[1,8], index: 7, kind: input, shape index: {}]   ;;  %s605_s8 = inlined_call_operand.vmem [shape: f32[2,32,8], index: 8, kind: output, shape index: {}]  }
   0x1   :  { %v46_v0 = vld [vmem:[%s597_s2 + $0x8] sm:$0xf]  ;;  %v45_v2 = vld [vmem:[%s597_s2] sm:$0xff]  ;;  %v31_v10 = vld [vmem:[%s599_s0 + $0x10] sm:$0xff] }
   0x2   :  { %v150_v1 = vld [vmem:[%s598_s3 + $0x8] sm:$0xf]  ;;  %424 = vmatprep.subr.msk.mxu0 %vm60_vm0, %v46_v0  ;;  %v149_v3 = vld [vmem:[%s598_s3] sm:$0xff]  ;;  %v35_v13 = vmax.f32 %v31_v10, 0.0  ;;  %v39_v14 = vld [vmem:[%s600_s1 + $0x10] sm:$0xff] }
   0x3   :  { %434 = vmatprep.subr.msk.mxu1 %vm60_vm0, %v150_v1  ;;  %v29_v4 = vld [vmem:[%s599_s0] sm:$0xff]  ;;  %425 = vmatpush3.msk.msra.mxu0 %vm60_vm0, %v46_v0  ;;  %v30_v8 = vld [vmem:[%s599_s0 + $0x8] sm:$0xff]  ;;  %v32_v15 = vld [vmem:[%s599_s0 + $0x18] sm:$0xff]  ;;  %v43_v17 = vmax.f32 %v39_v14, 0.0 }
   0x4   :  { %v37_v5 = vld [vmem:[%s600_s1] sm:$0xff]  ;;  %435 = vmatpush3.msk.msra.mxu1 %vm60_vm0, %v150_v1  ;;  %v33_v6 = vmax.f32 %v29_v4, 0.0  ;;  %v38_v9 = vld [vmem:[%s600_s1 + $0x8] sm:$0xff]  ;;  %426 = vmatprep.subr.mxu0 %v45_v2  ;;  %v34_v11 = vmax.f32 %v30_v8, 0.0  ;;  %v40_v16 = vld [vmem:[%s600_s1 + $0x18] sm:$0xff]  ;;  %v36_v18 = vmax.f32 %v32_v15, 0.0 }
   0x5   :  { %v41_v7 = vmax.f32 %v37_v5, 0.0  ;;  %436 = vmatprep.subr.mxu1 %v149_v3  ;;  %v42_v12 = vmax.f32 %v38_v9, 0.0  ;;  %427 = vmatpush3.msra.mxu0 %v45_v2  ;;  %v44_v19 = vmax.f32 %v40_v16, 0.0 }
   0x6   :  { %428 = vmatprep.mubr.msk.f32.mxu0 %vm47_vm1, %v33_v6  ;;  %437 = vmatpush3.msra.mxu1 %v149_v3 }
   0x7   :  { %438 = vmatprep.mubr.msk.f32.mxu1 %vm47_vm1, %v41_v7  ;;  %429 = vmatmul.mubr.msk.f32.vlgmr.msra.gmra.mxu0 %vm47_vm1, %v34_v11 }
   0x8   :  { %439 = vmatmul.mubr.msk.f32.vlgmr.msra.gmra.mxu1 %vm47_vm1, %v42_v12  ;;  %431 = vmatprep.mubr.msk.f32.mxu0 %vm47_vm1, %v35_v13 }
   0x9   :  { %441 = vmatprep.mubr.msk.f32.mxu1 %vm47_vm1, %v43_v17 }
   0xb   :  { %432 = vmatmul.mubr.msk.f32.gmra.mxu0 %vm47_vm1, %v36_v18 }
   0xc   :  { %442 = vmatmul.mubr.msk.f32.gmra.mxu1 %vm47_vm1, %v44_v19 }
  0xc7   :  { %v430_v20 = vpop.f32.mrf.mxu0 }
  0xc8   :  { %v440_v21 = vpop.f32.mrf.mxu1  ;;  %v255_v28 = vsel %vm253_vm2, %v430_v20, 0.0 }
  0xc9   :  { %v130_v22 = vpop.f32.mrf.mxu0  ;;  %v324_v29 = vsel %vm253_vm2, %v440_v21, 0.0 }
  0xca   :  { %v232_v23 = vpop.f32.mrf.mxu1  ;;  %v254_v24 = vsel %vm253_vm2, %v130_v22, 0.0 }
  0xcb   :  { %v323_v25 = vsel %vm253_vm2, %v232_v23, 0.0  ;;  %v433_v26 = vpop.f32.mrf.mxu0  ;;  %v256_v30 = vadd.f32 %v255_v28, %v254_v24 }
  0xcc   :  { %v443_v27 = vpop.f32.mrf.mxu1  ;;  %v325_v31 = vadd.f32 %v324_v29, %v323_v25  ;;  %v259_v38 = vsel %vm253_vm2, %v433_v26, 0.0 }
  0xcd   :  { %v140_v32 = vpop.f32.mrf.mxu0  ;;  %v328_v39 = vsel %vm253_vm2, %v443_v27, 0.0 }
  0xce   :  { %v242_v33 = vpop.f32.mrf.mxu1  ;;  %v257_v34 = vsel %vm253_vm2, %v140_v32, 0.0 }
  0xcf   :  { %v326_v35 = vsel %vm253_vm2, %v242_v33, 0.0  ;;  %v258_v36 = vadd.f32 %v257_v34, %v256_v30 }
  0xd0   :  { %v327_v37 = vadd.f32 %v326_v35, %v325_v31 }
  0xd1   :  { %v260_v40 = vadd.f32 %v259_v38, %v258_v36 }
  0xd2   :  { %v329_v41 = vadd.f32 %v328_v39, %v327_v37  ;;  %v404_v39 = vld [vmem:[%s601_s4] ss:$0 sm:$0xff] }
  0xd3   :  { %v261_v42 = vrot.slane %v260_v40, 4 }
  0xd4   :  { %v330_v43 = vrot.slane %v329_v41, 4 }
  0xd5   :  { %v262_v44 = vadd.f32 %v261_v42, %v260_v40 }
  0xd6   :  { %v331_v45 = vadd.f32 %v330_v43, %v329_v41 }
  0xd7   :  { %v263_v46 = vrot.slane %v262_v44, 2 }
  0xd8   :  { %v332_v47 = vrot.slane %v331_v45, 2 }
  0xd9   :  { %v264_v48 = vadd.f32 %v263_v46, %v262_v44  ;;  %v405_v46 = vld [vmem:[%s603_s5] ss:$0 sm:$0xff] }
  0xda   :  { %v333_v49 = vadd.f32 %v332_v47, %v331_v45  ;;  %v406_v45 = vld [vmem:[%s602_s6] ss:$0 sm:$0xff] }
  0xdb   :  { %v265_v50 = vrot.slane %v264_v48, 1 }
  0xdc   :  { %v334_v51 = vrot.slane %v333_v49, 1 }
  0xdd   :  { %v266_v52 = vadd.f32 %v265_v50, %v264_v48 }
  0xde   :  { %v335_v53 = vadd.f32 %v334_v51, %v333_v49 }
  0xdf   :  { %v268_v54 = vmul.f32 0.03125, %v266_v52 }
  0xe0   :  { %v336_v55 = vmul.f32 0.03125, %v335_v53 }
  0xe1   :  { %v269_v56 = vsub.f32 %v130_v22, %v268_v54  ;;  %v270_v57 = vsub.f32 %v430_v20, %v268_v54  ;;  %v271_v58 = vsub.f32 %v140_v32, %v268_v54  ;;  %v272_v59 = vsub.f32 %v433_v26, %v268_v54 }
  0xe2   :  { %v337_v60 = vsub.f32 %v232_v23, %v336_v55  ;;  %v338_v61 = vsub.f32 %v440_v21, %v336_v55  ;;  %v339_v62 = vsub.f32 %v242_v33, %v336_v55  ;;  %v340_v63 = vsub.f32 %v443_v27, %v336_v55  ;;  %v407_v55 = vld [vmem:[%s604_s7] ss:$0 sm:$0xff] }
  0xe3   :  { %v273_v0 = vmul.f32 %v269_v56, %v269_v56  ;;  %v274_v1 = vmul.f32 %v270_v57, %v270_v57  ;;  %v275_v2 = vmul.f32 %v271_v58, %v271_v58  ;;  %v276_v6 = vmul.f32 %v272_v59, %v272_v59 }
  0xe4   :  { %v341_v3 = vmul.f32 %v337_v60, %v337_v60  ;;  %v342_v4 = vmul.f32 %v338_v61, %v338_v61  ;;  %v343_v5 = vmul.f32 %v339_v62, %v339_v62  ;;  %v344_v10 = vmul.f32 %v340_v63, %v340_v63 }
  0xe5   :  { %v277_v7 = vsel %vm253_vm2, %v273_v0, 0.0  ;;  %v278_v8 = vsel %vm253_vm2, %v274_v1, 0.0  ;;  %v280_v13 = vsel %vm253_vm2, %v275_v2, 0.0  ;;  %v282_v17 = vsel %vm253_vm2, %v276_v6, 0.0 }
  0xe6   :  { %v279_v9 = vadd.f32 %v278_v8, %v277_v7  ;;  %v345_v11 = vsel %vm253_vm2, %v341_v3, 0.0  ;;  %v346_v12 = vsel %vm253_vm2, %v342_v4, 0.0  ;;  %v348_v16 = vsel %vm253_vm2, %v343_v5, 0.0 }
  0xe7   :  { %v347_v14 = vadd.f32 %v346_v12, %v345_v11  ;;  %v350_v20 = vsel %vm253_vm2, %v344_v10, 0.0 }
  0xe8   :  { %v281_v15 = vadd.f32 %v280_v13, %v279_v9 }
  0xe9   :  { %v349_v18 = vadd.f32 %v348_v16, %v347_v14 }
  0xea   :  { %v283_v19 = vadd.f32 %v282_v17, %v281_v15 }
  0xeb   :  { %v351_v21 = vadd.f32 %v350_v20, %v349_v18 }
  0xec   :  { %v284_v22 = vrot.slane %v283_v19, 4 }
  0xed   :  { %v352_v23 = vrot.slane %v351_v21, 4 }
  0xee   :  { %v285_v24 = vadd.f32 %v284_v22, %v283_v19 }
  0xef   :  { %v353_v25 = vadd.f32 %v352_v23, %v351_v21 }
  0xf0   :  { %v286_v26 = vrot.slane %v285_v24, 2 }
  0xf1   :  { %v354_v27 = vrot.slane %v353_v25, 2 }
  0xf2   :  { %v287_v28 = vadd.f32 %v286_v26, %v285_v24 }
  0xf3   :  { %v355_v29 = vadd.f32 %v354_v27, %v353_v25 }
  0xf4   :  { %v288_v30 = vrot.slane %v287_v28, 1 }
  0xf5   :  { %v356_v31 = vrot.slane %v355_v29, 1 }
  0xf6   :  { %v289_v32 = vadd.f32 %v288_v30, %v287_v28 }
  0xf7   :  { %v357_v33 = vadd.f32 %v356_v31, %v355_v29 }
  0xf8   :  { %v290_v34 = vmul.f32 0.03125, %v289_v32 }
  0xf9   :  { %v358_v35 = vmul.f32 0.03125, %v357_v33 }
  0xfa   :  { %v291_v36 = vadd.f32 1e-05, %v290_v34 }
  0xfb   :  { %v359_v37 = vadd.f32 1e-05, %v358_v35 }
  0xfc   :  { %444 = vrsqrt.f32 %v291_v36 }
  0xfd   :  { %446 = vrsqrt.f32 %v359_v37 }
 0x109   :  { %v445_v38 = vpop.eup %444 }
 0x10a   :  { %v447_v40 = vpop.eup %446  ;;  %v293_v41 = vmul.f32 %v445_v38, %v269_v56  ;;  %v294_v42 = vmul.f32 %v445_v38, %v270_v57  ;;  %v295_v43 = vmul.f32 %v445_v38, %v271_v58  ;;  %v296_v44 = vmul.f32 %v445_v38, %v272_v59 }
 0x10b   :  { %v361_v47 = vmul.f32 %v447_v40, %v337_v60  ;;  %v362_v48 = vmul.f32 %v447_v40, %v338_v61  ;;  %v363_v49 = vmul.f32 %v447_v40, %v339_v62  ;;  %v364_v50 = vmul.f32 %v447_v40, %v340_v63 }
 0x10c   :  { %v303_v51 = vmul.f32 %v404_v39, %v293_v41  ;;  %v304_v52 = vmul.f32 %v404_v39, %v294_v42  ;;  %v305_v53 = vmul.f32 %v404_v39, %v295_v43  ;;  %v306_v54 = vmul.f32 %v404_v39, %v296_v44 }
 0x10d   :  { %v371_v56 = vmul.f32 %v406_v45, %v361_v47  ;;  %v372_v57 = vmul.f32 %v406_v45, %v362_v48  ;;  %v373_v58 = vmul.f32 %v406_v45, %v363_v49  ;;  %v374_v59 = vmul.f32 %v406_v45, %v364_v50 }
 0x10e   :  { %v313_v0 = vadd.f32 %v405_v46, %v303_v51  ;;  %v314_v1 = vadd.f32 %v405_v46, %v304_v52  ;;  %v315_v2 = vadd.f32 %v405_v46, %v305_v53  ;;  %v316_v3 = vadd.f32 %v405_v46, %v306_v54 }
 0x10f   :  { %v381_v60 = vadd.f32 %v407_v55, %v371_v56  ;;  %v382_v61 = vadd.f32 %v407_v55, %v372_v57  ;;  %v383_v62 = vadd.f32 %v407_v55, %v373_v58  ;;  %v384_v63 = vadd.f32 %v407_v55, %v374_v59 }
 0x110   :  { %317 = vst.msk [vmem:[%s605_s8] sm:$0xff] %vm253_vm2, %v313_v0  ;;  %318 = vst.msk [vmem:[%s605_s8 + $0x8] sm:$0xff] %vm253_vm2, %v314_v1 }
 0x111   :  { %319 = vst.msk [vmem:[%s605_s8 + $0x10] sm:$0xff] %vm253_vm2, %v315_v2  ;;  %320 = vst.msk [vmem:[%s605_s8 + $0x18] sm:$0xff] %vm253_vm2, %v316_v3 }
 0x112   :  { %408 = vst.msk [vmem:[%s605_s8 + $0x20] sm:$0xff] %vm253_vm2, %v381_v60  ;;  %409 = vst.msk [vmem:[%s605_s8 + $0x28] sm:$0xff] %vm253_vm2, %v382_v61 }
 0x113   :  { %410 = vst.msk [vmem:[%s605_s8 + $0x30] sm:$0xff] %vm253_vm2, %v383_v62  ;;  %411 = vst.msk [vmem:[%s605_s8 + $0x38] sm:$0xff] %vm253_vm2, %v384_v63 }

// kernel: _lambda_.104
= control target key start
LH: loop header
LB: loop body
LE: loop exit
PB: predicated region body
PF: predicated region fallthrough
CT: control target
= control target key end

     0   :  { %vm86_vm0 = vcmask 1042432   ;;  %vm37_vm1 = vcmask 220160   ;;  %vm237_vm2 = vcmask 97280   ;;  %s782_s1 = inlined_call_operand.vmem [shape: f32[27,12], index: 1, kind: input, shape index: {}]   ;;  %s783_s0 = inlined_call_operand.vmem [shape: f32[128,27], index: 0, kind: input, shape index: {}]   ;;  %s784_s2 = inlined_call_operand.vmem [shape: f32[1,12], index: 2, kind: input, shape index: {}]   ;;  %s785_s3 = inlined_call_operand.vmem [shape: f32[1,12], index: 3, kind: input, shape index: {}]   ;;  %s786_s4 = inlined_call_operand.vmem [shape: f32[128,12], index: 4, kind: output, shape index: {}]  }
   0x1   :  { %v36_v0 = vld [vmem:[%s782_s1 + $0x18] sm:$0x7]  ;;  %v35_v1 = vld [vmem:[%s782_s1 + $0x10] sm:$0xff]  ;;  %v17_v2 = vld [vmem:[%s783_s0] sm:$0xff] }
   0x2   :  { %468 = vmatprep.subr.msk.mxu0 %vm86_vm0, %v36_v0  ;;  %500 = vmatprep.subr.msk.mxu1 %vm86_vm0, %v36_v0  ;;  %v34_v3 = vld [vmem:[%s782_s1 + $0x8] sm:$0xff]  ;;  %v33_v4 = vld [vmem:[%s782_s1] sm:$0xff]  ;;  %v19_v6 = vld [vmem:[%s783_s0 + $0x10] sm:$0xff] }
   0x3   :  { %469 = vmatpush3.msk.msra.mxu0 %vm86_vm0, %v36_v0  ;;  %476 = vmatprep.mubr.msk.f32.mxu0 %vm37_vm1, %v17_v2  ;;  %v18_v5 = vld [vmem:[%s783_s0 + $0x8] sm:$0xff]  ;;  %v25_v7 = vld [vmem:[%s783_s0 + $0x40] sm:$0xff]  ;;  %v27_v9 = vld [vmem:[%s783_s0 + $0x50] sm:$0xff] }
   0x4   :  { %470 = vmatprep.subr.mxu0 %v35_v1  ;;  %504 = vmatpush3.msk.msra.mxu1 %vm86_vm0, %v36_v0  ;;  %v26_v8 = vld [vmem:[%s783_s0 + $0x48] sm:$0xff]  ;;  %v20_v10 = vld [vmem:[%s783_s0 + $0x18] sm:$0xff]  ;;  %v21_v11 = vld [vmem:[%s783_s0 + $0x20] sm:$0xff] }
   0x5   :  { %471 = vmatpush3.msra.mxu0 %v35_v1  ;;  %501 = vmatprep.subr.mxu1 %v35_v1  ;;  %v28_v12 = vld [vmem:[%s783_s0 + $0x58] sm:$0xff]  ;;  %v29_v13 = vld [vmem:[%s783_s0 + $0x60] sm:$0xff]  ;;  %v22_v14 = vld [vmem:[%s783_s0 + $0x28] sm:$0xff] }
   0x6   :  { %472 = vmatprep.subr.mxu0 %v34_v3  ;;  %505 = vmatpush3.msra.mxu1 %v35_v1  ;;  %v23_v15 = vld [vmem:[%s783_s0 + $0x30] sm:$0xff]  ;;  %v30_v16 = vld [vmem:[%s783_s0 + $0x68] sm:$0xff]  ;;  %v24_v18 = vld [vmem:[%s783_s0 + $0x38] sm:$0xff] }
   0x7   :  { %473 = vmatpush3.msra.mxu0 %v34_v3  ;;  %502 = vmatprep.subr.mxu1 %v34_v3  ;;  %v31_v17 = vld [vmem:[%s783_s0 + $0x70] sm:$0xff]  ;;  %v32_v19 = vld [vmem:[%s783_s0 + $0x78] sm:$0xff] }
   0x8   :  { %474 = vmatprep.subr.mxu0 %v33_v4  ;;  %506 = vmatpush3.msra.mxu1 %v34_v3 }
   0x9   :  { %475 = vmatpush3.msra.mxu0 %v33_v4  ;;  %503 = vmatprep.subr.mxu1 %v33_v4 }
   0xa   :  { %477 = vmatmul.mubr.msk.f32.vlgmr.msra.gmra.mxu0 %vm37_vm1, %v18_v5  ;;  %507 = vmatpush3.msra.mxu1 %v33_v4 }
   0xb   :  { %479 = vmatprep.mubr.msk.f32.mxu0 %vm37_vm1, %v19_v6  ;;  %488 = vmatprep.mubr.msk.f32.mxu1 %vm37_vm1, %v25_v7 }
   0xc   :  { %489 = vmatmul.mubr.msk.f32.vlgmr.msra.gmra.mxu1 %vm37_vm1, %v26_v8 }
   0xd   :  { %491 = vmatprep.mubr.msk.f32.mxu1 %vm37_vm1, %v27_v9 }
   0xe   :  { %480 = vmatmul.mubr.msk.f32.gmra.mxu0 %vm37_vm1, %v20_v10 }
   0xf   :  { %482 = vmatprep.mubr.msk.f32.mxu0 %vm37_vm1, %v21_v11 }
  0x10   :  { %492 = vmatmul.mubr.msk.f32.gmra.mxu1 %vm37_vm1, %v28_v12 }
  0x11   :  { %494 = vmatprep.mubr.msk.f32.mxu1 %vm37_vm1, %v29_v13 }
  0x12   :  { %483 = vmatmul.mubr.msk.f32.gmra.mxu0 %vm37_vm1, %v22_v14 }
  0x13   :  { %485 = vmatprep.mubr.msk.f32.mxu0 %vm37_vm1, %v23_v15 }
  0x14   :  { %495 = vmatmul.mubr.msk.f32.gmra.mxu1 %vm37_vm1, %v30_v16 }
  0x15   :  { %497 = vmatprep.mubr.msk.f32.mxu1 %vm37_vm1, %v31_v17 }
  0x16   :  { %486 = vmatmul.mubr.msk.f32.gmra.mxu0 %vm37_vm1, %v24_v18 }
  0x18   :  { %498 = vmatmul.mubr.msk.f32.gmra.mxu1 %vm37_vm1, %v32_v19 }
  0xca   :  { %v478_v20 = vpop.f32.mrf.mxu0 }
  0xcb   :  { %v239_v26 = vsel %vm237_vm2, %v478_v20, 0.0 }
  0xcc   :  { %v156_v21 = vpop.f32.mrf.mxu0  ;;  %v611_v22 = vpop.f32.mrf.mxu1 }
  0xcd   :  { %v238_v23 = vsel %vm237_vm2, %v156_v21, 0.0  ;;  %v255_v51 = vsel %vm237_vm2, %v611_v22, 0.0 }
  0xce   :  { %v481_v24 = vpop.f32.mrf.mxu0  ;;  %v614_v25 = vpop.f32.mrf.mxu1  ;;  %v240_v27 = vadd.f32 %v239_v26, %v238_v23 }
  0xcf   :  { %v243_v33 = vsel %vm237_vm2, %v481_v24, 0.0  ;;  %v253_v48 = vsel %vm237_vm2, %v614_v25, 0.0 }
  0xd0   :  { %v166_v28 = vpop.f32.mrf.mxu0  ;;  %v618_v32 = vpop.f32.mrf.mxu1 }
  0xd1   :  { %v241_v29 = vsel %vm237_vm2, %v166_v28, 0.0  ;;  %v259_v56 = vsel %vm237_vm2, %v618_v32, 0.0 }
  0xd2   :  { %v242_v30 = vadd.f32 %v241_v29, %v240_v27  ;;  %v484_v31 = vpop.f32.mrf.mxu0  ;;  %v622_v39 = vpop.f32.mrf.mxu1 }
  0xd3   :  { %v247_v40 = vsel %vm237_vm2, %v484_v31, 0.0  ;;  %v257_v53 = vsel %vm237_vm2, %v622_v39, 0.0 }
  0xd4   :  { %v176_v34 = vpop.f32.mrf.mxu0  ;;  %v244_v35 = vadd.f32 %v243_v33, %v242_v30  ;;  %v626_v45 = vpop.f32.mrf.mxu1 }
  0xd5   :  { %v245_v36 = vsel %vm237_vm2, %v176_v34, 0.0  ;;  %v263_v61 = vsel %vm237_vm2, %v626_v45, 0.0 }
  0xd6   :  { %v246_v37 = vadd.f32 %v245_v36, %v244_v35  ;;  %v487_v38 = vpop.f32.mrf.mxu0  ;;  %v216_v50 = vpop.f32.mrf.mxu1 }
  0xd7   :  { %v251_v46 = vsel %vm237_vm2, %v487_v38, 0.0  ;;  %v261_v58 = vsel %vm237_vm2, %v216_v50, 0.0 }
  0xd8   :  { %v186_v41 = vpop.f32.mrf.mxu0  ;;  %v248_v42 = vadd.f32 %v247_v40, %v246_v37  ;;  %v635_v55 = vpop.f32.mrf.mxu1 }
  0xd9   :  { %v249_v43 = vsel %vm237_vm2, %v186_v41, 0.0  ;;  %v267_v1 = vsel %vm237_vm2, %v635_v55, 0.0 }
  0xda   :  { %v250_v44 = vadd.f32 %v249_v43, %v248_v42  ;;  %v226_v60 = vpop.f32.mrf.mxu1 }
  0xdb   :  { %v265_v63 = vsel %vm237_vm2, %v226_v60, 0.0 }
  0xdc   :  { %v252_v47 = vadd.f32 %v251_v46, %v250_v44 }
  0xde   :  { %v254_v49 = vadd.f32 %v253_v48, %v252_v47 }
  0xe0   :  { %v256_v52 = vadd.f32 %v255_v51, %v254_v49 }
  0xe2   :  { %v258_v54 = vadd.f32 %v257_v53, %v256_v52 }
  0xe4   :  { %v260_v57 = vadd.f32 %v259_v56, %v258_v54 }
  0xe6   :  { %v262_v59 = vadd.f32 %v261_v58, %v260_v57 }
  0xe8   :  { %v264_v62 = vadd.f32 %v263_v61, %v262_v59 }
  0xea   :  { %v266_v0 = vadd.f32 %v265_v63, %v264_v62 }
  0xec   :  { %v268_v2 = vadd.f32 %v267_v1, %v266_v0 }
  0xee   :  { %v269_v3 = vrot.slane %v268_v2, 4 }
  0xf0   :  { %v270_v4 = vadd.f32 %v269_v3, %v268_v2 }
  0xf2   :  { %v271_v5 = vrot.slane %v270_v4, 2 }
  0xf4   :  { %v272_v6 = vadd.f32 %v271_v5, %v270_v4 }
  0xf6   :  { %v273_v7 = vrot.slane %v272_v6, 1 }
  0xf8   :  { %v274_v8 = vadd.f32 %v273_v7, %v272_v6 }
  0xfa   :  { %v276_v9 = vmul.f32 0.0078125, %v274_v8 }
  0xfc   :  { %v645_v10 = vsub.f32 %v156_v21, %v276_v9  ;;  %v647_v11 = vsub.f32 %v478_v20, %v276_v9  ;;  %v649_v12 = vsub.f32 %v166_v28, %v276_v9  ;;  %v651_v13 = vsub.f32 %v481_v24, %v276_v9 }
  0xfd   :  { %v657_v16 = vsub.f32 %v176_v34, %v276_v9  ;;  %v661_v18 = vsub.f32 %v484_v31, %v276_v9  ;;  %v667_v24 = vsub.f32 %v186_v41, %v276_v9  ;;  %v672_v29 = vsub.f32 %v487_v38, %v276_v9 }
  0xfe   :  { %v293_v14 = vmul.f32 %v645_v10, %v645_v10  ;;  %v294_v15 = vmul.f32 %v647_v11, %v647_v11  ;;  %v295_v17 = vmul.f32 %v649_v12, %v649_v12  ;;  %v296_v19 = vmul.f32 %v651_v13, %v651_v13 }
  0xff   :  { %v297_v26 = vmul.f32 %v657_v16, %v657_v16  ;;  %v298_v30 = vmul.f32 %v661_v18, %v661_v18  ;;  %v678_v34 = vsub.f32 %v614_v25, %v276_v9  ;;  %v299_v35 = vmul.f32 %v667_v24, %v667_v24 }
 0x100   :  { %v309_v20 = vsel %vm237_vm2, %v293_v14, 0.0  ;;  %v310_v21 = vsel %vm237_vm2, %v294_v15, 0.0  ;;  %v312_v27 = vsel %vm237_vm2, %v295_v17, 0.0  ;;  %v314_v31 = vsel %vm237_vm2, %v296_v19, 0.0 }
 0x101   :  { %v311_v23 = vadd.f32 %v310_v21, %v309_v20  ;;  %v316_v36 = vsel %vm237_vm2, %v297_v26, 0.0  ;;  %v286_v40 = vsub.f32 %v611_v22, %v276_v9  ;;  %v300_v38 = vmul.f32 %v672_v29, %v672_v29 }
 0x102   :  { %v318_v41 = vsel %vm237_vm2, %v298_v30, 0.0  ;;  %v287_v43 = vsub.f32 %v622_v39, %v276_v9  ;;  %v301_v25 = vmul.f32 %v678_v34, %v678_v34  ;;  %v320_v44 = vsel %vm237_vm2, %v299_v35, 0.0 }
 0x103   :  { %v313_v28 = vadd.f32 %v312_v27, %v311_v23  ;;  %v288_v47 = vsub.f32 %v618_v32, %v276_v9  ;;  %v302_v48 = vmul.f32 %v286_v40, %v286_v40  ;;  %v322_v49 = vsel %vm237_vm2, %v300_v38, 0.0 }
 0x104   :  { %v289_v51 = vsub.f32 %v216_v50, %v276_v9  ;;  %v303_v52 = vmul.f32 %v287_v43, %v287_v43  ;;  %v324_v53 = vsel %vm237_vm2, %v301_v25, 0.0  ;;  %v290_v56 = vsub.f32 %v626_v45, %v276_v9 }
 0x105   :  { %v315_v33 = vadd.f32 %v314_v31, %v313_v28  ;;  %v304_v39 = vmul.f32 %v288_v47, %v288_v47  ;;  %v326_v57 = vsel %vm237_vm2, %v302_v48, 0.0  ;;  %v291_v59 = vsub.f32 %v226_v60, %v276_v9 }
 0x106   :  { %v305_v61 = vmul.f32 %v289_v51, %v289_v51  ;;  %v328_v62 = vsel %vm237_vm2, %v303_v52, 0.0  ;;  %v292_v63 = vsub.f32 %v635_v55, %v276_v9  ;;  %v306_v0 = vmul.f32 %v290_v56, %v290_v56 }
 0x107   :  { %v317_v37 = vadd.f32 %v316_v36, %v315_v33  ;;  %v330_v50 = vsel %vm237_vm2, %v304_v39, 0.0  ;;  %v307_v2 = vmul.f32 %v291_v59, %v291_v59  ;;  %v446_v33 = vld [vmem:[%s784_s2] ss:$0 sm:$0xff] }
 0x108   :  { %v332_v3 = vsel %vm237_vm2, %v305_v61, 0.0  ;;  %v308_v45 = vmul.f32 %v292_v63, %v292_v63  ;;  %v334_v5 = vsel %vm237_vm2, %v306_v0, 0.0 }
 0x109   :  { %v319_v42 = vadd.f32 %v318_v41, %v317_v37  ;;  %v336_v60 = vsel %vm237_vm2, %v307_v2, 0.0 }
 0x10a   :  { %v338_v8 = vsel %vm237_vm2, %v308_v45, 0.0 }
 0x10b   :  { %v321_v46 = vadd.f32 %v320_v44, %v319_v42 }
 0x10d   :  { %v323_v22 = vadd.f32 %v322_v49, %v321_v46 }
 0x10f   :  { %v325_v54 = vadd.f32 %v324_v53, %v323_v22 }
 0x111   :  { %v327_v58 = vadd.f32 %v326_v57, %v325_v54 }
 0x113   :  { %v329_v32 = vadd.f32 %v328_v62, %v327_v58 }
 0x115   :  { %v331_v1 = vadd.f32 %v330_v50, %v329_v32 }
 0x117   :  { %v333_v4 = vadd.f32 %v332_v3, %v331_v1 }
 0x119   :  { %v335_v6 = vadd.f32 %v334_v5, %v333_v4 }
 0x11b   :  { %v337_v7 = vadd.f32 %v336_v60, %v335_v6 }
 0x11d   :  { %v339_v14 = vadd.f32 %v338_v8, %v337_v7 }
 0x11f   :  { %v340_v15 = vrot.slane %v339_v14, 4 }
 0x121   :  { %v341_v55 = vadd.f32 %v340_v15, %v339_v14 }
 0x123   :  { %v342_v9 = vrot.slane %v341_v55, 2 }
 0x125   :  { %v343_v17 = vadd.f32 %v342_v9, %v341_v55 }
 0x127   :  { %v344_v19 = vrot.slane %v343_v17, 1 }
 0x129   :  { %v345_v20 = vadd.f32 %v344_v19, %v343_v17 }
 0x12b   :  { %v346_v21 = vmul.f32 0.0078125, %v345_v20 }
 0x12d   :  { %v347_v23 = vadd.f32 1e-05, %v346_v21 }
 0x12f   :  { %508 = vrsqrt.f32 %v347_v23 }
 0x13c   :  { %v509_v26 = vpop.eup %508 }
 0x13d   :  { %v349_v27 = vmul.f32 %v509_v26, %v645_v10  ;;  %v350_v28 = vmul.f32 %v509_v26, %v647_v11  ;;  %v351_v30 = vmul.f32 %v509_v26, %v649_v12  ;;  %v352_v31 = vmul.f32 %v509_v26, %v651_v13 }
 0x13e   :  { %v353_v35 = vmul.f32 %v509_v26, %v657_v16  ;;  %v354_v36 = vmul.f32 %v509_v26, %v661_v18  ;;  %v355_v37 = vmul.f32 %v509_v26, %v667_v24  ;;  %v356_v38 = vmul.f32 %v509_v26, %v672_v29  ;;  %v447_v16 = vld [vmem:[%s785_s3] ss:$0 sm:$0xff] }
 0x13f   :  { %v357_v10 = vmul.f32 %v509_v26, %v678_v34  ;;  %v358_v41 = vmul.f32 %v509_v26, %v286_v40  ;;  %v359_v11 = vmul.f32 %v509_v26, %v287_v43  ;;  %v360_v42 = vmul.f32 %v509_v26, %v288_v47 }
 0x140   :  { %v361_v12 = vmul.f32 %v509_v26, %v289_v51  ;;  %v362_v25 = vmul.f32 %v509_v26, %v290_v56  ;;  %v363_v13 = vmul.f32 %v509_v26, %v291_v59  ;;  %v364_v44 = vmul.f32 %v509_v26, %v292_v63 }
 0x141   :  { %v371_v46 = vmul.f32 %v446_v33, %v349_v27  ;;  %v372_v48 = vmul.f32 %v446_v33, %v350_v28  ;;  %v373_v49 = vmul.f32 %v446_v33, %v351_v30  ;;  %v374_v22 = vmul.f32 %v446_v33, %v352_v31 }
 0x142   :  { %v375_v18 = vmul.f32 %v446_v33, %v353_v35  ;;  %v376_v24 = vmul.f32 %v446_v33, %v354_v36  ;;  %v377_v29 = vmul.f32 %v446_v33, %v355_v37  ;;  %v378_v52 = vmul.f32 %v446_v33, %v356_v38 }
 0x143   :  { %v379_v34 = vmul.f32 %v446_v33, %v357_v10  ;;  %v380_v40 = vmul.f32 %v446_v33, %v358_v41  ;;  %v381_v43 = vmul.f32 %v446_v33, %v359_v11  ;;  %v382_v47 = vmul.f32 %v446_v33, %v360_v42 }
 0x144   :  { %v383_v51 = vmul.f32 %v446_v33, %v361_v12  ;;  %v384_v53 = vmul.f32 %v446_v33, %v362_v25  ;;  %v385_v54 = vmul.f32 %v446_v33, %v363_v13  ;;  %v386_v56 = vmul.f32 %v446_v33, %v364_v44 }
 0x145   :  { %v393_v39 = vadd.f32 %v447_v16, %v371_v46  ;;  %v394_v57 = vadd.f32 %v447_v16, %v372_v48  ;;  %v395_v58 = vadd.f32 %v447_v16, %v373_v49  ;;  %v396_v59 = vadd.f32 %v447_v16, %v374_v22 }
 0x146   :  { %v397_v61 = vadd.f32 %v447_v16, %v375_v18  ;;  %v398_v62 = vadd.f32 %v447_v16, %v376_v24  ;;  %v399_v32 = vadd.f32 %v447_v16, %v377_v29  ;;  %v400_v63 = vadd.f32 %v447_v16, %v378_v52 }
 0x147   :  { %v401_v0 = vadd.f32 %v447_v16, %v379_v34  ;;  %v402_v50 = vadd.f32 %v447_v16, %v380_v40  ;;  %v403_v1 = vadd.f32 %v447_v16, %v381_v43  ;;  %v404_v2 = vadd.f32 %v447_v16, %v382_v47  ;;  %409 = vst.msk [vmem:[%s786_s4] sm:$0xff] %vm237_vm2, %v393_v39 }
 0x148   :  { %410 = vst.msk [vmem:[%s786_s4 + $0x8] sm:$0xff] %vm237_vm2, %v394_v57  ;;  %411 = vst.msk [vmem:[%s786_s4 + $0x10] sm:$0xff] %vm237_vm2, %v395_v58  ;;  %v405_v3 = vadd.f32 %v447_v16, %v383_v51  ;;  %v406_v4 = vadd.f32 %v447_v16, %v384_v53  ;;  %v407_v45 = vadd.f32 %v447_v16, %v385_v54 }
 0x149   :  { %412 = vst.msk [vmem:[%s786_s4 + $0x18] sm:$0xff] %vm237_vm2, %v396_v59  ;;  %v408_v5 = vadd.f32 %v447_v16, %v386_v56  ;;  %413 = vst.msk [vmem:[%s786_s4 + $0x20] sm:$0xff] %vm237_vm2, %v397_v61 }
 0x14a   :  { %414 = vst.msk [vmem:[%s786_s4 + $0x28] sm:$0xff] %vm237_vm2, %v398_v62  ;;  %415 = vst.msk [vmem:[%s786_s4 + $0x30] sm:$0xff] %vm237_vm2, %v399_v32 }
 0x14b   :  { %416 = vst.msk [vmem:[%s786_s4 + $0x38] sm:$0xff] %vm237_vm2, %v400_v63  ;;  %417 = vst.msk [vmem:[%s786_s4 + $0x40] sm:$0xff] %vm237_vm2, %v401_v0 }
 0x14c   :  { %418 = vst.msk [vmem:[%s786_s4 + $0x48] sm:$0xff] %vm237_vm2, %v402_v50  ;;  %419 = vst.msk [vmem:[%s786_s4 + $0x50] sm:$0xff] %vm237_vm2, %v403_v1 }
 0x14d   :  { %420 = vst.msk [vmem:[%s786_s4 + $0x58] sm:$0xff] %vm237_vm2, %v404_v2  ;;  %421 = vst.msk [vmem:[%s786_s4 + $0x60] sm:$0xff] %vm237_vm2, %v405_v3 }
 0x14e   :  { %422 = vst.msk [vmem:[%s786_s4 + $0x68] sm:$0xff] %vm237_vm2, %v406_v4  ;;  %423 = vst.msk [vmem:[%s786_s4 + $0x70] sm:$0xff] %vm237_vm2, %v407_v45 }
 0x14f   :  { %424 = vst.msk [vmem:[%s786_s4 + $0x78] sm:$0xff] %vm237_vm2, %v408_v5 }

// kernel: _lambda_.174
= control target key start
LH: loop header
LB: loop body
LE: loop exit
PB: predicated region body
PF: predicated region fallthrough
CT: control target
= control target key end

     0   :  { %v300_v0 = vmov 0.0   ;;  %vm35_vm0 = vcmask 130048   ;;  %vm301_vm1 = vmmov 0   ;;  %vm186_vm2 = vcmask 64512   ;;  %s389_s2 = inlined_call_operand.vmem [shape: f32[16,8], index: 2, kind: input, shape index: {}]   ;;  %s390_s3 = inlined_call_operand.vmem [shape: f32[16,8], index: 3, kind: input, shape index: {}]   ;;  %s391_s0 = inlined_call_operand.vmem [shape: f32[8,16], index: 0, kind: input, shape index: {}]   ;;  %s392_s1 = inlined_call_operand.vmem [shape: f32[8,16], index: 1, kind: input, shape index: {}]   ;;  %s393_s4 = inlined_call_operand.vmem [shape: f32[1,8], index: 4, kind: input, shape index: {}]   ;;  %s394_s6 = inlined_call_operand.vmem [shape: f32[1,8], index: 6, kind: input, shape index: {}]   ;;  %s395_s5 = inlined_call_operand.vmem [shape: f32[1,8], index: 5, kind: input, shape index: {}]   ;;  %s396_s7 = inlined_call_operand.vmem [shape: f32[1,8], index: 7, kind: input, shape index: {}]   ;;  %s397_s8 = inlined_call_operand.vmem [shape: f32[2,8,8], index: 8, kind: output, shape index: {}]  }
   0x1   :  { %280 = vmatprep.subr.mxu0 %v300_v0  ;;  %287 = vmatprep.subr.mxu1 %v300_v0  ;;  %v34_v1 = vld [vmem:[%s389_s2 + $0x8] sm:$0xff]  ;;  %v33_v3 = vld [vmem:[%s389_s2] sm:$0xff] }
   0x2   :  { %v110_v2 = vld [vmem:[%s390_s3 + $0x8] sm:$0xff]  ;;  %281 = vmatpush3.msra.mxu0 %v34_v1  ;;  %v109_v4 = vld [vmem:[%s390_s3] sm:$0xff]  ;;  %284 = vmatprep.mubr.msk.f32.mxu0 %vm301_vm1, %v300_v0 }
   0x3   :  { %288 = vmatpush3.msra.mxu1 %v110_v2  ;;  %v29_v5 = vld [vmem:[%s391_s0] sm:$0xff]  ;;  %282 = vmatprep.subr.mxu0 %v300_v0 }
   0x4   :  { %v31_v6 = vld [vmem:[%s392_s1] sm:$0xff]  ;;  %289 = vmatprep.subr.mxu1 %v300_v0  ;;  %v30_v7 = vmax.f32 %v29_v5, 0.0  ;;  %283 = vmatpush3.msra.mxu0 %v33_v3 }
   0x5   :  { %v32_v8 = vmax.f32 %v31_v6, 0.0  ;;  %290 = vmatpush3.msra.mxu1 %v109_v4  ;;  %291 = vmatprep.mubr.msk.f32.mxu1 %vm301_vm1, %v300_v0  ;;  %v269_v52 = vld [vmem:[%s393_s4] ss:$0 sm:$0xff] }
   0x6   :  { %285 = vmatmul.mubr.msk.f32.vlgmr.msra.gmra.mxu0 %vm35_vm0, %v30_v7  ;;  %v271_v55 = vld [vmem:[%s394_s6] ss:$0 sm:$0xff] }
   0x7   :  { %292 = vmatmul.mubr.msk.f32.vlgmr.msra.gmra.mxu1 %vm35_vm0, %v32_v8  ;;  %v270_v56 = vld [vmem:[%s395_s5] ss:$0 sm:$0xff] }
   0x8   :  { %v272_v59 = vld [vmem:[%s396_s7] ss:$0 sm:$0xff] }
  0xc6   :  { %v105_v9 = vpop.f32.mrf.mxu0 }
  0xc7   :  { %v180_v10 = vpop.f32.mrf.mxu1  ;;  %v187_v11 = vsel %vm186_vm2, %v105_v9, 0.0 }
  0xc8   :  { %v226_v12 = vsel %vm186_vm2, %v180_v10, 0.0  ;;  %v188_v13 = vrot.slane %v187_v11, 4  ;;  %v286_v15 = vpop.f32.mrf.mxu0 }
  0xc9   :  { %v227_v14 = vrot.slane %v226_v12, 4  ;;  %v293_v16 = vpop.f32.mrf.mxu1 }
  0xca   :  { %v189_v17 = vadd.f32 %v188_v13, %v187_v11 }
  0xcb   :  { %v228_v18 = vadd.f32 %v227_v14, %v226_v12 }
  0xcc   :  { %v190_v19 = vrot.slane %v189_v17, 2 }
  0xcd   :  { %v229_v20 = vrot.slane %v228_v18, 2 }
  0xce   :  { %v191_v21 = vadd.f32 %v190_v19, %v189_v17 }
  0xcf   :  { %v230_v22 = vadd.f32 %v229_v20, %v228_v18 }
  0xd0   :  { %v192_v23 = vrot.slane %v191_v21, 1 }
  0xd1   :  { %v231_v24 = vrot.slane %v230_v22, 1 }
  0xd2   :  { %v193_v25 = vadd.f32 %v192_v23, %v191_v21 }
  0xd3   :  { %v232_v26 = vadd.f32 %v231_v24, %v230_v22 }
  0xd4   :  { %v195_v27 = vmul.f32 0.125, %v193_v25 }
  0xd5   :  { %v233_v28 = vmul.f32 0.125, %v232_v26 }
  0xd6   :  { %v196_v29 = vsub.f32 %v105_v9, %v195_v27 }
  0xd7   :  { %v234_v30 = vsub.f32 %v180_v10, %v233_v28 }
  0xd8   :  { %v197_v31 = vmul.f32 %v196_v29, %v196_v29 }
  0xd9   :  { %v235_v32 = vmul.f32 %v234_v30, %v234_v30 }
  0xda   :  { %v198_v33 = vsel %vm186_vm2, %v197_v31, 0.0 }
  0xdb   :  { %v236_v34 = vsel %vm186_vm2, %v235_v32, 0.0  ;;  %v199_v35 = vrot.slane %v198_v33, 4 }
  0xdc   :  { %v237_v36 = vrot.slane %v236_v34, 4 }
  0xdd   :  { %v200_v37 = vadd.f32 %v199_v35, %v198_v33 }
  0xde   :  { %v238_v38 = vadd.f32 %v237_v36, %v236_v34 }
  0xdf   :  { %v201_v39 = vrot.slane %v200_v37, 2 }
  0xe0   :  { %v239_v40 = vrot.slane %v238_v38, 2 }
  0xe1   :  { %v202_v41 = vadd.f32 %v201_v39, %v200_v37 }
  0xe2   :  { %v240_v42 = vadd.f32 %v239_v40, %v238_v38 }
  0xe3   :  { %v203_v43 = vrot.slane %v202_v41, 1 }
  0xe4   :  { %v241_v44 = vrot.slane %v240_v42, 1 }
  0xe5   :  { %v204_v45 = vadd.f32 %v203_v43, %v202_v41 }
  0xe6   :  { %v242_v46 = vadd.f32 %v241_v44, %v240_v42 }
  0xe7   :  { %v205_v47 = vmul.f32 0.125, %v204_v45 }
  0xe8   :  { %v243_v48 = vmul.f32 0.125, %v242_v46 }
  0xe9   :  { %v206_v49 = vadd.f32 1e-05, %v205_v47 }
  0xea   :  { %v244_v50 = vadd.f32 1e-05, %v243_v48 }
  0xeb   :  { %296 = vrsqrt.f32 %v206_v49 }
  0xec   :  { %298 = vrsqrt.f32 %v244_v50 }
  0xf8   :  { %v297_v51 = vpop.eup %296 }
  0xf9   :  { %v299_v53 = vpop.eup %298  ;;  %v208_v54 = vmul.f32 %v297_v51, %v196_v29 }
  0xfa   :  { %v246_v57 = vmul.f32 %v299_v53, %v234_v30 }
  0xfb   :  { %v215_v58 = vmul.f32 %v269_v52, %v208_v54 }
  0xfc   :  { %v253_v60 = vmul.f32 %v271_v55, %v246_v57 }
  0xfd   :  { %v222_v61 = vadd.f32 %v270_v56, %v215_v58 }
  0xfe   :  { %v260_v62 = vadd.f32 %v272_v59, %v253_v60 }
  0xff   :  { %223 = vst.msk [vmem:[%s397_s8] sm:$0xff] %vm186_vm2, %v222_v61 }
 0x100   :  { %273 = vst.msk [vmem:[%s397_s8 + $0x8] sm:$0xff] %vm186_vm2, %v260_v62 }

// kernel: _lambda_.175
= control target key start
LH: loop header
LB: loop body
LE: loop exit
PB: predicated region body
PF: predicated region fallthrough
CT: control target
= control target key end

     0   :  { %v284_v0 = vmov 0.0   ;;  %vm285_vm0 = vmmov 0   ;;  %vm54_vm1 = vcmask 130048   ;;  %vm56_vm2 = vcmask 122880   ;;  %s408_s2 = inlined_call_operand.vmem [shape: f32[16,16], index: 2, kind: input, shape index: {}]   ;;  %s409_s0 = inlined_call_operand.vmem [shape: f32[8,9,16], index: 0, kind: input, shape index: {}]   ;;  %s410_s1 = inlined_call_operand.vmem [shape: f32[9,16], index: 1, kind: input, shape index: {}]   ;;  %s411_s3 = inlined_call_operand.vmem [shape: f32[1,16], index: 3, kind: input, shape index: {}]   ;;  %s412_s4 = inlined_call_operand.vmem [shape: f32[1,16], index: 4, kind: input, shape index: {}]   ;;  %s413_s5 = inlined_call_operand.vmem [shape: f32[8,16], index: 5, kind: output, shape index: {}]  }
   0x1   :  { %273 = vmatprep.subr.mxu0 %v284_v0  ;;  %v129_v1 = vld [vmem:[%s408_s2 + $0x8] sm:$0xff]  ;;  %v128_v2 = vld [vmem:[%s408_s2] sm:$0xff]  ;;  %277 = vmatprep.mubr.msk.f32.mxu0 %vm285_vm0, %v284_v0  ;;  %v22_v5 = vld [vmem:[%s409_s0 + $0x10] sm:$0xff]  ;;  %vm138_vm3 = vcmask 1041409   ;;  %vm140_vm4 = vcmask 1042434   ;;  %vm142_vm5 = vcmask 1043459  }
   0x2   :  { %274 = vmatpush3.msra.mxu0 %v129_v1  ;;  %v20_v3 = vld [vmem:[%s409_s0] sm:$0xff]  ;;  %v21_v4 = vld [vmem:[%s409_s0 + $0x8] sm:$0x1]  ;;  %v23_v6 = vld [vmem:[%s409_s0 + $0x18] sm:$0x1]  ;;  %vm144_vm6 = vcmask 1044484  }
   0x3   :  { %275 = vmatprep.subr.mxu0 %v284_v0  ;;  %v24_v7 = vld [vmem:[%s409_s0 + $0x20] sm:$0xff]  ;;  %v25_v8 = vld [vmem:[%s409_s0 + $0x28] sm:$0x1]  ;;  %v26_v9 = vld [vmem:[%s409_s0 + $0x30] sm:$0xff]  ;;  %vm146_vm7 = vcmask 1045509   ;;  %vm148_vm8 = vcmask 1046534  }
   0x4   :  { %276 = vmatpush3.msra.mxu0 %v128_v2  ;;  %v27_v10 = vld [vmem:[%s409_s0 + $0x38] sm:$0x1]  ;;  %v28_v11 = vld [vmem:[%s409_s0 + $0x40] sm:$0xff]  ;;  %v29_v12 = vld [vmem:[%s409_s0 + $0x48] sm:$0x1]  ;;  %vm150_vm9 = vcmask 1047559  }
   0x5   :  { %v30_v13 = vld [vmem:[%s409_s0 + $0x50] sm:$0xff]  ;;  %v31_v14 = vld [vmem:[%s409_s0 + $0x58] sm:$0x1]  ;;  %v32_v15 = vld [vmem:[%s409_s0 + $0x60] sm:$0xff] }
   0x6   :  { %v36_v16 = vld [vmem:[%s410_s1] sm:$0xff]  ;;  %v37_v17 = vld [vmem:[%s410_s1 + $0x8] sm:$0x1]  ;;  %v34_v19 = vld [vmem:[%s409_s0 + $0x70] sm:$0xff] }
   0x7   :  { %v33_v18 = vld [vmem:[%s409_s0 + $0x68] sm:$0x1]  ;;  %v35_v20 = vld [vmem:[%s409_s0 + $0x78] sm:$0x1]  ;;  %v38_v21 = vmul.f32 %v36_v16, %v20_v3  ;;  %v39_v22 = vmul.f32 %v37_v17, %v21_v4  ;;  %v40_v23 = vmul.f32 %v36_v16, %v22_v5  ;;  %v41_v24 = vmul.f32 %v37_v17, %v23_v6 }
   0x8   :  { %v42_v25 = vmul.f32 %v36_v16, %v24_v7  ;;  %v43_v26 = vmul.f32 %v37_v17, %v25_v8  ;;  %v44_v27 = vmul.f32 %v36_v16, %v26_v9  ;;  %v45_v28 = vmul.f32 %v37_v17, %v27_v10 }
   0x9   :  { %v46_v29 = vmul.f32 %v36_v16, %v28_v11  ;;  %v47_v30 = vmul.f32 %v37_v17, %v29_v12  ;;  %v48_v31 = vmul.f32 %v36_v16, %v30_v13  ;;  %v49_v32 = vmul.f32 %v37_v17, %v31_v14 }
   0xa   :  { %v50_v33 = vmul.f32 %v36_v16, %v32_v15  ;;  %v51_v34 = vmul.f32 %v37_v17, %v33_v18  ;;  %v52_v35 = vmul.f32 %v36_v16, %v34_v19  ;;  %v53_v36 = vmul.f32 %v37_v17, %v35_v20 }
   0xb   :  { %v55_v37 = vsel %vm54_vm1, %v38_v21, 0.0  ;;  %v57_v38 = vsel %vm56_vm2, %v39_v22, 0.0  ;;  %v65_v39 = vsel %vm54_vm1, %v40_v23, 0.0  ;;  %v66_v40 = vsel %vm56_vm2, %v41_v24, 0.0 }
   0xc   :  { %v58_v41 = vadd.f32 %v57_v38, %v55_v37  ;;  %v67_v42 = vadd.f32 %v66_v40, %v65_v39  ;;  %v74_v43 = vsel %vm54_vm1, %v42_v25, 0.0  ;;  %v75_v44 = vsel %vm56_vm2, %v43_v26, 0.0 }
   0xd   :  { %v76_v45 = vadd.f32 %v75_v44, %v74_v43  ;;  %v83_v46 = vsel %vm54_vm1, %v44_v27, 0.0  ;;  %v84_v47 = vsel %vm56_vm2, %v45_v28, 0.0  ;;  %v92_v48 = vsel %vm54_vm1, %v46_v29, 0.0 }
   0xe   :  { %v59_v49 = vrot.slane %v58_v41, 4  ;;  %v68_v50 = vrot.slane %v67_v42, 4  ;;  %v85_v51 = vadd.f32 %v84_v47, %v83_v46  ;;  %v93_v52 = vsel %vm56_vm2, %v47_v30, 0.0 }
   0xf   :  { %v77_v53 = vrot.slane %v76_v45, 4  ;;  %v94_v54 = vadd.f32 %v93_v52, %v92_v48  ;;  %v101_v55 = vsel %vm54_vm1, %v48_v31, 0.0  ;;  %v102_v56 = vsel %vm56_vm2, %v49_v32, 0.0 }
  0x10   :  { %v60_v57 = vadd.f32 %v59_v49, %v58_v41  ;;  %v69_v58 = vadd.f32 %v68_v50, %v67_v42  ;;  %v86_v59 = vrot.slane %v85_v51, 4  ;;  %v103_v60 = vadd.f32 %v102_v56, %v101_v55 }
  0x11   :  { %v78_v61 = vadd.f32 %v77_v53, %v76_v45  ;;  %v95_v62 = vrot.slane %v94_v54, 4  ;;  %v110_v63 = vsel %vm54_vm1, %v50_v33, 0.0  ;;  %v111_v0 = vsel %vm56_vm2, %v51_v34, 0.0 }
  0x12   :  { %v61_v1 = vrot.slane %v60_v57, 2  ;;  %v70_v2 = vrot.slane %v69_v58, 2  ;;  %v87_v3 = vadd.f32 %v86_v59, %v85_v51  ;;  %v104_v4 = vrot.slane %v103_v60, 4 }
  0x13   :  { %v79_v5 = vrot.slane %v78_v61, 2  ;;  %v96_v6 = vadd.f32 %v95_v62, %v94_v54  ;;  %v112_v7 = vadd.f32 %v111_v0, %v110_v63  ;;  %v119_v8 = vsel %vm54_vm1, %v52_v35, 0.0 }
  0x14   :  { %v62_v9 = vadd.f32 %v61_v1, %v60_v57  ;;  %v71_v10 = vadd.f32 %v70_v2, %v69_v58  ;;  %v88_v11 = vrot.slane %v87_v3, 2  ;;  %v105_v12 = vadd.f32 %v104_v4, %v103_v60 }
  0x15   :  { %v80_v13 = vadd.f32 %v79_v5, %v78_v61  ;;  %v97_v14 = vrot.slane %v96_v6, 2  ;;  %v113_v15 = vrot.slane %v112_v7, 4  ;;  %v120_v16 = vsel %vm56_vm2, %v53_v36, 0.0 }
  0x16   :  { %v63_v17 = vrot.slane %v62_v9, 1  ;;  %v72_v18 = vrot.slane %v71_v10, 1  ;;  %v89_v19 = vadd.f32 %v88_v11, %v87_v3  ;;  %v106_v20 = vrot.slane %v105_v12, 2 }
  0x17   :  { %v81_v21 = vrot.slane %v80_v13, 1  ;;  %v98_v22 = vadd.f32 %v97_v14, %v96_v6  ;;  %v114_v23 = vadd.f32 %v113_v15, %v112_v7  ;;  %v121_v24 = vadd.f32 %v120_v16, %v119_v8 }
  0x18   :  { %v64_v25 = vadd.f32 %v63_v17, %v62_v9  ;;  %v73_v26 = vadd.f32 %v72_v18, %v71_v10  ;;  %v90_v27 = vrot.slane %v89_v19, 1  ;;  %v107_v28 = vadd.f32 %v106_v20, %v105_v12  ;;  %v268_v10 = vld [vmem:[%s411_s3] ss:$0 sm:$0xff] }
  0x19   :  { %v82_v29 = vadd.f32 %v81_v21, %v80_v13  ;;  %v99_v30 = vrot.slane %v98_v22, 1  ;;  %v115_v31 = vrot.slane %v114_v23, 2  ;;  %v122_v32 = vrot.slane %v121_v24, 4  ;;  %v269_v12 = vld [vmem:[%s412_s4] ss:$0 sm:$0xff] }
  0x1a   :  { %v91_v33 = vadd.f32 %v90_v27, %v89_v19  ;;  %v108_v34 = vrot.slane %v107_v28, 1  ;;  %v139_v35 = vsel %vm138_vm3, %v73_v26, %v64_v25 }
  0x1b   :  { %v100_v36 = vadd.f32 %v99_v30, %v98_v22  ;;  %v116_v37 = vadd.f32 %v115_v31, %v114_v23  ;;  %v123_v38 = vadd.f32 %v122_v32, %v121_v24  ;;  %v141_v39 = vsel %vm140_vm4, %v82_v29, %v139_v35 }
  0x1c   :  { %v109_v40 = vadd.f32 %v108_v34, %v107_v28  ;;  %v143_v41 = vsel %vm142_vm5, %v91_v33, %v141_v39 }
  0x1d   :  { %v117_v42 = vrot.slane %v116_v37, 1  ;;  %v124_v43 = vrot.slane %v123_v38, 2  ;;  %v145_v44 = vsel %vm144_vm6, %v100_v36, %v143_v41 }
  0x1e   :  { %v147_v47 = vsel %vm146_vm7, %v109_v40, %v145_v44 }
  0x1f   :  { %v118_v45 = vadd.f32 %v117_v42, %v116_v37  ;;  %v125_v46 = vadd.f32 %v124_v43, %v123_v38 }
  0x21   :  { %v126_v48 = vrot.slane %v125_v46, 1  ;;  %v149_v49 = vsel %vm148_vm8, %v118_v45, %v147_v47 }
  0x23   :  { %v127_v50 = vadd.f32 %v126_v48, %v125_v46 }
  0x25   :  { %v151_v51 = vsel %vm150_vm9, %v127_v50, %v149_v49 }
  0x26   :  { %278 = vmatmul.mubr.msk.f32.vlgmr.msra.gmra.mxu0 %vm54_vm1, %v151_v51 }
  0xe6   :  { %v220_v52 = vpop.f32.mrf.mxu0 }
  0xe7   :  { %v226_v53 = vsel %vm54_vm1, %v220_v52, 0.0 }
  0xe8   :  { %v227_v54 = vrot.slane %v226_v53, 4  ;;  %v279_v55 = vpop.f32.mrf.mxu0 }
  0xea   :  { %v228_v56 = vadd.f32 %v227_v54, %v226_v53 }
  0xec   :  { %v229_v57 = vrot.slane %v228_v56, 2 }
  0xee   :  { %v230_v58 = vadd.f32 %v229_v57, %v228_v56 }
  0xf0   :  { %v231_v59 = vrot.slane %v230_v58, 1 }
  0xf2   :  { %v232_v60 = vadd.f32 %v231_v59, %v230_v58 }
  0xf4   :  { %v234_v61 = vmul.f32 0.125, %v232_v60 }
  0xf6   :  { %v235_v62 = vsub.f32 %v220_v52, %v234_v61 }
  0xf8   :  { %v236_v63 = vmul.f32 %v235_v62, %v235_v62 }
  0xfa   :  { %v237_v0 = vsel %vm54_vm1, %v236_v63, 0.0 }
  0xfb   :  { %v238_v1 = vrot.slane %v237_v0, 4 }
  0xfd   :  { %v239_v2 = vadd.f32 %v238_v1, %v237_v0 }
  0xff   :  { %v240_v3 = vrot.slane %v239_v2, 2 }
 0x101   :  { %v241_v4 = vadd.f32 %v240_v3, %v239_v2 }
 0x103   :  { %v242_v5 = vrot.slane %v241_v4, 1 }
 0x105   :  { %v243_v6 = vadd.f32 %v242_v5, %v241_v4 }
 0x107   :  { %v244_v7 = vmul.f32 0.125, %v243_v6 }
 0x109   :  { %v245_v8 = vadd.f32 1e-05, %v244_v7 }
 0x10b   :  { %282 = vrsqrt.f32 %v245_v8 }
 0x118   :  { %v283_v9 = vpop.eup %282 }
 0x119   :  { %v247_v11 = vmul.f32 %v283_v9, %v235_v62 }
 0x11b   :  { %v254_v13 = vmul.f32 %v268_v10, %v247_v11 }
 0x11d   :  { %v261_v14 = vadd.f32 %v269_v12, %v254_v13 }
 0x11f   :  { %262 = vst.msk [vmem:[%s413_s5] sm:$0xff] %vm54_vm1, %v261_v14 }

// kernel: _lambda_.106
= control target key start
LH: loop header
LB: loop body
LE: loop exit
PB: predicated region body
PF: predicated region fallthrough
CT: control target
= control target key end

     0   :  { %vm100_vm0 = vcmask 1043456   ;;  %vm51_vm1 = vcmask 97280   ;;  %vm251_vm2 = vcmask 64512   ;;  %s780_s1 = inlined_call_operand.vmem [shape: f32[12,8], index: 1, kind: input, shape index: {}]   ;;  %s781_s0 = inlined_call_operand.vmem [shape: f32[128,12], index: 0, kind: input, shape index: {}]   ;;  %s782_s2 = inlined_call_operand.vmem [shape: f32[1,8], index: 2, kind: input, shape index: {}]   ;;  %s783_s3 = inlined_call_operand.vmem [shape: f32[1,8], index: 3, kind: input, shape index: {}]   ;;  %s784_s4 = inlined_call_operand.vmem [shape: f32[128,8], index: 4, kind: output, shape index: {}]  }
   0x1   :  { %v50_v0 = vld [vmem:[%s780_s1 + $0x8] sm:$0xf]  ;;  %v49_v1 = vld [vmem:[%s780_s1] sm:$0xff]  ;;  %v19_v5 = vld [vmem:[%s781_s0 + $0x10] sm:$0xff] }
   0x2   :  { %v17_v2 = vld [vmem:[%s781_s0] sm:$0xff]  ;;  %480 = vmatprep.subr.msk.mxu0 %vm100_vm0, %v50_v0  ;;  %v18_v4 = vld [vmem:[%s781_s0 + $0x8] sm:$0xff]  ;;  %508 = vmatprep.subr.msk.mxu1 %vm100_vm0, %v50_v0  ;;  %v35_v7 = vmax.f32 %v19_v5, 0.0  ;;  %v20_v8 = vld [vmem:[%s781_s0 + $0x18] sm:$0xff] }
   0x3   :  { %v33_v3 = vmax.f32 %v17_v2, 0.0  ;;  %481 = vmatpush3.msk.msra.mxu0 %vm100_vm0, %v50_v0  ;;  %v34_v6 = vmax.f32 %v18_v4, 0.0  ;;  %510 = vmatpush3.msk.msra.mxu1 %vm100_vm0, %v50_v0  ;;  %v21_v9 = vld [vmem:[%s781_s0 + $0x20] sm:$0xff]  ;;  %v26_v11 = vld [vmem:[%s781_s0 + $0x48] sm:$0xff]  ;;  %v27_v14 = vld [vmem:[%s781_s0 + $0x50] sm:$0xff]  ;;  %v36_v16 = vmax.f32 %v20_v8, 0.0 }
   0x4   :  { %482 = vmatprep.subr.mxu0 %v49_v1  ;;  %v25_v10 = vld [vmem:[%s781_s0 + $0x40] sm:$0xff]  ;;  %509 = vmatprep.subr.mxu1 %v49_v1  ;;  %v42_v13 = vmax.f32 %v26_v11, 0.0  ;;  %v28_v15 = vld [vmem:[%s781_s0 + $0x58] sm:$0xff]  ;;  %v43_v17 = vmax.f32 %v27_v14, 0.0  ;;  %v37_v19 = vmax.f32 %v21_v9, 0.0  ;;  %v22_v20 = vld [vmem:[%s781_s0 + $0x28] sm:$0xff] }
   0x5   :  { %484 = vmatprep.mubr.msk.f32.mxu0 %vm51_vm1, %v33_v3  ;;  %483 = vmatpush3.msra.mxu0 %v49_v1  ;;  %v41_v12 = vmax.f32 %v25_v10, 0.0  ;;  %v29_v18 = vld [vmem:[%s781_s0 + $0x60] sm:$0xff]  ;;  %v23_v21 = vld [vmem:[%s781_s0 + $0x30] sm:$0xff]  ;;  %v44_v22 = vmax.f32 %v28_v15, 0.0  ;;  %v30_v24 = vld [vmem:[%s781_s0 + $0x68] sm:$0xff]  ;;  %v38_v25 = vmax.f32 %v22_v20, 0.0 }
   0x6   :  { %485 = vmatmul.mubr.msk.f32.vlgmr.msra.gmra.mxu0 %vm51_vm1, %v34_v6  ;;  %511 = vmatpush3.msra.mxu1 %v49_v1  ;;  %v45_v23 = vmax.f32 %v29_v18, 0.0  ;;  %v31_v26 = vld [vmem:[%s781_s0 + $0x70] sm:$0xff]  ;;  %v39_v27 = vmax.f32 %v23_v21, 0.0  ;;  %v24_v28 = vld [vmem:[%s781_s0 + $0x38] sm:$0xff]  ;;  %v46_v29 = vmax.f32 %v30_v24, 0.0 }
   0x7   :  { %487 = vmatprep.mubr.msk.f32.mxu0 %vm51_vm1, %v35_v7  ;;  %496 = vmatprep.mubr.msk.f32.mxu1 %vm51_vm1, %v41_v12  ;;  %v47_v30 = vmax.f32 %v31_v26, 0.0  ;;  %v32_v31 = vld [vmem:[%s781_s0 + $0x78] sm:$0xff]  ;;  %v40_v32 = vmax.f32 %v24_v28, 0.0 }
   0x8   :  { %497 = vmatmul.mubr.msk.f32.vlgmr.msra.gmra.mxu1 %vm51_vm1, %v42_v13  ;;  %v48_v33 = vmax.f32 %v32_v31, 0.0 }
   0x9   :  { %499 = vmatprep.mubr.msk.f32.mxu1 %vm51_vm1, %v43_v17 }
   0xa   :  { %488 = vmatmul.mubr.msk.f32.gmra.mxu0 %vm51_vm1, %v36_v16 }
   0xb   :  { %490 = vmatprep.mubr.msk.f32.mxu0 %vm51_vm1, %v37_v19 }
   0xc   :  { %500 = vmatmul.mubr.msk.f32.gmra.mxu1 %vm51_vm1, %v44_v22 }
   0xd   :  { %502 = vmatprep.mubr.msk.f32.mxu1 %vm51_vm1, %v45_v23 }
   0xe   :  { %491 = vmatmul.mubr.msk.f32.gmra.mxu0 %vm51_vm1, %v38_v25 }
   0xf   :  { %493 = vmatprep.mubr.msk.f32.mxu0 %vm51_vm1, %v39_v27 }
  0x10   :  { %503 = vmatmul.mubr.msk.f32.gmra.mxu1 %vm51_vm1, %v46_v29 }
  0x11   :  { %505 = vmatprep.mubr.msk.f32.mxu1 %vm51_vm1, %v47_v30 }
  0x12   :  { %494 = vmatmul.mubr.msk.f32.gmra.mxu0 %vm51_vm1, %v40_v32 }
  0x14   :  { %506 = vmatmul.mubr.msk.f32.gmra.mxu1 %vm51_vm1, %v48_v33 }
  0xc6   :  { %v486_v34 = vpop.f32.mrf.mxu0 }
  0xc7   :  { %v253_v40 = vsel %vm251_vm2, %v486_v34, 0.0 }
  0xc8   :  { %v170_v35 = vpop.f32.mrf.mxu0  ;;  %v609_v36 = vpop.f32.mrf.mxu1 }
  0xc9   :  { %v252_v37 = vsel %vm251_vm2, %v170_v35, 0.0  ;;  %v269_v1 = vsel %vm251_vm2, %v609_v36, 0.0 }
  0xca   :  { %v489_v38 = vpop.f32.mrf.mxu0  ;;  %v612_v39 = vpop.f32.mrf.mxu1  ;;  %v254_v41 = vadd.f32 %v253_v40, %v252_v37 }
  0xcb   :  { %v257_v47 = vsel %vm251_vm2, %v489_v38, 0.0  ;;  %v267_v62 = vsel %vm251_vm2, %v612_v39, 0.0 }
  0xcc   :  { %v180_v42 = vpop.f32.mrf.mxu0  ;;  %v616_v46 = vpop.f32.mrf.mxu1 }
  0xcd   :  { %v255_v43 = vsel %vm251_vm2, %v180_v42, 0.0  ;;  %v273_v6 = vsel %vm251_vm2, %v616_v46, 0.0 }
  0xce   :  { %v256_v44 = vadd.f32 %v255_v43, %v254_v41  ;;  %v492_v45 = vpop.f32.mrf.mxu0  ;;  %v620_v53 = vpop.f32.mrf.mxu1 }
  0xcf   :  { %v261_v54 = vsel %vm251_vm2, %v492_v45, 0.0  ;;  %v271_v3 = vsel %vm251_vm2, %v620_v53, 0.0 }
  0xd0   :  { %v190_v48 = vpop.f32.mrf.mxu0  ;;  %v258_v49 = vadd.f32 %v257_v47, %v256_v44  ;;  %v624_v59 = vpop.f32.mrf.mxu1 }
  0xd1   :  { %v259_v50 = vsel %vm251_vm2, %v190_v48, 0.0  ;;  %v277_v11 = vsel %vm251_vm2, %v624_v59, 0.0 }
  0xd2   :  { %v260_v51 = vadd.f32 %v259_v50, %v258_v49  ;;  %v495_v52 = vpop.f32.mrf.mxu0  ;;  %v230_v0 = vpop.f32.mrf.mxu1 }
  0xd3   :  { %v265_v60 = vsel %vm251_vm2, %v495_v52, 0.0  ;;  %v275_v8 = vsel %vm251_vm2, %v230_v0, 0.0 }
  0xd4   :  { %v200_v55 = vpop.f32.mrf.mxu0  ;;  %v262_v56 = vadd.f32 %v261_v54, %v260_v51  ;;  %v633_v5 = vpop.f32.mrf.mxu1 }
  0xd5   :  { %v263_v57 = vsel %vm251_vm2, %v200_v55, 0.0  ;;  %v281_v15 = vsel %vm251_vm2, %v633_v5, 0.0 }
  0xd6   :  { %v264_v58 = vadd.f32 %v263_v57, %v262_v56  ;;  %v240_v10 = vpop.f32.mrf.mxu1 }
  0xd7   :  { %v279_v13 = vsel %vm251_vm2, %v240_v10, 0.0 }
  0xd8   :  { %v266_v61 = vadd.f32 %v265_v60, %v264_v58 }
  0xda   :  { %v268_v63 = vadd.f32 %v267_v62, %v266_v61 }
  0xdc   :  { %v270_v2 = vadd.f32 %v269_v1, %v268_v63 }
  0xde   :  { %v272_v4 = vadd.f32 %v271_v3, %v270_v2 }
  0xe0   :  { %v274_v7 = vadd.f32 %v273_v6, %v272_v4 }
  0xe2   :  { %v276_v9 = vadd.f32 %v275_v8, %v274_v7 }
  0xe4   :  { %v278_v12 = vadd.f32 %v277_v11, %v276_v9 }
  0xe6   :  { %v280_v14 = vadd.f32 %v279_v13, %v278_v12 }
  0xe8   :  { %v282_v16 = vadd.f32 %v281_v15, %v280_v14 }
  0xea   :  { %v283_v17 = vrot.slane %v282_v16, 4 }
  0xec   :  { %v284_v18 = vadd.f32 %v283_v17, %v282_v16 }
  0xee   :  { %v285_v19 = vrot.slane %v284_v18, 2 }
  0xf0   :  { %v286_v20 = vadd.f32 %v285_v19, %v284_v18 }
  0xf2   :  { %v287_v21 = vrot.slane %v286_v20, 1 }
  0xf4   :  { %v288_v22 = vadd.f32 %v287_v21, %v286_v20 }
  0xf6   :  { %v290_v23 = vmul.f32 0.0078125, %v288_v22 }
  0xf8   :  { %v643_v24 = vsub.f32 %v170_v35, %v290_v23  ;;  %v645_v25 = vsub.f32 %v486_v34, %v290_v23  ;;  %v647_v26 = vsub.f32 %v180_v42, %v290_v23  ;;  %v649_v27 = vsub.f32 %v489_v38, %v290_v23 }
  0xf9   :  { %v655_v30 = vsub.f32 %v190_v48, %v290_v23  ;;  %v659_v32 = vsub.f32 %v492_v45, %v290_v23  ;;  %v665_v38 = vsub.f32 %v200_v55, %v290_v23  ;;  %v670_v43 = vsub.f32 %v495_v52, %v290_v23 }
  0xfa   :  { %v307_v28 = vmul.f32 %v643_v24, %v643_v24  ;;  %v308_v29 = vmul.f32 %v645_v25, %v645_v25  ;;  %v309_v31 = vmul.f32 %v647_v26, %v647_v26  ;;  %v310_v33 = vmul.f32 %v649_v27, %v649_v27 }
  0xfb   :  { %v311_v40 = vmul.f32 %v655_v30, %v655_v30  ;;  %v312_v44 = vmul.f32 %v659_v32, %v659_v32  ;;  %v676_v48 = vsub.f32 %v612_v39, %v290_v23  ;;  %v313_v49 = vmul.f32 %v665_v38, %v665_v38 }
  0xfc   :  { %v323_v34 = vsel %vm251_vm2, %v307_v28, 0.0  ;;  %v324_v35 = vsel %vm251_vm2, %v308_v29, 0.0  ;;  %v326_v41 = vsel %vm251_vm2, %v309_v31, 0.0  ;;  %v328_v45 = vsel %vm251_vm2, %v310_v33, 0.0 }
  0xfd   :  { %v325_v37 = vadd.f32 %v324_v35, %v323_v34  ;;  %v330_v50 = vsel %vm251_vm2, %v311_v40, 0.0  ;;  %v300_v54 = vsub.f32 %v609_v36, %v290_v23  ;;  %v314_v52 = vmul.f32 %v670_v43, %v670_v43 }
  0xfe   :  { %v332_v55 = vsel %vm251_vm2, %v312_v44, 0.0  ;;  %v301_v57 = vsub.f32 %v620_v53, %v290_v23  ;;  %v315_v39 = vmul.f32 %v676_v48, %v676_v48  ;;  %v334_v58 = vsel %vm251_vm2, %v313_v49, 0.0 }
  0xff   :  { %v327_v42 = vadd.f32 %v326_v41, %v325_v37  ;;  %v302_v61 = vsub.f32 %v616_v46, %v290_v23  ;;  %v316_v62 = vmul.f32 %v300_v54, %v300_v54  ;;  %v336_v63 = vsel %vm251_vm2, %v314_v52, 0.0 }
 0x100   :  { %v303_v1 = vsub.f32 %v230_v0, %v290_v23  ;;  %v317_v2 = vmul.f32 %v301_v57, %v301_v57  ;;  %v338_v3 = vsel %vm251_vm2, %v315_v39, 0.0  ;;  %v304_v6 = vsub.f32 %v624_v59, %v290_v23 }
 0x101   :  { %v329_v47 = vadd.f32 %v328_v45, %v327_v42  ;;  %v318_v53 = vmul.f32 %v302_v61, %v302_v61  ;;  %v340_v7 = vsel %vm251_vm2, %v316_v62, 0.0  ;;  %v305_v9 = vsub.f32 %v240_v10, %v290_v23 }
 0x102   :  { %v319_v11 = vmul.f32 %v303_v1, %v303_v1  ;;  %v342_v12 = vsel %vm251_vm2, %v317_v2, 0.0  ;;  %v306_v13 = vsub.f32 %v633_v5, %v290_v23  ;;  %v320_v14 = vmul.f32 %v304_v6, %v304_v6 }
 0x103   :  { %v331_v51 = vadd.f32 %v330_v50, %v329_v47  ;;  %v344_v0 = vsel %vm251_vm2, %v318_v53, 0.0  ;;  %v321_v16 = vmul.f32 %v305_v9, %v305_v9  ;;  %v460_v47 = vld [vmem:[%s782_s2] ss:$0 sm:$0xff] }
 0x104   :  { %v346_v17 = vsel %vm251_vm2, %v319_v11, 0.0  ;;  %v322_v59 = vmul.f32 %v306_v13, %v306_v13  ;;  %v348_v19 = vsel %vm251_vm2, %v320_v14, 0.0 }
 0x105   :  { %v333_v56 = vadd.f32 %v332_v55, %v331_v51  ;;  %v350_v10 = vsel %vm251_vm2, %v321_v16, 0.0 }
 0x106   :  { %v352_v22 = vsel %vm251_vm2, %v322_v59, 0.0 }
 0x107   :  { %v335_v60 = vadd.f32 %v334_v58, %v333_v56 }
 0x109   :  { %v337_v36 = vadd.f32 %v336_v63, %v335_v60 }
 0x10b   :  { %v339_v4 = vadd.f32 %v338_v3, %v337_v36 }
 0x10d   :  { %v341_v8 = vadd.f32 %v340_v7, %v339_v4 }
 0x10f   :  { %v343_v46 = vadd.f32 %v342_v12, %v341_v8 }
 0x111   :  { %v345_v15 = vadd.f32 %v344_v0, %v343_v46 }
 0x113   :  { %v347_v18 = vadd.f32 %v346_v17, %v345_v15 }
 0x115   :  { %v349_v20 = vadd.f32 %v348_v19, %v347_v18 }
 0x117   :  { %v351_v21 = vadd.f32 %v350_v10, %v349_v20 }
 0x119   :  { %v353_v28 = vadd.f32 %v352_v22, %v351_v21 }
 0x11b   :  { %v354_v29 = vrot.slane %v353_v28, 4 }
 0x11d   :  { %v355_v5 = vadd.f32 %v354_v29, %v353_v28 }
 0x11f   :  { %v356_v23 = vrot.slane %v355_v5, 2 }
 0x121   :  { %v357_v31 = vadd.f32 %v356_v23, %v355_v5 }
 0x123   :  { %v358_v33 = vrot.slane %v357_v31, 1 }
 0x125   :  { %v359_v34 = vadd.f32 %v358_v33, %v357_v31 }
 0x127   :  { %v360_v35 = vmul.f32 0.0078125, %v359_v34 }
 0x129   :  { %v361_v37 = vadd.f32 1e-05, %v360_v35 }
 0x12b   :  { %512 = vrsqrt.f32 %v361_v37 }
 0x138   :  { %v513_v40 = vpop.eup %512 }
 0x139   :  { %v363_v41 = vmul.f32 %v513_v40, %v643_v24  ;;  %v364_v42 = vmul.f32 %v513_v40, %v645_v25  ;;  %v365_v44 = vmul.f32 %v513_v40, %v647_v26  ;;  %v366_v45 = vmul.f32 %v513_v40, %v649_v27 }
 0x13a   :  { %v367_v49 = vmul.f32 %v513_v40, %v655_v30  ;;  %v368_v50 = vmul.f32 %v513_v40, %v659_v32  ;;  %v369_v51 = vmul.f32 %v513_v40, %v665_v38  ;;  %v370_v52 = vmul.f32 %v513_v40, %v670_v43  ;;  %v461_v30 = vld [vmem:[%s783_s3] ss:$0 sm:$0xff] }
 0x13b   :  { %v371_v24 = vmul.f32 %v513_v40, %v676_v48  ;;  %v372_v55 = vmul.f32 %v513_v40, %v300_v54  ;;  %v373_v25 = vmul.f32 %v513_v40, %v301_v57  ;;  %v374_v56 = vmul.f32 %v513_v40, %v302_v61 }
 0x13c   :  { %v375_v26 = vmul.f32 %v513_v40, %v303_v1  ;;  %v376_v39 = vmul.f32 %v513_v40, %v304_v6  ;;  %v377_v27 = vmul.f32 %v513_v40, %v305_v9  ;;  %v378_v58 = vmul.f32 %v513_v40, %v306_v13 }
 0x13d   :  { %v385_v60 = vmul.f32 %v460_v47, %v363_v41  ;;  %v386_v62 = vmul.f32 %v460_v47, %v364_v42  ;;  %v387_v63 = vmul.f32 %v460_v47, %v365_v44  ;;  %v388_v36 = vmul.f32 %v460_v47, %v366_v45 }
 0x13e   :  { %v389_v32 = vmul.f32 %v460_v47, %v367_v49  ;;  %v390_v38 = vmul.f32 %v460_v47, %v368_v50  ;;  %v391_v43 = vmul.f32 %v460_v47, %v369_v51  ;;  %v392_v2 = vmul.f32 %v460_v47, %v370_v52 }
 0x13f   :  { %v393_v48 = vmul.f32 %v460_v47, %v371_v24  ;;  %v394_v54 = vmul.f32 %v460_v47, %v372_v55  ;;  %v395_v57 = vmul.f32 %v460_v47, %v373_v25  ;;  %v396_v61 = vmul.f32 %v460_v47, %v374_v56 }
 0x140   :  { %v397_v1 = vmul.f32 %v460_v47, %v375_v26  ;;  %v398_v3 = vmul.f32 %v460_v47, %v376_v39  ;;  %v399_v4 = vmul.f32 %v460_v47, %v377_v27  ;;  %v400_v6 = vmul.f32 %v460_v47, %v378_v58 }
 0x141   :  { %v407_v53 = vadd.f32 %v461_v30, %v385_v60  ;;  %v408_v7 = vadd.f32 %v461_v30, %v386_v62  ;;  %v409_v8 = vadd.f32 %v461_v30, %v387_v63  ;;  %v410_v9 = vadd.f32 %v461_v30, %v388_v36 }
 0x142   :  { %v411_v11 = vadd.f32 %v461_v30, %v389_v32  ;;  %v412_v12 = vadd.f32 %v461_v30, %v390_v38  ;;  %v413_v46 = vadd.f32 %v461_v30, %v391_v43  ;;  %v414_v13 = vadd.f32 %v461_v30, %v392_v2 }
 0x143   :  { %v415_v14 = vadd.f32 %v461_v30, %v393_v48  ;;  %v416_v0 = vadd.f32 %v461_v30, %v394_v54  ;;  %v417_v15 = vadd.f32 %v461_v30, %v395_v57  ;;  %v418_v16 = vadd.f32 %v461_v30, %v396_v61  ;;  %423 = vst.msk [vmem:[%s784_s4] sm:$0xff] %vm251_vm2, %v407_v53 }
 0x144   :  { %424 = vst.msk [vmem:[%s784_s4 + $0x8] sm:$0xff] %vm251_vm2, %v408_v7  ;;  %425 = vst.msk [vmem:[%s784_s4 + $0x10] sm:$0xff] %vm251_vm2, %v409_v8  ;;  %v419_v17 = vadd.f32 %v461_v30, %v397_v1  ;;  %v420_v18 = vadd.f32 %v461_v30, %v398_v3  ;;  %v421_v59 = vadd.f32 %v461_v30, %v399_v4 }
 0x145   :  { %426 = vst.msk [vmem:[%s784_s4 + $0x18] sm:$0xff] %vm251_vm2, %v410_v9  ;;  %v422_v19 = vadd.f32 %v461_v30, %v400_v6  ;;  %427 = vst.msk [vmem:[%s784_s4 + $0x20] sm:$0xff] %vm251_vm2, %v411_v11 }
 0x146   :  { %428 = vst.msk [vmem:[%s784_s4 + $0x28] sm:$0xff] %vm251_vm2, %v412_v12  ;;  %429 = vst.msk [vmem:[%s784_s4 + $0x30] sm:$0xff] %vm251_vm2, %v413_v46 }
 0x147   :  { %430 = vst.msk [vmem:[%s784_s4 + $0x38] sm:$0xff] %vm251_vm2, %v414_v13  ;;  %431 = vst.msk [vmem:[%s784_s4 + $0x40] sm:$0xff] %vm251_vm2, %v415_v14 }
 0x148   :  { %432 = vst.msk [vmem:[%s784_s4 + $0x48] sm:$0xff] %vm251_vm2, %v416_v0  ;;  %433 = vst.msk [vmem:[%s784_s4 + $0x50] sm:$0xff] %vm251_vm2, %v417_v15 }
 0x149   :  { %434 = vst.msk [vmem:[%s784_s4 + $0x58] sm:$0xff] %vm251_vm2, %v418_v16  ;;  %435 = vst.msk [vmem:[%s784_s4 + $0x60] sm:$0xff] %vm251_vm2, %v419_v17 }
 0x14a   :  { %436 = vst.msk [vmem:[%s784_s4 + $0x68] sm:$0xff] %vm251_vm2, %v420_v18  ;;  %437 = vst.msk [vmem:[%s784_s4 + $0x70] sm:$0xff] %vm251_vm2, %v421_v59 }
 0x14b   :  { %438 = vst.msk [vmem:[%s784_s4 + $0x78] sm:$0xff] %vm251_vm2, %v422_v19 }

// kernel: _lambda_.127
= control target key start
LH: loop header
LB: loop body
LE: loop exit
PB: predicated region body
PF: predicated region fallthrough
CT: control target
= control target key end

     0   :  { %vm46_vm0 = vcmask 64512   ;;  %vm244_vm1 = vcmask 31744   ;;  %s574_s2 = inlined_call_operand.vmem [shape: f32[8,4], index: 2, kind: input, shape index: {}]   ;;  %s575_s3 = inlined_call_operand.vmem [shape: f32[8,4], index: 3, kind: input, shape index: {}]   ;;  %s576_s0 = inlined_call_operand.vmem [shape: f32[32,8], index: 0, kind: input, shape index: {}]   ;;  %s577_s1 = inlined_call_operand.vmem [shape: f32[32,8], index: 1, kind: input, shape index: {}]   ;;  %s578_s4 = inlined_call_operand.vmem [shape: f32[1,4], index: 4, kind: input, shape index: {}]   ;;  %s579_s6 = inlined_call_operand.vmem [shape: f32[1,4], index: 6, kind: input, shape index: {}]   ;;  %s580_s5 = inlined_call_operand.vmem [shape: f32[1,4], index: 5, kind: input, shape index: {}]   ;;  %s581_s7 = inlined_call_operand.vmem [shape: f32[1,4], index: 7, kind: input, shape index: {}]   ;;  %s582_s8 = inlined_call_operand.vmem [shape: f32[2,32,4], index: 8, kind: output, shape index: {}]  }
   0x1   :  { %v45_v0 = vld [vmem:[%s574_s2] sm:$0xff]  ;;  %v30_v5 = vld [vmem:[%s576_s0 + $0x8] sm:$0xff]  ;;  %v31_v10 = vld [vmem:[%s576_s0 + $0x10] sm:$0xff] }
   0x2   :  { %v144_v1 = vld [vmem:[%s575_s3] sm:$0xff]  ;;  %411 = vmatprep.subr.mxu0 %v45_v0  ;;  %v38_v6 = vld [vmem:[%s577_s1 + $0x8] sm:$0xff]  ;;  %v34_v8 = vmax.f32 %v30_v5, 0.0  ;;  %v39_v11 = vld [vmem:[%s577_s1 + $0x10] sm:$0xff]  ;;  %v35_v13 = vmax.f32 %v31_v10, 0.0 }
   0x3   :  { %v29_v2 = vld [vmem:[%s576_s0] sm:$0xff]  ;;  %419 = vmatprep.subr.mxu1 %v144_v1  ;;  %412 = vmatpush3.msra.mxu0 %v45_v0  ;;  %v42_v9 = vmax.f32 %v38_v6, 0.0  ;;  %v32_v12 = vld [vmem:[%s576_s0 + $0x18] sm:$0xff]  ;;  %v43_v14 = vmax.f32 %v39_v11, 0.0 }
   0x4   :  { %v33_v3 = vmax.f32 %v29_v2, 0.0  ;;  %v37_v4 = vld [vmem:[%s577_s1] sm:$0xff]  ;;  %420 = vmatpush3.msra.mxu1 %v144_v1  ;;  %v40_v15 = vld [vmem:[%s577_s1 + $0x18] sm:$0xff]  ;;  %v36_v16 = vmax.f32 %v32_v12, 0.0 }
   0x5   :  { %v41_v7 = vmax.f32 %v37_v4, 0.0  ;;  %v44_v17 = vmax.f32 %v40_v15, 0.0 }
   0x6   :  { %413 = vmatprep.mubr.msk.f32.mxu0 %vm46_vm0, %v33_v3 }
   0x7   :  { %421 = vmatprep.mubr.msk.f32.mxu1 %vm46_vm0, %v41_v7  ;;  %414 = vmatmul.mubr.msk.f32.vlgmr.msra.gmra.mxu0 %vm46_vm0, %v34_v8 }
   0x8   :  { %422 = vmatmul.mubr.msk.f32.vlgmr.msra.gmra.mxu1 %vm46_vm0, %v42_v9  ;;  %416 = vmatprep.mubr.msk.f32.mxu0 %vm46_vm0, %v35_v13 }
   0x9   :  { %424 = vmatprep.mubr.msk.f32.mxu1 %vm46_vm0, %v43_v14 }
   0xb   :  { %417 = vmatmul.mubr.msk.f32.gmra.mxu0 %vm46_vm0, %v36_v16 }
   0xc   :  { %425 = vmatmul.mubr.msk.f32.gmra.mxu1 %vm46_vm0, %v44_v17 }
  0xc7   :  { %v415_v18 = vpop.f32.mrf.mxu0 }
  0xc8   :  { %v423_v19 = vpop.f32.mrf.mxu1  ;;  %v246_v25 = vsel %vm244_vm1, %v415_v18, 0.0 }
  0xc9   :  { %v125_v20 = vpop.f32.mrf.mxu0  ;;  %v315_v27 = vsel %vm244_vm1, %v423_v19, 0.0 }
  0xca   :  { %v245_v21 = vsel %vm244_vm1, %v125_v20, 0.0  ;;  %v223_v22 = vpop.f32.mrf.mxu1 }
  0xcb   :  { %v314_v23 = vsel %vm244_vm1, %v223_v22, 0.0  ;;  %v418_v24 = vpop.f32.mrf.mxu0  ;;  %v247_v28 = vadd.f32 %v246_v25, %v245_v21 }
  0xcc   :  { %v426_v26 = vpop.f32.mrf.mxu1  ;;  %v316_v30 = vadd.f32 %v315_v27, %v314_v23  ;;  %v250_v35 = vsel %vm244_vm1, %v418_v24, 0.0 }
  0xcd   :  { %v135_v29 = vpop.f32.mrf.mxu0  ;;  %v319_v37 = vsel %vm244_vm1, %v426_v26, 0.0 }
  0xce   :  { %v248_v31 = vsel %vm244_vm1, %v135_v29, 0.0  ;;  %v233_v32 = vpop.f32.mrf.mxu1 }
  0xcf   :  { %v249_v33 = vadd.f32 %v248_v31, %v247_v28  ;;  %v317_v34 = vsel %vm244_vm1, %v233_v32, 0.0 }
  0xd0   :  { %v318_v36 = vadd.f32 %v317_v34, %v316_v30 }
  0xd1   :  { %v251_v38 = vadd.f32 %v250_v35, %v249_v33 }
  0xd2   :  { %v320_v39 = vadd.f32 %v319_v37, %v318_v36  ;;  %v393_v37 = vld [vmem:[%s578_s4] ss:$0 sm:$0xff] }
  0xd3   :  { %v252_v40 = vrot.slane %v251_v38, 4 }
  0xd4   :  { %v321_v41 = vrot.slane %v320_v39, 4 }
  0xd5   :  { %v253_v42 = vadd.f32 %v252_v40, %v251_v38 }
  0xd6   :  { %v322_v43 = vadd.f32 %v321_v41, %v320_v39 }
  0xd7   :  { %v254_v44 = vrot.slane %v253_v42, 2 }
  0xd8   :  { %v323_v45 = vrot.slane %v322_v43, 2 }
  0xd9   :  { %v255_v46 = vadd.f32 %v254_v44, %v253_v42  ;;  %v394_v44 = vld [vmem:[%s580_s5] ss:$0 sm:$0xff] }
  0xda   :  { %v324_v47 = vadd.f32 %v323_v45, %v322_v43  ;;  %v395_v43 = vld [vmem:[%s579_s6] ss:$0 sm:$0xff] }
  0xdb   :  { %v256_v48 = vrot.slane %v255_v46, 1 }
  0xdc   :  { %v325_v49 = vrot.slane %v324_v47, 1 }
  0xdd   :  { %v257_v50 = vadd.f32 %v256_v48, %v255_v46 }
  0xde   :  { %v326_v51 = vadd.f32 %v325_v49, %v324_v47 }
  0xdf   :  { %v259_v52 = vmul.f32 0.03125, %v257_v50 }
  0xe0   :  { %v327_v53 = vmul.f32 0.03125, %v326_v51 }
  0xe1   :  { %v260_v54 = vsub.f32 %v125_v20, %v259_v52  ;;  %v261_v55 = vsub.f32 %v415_v18, %v259_v52  ;;  %v262_v56 = vsub.f32 %v135_v29, %v259_v52  ;;  %v263_v57 = vsub.f32 %v418_v24, %v259_v52 }
  0xe2   :  { %v328_v58 = vsub.f32 %v223_v22, %v327_v53  ;;  %v329_v59 = vsub.f32 %v423_v19, %v327_v53  ;;  %v330_v60 = vsub.f32 %v233_v32, %v327_v53  ;;  %v331_v61 = vsub.f32 %v426_v26, %v327_v53  ;;  %v396_v53 = vld [vmem:[%s581_s7] ss:$0 sm:$0xff] }
  0xe3   :  { %v264_v62 = vmul.f32 %v260_v54, %v260_v54  ;;  %v265_v63 = vmul.f32 %v261_v55, %v261_v55  ;;  %v266_v0 = vmul.f32 %v262_v56, %v262_v56  ;;  %v267_v4 = vmul.f32 %v263_v57, %v263_v57 }
  0xe4   :  { %v332_v1 = vmul.f32 %v328_v58, %v328_v58  ;;  %v333_v2 = vmul.f32 %v329_v59, %v329_v59  ;;  %v334_v3 = vmul.f32 %v330_v60, %v330_v60  ;;  %v335_v8 = vmul.f32 %v331_v61, %v331_v61 }
  0xe5   :  { %v268_v5 = vsel %vm244_vm1, %v264_v62, 0.0  ;;  %v269_v6 = vsel %vm244_vm1, %v265_v63, 0.0  ;;  %v271_v11 = vsel %vm244_vm1, %v266_v0, 0.0  ;;  %v273_v15 = vsel %vm244_vm1, %v267_v4, 0.0 }
  0xe6   :  { %v270_v7 = vadd.f32 %v269_v6, %v268_v5  ;;  %v336_v9 = vsel %vm244_vm1, %v332_v1, 0.0  ;;  %v337_v10 = vsel %vm244_vm1, %v333_v2, 0.0  ;;  %v339_v14 = vsel %vm244_vm1, %v334_v3, 0.0 }
  0xe7   :  { %v338_v12 = vadd.f32 %v337_v10, %v336_v9  ;;  %v341_v18 = vsel %vm244_vm1, %v335_v8, 0.0 }
  0xe8   :  { %v272_v13 = vadd.f32 %v271_v11, %v270_v7 }
  0xe9   :  { %v340_v16 = vadd.f32 %v339_v14, %v338_v12 }
  0xea   :  { %v274_v17 = vadd.f32 %v273_v15, %v272_v13 }
  0xeb   :  { %v342_v19 = vadd.f32 %v341_v18, %v340_v16 }
  0xec   :  { %v275_v20 = vrot.slane %v274_v17, 4 }
  0xed   :  { %v343_v21 = vrot.slane %v342_v19, 4 }
  0xee   :  { %v276_v22 = vadd.f32 %v275_v20, %v274_v17 }
  0xef   :  { %v344_v23 = vadd.f32 %v343_v21, %v342_v19 }
  0xf0   :  { %v277_v24 = vrot.slane %v276_v22, 2 }
  0xf1   :  { %v345_v25 = vrot.slane %v344_v23, 2 }
  0xf2   :  { %v278_v26 = vadd.f32 %v277_v24, %v276_v22 }
  0xf3   :  { %v346_v27 = vadd.f32 %v345_v25, %v344_v23 }
  0xf4   :  { %v279_v28 = vrot.slane %v278_v26, 1 }
  0xf5   :  { %v347_v29 = vrot.slane %v346_v27, 1 }
  0xf6   :  { %v280_v30 = vadd.f32 %v279_v28, %v278_v26 }
  0xf7   :  { %v348_v31 = vadd.f32 %v347_v29, %v346_v27 }
  0xf8   :  { %v281_v32 = vmul.f32 0.03125, %v280_v30 }
  0xf9   :  { %v349_v33 = vmul.f32 0.03125, %v348_v31 }
  0xfa   :  { %v282_v34 = vadd.f32 1e-05, %v281_v32 }
  0xfb   :  { %v350_v35 = vadd.f32 1e-05, %v349_v33 }
  0xfc   :  { %427 = vrsqrt.f32 %v282_v34 }
  0xfd   :  { %429 = vrsqrt.f32 %v350_v35 }
 0x109   :  { %v428_v36 = vpop.eup %427 }
 0x10a   :  { %v430_v38 = vpop.eup %429  ;;  %v284_v39 = vmul.f32 %v428_v36, %v260_v54  ;;  %v285_v40 = vmul.f32 %v428_v36, %v261_v55  ;;  %v286_v41 = vmul.f32 %v428_v36, %v262_v56  ;;  %v287_v42 = vmul.f32 %v428_v36, %v263_v57 }
 0x10b   :  { %v352_v45 = vmul.f32 %v430_v38, %v328_v58  ;;  %v353_v46 = vmul.f32 %v430_v38, %v329_v59  ;;  %v354_v47 = vmul.f32 %v430_v38, %v330_v60  ;;  %v355_v48 = vmul.f32 %v430_v38, %v331_v61 }
 0x10c   :  { %v294_v49 = vmul.f32 %v393_v37, %v284_v39  ;;  %v295_v50 = vmul.f32 %v393_v37, %v285_v40  ;;  %v296_v51 = vmul.f32 %v393_v37, %v286_v41  ;;  %v297_v52 = vmul.f32 %v393_v37, %v287_v42 }
 0x10d   :  { %v362_v54 = vmul.f32 %v395_v43, %v352_v45  ;;  %v363_v55 = vmul.f32 %v395_v43, %v353_v46  ;;  %v364_v56 = vmul.f32 %v395_v43, %v354_v47  ;;  %v365_v57 = vmul.f32 %v395_v43, %v355_v48 }
 0x10e   :  { %v304_v62 = vadd.f32 %v394_v44, %v294_v49  ;;  %v305_v63 = vadd.f32 %v394_v44, %v295_v50  ;;  %v306_v0 = vadd.f32 %v394_v44, %v296_v51  ;;  %v307_v1 = vadd.f32 %v394_v44, %v297_v52 }
 0x10f   :  { %v372_v58 = vadd.f32 %v396_v53, %v362_v54  ;;  %v373_v59 = vadd.f32 %v396_v53, %v363_v55  ;;  %v374_v60 = vadd.f32 %v396_v53, %v364_v56  ;;  %v375_v61 = vadd.f32 %v396_v53, %v365_v57 }
 0x110   :  { %308 = vst.msk [vmem:[%s582_s8] sm:$0xff] %vm244_vm1, %v304_v62  ;;  %309 = vst.msk [vmem:[%s582_s8 + $0x8] sm:$0xff] %vm244_vm1, %v305_v63 }
 0x111   :  { %310 = vst.msk [vmem:[%s582_s8 + $0x10] sm:$0xff] %vm244_vm1, %v306_v0  ;;  %311 = vst.msk [vmem:[%s582_s8 + $0x18] sm:$0xff] %vm244_vm1, %v307_v1 }
 0x112   :  { %397 = vst.msk [vmem:[%s582_s8 + $0x20] sm:$0xff] %vm244_vm1, %v372_v58  ;;  %398 = vst.msk [vmem:[%s582_s8 + $0x28] sm:$0xff] %vm244_vm1, %v373_v59 }
 0x113   :  { %399 = vst.msk [vmem:[%s582_s8 + $0x30] sm:$0xff] %vm244_vm1, %v374_v60  ;;  %400 = vst.msk [vmem:[%s582_s8 + $0x38] sm:$0xff] %vm244_vm1, %v375_v61 }

// kernel: _lambda_.154
= control target key start
LH: loop header
LB: loop body
LE: loop exit
PB: predicated region body
PF: predicated region fallthrough
CT: control target
= control target key end

     0   :  { %vm24_vm0 = vcmask 130048   ;;  %vm26_vm1 = vcmask 122880   ;;  %vm106_vm2 = vcmask 1041409   ;;  %vm108_vm3 = vcmask 1042434   ;;  %s207_s0 = inlined_call_operand.vmem [shape: f32[8,9,16], index: 0, kind: input, shape index: {}]   ;;  %s208_s1 = inlined_call_operand.vmem [shape: f32[8,16], index: 1, kind: output, shape index: {}]  }
   0x1   :  { %v8_v0 = vld [vmem:[%s207_s0] sm:$0xff]  ;;  %v9_v1 = vld [vmem:[%s207_s0 + $0x8] sm:$0x1]  ;;  %v10_v2 = vld [vmem:[%s207_s0 + $0x10] sm:$0xff]  ;;  %vm110_vm4 = vcmask 1043459   ;;  %vm112_vm5 = vcmask 1044484  }
   0x2   :  { %v11_v3 = vld [vmem:[%s207_s0 + $0x18] sm:$0x1]  ;;  %v12_v4 = vld [vmem:[%s207_s0 + $0x20] sm:$0xff]  ;;  %v13_v5 = vld [vmem:[%s207_s0 + $0x28] sm:$0x1]  ;;  %v25_v6 = vsel %vm24_vm0, %v8_v0, -inf }
   0x3   :  { %v14_v7 = vld [vmem:[%s207_s0 + $0x30] sm:$0xff]  ;;  %v15_v8 = vld [vmem:[%s207_s0 + $0x38] sm:$0x1]  ;;  %v27_v9 = vsel %vm26_vm1, %v9_v1, -inf  ;;  %v35_v10 = vsel %vm24_vm0, %v10_v2, -inf  ;;  %v16_v11 = vld [vmem:[%s207_s0 + $0x40] sm:$0xff] }
   0x4   :  { %v17_v12 = vld [vmem:[%s207_s0 + $0x48] sm:$0x1]  ;;  %v28_v13 = vmax.f32 %v25_v6, %v27_v9  ;;  %v36_v14 = vsel %vm26_vm1, %v11_v3, -inf  ;;  %v18_v15 = vld [vmem:[%s207_s0 + $0x50] sm:$0xff]  ;;  %v44_v17 = vsel %vm24_vm0, %v12_v4, -inf  ;;  %v45_v18 = vsel %vm26_vm1, %v13_v5, -inf }
   0x5   :  { %v37_v16 = vmax.f32 %v35_v10, %v36_v14  ;;  %v19_v19 = vld [vmem:[%s207_s0 + $0x58] sm:$0x1]  ;;  %v20_v20 = vld [vmem:[%s207_s0 + $0x60] sm:$0xff]  ;;  %v46_v22 = vmax.f32 %v44_v17, %v45_v18  ;;  %v53_v23 = vsel %vm24_vm0, %v14_v7, -inf  ;;  %v54_v24 = vsel %vm26_vm1, %v15_v8, -inf  ;;  %v22_v30 = vld [vmem:[%s207_s0 + $0x70] sm:$0xff] }
   0x6   :  { %v29_v21 = vrot.slane %v28_v13, 4  ;;  %v55_v26 = vmax.f32 %v53_v23, %v54_v24  ;;  %v62_v27 = vsel %vm24_vm0, %v16_v11, -inf  ;;  %v63_v28 = vsel %vm26_vm1, %v17_v12, -inf  ;;  %v21_v29 = vld [vmem:[%s207_s0 + $0x68] sm:$0x1] }
   0x7   :  { %v38_v25 = vrot.slane %v37_v16, 4  ;;  %v47_v32 = vrot.slane %v46_v22, 4  ;;  %v64_v33 = vmax.f32 %v62_v27, %v63_v28  ;;  %v71_v34 = vsel %vm24_vm0, %v18_v15, -inf  ;;  %v23_v39 = vld [vmem:[%s207_s0 + $0x78] sm:$0x1] }
   0x8   :  { %v30_v31 = vmax.f32 %v28_v13, %v29_v21  ;;  %v56_v36 = vrot.slane %v55_v26, 4  ;;  %v72_v37 = vsel %vm26_vm1, %v19_v19, -inf  ;;  %v80_v38 = vsel %vm24_vm0, %v20_v20, -inf }
   0x9   :  { %v39_v35 = vmax.f32 %v37_v16, %v38_v25  ;;  %v48_v41 = vmax.f32 %v46_v22, %v47_v32  ;;  %v65_v42 = vrot.slane %v64_v33, 4  ;;  %v73_v43 = vmax.f32 %v71_v34, %v72_v37 }
   0xa   :  { %v31_v40 = vrot.slane %v30_v31, 2  ;;  %v57_v45 = vmax.f32 %v55_v26, %v56_v36  ;;  %v81_v46 = vsel %vm26_vm1, %v21_v29, -inf  ;;  %v89_v47 = vsel %vm24_vm0, %v22_v30, -inf }
   0xb   :  { %v40_v44 = vrot.slane %v39_v35, 2  ;;  %v49_v49 = vrot.slane %v48_v41, 2  ;;  %v66_v50 = vmax.f32 %v64_v33, %v65_v42  ;;  %v74_v51 = vrot.slane %v73_v43, 4 }
   0xc   :  { %v32_v48 = vmax.f32 %v30_v31, %v31_v40  ;;  %v58_v53 = vrot.slane %v57_v45, 2  ;;  %v82_v54 = vmax.f32 %v80_v38, %v81_v46  ;;  %v90_v55 = vsel %vm26_vm1, %v23_v39, -inf }
   0xd   :  { %v41_v52 = vmax.f32 %v39_v35, %v40_v44  ;;  %v50_v57 = vmax.f32 %v48_v41, %v49_v49  ;;  %v67_v58 = vrot.slane %v66_v50, 2  ;;  %v75_v59 = vmax.f32 %v73_v43, %v74_v51 }
   0xe   :  { %v33_v56 = vrot.slane %v32_v48, 1  ;;  %v59_v61 = vmax.f32 %v57_v45, %v58_v53  ;;  %v83_v62 = vrot.slane %v82_v54, 4  ;;  %v91_v63 = vmax.f32 %v89_v47, %v90_v55 }
   0xf   :  { %v42_v60 = vrot.slane %v41_v52, 1  ;;  %v51_v1 = vrot.slane %v50_v57, 1  ;;  %v68_v2 = vmax.f32 %v66_v50, %v67_v58  ;;  %v76_v3 = vrot.slane %v75_v59, 2 }
  0x10   :  { %v34_v0 = vmax.f32 %v32_v48, %v33_v56  ;;  %v60_v5 = vrot.slane %v59_v61, 1  ;;  %v84_v6 = vmax.f32 %v82_v54, %v83_v62  ;;  %v92_v7 = vrot.slane %v91_v63, 4 }
  0x11   :  { %v43_v4 = vmax.f32 %v41_v52, %v42_v60  ;;  %v52_v8 = vmax.f32 %v50_v57, %v51_v1  ;;  %v69_v9 = vrot.slane %v68_v2, 1  ;;  %v77_v10 = vmax.f32 %v75_v59, %v76_v3 }
  0x12   :  { %v61_v11 = vmax.f32 %v59_v61, %v60_v5  ;;  %v85_v12 = vrot.slane %v84_v6, 2  ;;  %v93_v13 = vmax.f32 %v91_v63, %v92_v7  ;;  %vm114_vm6 = vcmask 1045509  }
  0x13   :  { %v107_v14 = vsel %vm106_vm2, %v43_v4, %v34_v0  ;;  %v70_v15 = vmax.f32 %v68_v2, %v69_v9  ;;  %v78_v16 = vrot.slane %v77_v10, 1  ;;  %vm116_vm7 = vcmask 1046534  }
  0x14   :  { %v109_v17 = vsel %vm108_vm3, %v52_v8, %v107_v14  ;;  %v86_v18 = vmax.f32 %v84_v6, %v85_v12  ;;  %v94_v19 = vrot.slane %v93_v13, 2  ;;  %vm118_vm8 = vcmask 1047559  }
  0x15   :  { %v111_v20 = vsel %vm110_vm4, %v61_v11, %v109_v17  ;;  %v79_v21 = vmax.f32 %v77_v10, %v78_v16 }
  0x16   :  { %v113_v22 = vsel %vm112_vm5, %v70_v15, %v111_v20  ;;  %v87_v23 = vrot.slane %v86_v18, 1  ;;  %v95_v24 = vmax.f32 %v93_v13, %v94_v19 }
  0x17   :  { %v115_v25 = vsel %vm114_vm6, %v79_v21, %v113_v22 }
  0x18   :  { %v88_v26 = vmax.f32 %v86_v18, %v87_v23  ;;  %v96_v27 = vrot.slane %v95_v24, 1 }
  0x1a   :  { %v97_v28 = vmax.f32 %v95_v24, %v96_v27  ;;  %v117_v29 = vsel %vm116_vm7, %v88_v26, %v115_v25 }
  0x1c   :  { %v119_v30 = vsel %vm118_vm8, %v97_v28, %v117_v29 }
  0x1d   :  { %121 = vst.msk [vmem:[%s208_s1] sm:$0xff] %vm24_vm0, %v119_v30 }

// kernel: _lambda_.155
= control target key start
LH: loop header
LB: loop body
LE: loop exit
PB: predicated region body
PF: predicated region fallthrough
CT: control target
= control target key end

     0   :  { %v190_v0 = vmov 0   ;;  %vm27_vm0 = vcmask 130048   ;;  %vm29_vm1 = vcmask 122880   ;;  %vm146_vm2 = vcmask 1041409   ;;  %s279_s1 = inlined_call_operand.vmem [shape: f32[8,1], index: 1, kind: input, shape index: {}]   ;;  %s280_s0 = inlined_call_operand.vmem [shape: f32[8,9,16], index: 0, kind: input, shape index: {}]   ;;  %s281_s2 = inlined_call_operand.vmem [shape: f32[8,16], index: 2, kind: output, shape index: {}]  }
   0x1   :  { %173 = vset.pattern.permute.xlu0 %v190_v0  ;;  %v101_v1 = vld [vmem:[%s279_s1] sm:$0xff]  ;;  %v12_v3 = vld [vmem:[%s280_s0 + $0x8] sm:$0x1]  ;;  %v13_v4 = vld [vmem:[%s280_s0 + $0x10] sm:$0xff]  ;;  %vm149_vm3 = vcmask 1042434   ;;  %vm152_vm4 = vcmask 1043459  }
   0x2   :  { %104 = vperm.xlu0 %173, %v101_v1   ;;  %v11_v2 = vld [vmem:[%s280_s0] sm:$0xff]  ;;  %v14_v5 = vld [vmem:[%s280_s0 + $0x18] sm:$0x1]  ;;  %v16_v7 = vld [vmem:[%s280_s0 + $0x28] sm:$0x1]  ;;  %v30_v9 = vsel %vm29_vm1, %v12_v3, 0.0 }
   0x3   :  { %v15_v6 = vld [vmem:[%s280_s0 + $0x20] sm:$0xff]  ;;  %v28_v8 = vsel %vm27_vm0, %v11_v2, 0.0  ;;  %v17_v10 = vld [vmem:[%s280_s0 + $0x30] sm:$0xff]  ;;  %v18_v11 = vld [vmem:[%s280_s0 + $0x38] sm:$0x1]  ;;  %v38_v12 = vsel %vm27_vm0, %v13_v4, 0.0 }
   0x4   :  { %v39_v13 = vsel %vm29_vm1, %v14_v5, 0.0  ;;  %v19_v14 = vld [vmem:[%s280_s0 + $0x40] sm:$0xff]  ;;  %v20_v15 = vld [vmem:[%s280_s0 + $0x48] sm:$0x1]  ;;  %v21_v16 = vld [vmem:[%s280_s0 + $0x50] sm:$0xff]  ;;  %v31_v18 = vadd.f32 %v30_v9, %v28_v8  ;;  %v47_v19 = vsel %vm27_vm0, %v15_v6, 0.0 }
   0x5   :  { %v22_v17 = vld [vmem:[%s280_s0 + $0x58] sm:$0x1]  ;;  %v48_v20 = vsel %vm29_vm1, %v16_v7, 0.0  ;;  %v23_v21 = vld [vmem:[%s280_s0 + $0x60] sm:$0xff]  ;;  %v24_v22 = vld [vmem:[%s280_s0 + $0x68] sm:$0x1]  ;;  %v40_v23 = vadd.f32 %v39_v13, %v38_v12 }
   0x6   :  { %v56_v24 = vsel %vm27_vm0, %v17_v10, 0.0  ;;  %v57_v25 = vsel %vm29_vm1, %v18_v11, 0.0  ;;  %v25_v26 = vld [vmem:[%s280_s0 + $0x70] sm:$0xff]  ;;  %v26_v27 = vld [vmem:[%s280_s0 + $0x78] sm:$0x1]  ;;  %v65_v28 = vsel %vm27_vm0, %v19_v14, 0.0  ;;  %v49_v30 = vadd.f32 %v48_v20, %v47_v19 }
   0x7   :  { %v66_v29 = vsel %vm29_vm1, %v20_v15, 0.0  ;;  %v74_v31 = vsel %vm27_vm0, %v21_v16, 0.0  ;;  %v75_v32 = vsel %vm29_vm1, %v22_v17, 0.0  ;;  %v32_v33 = vrot.slane %v31_v18, 4 }
   0x8   :  { %v58_v34 = vadd.f32 %v57_v25, %v56_v24  ;;  %v83_v35 = vsel %vm27_vm0, %v23_v21, 0.0  ;;  %v84_v36 = vsel %vm29_vm1, %v24_v22, 0.0  ;;  %v41_v37 = vrot.slane %v40_v23, 4 }
   0x9   :  { %v67_v38 = vadd.f32 %v66_v29, %v65_v28  ;;  %v92_v39 = vsel %vm27_vm0, %v25_v26, 0.0  ;;  %v93_v40 = vsel %vm29_vm1, %v26_v27, 0.0  ;;  %v76_v41 = vadd.f32 %v75_v32, %v74_v31 }
   0xa   :  { %v50_v42 = vrot.slane %v49_v30, 4  ;;  %v85_v43 = vadd.f32 %v84_v36, %v83_v35  ;;  %v59_v44 = vrot.slane %v58_v34, 4  ;;  %v94_v45 = vadd.f32 %v93_v40, %v92_v39 }
   0xb   :  { %v33_v46 = vadd.f32 %v32_v33, %v31_v18  ;;  %v42_v47 = vadd.f32 %v41_v37, %v40_v23  ;;  %v68_v48 = vrot.slane %v67_v38, 4  ;;  %v77_v49 = vrot.slane %v76_v41, 4 }
   0xc   :  { %v51_v50 = vadd.f32 %v50_v42, %v49_v30  ;;  %v86_v51 = vrot.slane %v85_v43, 4  ;;  %v60_v52 = vadd.f32 %v59_v44, %v58_v34  ;;  %v95_v53 = vrot.slane %v94_v45, 4 }
   0xd   :  { %v34_v55 = vrot.slane %v33_v46, 2  ;;  %v43_v56 = vrot.slane %v42_v47, 2  ;;  %v69_v57 = vadd.f32 %v68_v48, %v67_v38  ;;  %v78_v58 = vadd.f32 %v77_v49, %v76_v41 }
   0xe   :  { %v52_v62 = vrot.slane %v51_v50, 2  ;;  %v87_v63 = vadd.f32 %v86_v51, %v85_v43  ;;  %v61_v1 = vrot.slane %v60_v52, 2  ;;  %v96_v2 = vadd.f32 %v95_v53, %v94_v45 }
   0xf   :  { %v70_v4 = vrot.slane %v69_v57, 2  ;;  %v44_v6 = vadd.f32 %v43_v56, %v42_v47  ;;  %v79_v7 = vrot.slane %v78_v58, 2  ;;  %v35_v11 = vadd.f32 %v34_v55, %v33_v46 }
  0x10   :  { %v53_v9 = vadd.f32 %v52_v62, %v51_v50  ;;  %v88_v10 = vrot.slane %v87_v63, 2  ;;  %v62_v12 = vadd.f32 %v61_v1, %v60_v52  ;;  %v97_v13 = vrot.slane %v96_v2, 2 }
  0x11   :  { %v71_v14 = vadd.f32 %v70_v4, %v69_v57  ;;  %v45_v15 = vrot.slane %v44_v6, 1  ;;  %v80_v16 = vadd.f32 %v79_v7, %v78_v58  ;;  %v36_v19 = vrot.slane %v35_v11, 1 }
  0x12   :  { %v54_v17 = vrot.slane %v53_v9, 1  ;;  %v89_v18 = vadd.f32 %v88_v10, %v87_v63  ;;  %v63_v20 = vrot.slane %v62_v12, 1  ;;  %v98_v21 = vadd.f32 %v97_v13, %v96_v2 }
  0x13   :  { %v72_v22 = vrot.slane %v71_v14, 1  ;;  %v46_v23 = vadd.f32 %v45_v15, %v44_v6  ;;  %v81_v24 = vrot.slane %v80_v16, 1  ;;  %v37_v28 = vadd.f32 %v36_v19, %v35_v11 }
  0x14   :  { %v55_v25 = vadd.f32 %v54_v17, %v53_v9  ;;  %v90_v26 = vrot.slane %v89_v18, 1  ;;  %v64_v29 = vadd.f32 %v63_v20, %v62_v12  ;;  %v99_v30 = vrot.slane %v98_v21, 1 }
  0x15   :  { %v73_v32 = vadd.f32 %v72_v22, %v71_v14  ;;  %v82_v34 = vadd.f32 %v81_v24, %v80_v16  ;;  %vm155_vm5 = vcmask 1044484   ;;  %vm158_vm6 = vcmask 1045509  }
  0x16   :  { %v91_v37 = vadd.f32 %v90_v26, %v89_v18  ;;  %v100_v40 = vadd.f32 %v99_v30, %v98_v21  ;;  %vm161_vm7 = vcmask 1046534   ;;  %vm164_vm8 = vcmask 1047559  }
  0x7d   :  { %v105_v54 = vpop.permute.xlu0 %104 }
  0x7e   :  { %v106_v59 = vrot.slane %v105_v54, 1  ;;  %v107_v60 = vrot.slane %v105_v54, 2  ;;  %v108_v61 = vrot.slane %v105_v54, 3  ;;  %v109_v0 = vrot.slane %v105_v54, 4 }
  0x7f   :  { %174 = vrcp.f32 %v105_v54  ;;  %v110_v3 = vrot.slane %v105_v54, 5  ;;  %v111_v5 = vrot.slane %v105_v54, 6  ;;  %v112_v8 = vrot.slane %v105_v54, 7 }
  0x80   :  { %176 = vrcp.f32 %v106_v59 }
  0x81   :  { %178 = vrcp.f32 %v107_v60 }
  0x82   :  { %180 = vrcp.f32 %v108_v61 }
  0x83   :  { %182 = vrcp.f32 %v109_v0 }
  0x84   :  { %184 = vrcp.f32 %v110_v3 }
  0x85   :  { %186 = vrcp.f32 %v111_v5 }
  0x86   :  { %188 = vrcp.f32 %v112_v8 }
  0x8c   :  { %v175_v27 = vpop.eup %174 }
  0x8d   :  { %v177_v31 = vpop.eup %176  ;;  %v122_v41 = vmul.f32 %v175_v27, %v37_v28 }
  0x8e   :  { %v179_v33 = vpop.eup %178  ;;  %v124_v35 = vmul.f32 %v177_v31, %v46_v23 }
  0x8f   :  { %v181_v36 = vpop.eup %180  ;;  %v126_v38 = vmul.f32 %v179_v33, %v55_v25 }
  0x90   :  { %v183_v39 = vpop.eup %182  ;;  %v128_v42 = vmul.f32 %v181_v36, %v64_v29  ;;  %v145_v43 = vrot.slane %v124_v35, 7 }
  0x91   :  { %v185_v44 = vpop.eup %184  ;;  %v130_v45 = vmul.f32 %v183_v39, %v73_v32  ;;  %v148_v46 = vrot.slane %v126_v38, 6 }
  0x92   :  { %v187_v47 = vpop.eup %186  ;;  %v132_v48 = vmul.f32 %v185_v44, %v82_v34  ;;  %v147_v49 = vsel %vm146_vm2, %v145_v43, %v122_v41  ;;  %v151_v50 = vrot.slane %v128_v42, 5 }
  0x93   :  { %v189_v51 = vpop.eup %188  ;;  %v134_v52 = vmul.f32 %v187_v47, %v91_v37  ;;  %v150_v53 = vsel %vm149_vm3, %v148_v46, %v147_v49  ;;  %v154_v54 = vrot.slane %v130_v45, 4 }
  0x94   :  { %v136_v55 = vmul.f32 %v189_v51, %v100_v40  ;;  %v153_v56 = vsel %vm152_vm4, %v151_v50, %v150_v53  ;;  %v157_v57 = vrot.slane %v132_v48, 3 }
  0x95   :  { %v156_v58 = vsel %vm155_vm5, %v154_v54, %v153_v56  ;;  %v160_v59 = vrot.slane %v134_v52, 2 }
  0x96   :  { %v159_v60 = vsel %vm158_vm6, %v157_v57, %v156_v58  ;;  %v163_v61 = vrot.slane %v136_v55, 1 }
  0x97   :  { %v162_v62 = vsel %vm161_vm7, %v160_v59, %v159_v60 }
  0x98   :  { %v165_v63 = vsel %vm164_vm8, %v163_v61, %v162_v62 }
  0x99   :  { %167 = vst.msk [vmem:[%s281_s2] sm:$0xff] %vm27_vm0, %v165_v63 }

// kernel: _lambda_.177
= control target key start
LH: loop header
LB: loop body
LE: loop exit
PB: predicated region body
PF: predicated region fallthrough
CT: control target
= control target key end

     0   :  { %v350_v0 = vmov 0.0   ;;  %vm351_vm0 = vmmov 0   ;;  %vm88_vm1 = vcmask 130048   ;;  %vm94_vm2 = vcmask 122880   ;;  %s561_s2 = inlined_call_operand.vmem [shape: f32[16,16], index: 2, kind: input, shape index: {}]   ;;  %s562_s0 = inlined_call_operand.vmem [shape: f32[8,25,16], index: 0, kind: input, shape index: {}]   ;;  %s563_s1 = inlined_call_operand.vmem [shape: f32[25,16], index: 1, kind: input, shape index: {}]   ;;  %s564_s3 = inlined_call_operand.vmem [shape: f32[1,16], index: 3, kind: input, shape index: {}]   ;;  %s565_s4 = inlined_call_operand.vmem [shape: f32[1,16], index: 4, kind: input, shape index: {}]   ;;  %s566_s5 = inlined_call_operand.vmem [shape: f32[8,16], index: 5, kind: output, shape index: {}]  }
   0x1   :  { %339 = vmatprep.subr.mxu0 %v350_v0  ;;  %v195_v1 = vld [vmem:[%s561_s2 + $0x8] sm:$0xff]  ;;  %v194_v2 = vld [vmem:[%s561_s2] sm:$0xff]  ;;  %343 = vmatprep.mubr.msk.f32.mxu0 %vm351_vm0, %v350_v0  ;;  %v22_v6 = vld [vmem:[%s562_s0 + $0x10] sm:$0xff]  ;;  %vm204_vm3 = vcmask 1041409   ;;  %vm206_vm4 = vcmask 1042434   ;;  %vm208_vm5 = vcmask 1043459  }
   0x2   :  { %340 = vmatpush3.msra.mxu0 %v195_v1  ;;  %v20_v3 = vld [vmem:[%s562_s0] sm:$0xff]  ;;  %v21_v4 = vld [vmem:[%s562_s0 + $0x8] sm:$0xff]  ;;  %v23_v7 = vld [vmem:[%s562_s0 + $0x18] sm:$0x1]  ;;  %vm210_vm6 = vcmask 1044484   ;;  %vm212_vm7 = vcmask 1045509  }
   0x3   :  { %341 = vmatprep.subr.mxu0 %v350_v0  ;;  %v24_v5 = vld [vmem:[%s562_s0 + $0x20] sm:$0xff]  ;;  %v25_v8 = vld [vmem:[%s562_s0 + $0x28] sm:$0xff]  ;;  %v26_v9 = vld [vmem:[%s562_s0 + $0x30] sm:$0xff]  ;;  %vm214_vm8 = vcmask 1046534   ;;  %vm216_vm9 = vcmask 1047559  }
   0x4   :  { %342 = vmatpush3.msra.mxu0 %v194_v2  ;;  %v27_v10 = vld [vmem:[%s562_s0 + $0x38] sm:$0x1]  ;;  %v28_v11 = vld [vmem:[%s562_s0 + $0x40] sm:$0xff]  ;;  %v29_v12 = vld [vmem:[%s562_s0 + $0x48] sm:$0xff] }
   0x5   :  { %v30_v13 = vld [vmem:[%s562_s0 + $0x50] sm:$0xff]  ;;  %v31_v14 = vld [vmem:[%s562_s0 + $0x58] sm:$0x1]  ;;  %v32_v15 = vld [vmem:[%s562_s0 + $0x60] sm:$0xff] }
   0x6   :  { %v33_v16 = vld [vmem:[%s562_s0 + $0x68] sm:$0xff]  ;;  %v34_v17 = vld [vmem:[%s562_s0 + $0x70] sm:$0xff]  ;;  %v35_v18 = vld [vmem:[%s562_s0 + $0x78] sm:$0x1] }
   0x7   :  { %v36_v19 = vld [vmem:[%s562_s0 + $0x80] sm:$0xff]  ;;  %v37_v20 = vld [vmem:[%s562_s0 + $0x88] sm:$0xff]  ;;  %v38_v21 = vld [vmem:[%s562_s0 + $0x90] sm:$0xff] }
   0x8   :  { %v52_v22 = vld [vmem:[%s563_s1] sm:$0xff]  ;;  %v53_v23 = vld [vmem:[%s563_s1 + $0x8] sm:$0xff]  ;;  %v39_v24 = vld [vmem:[%s562_s0 + $0x98] sm:$0x1] }
   0x9   :  { %v54_v25 = vld [vmem:[%s563_s1 + $0x10] sm:$0xff]  ;;  %v55_v26 = vld [vmem:[%s563_s1 + $0x18] sm:$0x1]  ;;  %v56_v27 = vmul.f32 %v52_v22, %v20_v3  ;;  %v57_v28 = vmul.f32 %v53_v23, %v21_v4  ;;  %v60_v29 = vmul.f32 %v52_v22, %v24_v5  ;;  %v61_v30 = vmul.f32 %v53_v23, %v25_v8  ;;  %v40_v31 = vld [vmem:[%s562_s0 + $0xa0] sm:$0xff] }
   0xa   :  { %v41_v32 = vld [vmem:[%s562_s0 + $0xa8] sm:$0xff]  ;;  %v42_v33 = vld [vmem:[%s562_s0 + $0xb0] sm:$0xff]  ;;  %v58_v34 = vmul.f32 %v54_v25, %v22_v6  ;;  %v59_v35 = vmul.f32 %v55_v26, %v23_v7  ;;  %v62_v36 = vmul.f32 %v54_v25, %v26_v9  ;;  %v63_v37 = vmul.f32 %v55_v26, %v27_v10  ;;  %v43_v38 = vld [vmem:[%s562_s0 + $0xb8] sm:$0x1] }
   0xb   :  { %v44_v39 = vld [vmem:[%s562_s0 + $0xc0] sm:$0xff]  ;;  %v45_v40 = vld [vmem:[%s562_s0 + $0xc8] sm:$0xff]  ;;  %v64_v41 = vmul.f32 %v52_v22, %v28_v11  ;;  %v65_v42 = vmul.f32 %v53_v23, %v29_v12  ;;  %v66_v43 = vmul.f32 %v54_v25, %v30_v13  ;;  %v67_v44 = vmul.f32 %v55_v26, %v31_v14  ;;  %v46_v45 = vld [vmem:[%s562_s0 + $0xd0] sm:$0xff] }
   0xc   :  { %v47_v46 = vld [vmem:[%s562_s0 + $0xd8] sm:$0x1]  ;;  %v48_v47 = vld [vmem:[%s562_s0 + $0xe0] sm:$0xff]  ;;  %v68_v48 = vmul.f32 %v52_v22, %v32_v15  ;;  %v69_v49 = vmul.f32 %v53_v23, %v33_v16  ;;  %v70_v50 = vmul.f32 %v54_v25, %v34_v17  ;;  %v71_v51 = vmul.f32 %v55_v26, %v35_v18  ;;  %v49_v52 = vld [vmem:[%s562_s0 + $0xe8] sm:$0xff] }
   0xd   :  { %v50_v53 = vld [vmem:[%s562_s0 + $0xf0] sm:$0xff]  ;;  %v51_v54 = vld [vmem:[%s562_s0 + $0xf8] sm:$0x1]  ;;  %v72_v55 = vmul.f32 %v52_v22, %v36_v19  ;;  %v73_v56 = vmul.f32 %v53_v23, %v37_v20  ;;  %v74_v57 = vmul.f32 %v54_v25, %v38_v21  ;;  %v75_v58 = vmul.f32 %v55_v26, %v39_v24 }
   0xe   :  { %v76_v59 = vmul.f32 %v52_v22, %v40_v31  ;;  %v77_v60 = vmul.f32 %v53_v23, %v41_v32  ;;  %v78_v61 = vmul.f32 %v54_v25, %v42_v33  ;;  %v79_v62 = vmul.f32 %v55_v26, %v43_v38 }
   0xf   :  { %v80_v63 = vmul.f32 %v52_v22, %v44_v39  ;;  %v81_v0 = vmul.f32 %v53_v23, %v45_v40  ;;  %v496_v1 = vmul.f32 %v54_v25, %v46_v45  ;;  %v498_v2 = vmul.f32 %v55_v26, %v47_v46 }
  0x10   :  { %v500_v3 = vmul.f32 %v52_v22, %v48_v47  ;;  %v502_v4 = vmul.f32 %v53_v23, %v49_v52  ;;  %v504_v5 = vmul.f32 %v54_v25, %v50_v53  ;;  %v506_v6 = vmul.f32 %v55_v26, %v51_v54 }
  0x11   :  { %v89_v7 = vsel %vm88_vm1, %v56_v27, 0.0  ;;  %v90_v8 = vsel %vm88_vm1, %v57_v28, 0.0  ;;  %v92_v9 = vsel %vm88_vm1, %v58_v34, 0.0  ;;  %v95_v10 = vsel %vm94_vm2, %v59_v35, 0.0 }
  0x12   :  { %v91_v11 = vadd.f32 %v90_v8, %v89_v7  ;;  %v103_v12 = vsel %vm88_vm1, %v60_v29, 0.0  ;;  %v104_v13 = vsel %vm88_vm1, %v61_v30, 0.0  ;;  %v106_v14 = vsel %vm88_vm1, %v62_v36, 0.0 }
  0x13   :  { %v105_v15 = vadd.f32 %v104_v13, %v103_v12  ;;  %v108_v16 = vsel %vm94_vm2, %v63_v37, 0.0  ;;  %v116_v17 = vsel %vm88_vm1, %v64_v41, 0.0  ;;  %v117_v18 = vsel %vm88_vm1, %v65_v42, 0.0 }
  0x14   :  { %v93_v19 = vadd.f32 %v92_v9, %v91_v11  ;;  %v118_v20 = vadd.f32 %v117_v18, %v116_v17  ;;  %v119_v21 = vsel %vm88_vm1, %v66_v43, 0.0  ;;  %v121_v22 = vsel %vm94_vm2, %v67_v44, 0.0 }
  0x15   :  { %v107_v23 = vadd.f32 %v106_v14, %v105_v15  ;;  %v129_v24 = vsel %vm88_vm1, %v68_v48, 0.0  ;;  %v130_v25 = vsel %vm88_vm1, %v69_v49, 0.0  ;;  %v132_v26 = vsel %vm88_vm1, %v70_v50, 0.0 }
  0x16   :  { %v96_v27 = vadd.f32 %v95_v10, %v93_v19  ;;  %v120_v28 = vadd.f32 %v119_v21, %v118_v20  ;;  %v131_v29 = vadd.f32 %v130_v25, %v129_v24  ;;  %v134_v30 = vsel %vm94_vm2, %v71_v51, 0.0 }
  0x17   :  { %v109_v31 = vadd.f32 %v108_v16, %v107_v23  ;;  %v142_v32 = vsel %vm88_vm1, %v72_v55, 0.0  ;;  %v143_v33 = vsel %vm88_vm1, %v73_v56, 0.0  ;;  %v145_v34 = vsel %vm88_vm1, %v74_v57, 0.0 }
  0x18   :  { %v97_v35 = vrot.slane %v96_v27, 4  ;;  %v122_v36 = vadd.f32 %v121_v22, %v120_v28  ;;  %v133_v37 = vadd.f32 %v132_v26, %v131_v29  ;;  %v144_v38 = vadd.f32 %v143_v33, %v142_v32 }
  0x19   :  { %v110_v39 = vrot.slane %v109_v31, 4  ;;  %v147_v40 = vsel %vm94_vm2, %v75_v58, 0.0  ;;  %v155_v41 = vsel %vm88_vm1, %v76_v59, 0.0  ;;  %v156_v42 = vsel %vm88_vm1, %v77_v60, 0.0 }
  0x1a   :  { %v98_v43 = vadd.f32 %v97_v35, %v96_v27  ;;  %v123_v44 = vrot.slane %v122_v36, 4  ;;  %v135_v45 = vadd.f32 %v134_v30, %v133_v37  ;;  %v146_v46 = vadd.f32 %v145_v34, %v144_v38 }
  0x1b   :  { %v111_v47 = vadd.f32 %v110_v39, %v109_v31  ;;  %v157_v48 = vadd.f32 %v156_v42, %v155_v41  ;;  %v158_v49 = vsel %vm88_vm1, %v78_v61, 0.0  ;;  %v160_v50 = vsel %vm94_vm2, %v79_v62, 0.0 }
  0x1c   :  { %v99_v51 = vrot.slane %v98_v43, 2  ;;  %v124_v52 = vadd.f32 %v123_v44, %v122_v36  ;;  %v136_v53 = vrot.slane %v135_v45, 4  ;;  %v148_v54 = vadd.f32 %v147_v40, %v146_v46 }
  0x1d   :  { %v112_v55 = vrot.slane %v111_v47, 2  ;;  %v159_v56 = vadd.f32 %v158_v49, %v157_v48  ;;  %v168_v57 = vsel %vm88_vm1, %v80_v63, 0.0  ;;  %v169_v58 = vsel %vm88_vm1, %v81_v0, 0.0 }
  0x1e   :  { %v100_v59 = vadd.f32 %v99_v51, %v98_v43  ;;  %v125_v60 = vrot.slane %v124_v52, 2  ;;  %v137_v7 = vadd.f32 %v136_v53, %v135_v45  ;;  %v149_v8 = vrot.slane %v148_v54, 4 }
  0x1f   :  { %v113_v9 = vadd.f32 %v112_v55, %v111_v47  ;;  %v161_v61 = vadd.f32 %v160_v50, %v159_v56  ;;  %v170_v10 = vadd.f32 %v169_v58, %v168_v57  ;;  %v171_v62 = vsel %vm88_vm1, %v496_v1, 0.0 }
  0x20   :  { %v101_v11 = vrot.slane %v100_v59, 1  ;;  %v126_v12 = vadd.f32 %v125_v60, %v124_v52  ;;  %v138_v13 = vrot.slane %v137_v7, 2  ;;  %v150_v14 = vadd.f32 %v149_v8, %v148_v54 }
  0x21   :  { %v114_v15 = vrot.slane %v113_v9, 1  ;;  %v162_v16 = vrot.slane %v161_v61, 4  ;;  %v172_v63 = vadd.f32 %v171_v62, %v170_v10  ;;  %v173_v0 = vsel %vm94_vm2, %v498_v2, 0.0 }
  0x22   :  { %v102_v17 = vadd.f32 %v101_v11, %v100_v59  ;;  %v127_v18 = vrot.slane %v126_v12, 1  ;;  %v139_v19 = vadd.f32 %v138_v13, %v137_v7  ;;  %v151_v20 = vrot.slane %v150_v14, 2 }
  0x23   :  { %v115_v21 = vadd.f32 %v114_v15, %v113_v9  ;;  %v163_v22 = vadd.f32 %v162_v16, %v161_v61  ;;  %v174_v23 = vadd.f32 %v173_v0, %v172_v63  ;;  %v181_v1 = vsel %vm88_vm1, %v500_v3, 0.0 }
  0x24   :  { %v128_v24 = vadd.f32 %v127_v18, %v126_v12  ;;  %v140_v25 = vrot.slane %v139_v19, 1  ;;  %v152_v26 = vadd.f32 %v151_v20, %v150_v14  ;;  %v182_v27 = vsel %vm88_vm1, %v502_v4, 0.0  ;;  %v334_v18 = vld [vmem:[%s564_s3] ss:$0 sm:$0xff] }
  0x25   :  { %v164_v28 = vrot.slane %v163_v22, 2  ;;  %v175_v29 = vrot.slane %v174_v23, 4  ;;  %v183_v30 = vadd.f32 %v182_v27, %v181_v1  ;;  %v184_v2 = vsel %vm88_vm1, %v504_v5, 0.0  ;;  %v335_v20 = vld [vmem:[%s565_s4] ss:$0 sm:$0xff] }
  0x26   :  { %v153_v31 = vrot.slane %v152_v26, 1  ;;  %v186_v32 = vsel %vm94_vm2, %v506_v6, 0.0  ;;  %v205_v33 = vsel %vm204_vm3, %v115_v21, %v102_v17  ;;  %v141_v34 = vadd.f32 %v140_v25, %v139_v19 }
  0x27   :  { %v165_v3 = vadd.f32 %v164_v28, %v163_v22  ;;  %v176_v35 = vadd.f32 %v175_v29, %v174_v23  ;;  %v185_v36 = vadd.f32 %v184_v2, %v183_v30  ;;  %v207_v37 = vsel %vm206_vm4, %v128_v24, %v205_v33 }
  0x28   :  { %v154_v40 = vadd.f32 %v153_v31, %v152_v26  ;;  %v209_v5 = vsel %vm208_vm5, %v141_v34, %v207_v37 }
  0x29   :  { %v166_v4 = vrot.slane %v165_v3, 1  ;;  %v177_v38 = vrot.slane %v176_v35, 2  ;;  %v187_v39 = vadd.f32 %v186_v32, %v185_v36 }
  0x2a   :  { %v211_v45 = vsel %vm210_vm6, %v154_v40, %v209_v5 }
  0x2b   :  { %v178_v41 = vadd.f32 %v177_v38, %v176_v35  ;;  %v188_v42 = vrot.slane %v187_v39, 4  ;;  %v167_v43 = vadd.f32 %v166_v4, %v165_v3 }
  0x2d   :  { %v179_v44 = vrot.slane %v178_v41, 1  ;;  %v189_v6 = vadd.f32 %v188_v42, %v187_v39  ;;  %v213_v49 = vsel %vm212_vm7, %v167_v43, %v211_v45 }
  0x2f   :  { %v190_v46 = vrot.slane %v189_v6, 2  ;;  %v180_v47 = vadd.f32 %v179_v44, %v178_v41 }
  0x31   :  { %v191_v48 = vadd.f32 %v190_v46, %v189_v6  ;;  %v215_v51 = vsel %vm214_vm8, %v180_v47, %v213_v49 }
  0x33   :  { %v192_v50 = vrot.slane %v191_v48, 1 }
  0x35   :  { %v193_v52 = vadd.f32 %v192_v50, %v191_v48 }
  0x37   :  { %v217_v53 = vsel %vm216_vm9, %v193_v52, %v215_v51 }
  0x38   :  { %344 = vmatmul.mubr.msk.f32.vlgmr.msra.gmra.mxu0 %vm88_vm1, %v217_v53 }
  0xf8   :  { %v286_v54 = vpop.f32.mrf.mxu0 }
  0xf9   :  { %v292_v55 = vsel %vm88_vm1, %v286_v54, 0.0 }
  0xfa   :  { %v293_v56 = vrot.slane %v292_v55, 4  ;;  %v345_v57 = vpop.f32.mrf.mxu0 }
  0xfc   :  { %v294_v58 = vadd.f32 %v293_v56, %v292_v55 }
  0xfe   :  { %v295_v59 = vrot.slane %v294_v58, 2 }
 0x100   :  { %v296_v60 = vadd.f32 %v295_v59, %v294_v58 }
 0x102   :  { %v297_v7 = vrot.slane %v296_v60, 1 }
 0x104   :  { %v298_v8 = vadd.f32 %v297_v7, %v296_v60 }
 0x106   :  { %v300_v9 = vmul.f32 0.125, %v298_v8 }
 0x108   :  { %v301_v61 = vsub.f32 %v286_v54, %v300_v9 }
 0x10a   :  { %v302_v10 = vmul.f32 %v301_v61, %v301_v61 }
 0x10c   :  { %v303_v62 = vsel %vm88_vm1, %v302_v10, 0.0 }
 0x10d   :  { %v304_v11 = vrot.slane %v303_v62, 4 }
 0x10f   :  { %v305_v12 = vadd.f32 %v304_v11, %v303_v62 }
 0x111   :  { %v306_v13 = vrot.slane %v305_v12, 2 }
 0x113   :  { %v307_v14 = vadd.f32 %v306_v13, %v305_v12 }
 0x115   :  { %v308_v15 = vrot.slane %v307_v14, 1 }
 0x117   :  { %v309_v16 = vadd.f32 %v308_v15, %v307_v14 }
 0x119   :  { %v310_v63 = vmul.f32 0.125, %v309_v16 }
 0x11b   :  { %v311_v0 = vadd.f32 1e-05, %v310_v63 }
 0x11d   :  { %348 = vrsqrt.f32 %v311_v0 }
 0x12a   :  { %v349_v17 = vpop.eup %348 }
 0x12b   :  { %v313_v19 = vmul.f32 %v349_v17, %v301_v61 }
 0x12d   :  { %v320_v21 = vmul.f32 %v334_v18, %v313_v19 }
 0x12f   :  { %v327_v22 = vadd.f32 %v335_v20, %v320_v21 }
 0x131   :  { %328 = vst.msk [vmem:[%s566_s5] sm:$0xff] %vm88_vm1, %v327_v22 }

// kernel: _lambda_.128
= control target key start
LH: loop header
LB: loop body
LE: loop exit
PB: predicated region body
PF: predicated region fallthrough
CT: control target
= control target key end

     0   :  { %vm150_vm0 = vcmask 64512   ;;  %vm152_vm1 = vcmask 57344   ;;  %vm473_vm2 = vcmask 1041409   ;;  %vm475_vm3 = vcmask 1042434   ;;  %s1122_s2 = inlined_call_operand.vmem [shape: f32[8,8], index: 2, kind: input, shape index: {}]   ;;  %s1123_s0 = inlined_call_operand.vmem [shape: f32[32,9,8], index: 0, kind: input, shape index: {}]   ;;  %s1124_s1 = inlined_call_operand.vmem [shape: f32[9,8], index: 1, kind: input, shape index: {}]   ;;  %s1125_s3 = inlined_call_operand.vmem [shape: f32[1,8], index: 3, kind: input, shape index: {}]   ;;  %s1126_s4 = inlined_call_operand.vmem [shape: f32[1,8], index: 4, kind: input, shape index: {}]   ;;  %s1127_s5 = inlined_call_operand.vmem [shape: f32[32,8], index: 5, kind: output, shape index: {}]  }
   0x1   :  { %v440_v0 = vld [vmem:[%s1122_s2] sm:$0xff]  ;;  %v22_v2 = vld [vmem:[%s1123_s0 + $0x10] sm:$0xff]  ;;  %v21_v3 = vld [vmem:[%s1123_s0 + $0x8] sm:$0x1]  ;;  %vm477_vm4 = vcmask 1043459   ;;  %vm479_vm5 = vcmask 1044484  }
   0x2   :  { %685 = vmatprep.subr.mxu0 %v440_v0  ;;  %693 = vmatprep.subr.mxu1 %v440_v0  ;;  %v20_v1 = vld [vmem:[%s1123_s0] sm:$0xff]  ;;  %v23_v4 = vld [vmem:[%s1123_s0 + $0x18] sm:$0x1]  ;;  %v25_v6 = vld [vmem:[%s1123_s0 + $0x28] sm:$0x1]  ;;  %vm481_vm6 = vcmask 1045509  }
   0x3   :  { %686 = vmatpush3.msra.mxu0 %v440_v0  ;;  %694 = vmatpush3.msra.mxu1 %v440_v0  ;;  %v24_v5 = vld [vmem:[%s1123_s0 + $0x20] sm:$0xff]  ;;  %v26_v7 = vld [vmem:[%s1123_s0 + $0x30] sm:$0xff]  ;;  %v27_v8 = vld [vmem:[%s1123_s0 + $0x38] sm:$0x1]  ;;  %vm483_vm7 = vcmask 1046534   ;;  %vm485_vm8 = vcmask 1047559  }
   0x4   :  { %v28_v9 = vld [vmem:[%s1123_s0 + $0x40] sm:$0xff]  ;;  %v29_v10 = vld [vmem:[%s1123_s0 + $0x48] sm:$0x1]  ;;  %v30_v11 = vld [vmem:[%s1123_s0 + $0x50] sm:$0xff] }
   0x5   :  { %v31_v12 = vld [vmem:[%s1123_s0 + $0x58] sm:$0x1]  ;;  %v32_v13 = vld [vmem:[%s1123_s0 + $0x60] sm:$0xff]  ;;  %v33_v14 = vld [vmem:[%s1123_s0 + $0x68] sm:$0x1] }
   0x6   :  { %v775_v15 = vld [vmem:[%s1124_s1] sm:$0xff]  ;;  %v34_v16 = vld [vmem:[%s1123_s0 + $0x70] sm:$0xff]  ;;  %v35_v17 = vld [vmem:[%s1123_s0 + $0x78] sm:$0x1] }
   0x7   :  { %v786_v18 = vld [vmem:[%s1124_s1 + $0x8] sm:$0x1]  ;;  %v86_v19 = vmul.f32 %v775_v15, %v20_v1  ;;  %v88_v20 = vmul.f32 %v775_v15, %v22_v2  ;;  %v90_v21 = vmul.f32 %v775_v15, %v24_v5  ;;  %v92_v22 = vmul.f32 %v775_v15, %v26_v7 }
   0x8   :  { %v87_v23 = vmul.f32 %v786_v18, %v21_v3  ;;  %v89_v24 = vmul.f32 %v786_v18, %v23_v4  ;;  %v91_v25 = vmul.f32 %v786_v18, %v25_v6  ;;  %v93_v26 = vmul.f32 %v786_v18, %v27_v8 }
   0x9   :  { %v94_v27 = vmul.f32 %v775_v15, %v28_v9  ;;  %v95_v28 = vmul.f32 %v786_v18, %v29_v10  ;;  %v96_v29 = vmul.f32 %v775_v15, %v30_v11  ;;  %v97_v30 = vmul.f32 %v786_v18, %v31_v12 }
   0xa   :  { %v98_v31 = vmul.f32 %v775_v15, %v32_v13  ;;  %v99_v32 = vmul.f32 %v786_v18, %v33_v14  ;;  %v100_v33 = vmul.f32 %v775_v15, %v34_v16  ;;  %v101_v34 = vmul.f32 %v786_v18, %v35_v17 }
   0xb   :  { %v151_v35 = vsel %vm150_vm0, %v86_v19, 0.0  ;;  %v153_v36 = vsel %vm152_vm1, %v87_v23, 0.0  ;;  %v161_v37 = vsel %vm150_vm0, %v88_v20, 0.0  ;;  %v162_v38 = vsel %vm152_vm1, %v89_v24, 0.0 }
   0xc   :  { %v154_v39 = vadd.f32 %v153_v36, %v151_v35  ;;  %v163_v40 = vadd.f32 %v162_v38, %v161_v37  ;;  %v170_v41 = vsel %vm150_vm0, %v90_v21, 0.0  ;;  %v171_v42 = vsel %vm152_vm1, %v91_v25, 0.0  ;;  %v52_v25 = vld [vmem:[%s1123_s0 + $0x100] sm:$0xff]  ;;  %v54_v35 = vld [vmem:[%s1123_s0 + $0x110] sm:$0xff] }
   0xd   :  { %v172_v43 = vadd.f32 %v171_v42, %v170_v41  ;;  %v179_v44 = vsel %vm150_vm0, %v92_v22, 0.0  ;;  %v180_v45 = vsel %vm152_vm1, %v93_v26, 0.0  ;;  %v188_v46 = vsel %vm150_vm0, %v94_v27, 0.0 }
   0xe   :  { %v155_v47 = vrot.slane %v154_v39, 4  ;;  %v164_v48 = vrot.slane %v163_v40, 4  ;;  %v181_v49 = vadd.f32 %v180_v45, %v179_v44  ;;  %v189_v50 = vsel %vm152_vm1, %v95_v28, 0.0  ;;  %v56_v45 = vld [vmem:[%s1123_s0 + $0x120] sm:$0xff] }
   0xf   :  { %v173_v51 = vrot.slane %v172_v43, 4  ;;  %v190_v52 = vadd.f32 %v189_v50, %v188_v46  ;;  %v197_v53 = vsel %vm150_vm0, %v96_v29, 0.0  ;;  %v198_v54 = vsel %vm152_vm1, %v97_v30, 0.0  ;;  %v57_v46 = vld [vmem:[%s1123_s0 + $0x128] sm:$0x1] }
  0x10   :  { %v156_v55 = vadd.f32 %v155_v47, %v154_v39  ;;  %v165_v56 = vadd.f32 %v164_v48, %v163_v40  ;;  %v182_v57 = vrot.slane %v181_v49, 4  ;;  %v199_v58 = vadd.f32 %v198_v54, %v197_v53  ;;  %v55_v39 = vld [vmem:[%s1123_s0 + $0x118] sm:$0x1]  ;;  %v58_v47 = vld [vmem:[%s1123_s0 + $0x130] sm:$0xff] }
  0x11   :  { %v174_v59 = vadd.f32 %v173_v51, %v172_v43  ;;  %v191_v60 = vrot.slane %v190_v52, 4  ;;  %v206_v61 = vsel %vm150_vm0, %v98_v31, 0.0  ;;  %v207_v62 = vsel %vm152_vm1, %v99_v32, 0.0  ;;  %v59_v50 = vld [vmem:[%s1123_s0 + $0x138] sm:$0x1]  ;;  %v60_v51 = vld [vmem:[%s1123_s0 + $0x140] sm:$0xff] }
  0x12   :  { %v157_v63 = vrot.slane %v156_v55, 2  ;;  %v166_v0 = vrot.slane %v165_v56, 2  ;;  %v183_v1 = vadd.f32 %v182_v57, %v181_v49  ;;  %v200_v2 = vrot.slane %v199_v58, 4 }
  0x13   :  { %v175_v3 = vrot.slane %v174_v59, 2  ;;  %v192_v4 = vadd.f32 %v191_v60, %v190_v52  ;;  %v208_v5 = vadd.f32 %v207_v62, %v206_v61  ;;  %v215_v6 = vsel %vm150_vm0, %v100_v33, 0.0  ;;  %v61_v52 = vld [vmem:[%s1123_s0 + $0x148] sm:$0x1]  ;;  %v64_v60 = vld [vmem:[%s1123_s0 + $0x160] sm:$0xff] }
  0x14   :  { %v158_v7 = vadd.f32 %v157_v63, %v156_v55  ;;  %v167_v8 = vadd.f32 %v166_v0, %v165_v56  ;;  %v184_v9 = vrot.slane %v183_v1, 2  ;;  %v201_v10 = vadd.f32 %v200_v2, %v199_v58  ;;  %v62_v58 = vld [vmem:[%s1123_s0 + $0x150] sm:$0xff]  ;;  %v65_v63 = vld [vmem:[%s1123_s0 + $0x168] sm:$0x1] }
  0x15   :  { %v176_v11 = vadd.f32 %v175_v3, %v174_v59  ;;  %v193_v12 = vrot.slane %v192_v4, 2  ;;  %v209_v13 = vrot.slane %v208_v5, 4  ;;  %v216_v14 = vsel %vm152_vm1, %v101_v34, 0.0  ;;  %v53_v34 = vld [vmem:[%s1123_s0 + $0x108] sm:$0x1]  ;;  %v66_v0 = vld [vmem:[%s1123_s0 + $0x170] sm:$0xff] }
  0x16   :  { %v159_v16 = vrot.slane %v158_v7, 1  ;;  %v168_v17 = vrot.slane %v167_v8, 1  ;;  %v185_v19 = vadd.f32 %v184_v9, %v183_v1  ;;  %v202_v20 = vrot.slane %v201_v10, 2  ;;  %v63_v59 = vld [vmem:[%s1123_s0 + $0x158] sm:$0x1] }
  0x17   :  { %v177_v21 = vrot.slane %v176_v11, 1  ;;  %v194_v22 = vadd.f32 %v193_v12, %v192_v4  ;;  %v210_v23 = vadd.f32 %v209_v13, %v208_v5  ;;  %v217_v24 = vadd.f32 %v216_v14, %v215_v6  ;;  %v67_v6 = vld [vmem:[%s1123_s0 + $0x178] sm:$0x1] }
  0x18   :  { %v160_v26 = vadd.f32 %v159_v16, %v158_v7  ;;  %v169_v27 = vadd.f32 %v168_v17, %v167_v8  ;;  %v186_v28 = vrot.slane %v185_v19, 1  ;;  %v203_v29 = vadd.f32 %v202_v20, %v201_v10 }
  0x19   :  { %v178_v30 = vadd.f32 %v177_v21, %v176_v11  ;;  %v195_v31 = vrot.slane %v194_v22, 1  ;;  %v211_v32 = vrot.slane %v210_v23, 2  ;;  %v218_v33 = vrot.slane %v217_v24, 4 }
  0x1a   :  { %v187_v36 = vadd.f32 %v186_v28, %v185_v19  ;;  %v204_v37 = vrot.slane %v203_v29, 1  ;;  %v474_v38 = vsel %vm473_vm2, %v169_v27, %v160_v26  ;;  %v118_v40 = vmul.f32 %v775_v15, %v52_v25 }
  0x1b   :  { %v196_v41 = vadd.f32 %v195_v31, %v194_v22  ;;  %v212_v42 = vadd.f32 %v211_v32, %v210_v23  ;;  %v219_v43 = vadd.f32 %v218_v33, %v217_v24  ;;  %v476_v44 = vsel %vm475_vm3, %v178_v30, %v474_v38 }
  0x1c   :  { %v205_v48 = vadd.f32 %v204_v37, %v203_v29  ;;  %v478_v49 = vsel %vm477_vm4, %v187_v36, %v476_v44  ;;  %v119_v53 = vmul.f32 %v786_v18, %v53_v34  ;;  %v120_v54 = vmul.f32 %v775_v15, %v54_v35 }
  0x1d   :  { %v213_v55 = vrot.slane %v212_v42, 1  ;;  %v220_v56 = vrot.slane %v219_v43, 2  ;;  %v480_v57 = vsel %vm479_vm5, %v196_v41, %v478_v49  ;;  %v121_v61 = vmul.f32 %v786_v18, %v55_v39 }
  0x1e   :  { %v482_v62 = vsel %vm481_vm6, %v205_v48, %v480_v57  ;;  %v122_v1 = vmul.f32 %v775_v15, %v56_v45  ;;  %v123_v2 = vmul.f32 %v786_v18, %v57_v46  ;;  %v124_v3 = vmul.f32 %v775_v15, %v58_v47 }
  0x1f   :  { %v214_v4 = vadd.f32 %v213_v55, %v212_v42  ;;  %v221_v5 = vadd.f32 %v220_v56, %v219_v43  ;;  %v125_v7 = vmul.f32 %v786_v18, %v59_v50  ;;  %v126_v8 = vmul.f32 %v775_v15, %v60_v51 }
  0x20   :  { %v127_v9 = vmul.f32 %v786_v18, %v61_v52  ;;  %v128_v10 = vmul.f32 %v775_v15, %v62_v58  ;;  %v129_v11 = vmul.f32 %v786_v18, %v63_v59  ;;  %v130_v12 = vmul.f32 %v775_v15, %v64_v60 }
  0x21   :  { %v222_v13 = vrot.slane %v221_v5, 1  ;;  %v484_v14 = vsel %vm483_vm7, %v214_v4, %v482_v62  ;;  %v131_v16 = vmul.f32 %v786_v18, %v65_v63  ;;  %v132_v17 = vmul.f32 %v775_v15, %v66_v0 }
  0x22   :  { %v133_v19 = vmul.f32 %v786_v18, %v67_v6  ;;  %v296_v20 = vsel %vm150_vm0, %v118_v40, 0.0  ;;  %v297_v21 = vsel %vm152_vm1, %v119_v53, 0.0  ;;  %v305_v22 = vsel %vm150_vm0, %v120_v54, 0.0 }
  0x23   :  { %v223_v23 = vadd.f32 %v222_v13, %v221_v5  ;;  %v298_v24 = vadd.f32 %v297_v21, %v296_v20  ;;  %v306_v25 = vsel %vm152_vm1, %v121_v61, 0.0  ;;  %v314_v26 = vsel %vm150_vm0, %v122_v1, 0.0 }
  0x24   :  { %v307_v27 = vadd.f32 %v306_v25, %v305_v22  ;;  %v315_v28 = vsel %vm152_vm1, %v123_v2, 0.0  ;;  %v323_v29 = vsel %vm150_vm0, %v124_v3, 0.0  ;;  %v324_v30 = vsel %vm152_vm1, %v125_v7, 0.0  ;;  %v36_v7 = vld [vmem:[%s1123_s0 + $0x80] sm:$0xff] }
  0x25   :  { %v486_v31 = vsel %vm485_vm8, %v223_v23, %v484_v14  ;;  %v299_v32 = vrot.slane %v298_v24, 4  ;;  %v316_v33 = vadd.f32 %v315_v28, %v314_v26  ;;  %v325_v34 = vadd.f32 %v324_v30, %v323_v29  ;;  %v39_v28 = vld [vmem:[%s1123_s0 + $0x98] sm:$0x1]  ;;  %v40_v29 = vld [vmem:[%s1123_s0 + $0xa0] sm:$0xff]  ;;  %v41_v30 = vld [vmem:[%s1123_s0 + $0xa8] sm:$0x1] }
  0x26   :  { %687 = vmatprep.mubr.msk.f32.mxu0 %vm150_vm0, %v486_v31  ;;  %v308_v35 = vrot.slane %v307_v27, 4  ;;  %v332_v36 = vsel %vm150_vm0, %v126_v8, 0.0  ;;  %v333_v37 = vsel %vm152_vm1, %v127_v9, 0.0  ;;  %v341_v38 = vsel %vm150_vm0, %v128_v10, 0.0 }
  0x27   :  { %v300_v39 = vadd.f32 %v299_v32, %v298_v24  ;;  %v317_v40 = vrot.slane %v316_v33, 4  ;;  %v326_v41 = vrot.slane %v325_v34, 4  ;;  %v334_v42 = vadd.f32 %v333_v37, %v332_v36 }
  0x28   :  { %v309_v43 = vadd.f32 %v308_v35, %v307_v27  ;;  %v342_v44 = vsel %vm152_vm1, %v129_v11, 0.0  ;;  %v350_v45 = vsel %vm150_vm0, %v130_v12, 0.0  ;;  %v351_v46 = vsel %vm152_vm1, %v131_v16, 0.0  ;;  %v44_v35 = vld [vmem:[%s1123_s0 + $0xc0] sm:$0xff] }
  0x29   :  { %v301_v47 = vrot.slane %v300_v39, 2  ;;  %v318_v48 = vadd.f32 %v317_v40, %v316_v33  ;;  %v327_v49 = vadd.f32 %v326_v41, %v325_v34  ;;  %v335_v50 = vrot.slane %v334_v42, 4  ;;  %v42_v33 = vld [vmem:[%s1123_s0 + $0xb0] sm:$0xff]  ;;  %v43_v34 = vld [vmem:[%s1123_s0 + $0xb8] sm:$0x1] }
  0x2a   :  { %v310_v51 = vrot.slane %v309_v43, 2  ;;  %v343_v52 = vadd.f32 %v342_v44, %v341_v38  ;;  %v352_v53 = vadd.f32 %v351_v46, %v350_v45  ;;  %v359_v54 = vsel %vm150_vm0, %v132_v17, 0.0  ;;  %v37_v17 = vld [vmem:[%s1123_s0 + $0x88] sm:$0x1]  ;;  %v47_v45 = vld [vmem:[%s1123_s0 + $0xd8] sm:$0x1] }
  0x2b   :  { %v302_v55 = vadd.f32 %v301_v47, %v300_v39  ;;  %v319_v56 = vrot.slane %v318_v48, 2  ;;  %v328_v57 = vrot.slane %v327_v49, 2  ;;  %v336_v58 = vadd.f32 %v335_v50, %v334_v42  ;;  %v45_v42 = vld [vmem:[%s1123_s0 + $0xc8] sm:$0x1]  ;;  %v48_v46 = vld [vmem:[%s1123_s0 + $0xe0] sm:$0xff] }
  0x2c   :  { %v311_v59 = vadd.f32 %v310_v51, %v309_v43  ;;  %v344_v60 = vrot.slane %v343_v52, 4  ;;  %v353_v61 = vrot.slane %v352_v53, 4  ;;  %v360_v62 = vsel %vm152_vm1, %v133_v19, 0.0  ;;  %v38_v19 = vld [vmem:[%s1123_s0 + $0x90] sm:$0xff] }
  0x2d   :  { %v303_v63 = vrot.slane %v302_v55, 1  ;;  %v320_v0 = vadd.f32 %v319_v56, %v318_v48  ;;  %v329_v1 = vadd.f32 %v328_v57, %v327_v49  ;;  %v337_v2 = vrot.slane %v336_v58, 2  ;;  %v46_v43 = vld [vmem:[%s1123_s0 + $0xd0] sm:$0xff] }
  0x2e   :  { %v312_v3 = vrot.slane %v311_v59, 1  ;;  %v345_v4 = vadd.f32 %v344_v60, %v343_v52  ;;  %v354_v5 = vadd.f32 %v353_v61, %v352_v53  ;;  %v361_v6 = vadd.f32 %v360_v62, %v359_v54  ;;  %v49_v53 = vld [vmem:[%s1123_s0 + $0xe8] sm:$0x1]  ;;  %v50_v54 = vld [vmem:[%s1123_s0 + $0xf0] sm:$0xff] }
  0x2f   :  { %v304_v8 = vadd.f32 %v303_v63, %v302_v55  ;;  %v321_v9 = vrot.slane %v320_v0, 1  ;;  %v330_v10 = vrot.slane %v329_v1, 1  ;;  %v338_v11 = vadd.f32 %v337_v2, %v336_v58  ;;  %v51_v55 = vld [vmem:[%s1123_s0 + $0xf8] sm:$0x1] }
  0x30   :  { %v313_v12 = vadd.f32 %v312_v3, %v311_v59  ;;  %v346_v13 = vrot.slane %v345_v4, 2  ;;  %v355_v14 = vrot.slane %v354_v5, 2  ;;  %v362_v16 = vrot.slane %v361_v6, 4 }
  0x31   :  { %v322_v20 = vadd.f32 %v321_v9, %v320_v0  ;;  %v331_v21 = vadd.f32 %v330_v10, %v329_v1  ;;  %v339_v22 = vrot.slane %v338_v11, 1  ;;  %v102_v23 = vmul.f32 %v775_v15, %v36_v7 }
  0x32   :  { %v347_v24 = vadd.f32 %v346_v13, %v345_v4  ;;  %v356_v25 = vadd.f32 %v355_v14, %v354_v5  ;;  %v363_v26 = vadd.f32 %v362_v16, %v361_v6  ;;  %v494_v27 = vsel %vm473_vm2, %v313_v12, %v304_v8 }
  0x33   :  { %v340_v31 = vadd.f32 %v339_v22, %v338_v11  ;;  %v495_v32 = vsel %vm475_vm3, %v322_v20, %v494_v27  ;;  %v103_v36 = vmul.f32 %v786_v18, %v37_v17  ;;  %v104_v37 = vmul.f32 %v775_v15, %v38_v19 }
  0x34   :  { %v348_v38 = vrot.slane %v347_v24, 1  ;;  %v357_v39 = vrot.slane %v356_v25, 1  ;;  %v364_v40 = vrot.slane %v363_v26, 2  ;;  %v496_v41 = vsel %vm477_vm4, %v331_v21, %v495_v32 }
  0x35   :  { %v497_v44 = vsel %vm479_vm5, %v340_v31, %v496_v41  ;;  %v105_v47 = vmul.f32 %v786_v18, %v39_v28  ;;  %v106_v48 = vmul.f32 %v775_v15, %v40_v29  ;;  %v107_v49 = vmul.f32 %v786_v18, %v41_v30 }
  0x36   :  { %v349_v50 = vadd.f32 %v348_v38, %v347_v24  ;;  %v358_v51 = vadd.f32 %v357_v39, %v356_v25  ;;  %v365_v52 = vadd.f32 %v364_v40, %v363_v26  ;;  %v108_v56 = vmul.f32 %v775_v15, %v42_v33 }
  0x37   :  { %v109_v57 = vmul.f32 %v786_v18, %v43_v34  ;;  %v110_v58 = vmul.f32 %v775_v15, %v44_v35  ;;  %v111_v59 = vmul.f32 %v786_v18, %v45_v42  ;;  %v112_v60 = vmul.f32 %v775_v15, %v46_v43 }
  0x38   :  { %v366_v61 = vrot.slane %v365_v52, 1  ;;  %v498_v62 = vsel %vm481_vm6, %v349_v50, %v497_v44  ;;  %v113_v63 = vmul.f32 %v786_v18, %v47_v45  ;;  %v114_v0 = vmul.f32 %v775_v15, %v48_v46 }
  0x39   :  { %v499_v1 = vsel %vm483_vm7, %v358_v51, %v498_v62  ;;  %v115_v2 = vmul.f32 %v786_v18, %v49_v53  ;;  %v116_v3 = vmul.f32 %v775_v15, %v50_v54  ;;  %v117_v4 = vmul.f32 %v786_v18, %v51_v55 }
  0x3a   :  { %v367_v5 = vadd.f32 %v366_v61, %v365_v52  ;;  %v224_v6 = vsel %vm150_vm0, %v102_v23, 0.0  ;;  %v225_v7 = vsel %vm152_vm1, %v103_v36, 0.0  ;;  %v233_v8 = vsel %vm150_vm0, %v104_v37, 0.0 }
  0x3b   :  { %v226_v9 = vadd.f32 %v225_v7, %v224_v6  ;;  %v234_v10 = vsel %vm152_vm1, %v105_v47, 0.0  ;;  %v242_v11 = vsel %vm150_vm0, %v106_v48, 0.0  ;;  %v243_v12 = vsel %vm152_vm1, %v107_v49, 0.0 }
  0x3c   :  { %v500_v13 = vsel %vm485_vm8, %v367_v5, %v499_v1  ;;  %v235_v14 = vadd.f32 %v234_v10, %v233_v8  ;;  %v244_v16 = vadd.f32 %v243_v12, %v242_v11  ;;  %v251_v17 = vsel %vm150_vm0, %v108_v56, 0.0  ;;  %v70_v8 = vld [vmem:[%s1123_s0 + $0x190] sm:$0xff]  ;;  %v72_v10 = vld [vmem:[%s1123_s0 + $0x1a0] sm:$0xff] }
  0x3d   :  { %690 = vmatprep.mubr.msk.f32.mxu1 %vm150_vm0, %v500_v13  ;;  %v227_v19 = vrot.slane %v226_v9, 4  ;;  %v252_v20 = vsel %vm152_vm1, %v109_v57, 0.0  ;;  %v260_v21 = vsel %vm150_vm0, %v110_v58, 0.0  ;;  %v261_v22 = vsel %vm152_vm1, %v111_v59, 0.0  ;;  %v68_v59 = vld [vmem:[%s1123_s0 + $0x180] sm:$0xff] }
  0x3e   :  { %v236_v23 = vrot.slane %v235_v14, 4  ;;  %v245_v24 = vrot.slane %v244_v16, 4  ;;  %v253_v25 = vadd.f32 %v252_v20, %v251_v17  ;;  %v262_v26 = vadd.f32 %v261_v22, %v260_v21 }
  0x3f   :  { %v228_v27 = vadd.f32 %v227_v19, %v226_v9  ;;  %v269_v28 = vsel %vm150_vm0, %v112_v60, 0.0  ;;  %v270_v29 = vsel %vm152_vm1, %v113_v63, 0.0  ;;  %v278_v30 = vsel %vm150_vm0, %v114_v0, 0.0  ;;  %v69_v0 = vld [vmem:[%s1123_s0 + $0x188] sm:$0x1] }
  0x40   :  { %v237_v31 = vadd.f32 %v236_v23, %v235_v14  ;;  %v246_v32 = vadd.f32 %v245_v24, %v244_v16  ;;  %v254_v33 = vrot.slane %v253_v25, 4  ;;  %v263_v34 = vrot.slane %v262_v26, 4  ;;  %v71_v9 = vld [vmem:[%s1123_s0 + $0x198] sm:$0x1]  ;;  %v73_v16 = vld [vmem:[%s1123_s0 + $0x1a8] sm:$0x1] }
  0x41   :  { %v229_v35 = vrot.slane %v228_v27, 2  ;;  %v271_v36 = vadd.f32 %v270_v29, %v269_v28  ;;  %v279_v37 = vsel %vm152_vm1, %v115_v2, 0.0  ;;  %v287_v38 = vsel %vm150_vm0, %v116_v3, 0.0  ;;  %v74_v23 = vld [vmem:[%s1123_s0 + $0x1b0] sm:$0xff]  ;;  %v75_v24 = vld [vmem:[%s1123_s0 + $0x1b8] sm:$0x1] }
  0x42   :  { %v238_v39 = vrot.slane %v237_v31, 2  ;;  %v247_v40 = vrot.slane %v246_v32, 2  ;;  %v255_v41 = vadd.f32 %v254_v33, %v253_v25  ;;  %v264_v42 = vadd.f32 %v263_v34, %v262_v26  ;;  %v76_v25 = vld [vmem:[%s1123_s0 + $0x1c0] sm:$0xff]  ;;  %v78_v28 = vld [vmem:[%s1123_s0 + $0x1d0] sm:$0xff] }
  0x43   :  { %v230_v43 = vadd.f32 %v229_v35, %v228_v27  ;;  %v272_v44 = vrot.slane %v271_v36, 4  ;;  %v280_v45 = vadd.f32 %v279_v37, %v278_v30  ;;  %v288_v46 = vsel %vm152_vm1, %v117_v4, 0.0  ;;  %v77_v27 = vld [vmem:[%s1123_s0 + $0x1c8] sm:$0x1]  ;;  %v80_v37 = vld [vmem:[%s1123_s0 + $0x1e0] sm:$0xff] }
  0x44   :  { %v239_v47 = vadd.f32 %v238_v39, %v237_v31  ;;  %v248_v48 = vadd.f32 %v247_v40, %v246_v32  ;;  %v256_v49 = vrot.slane %v255_v41, 2  ;;  %v265_v50 = vrot.slane %v264_v42, 2  ;;  %v82_v39 = vld [vmem:[%s1123_s0 + $0x1f0] sm:$0xff]  ;;  %v83_v40 = vld [vmem:[%s1123_s0 + $0x1f8] sm:$0x1] }
  0x45   :  { %v231_v51 = vrot.slane %v230_v43, 1  ;;  %v273_v52 = vadd.f32 %v272_v44, %v271_v36  ;;  %v281_v53 = vrot.slane %v280_v45, 4  ;;  %v289_v54 = vadd.f32 %v288_v46, %v287_v38  ;;  %v79_v36 = vld [vmem:[%s1123_s0 + $0x1d8] sm:$0x1]  ;;  %v81_v38 = vld [vmem:[%s1123_s0 + $0x1e8] sm:$0x1] }
  0x46   :  { %v240_v55 = vrot.slane %v239_v47, 1  ;;  %v249_v56 = vrot.slane %v248_v48, 1  ;;  %v257_v57 = vadd.f32 %v256_v49, %v255_v41  ;;  %v266_v58 = vadd.f32 %v265_v50, %v264_v42 }
  0x47   :  { %v232_v60 = vadd.f32 %v231_v51, %v230_v43  ;;  %v274_v61 = vrot.slane %v273_v52, 2  ;;  %v282_v62 = vadd.f32 %v281_v53, %v280_v45  ;;  %v290_v63 = vrot.slane %v289_v54, 4 }
  0x48   :  { %v241_v1 = vadd.f32 %v240_v55, %v239_v47  ;;  %v250_v2 = vadd.f32 %v249_v56, %v248_v48  ;;  %v258_v3 = vrot.slane %v257_v57, 1  ;;  %v267_v4 = vrot.slane %v266_v58, 1 }
  0x49   :  { %v275_v5 = vadd.f32 %v274_v61, %v273_v52  ;;  %v283_v6 = vrot.slane %v282_v62, 2  ;;  %v291_v7 = vadd.f32 %v290_v63, %v289_v54  ;;  %v134_v11 = vmul.f32 %v775_v15, %v68_v59 }
  0x4a   :  { %v259_v12 = vadd.f32 %v258_v3, %v257_v57  ;;  %v268_v13 = vadd.f32 %v267_v4, %v266_v58  ;;  %v487_v14 = vsel %vm473_vm2, %v241_v1, %v232_v60  ;;  %v135_v17 = vmul.f32 %v786_v18, %v69_v0 }
  0x4b   :  { %v276_v19 = vrot.slane %v275_v5, 1  ;;  %v284_v20 = vadd.f32 %v283_v6, %v282_v62  ;;  %v292_v21 = vrot.slane %v291_v7, 2  ;;  %v488_v22 = vsel %vm475_vm3, %v250_v2, %v487_v14 }
  0x4c   :  { %v489_v26 = vsel %vm477_vm4, %v259_v12, %v488_v22  ;;  %v136_v29 = vmul.f32 %v775_v15, %v70_v8  ;;  %v137_v30 = vmul.f32 %v786_v18, %v71_v9  ;;  %v138_v31 = vmul.f32 %v775_v15, %v72_v10 }
  0x4d   :  { %v277_v32 = vadd.f32 %v276_v19, %v275_v5  ;;  %v285_v33 = vrot.slane %v284_v20, 1  ;;  %v293_v34 = vadd.f32 %v292_v21, %v291_v7  ;;  %v490_v35 = vsel %vm479_vm5, %v268_v13, %v489_v26 }
  0x4e   :  { %v139_v41 = vmul.f32 %v786_v18, %v73_v16  ;;  %v140_v42 = vmul.f32 %v775_v15, %v74_v23  ;;  %v141_v43 = vmul.f32 %v786_v18, %v75_v24  ;;  %v142_v44 = vmul.f32 %v775_v15, %v76_v25 }
  0x4f   :  { %v286_v45 = vadd.f32 %v285_v33, %v284_v20  ;;  %v294_v46 = vrot.slane %v293_v34, 1  ;;  %v491_v47 = vsel %vm481_vm6, %v277_v32, %v490_v35  ;;  %v143_v48 = vmul.f32 %v786_v18, %v77_v27 }
  0x50   :  { %v144_v49 = vmul.f32 %v775_v15, %v78_v28  ;;  %v145_v50 = vmul.f32 %v786_v18, %v79_v36  ;;  %v146_v51 = vmul.f32 %v775_v15, %v80_v37  ;;  %v147_v52 = vmul.f32 %v786_v18, %v81_v38 }
  0x51   :  { %v295_v53 = vadd.f32 %v294_v46, %v293_v34  ;;  %v492_v54 = vsel %vm483_vm7, %v286_v45, %v491_v47  ;;  %v148_v55 = vmul.f32 %v775_v15, %v82_v39  ;;  %v149_v56 = vmul.f32 %v786_v18, %v83_v40 }
  0x52   :  { %v368_v57 = vsel %vm150_vm0, %v134_v11, 0.0  ;;  %v369_v58 = vsel %vm152_vm1, %v135_v17, 0.0  ;;  %v377_v59 = vsel %vm150_vm0, %v136_v29, 0.0  ;;  %v378_v60 = vsel %vm152_vm1, %v137_v30, 0.0 }
  0x53   :  { %v493_v61 = vsel %vm485_vm8, %v295_v53, %v492_v54  ;;  %v370_v62 = vadd.f32 %v369_v58, %v368_v57  ;;  %v379_v63 = vadd.f32 %v378_v60, %v377_v59  ;;  %v386_v0 = vsel %vm150_vm0, %v138_v31, 0.0 }
  0x54   :  { %688 = vmatmul.mubr.msk.f32.vlgmr.msra.gmra.mxu0 %vm150_vm0, %v493_v61  ;;  %v387_v15 = vsel %vm152_vm1, %v139_v41, 0.0  ;;  %v395_v18 = vsel %vm150_vm0, %v140_v42, 0.0  ;;  %v396_v1 = vsel %vm152_vm1, %v141_v43, 0.0  ;;  %v404_v2 = vsel %vm150_vm0, %v142_v44, 0.0 }
  0x55   :  { %v371_v3 = vrot.slane %v370_v62, 4  ;;  %v380_v4 = vrot.slane %v379_v63, 4  ;;  %v388_v5 = vadd.f32 %v387_v15, %v386_v0  ;;  %v397_v6 = vadd.f32 %v396_v1, %v395_v18 }
  0x56   :  { %v405_v7 = vsel %vm152_vm1, %v143_v48, 0.0  ;;  %v413_v8 = vsel %vm150_vm0, %v144_v49, 0.0  ;;  %v414_v9 = vsel %vm152_vm1, %v145_v50, 0.0  ;;  %v422_v10 = vsel %vm150_vm0, %v146_v51, 0.0 }
  0x57   :  { %v372_v11 = vadd.f32 %v371_v3, %v370_v62  ;;  %v381_v12 = vadd.f32 %v380_v4, %v379_v63  ;;  %v389_v13 = vrot.slane %v388_v5, 4  ;;  %v398_v14 = vrot.slane %v397_v6, 4 }
  0x58   :  { %v406_v16 = vadd.f32 %v405_v7, %v404_v2  ;;  %v415_v17 = vadd.f32 %v414_v9, %v413_v8  ;;  %v423_v19 = vsel %vm152_vm1, %v147_v52, 0.0  ;;  %v431_v20 = vsel %vm150_vm0, %v148_v55, 0.0 }
  0x59   :  { %v373_v21 = vrot.slane %v372_v11, 2  ;;  %v382_v22 = vrot.slane %v381_v12, 2  ;;  %v390_v23 = vadd.f32 %v389_v13, %v388_v5  ;;  %v399_v24 = vadd.f32 %v398_v14, %v397_v6 }
  0x5a   :  { %v407_v25 = vrot.slane %v406_v16, 4  ;;  %v416_v26 = vrot.slane %v415_v17, 4  ;;  %v424_v27 = vadd.f32 %v423_v19, %v422_v10  ;;  %v432_v28 = vsel %vm152_vm1, %v149_v56, 0.0 }
  0x5b   :  { %v374_v29 = vadd.f32 %v373_v21, %v372_v11  ;;  %v383_v30 = vadd.f32 %v382_v22, %v381_v12  ;;  %v391_v31 = vrot.slane %v390_v23, 2  ;;  %v400_v32 = vrot.slane %v399_v24, 2 }
  0x5c   :  { %v408_v33 = vadd.f32 %v407_v25, %v406_v16  ;;  %v417_v34 = vadd.f32 %v416_v26, %v415_v17  ;;  %v425_v35 = vrot.slane %v424_v27, 4  ;;  %v433_v36 = vadd.f32 %v432_v28, %v431_v20 }
  0x5d   :  { %v375_v37 = vrot.slane %v374_v29, 1  ;;  %v384_v38 = vrot.slane %v383_v30, 1  ;;  %v392_v39 = vadd.f32 %v391_v31, %v390_v23  ;;  %v401_v40 = vadd.f32 %v400_v32, %v399_v24 }
  0x5e   :  { %v409_v41 = vrot.slane %v408_v33, 2  ;;  %v418_v42 = vrot.slane %v417_v34, 2  ;;  %v426_v43 = vadd.f32 %v425_v35, %v424_v27  ;;  %v434_v44 = vrot.slane %v433_v36, 4 }
  0x5f   :  { %v376_v45 = vadd.f32 %v375_v37, %v374_v29  ;;  %v385_v46 = vadd.f32 %v384_v38, %v383_v30  ;;  %v393_v47 = vrot.slane %v392_v39, 1  ;;  %v402_v48 = vrot.slane %v401_v40, 1 }
  0x60   :  { %v410_v49 = vadd.f32 %v409_v41, %v408_v33  ;;  %v419_v50 = vadd.f32 %v418_v42, %v417_v34  ;;  %v427_v51 = vrot.slane %v426_v43, 2  ;;  %v435_v52 = vadd.f32 %v434_v44, %v433_v36 }
  0x61   :  { %v394_v53 = vadd.f32 %v393_v47, %v392_v39  ;;  %v403_v54 = vadd.f32 %v402_v48, %v401_v40  ;;  %v501_v55 = vsel %vm473_vm2, %v385_v46, %v376_v45 }
  0x62   :  { %v411_v56 = vrot.slane %v410_v49, 1  ;;  %v420_v57 = vrot.slane %v419_v50, 1  ;;  %v428_v58 = vadd.f32 %v427_v51, %v426_v43  ;;  %v436_v59 = vrot.slane %v435_v52, 2  ;;  %v678_v51 = vld [vmem:[%s1125_s3] ss:$0 sm:$0xff] }
  0x63   :  { %v502_v60 = vsel %vm475_vm3, %v394_v53, %v501_v55 }
  0x64   :  { %v412_v61 = vadd.f32 %v411_v56, %v410_v49  ;;  %v421_v62 = vadd.f32 %v420_v57, %v419_v50  ;;  %v429_v63 = vrot.slane %v428_v58, 1  ;;  %v437_v0 = vadd.f32 %v436_v59, %v435_v52  ;;  %v679_v56 = vld [vmem:[%s1126_s4] ss:$0 sm:$0xff] }
  0x65   :  { %v503_v15 = vsel %vm477_vm4, %v403_v54, %v502_v60 }
  0x66   :  { %v430_v18 = vadd.f32 %v429_v63, %v428_v58  ;;  %v438_v1 = vrot.slane %v437_v0, 1  ;;  %v504_v2 = vsel %vm479_vm5, %v412_v61, %v503_v15 }
  0x67   :  { %v505_v3 = vsel %vm481_vm6, %v421_v62, %v504_v2 }
  0x68   :  { %v439_v4 = vadd.f32 %v438_v1, %v437_v0  ;;  %v506_v5 = vsel %vm483_vm7, %v430_v18, %v505_v3 }
  0x6a   :  { %v507_v6 = vsel %vm485_vm8, %v439_v4, %v506_v5 }
  0x6b   :  { %691 = vmatmul.mubr.msk.f32.vlgmr.msra.gmra.mxu1 %vm150_vm0, %v507_v6 }
 0x114   :  { %v689_v7 = vpop.f32.mrf.mxu0 }
 0x115   :  { %v604_v10 = vsel %vm150_vm0, %v689_v7, 0.0 }
 0x116   :  { %v582_v8 = vpop.f32.mrf.mxu0 }
 0x117   :  { %v603_v9 = vsel %vm150_vm0, %v582_v8, 0.0 }
 0x118   :  { %v605_v12 = vadd.f32 %v604_v10, %v603_v9 }
 0x12b   :  { %v692_v11 = vpop.f32.mrf.mxu1 }
 0x12c   :  { %v608_v17 = vsel %vm150_vm0, %v692_v11, 0.0 }
 0x12d   :  { %v592_v13 = vpop.f32.mrf.mxu1 }
 0x12e   :  { %v606_v14 = vsel %vm150_vm0, %v592_v13, 0.0 }
 0x12f   :  { %v607_v16 = vadd.f32 %v606_v14, %v605_v12 }
 0x131   :  { %v609_v19 = vadd.f32 %v608_v17, %v607_v16 }
 0x133   :  { %v610_v20 = vrot.slane %v609_v19, 4 }
 0x135   :  { %v611_v21 = vadd.f32 %v610_v20, %v609_v19 }
 0x137   :  { %v612_v22 = vrot.slane %v611_v21, 2 }
 0x139   :  { %v613_v23 = vadd.f32 %v612_v22, %v611_v21 }
 0x13b   :  { %v614_v24 = vrot.slane %v613_v23, 1 }
 0x13d   :  { %v615_v25 = vadd.f32 %v614_v24, %v613_v23 }
 0x13f   :  { %v617_v26 = vmul.f32 0.03125, %v615_v25 }
 0x141   :  { %v618_v27 = vsub.f32 %v582_v8, %v617_v26  ;;  %v619_v28 = vsub.f32 %v689_v7, %v617_v26  ;;  %v620_v29 = vsub.f32 %v592_v13, %v617_v26  ;;  %v621_v30 = vsub.f32 %v692_v11, %v617_v26 }
 0x143   :  { %v622_v31 = vmul.f32 %v618_v27, %v618_v27  ;;  %v623_v32 = vmul.f32 %v619_v28, %v619_v28  ;;  %v624_v33 = vmul.f32 %v620_v29, %v620_v29  ;;  %v625_v34 = vmul.f32 %v621_v30, %v621_v30 }
 0x145   :  { %v626_v35 = vsel %vm150_vm0, %v622_v31, 0.0  ;;  %v627_v36 = vsel %vm150_vm0, %v623_v32, 0.0  ;;  %v629_v38 = vsel %vm150_vm0, %v624_v33, 0.0  ;;  %v631_v40 = vsel %vm150_vm0, %v625_v34, 0.0 }
 0x146   :  { %v628_v37 = vadd.f32 %v627_v36, %v626_v35 }
 0x148   :  { %v630_v39 = vadd.f32 %v629_v38, %v628_v37 }
 0x14a   :  { %v632_v41 = vadd.f32 %v631_v40, %v630_v39 }
 0x14c   :  { %v633_v42 = vrot.slane %v632_v41, 4 }
 0x14e   :  { %v634_v43 = vadd.f32 %v633_v42, %v632_v41 }
 0x150   :  { %v635_v44 = vrot.slane %v634_v43, 2 }
 0x152   :  { %v636_v45 = vadd.f32 %v635_v44, %v634_v43 }
 0x154   :  { %v637_v46 = vrot.slane %v636_v45, 1 }
 0x156   :  { %v638_v47 = vadd.f32 %v637_v46, %v636_v45 }
 0x158   :  { %v639_v48 = vmul.f32 0.03125, %v638_v47 }
 0x15a   :  { %v640_v49 = vadd.f32 1e-05, %v639_v48 }
 0x15c   :  { %695 = vrsqrt.f32 %v640_v49 }
 0x169   :  { %v696_v50 = vpop.eup %695 }
 0x16a   :  { %v642_v52 = vmul.f32 %v696_v50, %v618_v27  ;;  %v643_v53 = vmul.f32 %v696_v50, %v619_v28  ;;  %v644_v54 = vmul.f32 %v696_v50, %v620_v29  ;;  %v645_v55 = vmul.f32 %v696_v50, %v621_v30 }
 0x16c   :  { %v652_v57 = vmul.f32 %v678_v51, %v642_v52  ;;  %v653_v58 = vmul.f32 %v678_v51, %v643_v53  ;;  %v654_v59 = vmul.f32 %v678_v51, %v644_v54  ;;  %v655_v60 = vmul.f32 %v678_v51, %v645_v55 }
 0x16e   :  { %v662_v61 = vadd.f32 %v679_v56, %v652_v57  ;;  %v663_v62 = vadd.f32 %v679_v56, %v653_v58  ;;  %v664_v63 = vadd.f32 %v679_v56, %v654_v59  ;;  %v665_v0 = vadd.f32 %v679_v56, %v655_v60 }
 0x170   :  { %666 = vst.msk [vmem:[%s1127_s5] sm:$0xff] %vm150_vm0, %v662_v61  ;;  %667 = vst.msk [vmem:[%s1127_s5 + $0x8] sm:$0xff] %vm150_vm0, %v663_v62 }
 0x171   :  { %668 = vst.msk [vmem:[%s1127_s5 + $0x10] sm:$0xff] %vm150_vm0, %v664_v63  ;;  %669 = vst.msk [vmem:[%s1127_s5 + $0x18] sm:$0xff] %vm150_vm0, %v665_v0 }

// kernel: _lambda_.181
= control target key start
LH: loop header
LB: loop body
LE: loop exit
PB: predicated region body
PF: predicated region fallthrough
CT: control target
= control target key end

     0   :  { %13 = vsyncpa [#allocation3], 0  ;;  %s176_s0 = inlined_call_operand.vmem [shape: f32[7], index: 0, kind: input, shape index: {}]   ;;  %s177_s1 = inlined_call_operand.vmem [shape: f32[1,128], index: 1, kind: input, shape index: {}]   ;;  %s178_s2 = inlined_call_operand.vmem [shape: f32[1,128], index: 2, kind: input, shape index: {}]   ;;  %s179_s3 = inlined_call_operand.vmem [shape: f32[1,128], index: 3, kind: input, shape index: {}]   ;;  %s180_s4 = inlined_call_operand.vmem [shape: f32[1,128], index: 4, kind: input, shape index: {}]   ;;  %s181_s5 = inlined_call_operand.vmem [shape: f32[1,128], index: 5, kind: input, shape index: {}]   ;;  %s182_s6 = inlined_call_operand.vmem [shape: f32[1,128], index: 6, kind: input, shape index: {}]   ;;  %s183_s7 = inlined_call_operand.vmem [shape: f32[1,128], index: 7, kind: input, shape index: {}]   ;;  %s184_s8 = inlined_call_operand.vmem [shape: f32[1,128], index: 8, kind: output, shape index: {}]  }
   0x1   :  { %s20_s29 = sshll.u32 %s176_s0, 4  ;;  %s21_s29 = int_to_ptr.vmem [resolvable:$true] %s20_s29 }
   0x2   :  { %s89_s30 = scalar_lea.vmem %s21_s29, 16  ;;  %p94_p1 = scmp.lt.s32.totalorder %s21_s29, %s21_s29 }
   0x3   :  { %p90_p0 = scmp.ne.s32.totalorder %s21_s29, %s89_s30  ;;  %p95_p2 = scmp.lt.s32.totalorder %s89_s30, %s89_s30 }
   0x5   :  { %p96_p3 = por %p95_p2, %p94_p1 }
   0x7   :  { %p97_p4 = pnand %p96_p3, %p90_p0 }
   0x9   :  { %100 = shalt.err (!%p97_p4)
}
   0xa   :  { %s103_s9 = smov [#allocation2]  }
   0xb   :  { %23 = dma.vmem_to_smem %s21_s29, 16, %s103_s9, [#allocation3]  }
   0xc   :  { %101 = dma.done.wait [#allocation3], 16  }
   0xd   :  { %102 = vsyncadd [#allocation3], 4294967280 }
   0xe   :  { %41 = sfence }
   0xf   :  { %s42_s10 = sld [smem:[#allocation2]]  ;;  %v43_v0 = vld [vmem:[%s177_s1] sm:$0x1] }
  0x10   :  { %s82_s11 = sld [smem:[#allocation2 + $0x1]]  ;;  %v47_v1 = vld [vmem:[%s178_s2] sm:$0x1] }
  0x11   :  { %s83_s12 = sld [smem:[#allocation2 + $0x2]]  ;;  %v52_v3 = vld [vmem:[%s179_s3] sm:$0x1] }
  0x12   :  { %s84_s13 = sld [smem:[#allocation2 + $0x3]]  ;;  %v57_v6 = vld [vmem:[%s180_s4] sm:$0x1] }
  0x13   :  { %s85_s0 = sld [smem:[#allocation2 + $0x4]]  ;;  %v62_v11 = vld [vmem:[%s181_s5] sm:$0x1] }
  0x14   :  { %s86_s18 = sld [smem:[#allocation2 + $0x5]]  ;;  %v67_v15 = vld [vmem:[%s182_s6] sm:$0x1] }
  0x15   :  { %v44_v2 = vstv %s42_s10  ;;  %s87_s21 = sld [smem:[#allocation2 + $0x6]]  ;;  %v72_v19 = vld [vmem:[%s183_s7] sm:$0x1] }
  0x16   :  { %v45_v4 = vmul.f32 %v44_v2, %v43_v0  ;;  %v48_v5 = vstv %s82_s11 }
  0x17   :  { %v49_v7 = vmul.f32 %v48_v5, %v47_v1  ;;  %v53_v8 = vstv %s83_s12 }
  0x18   :  { %v54_v9 = vmul.f32 %v53_v8, %v52_v3  ;;  %v58_v10 = vstv %s84_s13 }
  0x19   :  { %v50_v12 = vadd.f32 %v49_v7, %v45_v4  ;;  %v59_v13 = vmul.f32 %v58_v10, %v57_v6  ;;  %v63_v14 = vstv %s85_s0 }
  0x1a   :  { %v68_v16 = vstv %s86_s18  ;;  %v64_v18 = vmul.f32 %v63_v14, %v62_v11 }
  0x1b   :  { %v55_v17 = vadd.f32 %v54_v9, %v50_v12  ;;  %v73_v20 = vstv %s87_s21  ;;  %v69_v22 = vmul.f32 %v68_v16, %v67_v15 }
  0x1c   :  { %v74_v24 = vmul.f32 %v73_v20, %v72_v19 }
  0x1d   :  { %v60_v21 = vadd.f32 %v59_v13, %v55_v17 }
  0x1f   :  { %v65_v23 = vadd.f32 %v64_v18, %v60_v21 }
  0x21   :  { %v70_v25 = vadd.f32 %v69_v22, %v65_v23 }
  0x23   :  { %v75_v26 = vadd.f32 %v74_v24, %v70_v25 }
  0x25   :  { %76 = vst [vmem:[%s184_s8] sm:$0x1] %v75_v26 }
  0x26   :  { %81 = vsyncpa [#allocation3], 1 }

// kernel: _lambda_.133
= control target key start
LH: loop header
LB: loop body
LE: loop exit
PB: predicated region body
PF: predicated region fallthrough
CT: control target
= control target key end

     0   :  { %vm280_vm0 = vcmask 64512   ;;  %vm286_vm1 = vcmask 57344   ;;  %vm731_vm2 = vcmask 1041409   ;;  %vm733_vm3 = vcmask 1042434   ;;  %s2166_s0 = inlined_call_operand.vmem [shape: f32[32,25,8], index: 0, kind: input, shape index: {}]   ;;  %s2167_s1 = inlined_call_operand.vmem [shape: f32[25,8], index: 1, kind: input, shape index: {}]   ;;  %s2168_s2 = inlined_call_operand.vmem [shape: f32[8,8], index: 2, kind: input, shape index: {}]   ;;  %s2169_s3 = inlined_call_operand.vmem [shape: f32[1,8], index: 3, kind: input, shape index: {}]   ;;  %s2170_s4 = inlined_call_operand.vmem [shape: f32[1,8], index: 4, kind: input, shape index: {}]   ;;  %s2171_s5 = inlined_call_operand.vmem [shape: f32[32,8], index: 5, kind: output, shape index: {}]  }
   0x1   :  { %v20_v0 = vld [vmem:[%s2166_s0] sm:$0xff]  ;;  %v21_v1 = vld [vmem:[%s2166_s0 + $0x8] sm:$0xff]  ;;  %v22_v2 = vld [vmem:[%s2166_s0 + $0x10] sm:$0xff]  ;;  %vm735_vm4 = vcmask 1043459   ;;  %vm737_vm5 = vcmask 1044484   ;;  %vm739_vm6 = vcmask 1045509  }
   0x2   :  { %v24_v3 = vld [vmem:[%s2166_s0 + $0x20] sm:$0xff]  ;;  %v23_v4 = vld [vmem:[%s2166_s0 + $0x18] sm:$0x1]  ;;  %v25_v5 = vld [vmem:[%s2166_s0 + $0x28] sm:$0xff]  ;;  %vm741_vm7 = vcmask 1046534   ;;  %vm743_vm8 = vcmask 1047559  }
   0x3   :  { %v26_v6 = vld [vmem:[%s2166_s0 + $0x30] sm:$0xff]  ;;  %v27_v7 = vld [vmem:[%s2166_s0 + $0x38] sm:$0x1]  ;;  %v28_v8 = vld [vmem:[%s2166_s0 + $0x40] sm:$0xff] }
   0x4   :  { %v29_v9 = vld [vmem:[%s2166_s0 + $0x48] sm:$0xff]  ;;  %v30_v10 = vld [vmem:[%s2166_s0 + $0x50] sm:$0xff]  ;;  %v31_v11 = vld [vmem:[%s2166_s0 + $0x58] sm:$0x1] }
   0x5   :  { %v32_v12 = vld [vmem:[%s2166_s0 + $0x60] sm:$0xff]  ;;  %v33_v13 = vld [vmem:[%s2166_s0 + $0x68] sm:$0xff]  ;;  %v34_v14 = vld [vmem:[%s2166_s0 + $0x70] sm:$0xff] }
   0x6   :  { %v35_v15 = vld [vmem:[%s2166_s0 + $0x78] sm:$0x1]  ;;  %v36_v16 = vld [vmem:[%s2166_s0 + $0x80] sm:$0xff]  ;;  %v37_v17 = vld [vmem:[%s2166_s0 + $0x88] sm:$0xff] }
   0x7   :  { %v1042_v18 = vld [vmem:[%s2167_s1] sm:$0xff]  ;;  %v38_v19 = vld [vmem:[%s2166_s0 + $0x90] sm:$0xff]  ;;  %v39_v20 = vld [vmem:[%s2166_s0 + $0x98] sm:$0x1] }
   0x8   :  { %v40_v21 = vld [vmem:[%s2166_s0 + $0xa0] sm:$0xff]  ;;  %v41_v22 = vld [vmem:[%s2166_s0 + $0xa8] sm:$0xff]  ;;  %v1064_v24 = vld [vmem:[%s2167_s1 + $0x10] sm:$0xff]  ;;  %v1072_v26 = vmul.f32 %v1042_v18, %v20_v0  ;;  %v1075_v27 = vmul.f32 %v1042_v18, %v24_v3  ;;  %v1096_v34 = vmul.f32 %v1042_v18, %v28_v8  ;;  %v1099_v35 = vmul.f32 %v1042_v18, %v32_v12 }
   0x9   :  { %v1059_v23 = vld [vmem:[%s2167_s1 + $0x8] sm:$0xff]  ;;  %v1069_v25 = vld [vmem:[%s2167_s1 + $0x18] sm:$0x1]  ;;  %v42_v28 = vld [vmem:[%s2166_s0 + $0xb0] sm:$0xff]  ;;  %v1093_v33 = vmul.f32 %v1064_v24, %v22_v2  ;;  %v1120_v42 = vmul.f32 %v1064_v24, %v26_v6  ;;  %v1141_v49 = vmul.f32 %v1064_v24, %v30_v10  ;;  %v1162_v56 = vmul.f32 %v1064_v24, %v34_v14 }
   0xa   :  { %v43_v29 = vld [vmem:[%s2166_s0 + $0xb8] sm:$0x1]  ;;  %v44_v30 = vld [vmem:[%s2166_s0 + $0xc0] sm:$0xff]  ;;  %v45_v31 = vld [vmem:[%s2166_s0 + $0xc8] sm:$0xff]  ;;  %v1090_v32 = vmul.f32 %v1059_v23, %v21_v1  ;;  %v1114_v40 = vmul.f32 %v1069_v25, %v23_v4  ;;  %v1117_v41 = vmul.f32 %v1059_v23, %v25_v5  ;;  %v1123_v43 = vmul.f32 %v1069_v25, %v27_v7 }
   0xb   :  { %v46_v36 = vld [vmem:[%s2166_s0 + $0xd0] sm:$0xff]  ;;  %v47_v37 = vld [vmem:[%s2166_s0 + $0xd8] sm:$0x1]  ;;  %v48_v38 = vld [vmem:[%s2166_s0 + $0xe0] sm:$0xff]  ;;  %v1138_v48 = vmul.f32 %v1059_v23, %v29_v9  ;;  %v1144_v50 = vmul.f32 %v1069_v25, %v31_v11  ;;  %v1147_v51 = vmul.f32 %v1059_v23, %v33_v13  ;;  %v1165_v57 = vmul.f32 %v1069_v25, %v35_v15 }
   0xc   :  { %v49_v39 = vld [vmem:[%s2166_s0 + $0xe8] sm:$0xff]  ;;  %v50_v44 = vld [vmem:[%s2166_s0 + $0xf0] sm:$0xff]  ;;  %v51_v45 = vld [vmem:[%s2166_s0 + $0xf8] sm:$0x1]  ;;  %v1168_v58 = vmul.f32 %v1042_v18, %v36_v16  ;;  %v1171_v59 = vmul.f32 %v1059_v23, %v37_v17  ;;  %v1186_v0 = vmul.f32 %v1064_v24, %v38_v19  ;;  %v1189_v1 = vmul.f32 %v1069_v25, %v39_v20 }
   0xd   :  { %v52_v46 = vld [vmem:[%s2166_s0 + $0x100] sm:$0xff]  ;;  %v53_v47 = vld [vmem:[%s2166_s0 + $0x108] sm:$0xff]  ;;  %v54_v52 = vld [vmem:[%s2166_s0 + $0x110] sm:$0xff]  ;;  %v1192_v2 = vmul.f32 %v1042_v18, %v40_v21  ;;  %v1195_v3 = vmul.f32 %v1059_v23, %v41_v22  ;;  %v1210_v8 = vmul.f32 %v1064_v24, %v42_v28  ;;  %v1213_v9 = vmul.f32 %v1069_v25, %v43_v29 }
   0xe   :  { %v55_v53 = vld [vmem:[%s2166_s0 + $0x118] sm:$0x1]  ;;  %v56_v54 = vld [vmem:[%s2166_s0 + $0x120] sm:$0xff]  ;;  %v57_v55 = vld [vmem:[%s2166_s0 + $0x128] sm:$0xff]  ;;  %v1216_v10 = vmul.f32 %v1042_v18, %v44_v30  ;;  %v1219_v11 = vmul.f32 %v1059_v23, %v45_v31  ;;  %v1234_v16 = vmul.f32 %v1064_v24, %v46_v36  ;;  %v1237_v17 = vmul.f32 %v1069_v25, %v47_v37 }
   0xf   :  { %v58_v60 = vld [vmem:[%s2166_s0 + $0x130] sm:$0xff]  ;;  %v59_v61 = vld [vmem:[%s2166_s0 + $0x138] sm:$0x1]  ;;  %v60_v62 = vld [vmem:[%s2166_s0 + $0x140] sm:$0xff]  ;;  %v1240_v19 = vmul.f32 %v1042_v18, %v48_v38  ;;  %v1243_v20 = vmul.f32 %v1059_v23, %v49_v39  ;;  %v1258_v30 = vmul.f32 %v1064_v24, %v50_v44  ;;  %v1261_v31 = vmul.f32 %v1069_v25, %v51_v45 }
  0x10   :  { %v61_v63 = vld [vmem:[%s2166_s0 + $0x148] sm:$0xff]  ;;  %v62_v4 = vld [vmem:[%s2166_s0 + $0x150] sm:$0xff]  ;;  %v63_v5 = vld [vmem:[%s2166_s0 + $0x158] sm:$0x1]  ;;  %v1264_v36 = vmul.f32 %v1042_v18, %v52_v46  ;;  %v1267_v37 = vmul.f32 %v1059_v23, %v53_v47  ;;  %v1282_v46 = vmul.f32 %v1064_v24, %v54_v52  ;;  %v1285_v47 = vmul.f32 %v1069_v25, %v55_v53 }
  0x11   :  { %v64_v6 = vld [vmem:[%s2166_s0 + $0x160] sm:$0xff]  ;;  %v65_v7 = vld [vmem:[%s2166_s0 + $0x168] sm:$0xff]  ;;  %v66_v12 = vld [vmem:[%s2166_s0 + $0x170] sm:$0xff]  ;;  %2172 = vst [vmem:[#allocation2_spill] sm:$0xff] %v1243_v20 }
  0x12   :  { %v67_v13 = vld [vmem:[%s2166_s0 + $0x178] sm:$0x1]  ;;  %v68_v14 = vld [vmem:[%s2166_s0 + $0x180] sm:$0xff]  ;;  %v69_v15 = vld [vmem:[%s2166_s0 + $0x188] sm:$0xff]  ;;  %2173 = vst [vmem:[#allocation3_spill] sm:$0xff] %v1258_v30 }
  0x13   :  { %v70_v21 = vld [vmem:[%s2166_s0 + $0x190] sm:$0xff]  ;;  %v71_v22 = vld [vmem:[%s2166_s0 + $0x198] sm:$0x1]  ;;  %v72_v28 = vld [vmem:[%s2166_s0 + $0x1a0] sm:$0xff]  ;;  %2174 = vst [vmem:[#allocation4_spill] sm:$0xff] %v1261_v31 }
  0x14   :  { %v73_v29 = vld [vmem:[%s2166_s0 + $0x1a8] sm:$0xff]  ;;  %2175 = vst [vmem:[#allocation5_spill] sm:$0xff] %v1264_v36  ;;  %2176 = vst [vmem:[#allocation6_spill] sm:$0xff] %v1267_v37  ;;  %v74_v38 = vld [vmem:[%s2166_s0 + $0x1b0] sm:$0xff]  ;;  %v1288_v37 = vmul.f32 %v1042_v18, %v56_v54  ;;  %v1291_v36 = vmul.f32 %v1059_v23, %v57_v55  ;;  %v1306_v54 = vmul.f32 %v1064_v24, %v58_v60 }
  0x15   :  { %v75_v39 = vld [vmem:[%s2166_s0 + $0x1b8] sm:$0x1]  ;;  %v76_v44 = vld [vmem:[%s2166_s0 + $0x1c0] sm:$0xff]  ;;  %v77_v45 = vld [vmem:[%s2166_s0 + $0x1c8] sm:$0xff]  ;;  %2177 = vst [vmem:[#allocation7_spill] sm:$0xff] %v1282_v46  ;;  %v1309_v55 = vmul.f32 %v1069_v25, %v59_v61 }
  0x16   :  { %2178 = vst [vmem:[#allocation8_spill] sm:$0xff] %v1285_v47  ;;  %2179 = vst [vmem:[#allocation9_spill] sm:$0xff] %v1288_v37  ;;  %v78_v31 = vld [vmem:[%s2166_s0 + $0x1d0] sm:$0xff]  ;;  %v79_v30 = vld [vmem:[%s2166_s0 + $0x1d8] sm:$0x1]  ;;  %v1315_v37 = vmul.f32 %v1059_v23, %v61_v63  ;;  %v1333_v63 = vmul.f32 %v1069_v25, %v63_v5 }
  0x17   :  { %2180 = vst [vmem:[#allocation10_spill] sm:$0xff] %v1291_v36  ;;  %v80_v52 = vld [vmem:[%s2166_s0 + $0x1e0] sm:$0xff]  ;;  %v81_v53 = vld [vmem:[%s2166_s0 + $0x1e8] sm:$0xff]  ;;  %2181 = vst [vmem:[#allocation11_spill] sm:$0xff] %v1306_v54  ;;  %v1312_v36 = vmul.f32 %v1042_v18, %v60_v62  ;;  %v1330_v62 = vmul.f32 %v1064_v24, %v62_v4 }
  0x18   :  { %2182 = vst [vmem:[#allocation12_spill] sm:$0xff] %v1309_v55  ;;  %2184 = vst [vmem:[#allocation14_spill] sm:$0xff] %v1315_v37  ;;  %v82_v47 = vld [vmem:[%s2166_s0 + $0x1f0] sm:$0xff]  ;;  %v83_v46 = vld [vmem:[%s2166_s0 + $0x1f8] sm:$0x1]  ;;  %v1336_v37 = vmul.f32 %v1042_v18, %v64_v6  ;;  %v1354_v6 = vmul.f32 %v1064_v24, %v66_v12 }
  0x19   :  { %2183 = vst [vmem:[#allocation13_spill] sm:$0xff] %v1312_v36  ;;  %v84_v60 = vld [vmem:[%s2166_s0 + $0x200] sm:$0xff]  ;;  %v85_v61 = vld [vmem:[%s2166_s0 + $0x208] sm:$0xff]  ;;  %2185 = vst [vmem:[#allocation15_spill] sm:$0xff] %v1330_v62  ;;  %v1339_v36 = vmul.f32 %v1059_v23, %v65_v7  ;;  %v1357_v7 = vmul.f32 %v1069_v25, %v67_v13 }
  0x1a   :  { %2186 = vst [vmem:[#allocation16_spill] sm:$0xff] %v1333_v63  ;;  %2187 = vst [vmem:[#allocation17_spill] sm:$0xff] %v1336_v37  ;;  %v86_v55 = vld [vmem:[%s2166_s0 + $0x210] sm:$0xff]  ;;  %v87_v54 = vld [vmem:[%s2166_s0 + $0x218] sm:$0x1]  ;;  %v1363_v37 = vmul.f32 %v1059_v23, %v69_v15  ;;  %v1381_v15 = vmul.f32 %v1069_v25, %v71_v22 }
  0x1b   :  { %2188 = vst [vmem:[#allocation18_spill] sm:$0xff] %v1339_v36  ;;  %v88_v4 = vld [vmem:[%s2166_s0 + $0x220] sm:$0xff]  ;;  %v89_v5 = vld [vmem:[%s2166_s0 + $0x228] sm:$0xff]  ;;  %2189 = vst [vmem:[#allocation19_spill] sm:$0xff] %v1354_v6  ;;  %v1360_v36 = vmul.f32 %v1042_v18, %v68_v14  ;;  %v1378_v14 = vmul.f32 %v1064_v24, %v70_v21 }
  0x1c   :  { %2190 = vst [vmem:[#allocation20_spill] sm:$0xff] %v1357_v7  ;;  %2192 = vst [vmem:[#allocation22_spill] sm:$0xff] %v1363_v37  ;;  %v90_v63 = vld [vmem:[%s2166_s0 + $0x230] sm:$0xff]  ;;  %v91_v62 = vld [vmem:[%s2166_s0 + $0x238] sm:$0x1]  ;;  %v1384_v37 = vmul.f32 %v1042_v18, %v72_v28  ;;  %v1402_v28 = vmul.f32 %v1064_v24, %v74_v38 }
  0x1d   :  { %2191 = vst [vmem:[#allocation21_spill] sm:$0xff] %v1360_v36  ;;  %v92_v12 = vld [vmem:[%s2166_s0 + $0x240] sm:$0xff]  ;;  %v93_v13 = vld [vmem:[%s2166_s0 + $0x248] sm:$0xff]  ;;  %2193 = vst [vmem:[#allocation23_spill] sm:$0xff] %v1378_v14  ;;  %v1387_v36 = vmul.f32 %v1059_v23, %v73_v29  ;;  %v1405_v29 = vmul.f32 %v1069_v25, %v75_v39 }
  0x1e   :  { %2194 = vst [vmem:[#allocation24_spill] sm:$0xff] %v1381_v15  ;;  %2195 = vst [vmem:[#allocation25_spill] sm:$0xff] %v1384_v37  ;;  %v94_v7 = vld [vmem:[%s2166_s0 + $0x250] sm:$0xff]  ;;  %v95_v6 = vld [vmem:[%s2166_s0 + $0x258] sm:$0x1]  ;;  %v1411_v37 = vmul.f32 %v1059_v23, %v77_v45  ;;  %v1429_v45 = vmul.f32 %v1069_v25, %v79_v30 }
  0x1f   :  { %2196 = vst [vmem:[#allocation26_spill] sm:$0xff] %v1387_v36  ;;  %v96_v21 = vld [vmem:[%s2166_s0 + $0x260] sm:$0xff]  ;;  %v97_v22 = vld [vmem:[%s2166_s0 + $0x268] sm:$0xff]  ;;  %2197 = vst [vmem:[#allocation27_spill] sm:$0xff] %v1402_v28  ;;  %v1408_v36 = vmul.f32 %v1042_v18, %v76_v44  ;;  %v1426_v44 = vmul.f32 %v1064_v24, %v78_v31 }
  0x20   :  { %2198 = vst [vmem:[#allocation28_spill] sm:$0xff] %v1405_v29  ;;  %2200 = vst [vmem:[#allocation30_spill] sm:$0xff] %v1411_v37  ;;  %v98_v15 = vld [vmem:[%s2166_s0 + $0x270] sm:$0xff]  ;;  %v99_v14 = vld [vmem:[%s2166_s0 + $0x278] sm:$0x1]  ;;  %v1432_v37 = vmul.f32 %v1042_v18, %v80_v52  ;;  %v1450_v52 = vmul.f32 %v1064_v24, %v82_v47 }
  0x21   :  { %2199 = vst [vmem:[#allocation29_spill] sm:$0xff] %v1408_v36  ;;  %v100_v38 = vld [vmem:[%s2166_s0 + $0x280] sm:$0xff]  ;;  %v101_v39 = vld [vmem:[%s2166_s0 + $0x288] sm:$0xff]  ;;  %2201 = vst [vmem:[#allocation31_spill] sm:$0xff] %v1426_v44  ;;  %v1435_v36 = vmul.f32 %v1059_v23, %v81_v53  ;;  %v1453_v53 = vmul.f32 %v1069_v25, %v83_v46 }
  0x22   :  { %2202 = vst [vmem:[#allocation32_spill] sm:$0xff] %v1429_v45  ;;  %2203 = vst [vmem:[#allocation33_spill] sm:$0xff] %v1432_v37  ;;  %v102_v29 = vld [vmem:[%s2166_s0 + $0x290] sm:$0xff]  ;;  %v103_v28 = vld [vmem:[%s2166_s0 + $0x298] sm:$0x1]  ;;  %v1459_v37 = vmul.f32 %v1059_v23, %v85_v61  ;;  %v1477_v61 = vmul.f32 %v1069_v25, %v87_v54 }
  0x23   :  { %2204 = vst [vmem:[#allocation34_spill] sm:$0xff] %v1435_v36  ;;  %v104_v31 = vld [vmem:[%s2166_s0 + $0x2a0] sm:$0xff]  ;;  %v105_v30 = vld [vmem:[%s2166_s0 + $0x2a8] sm:$0xff]  ;;  %2205 = vst [vmem:[#allocation35_spill] sm:$0xff] %v1450_v52  ;;  %v1456_v36 = vmul.f32 %v1042_v18, %v84_v60  ;;  %v1474_v60 = vmul.f32 %v1064_v24, %v86_v55 }
  0x24   :  { %2206 = vst [vmem:[#allocation36_spill] sm:$0xff] %v1453_v53  ;;  %2208 = vst [vmem:[#allocation38_spill] sm:$0xff] %v1459_v37  ;;  %v106_v45 = vld [vmem:[%s2166_s0 + $0x2b0] sm:$0xff]  ;;  %v107_v44 = vld [vmem:[%s2166_s0 + $0x2b8] sm:$0x1]  ;;  %v1480_v37 = vmul.f32 %v1042_v18, %v88_v4 }
  0x25   :  { %2207 = vst [vmem:[#allocation37_spill] sm:$0xff] %v1456_v36  ;;  %v108_v47 = vld [vmem:[%s2166_s0 + $0x2c0] sm:$0xff]  ;;  %v109_v46 = vld [vmem:[%s2166_s0 + $0x2c8] sm:$0xff]  ;;  %2209 = vst [vmem:[#allocation39_spill] sm:$0xff] %v1474_v60  ;;  %v1483_v36 = vmul.f32 %v1059_v23, %v89_v5  ;;  %v1501_v5 = vmul.f32 %v1064_v24, %v90_v63 }
  0x26   :  { %2210 = vst [vmem:[#allocation40_spill] sm:$0xff] %v1477_v61  ;;  %2211 = vst [vmem:[#allocation41_spill] sm:$0xff] %v1480_v37  ;;  %v698_v53 = vld [vmem:[%s2168_s2] sm:$0xff]  ;;  %v110_v52 = vld [vmem:[%s2166_s0 + $0x2d0] sm:$0xff]  ;;  %v1507_v37 = vmul.f32 %v1042_v18, %v92_v12  ;;  %v1510_v61 = vmul.f32 %v1059_v23, %v93_v13  ;;  %v1525_v12 = vmul.f32 %v1064_v24, %v94_v7 }
  0x27   :  { %2212 = vst [vmem:[#allocation42_spill] sm:$0xff] %v1483_v36  ;;  %v111_v55 = vld [vmem:[%s2166_s0 + $0x2d8] sm:$0x1]  ;;  %v112_v54 = vld [vmem:[%s2166_s0 + $0x2e0] sm:$0xff]  ;;  %v113_v4 = vld [vmem:[%s2166_s0 + $0x2e8] sm:$0xff]  ;;  %v1504_v36 = vmul.f32 %v1069_v25, %v91_v62  ;;  %943 = vmatprep.subr.mxu0 %v698_v53  ;;  %v1528_v13 = vmul.f32 %v1069_v25, %v95_v6  ;;  %951 = vmatprep.subr.mxu1 %v698_v53 }
  0x28   :  { %2213 = vst [vmem:[#allocation43_spill] sm:$0xff] %v1501_v5  ;;  %2215 = vst [vmem:[#allocation45_spill] sm:$0xff] %v1507_v37  ;;  %v114_v60 = vld [vmem:[%s2166_s0 + $0x2f0] sm:$0xff]  ;;  %v115_v20 = vld [vmem:[%s2166_s0 + $0x2f8] sm:$0x1]  ;;  %v1534_v37 = vmul.f32 %v1059_v23, %v97_v22  ;;  %v1552_v22 = vmul.f32 %v1069_v25, %v99_v14  ;;  %944 = vmatpush3.msra.mxu0 %v698_v53  ;;  %952 = vmatpush3.msra.mxu1 %v698_v53 }
  0x29   :  { %2214 = vst [vmem:[#allocation44_spill] sm:$0xff] %v1504_v36  ;;  %2216 = vst [vmem:[#allocation46_spill] sm:$0xff] %v1510_v61  ;;  %v116_v62 = vld [vmem:[%s2166_s0 + $0x300] sm:$0xff]  ;;  %v117_v63 = vld [vmem:[%s2166_s0 + $0x308] sm:$0xff]  ;;  %v1531_v61 = vmul.f32 %v1042_v18, %v96_v21  ;;  %v1549_v21 = vmul.f32 %v1064_v24, %v98_v15  ;;  %v1570_v15 = vmul.f32 %v1064_v24, %v102_v29 }
  0x2a   :  { %2217 = vst [vmem:[#allocation47_spill] sm:$0xff] %v1525_v12  ;;  %2218 = vst [vmem:[#allocation48_spill] sm:$0xff] %v1528_v13  ;;  %v118_v36 = vld [vmem:[%s2166_s0 + $0x310] sm:$0xff]  ;;  %v119_v5 = vld [vmem:[%s2166_s0 + $0x318] sm:$0x1]  ;;  %v1597_v53 = vmul.f32 %v1042_v18, %v108_v47  ;;  %v1615_v47 = vmul.f32 %v1069_v25, %v111_v55  ;;  %v1633_v55 = vmul.f32 %v1064_v24, %v114_v60 }
  0x2b   :  { %2219 = vst [vmem:[#allocation49_spill] sm:$0xff] %v1531_v61  ;;  %2220 = vst [vmem:[#allocation50_spill] sm:$0xff] %v1534_v37  ;;  %v120_v6 = vld [vmem:[%s2166_s0 + $0x320] sm:$0xff]  ;;  %v121_v7 = vld [vmem:[%s2166_s0 + $0x328] sm:$0xff]  ;;  %v1555_v37 = vmul.f32 %v1042_v18, %v100_v38  ;;  %v1558_v61 = vmul.f32 %v1059_v23, %v101_v39  ;;  %v1573_v38 = vmul.f32 %v1069_v25, %v103_v28 }
  0x2c   :  { %v122_v13 = vld [vmem:[%s2166_s0 + $0x330] sm:$0xff]  ;;  %v123_v12 = vld [vmem:[%s2166_s0 + $0x338] sm:$0x1]  ;;  %v124_v14 = vld [vmem:[%s2166_s0 + $0x340] sm:$0xff]  ;;  %v1576_v39 = vmul.f32 %v1042_v18, %v104_v31  ;;  %v1591_v31 = vmul.f32 %v1064_v24, %v106_v45  ;;  %2227 = vst [vmem:[#allocation57_spill] sm:$0xff] %v1597_v53 }
  0x2d   :  { %2221 = vst [vmem:[#allocation51_spill] sm:$0xff] %v1555_v37  ;;  %2222 = vst [vmem:[#allocation52_spill] sm:$0xff] %v1558_v61  ;;  %v1579_v61 = vmul.f32 %v1059_v23, %v105_v30  ;;  %v125_v37 = vld [vmem:[%s2166_s0 + $0x348] sm:$0xff]  ;;  %v126_v29 = vld [vmem:[%s2166_s0 + $0x350] sm:$0xff]  ;;  %v1594_v30 = vmul.f32 %v1069_v25, %v107_v44  ;;  %v1612_v44 = vmul.f32 %v1064_v24, %v110_v52 }
  0x2e   :  { %2223 = vst [vmem:[#allocation53_spill] sm:$0xff] %v1573_v38  ;;  %2224 = vst [vmem:[#allocation54_spill] sm:$0xff] %v1576_v39  ;;  %v127_v28 = vld [vmem:[%s2166_s0 + $0x358] sm:$0x1]  ;;  %v128_v39 = vld [vmem:[%s2166_s0 + $0x360] sm:$0xff] }
  0x2f   :  { %2225 = vst [vmem:[#allocation55_spill] sm:$0xff] %v1579_v61  ;;  %2226 = vst [vmem:[#allocation56_spill] sm:$0xff] %v1594_v30  ;;  %v1600_v61 = vmul.f32 %v1059_v23, %v109_v46  ;;  %v129_v38 = vld [vmem:[%s2166_s0 + $0x368] sm:$0xff]  ;;  %v130_v45 = vld [vmem:[%s2166_s0 + $0x370] sm:$0xff]  ;;  %v1618_v46 = vmul.f32 %v1042_v18, %v112_v54  ;;  %v1636_v54 = vmul.f32 %v1069_v25, %v115_v20 }
  0x30   :  { %2229 = vst [vmem:[#allocation59_spill] sm:$0xff] %v1615_v47  ;;  %v131_v53 = vld [vmem:[%s2166_s0 + $0x378] sm:$0x1]  ;;  %v132_v30 = vld [vmem:[%s2166_s0 + $0x380] sm:$0xff]  ;;  %v133_v52 = vld [vmem:[%s2166_s0 + $0x388] sm:$0xff]  ;;  %v1654_v20 = vmul.f32 %v1064_v24, %v118_v36 }
  0x31   :  { %2228 = vst [vmem:[#allocation58_spill] sm:$0xff] %v1600_v61  ;;  %2230 = vst [vmem:[#allocation60_spill] sm:$0xff] %v1618_v46  ;;  %v1621_v61 = vmul.f32 %v1059_v23, %v113_v4  ;;  %v1639_v4 = vmul.f32 %v1042_v18, %v116_v62  ;;  %v134_v46 = vld [vmem:[%s2166_s0 + $0x390] sm:$0xff]  ;;  %v135_v47 = vld [vmem:[%s2166_s0 + $0x398] sm:$0x1]  ;;  %v1657_v62 = vmul.f32 %v1069_v25, %v119_v5 }
  0x32   :  { %2232 = vst [vmem:[#allocation62_spill] sm:$0xff] %v1636_v54  ;;  %v136_v60 = vld [vmem:[%s2166_s0 + $0x3a0] sm:$0xff]  ;;  %v138_v54 = vld [vmem:[%s2166_s0 + $0x3b0] sm:$0xff]  ;;  %v139_v36 = vld [vmem:[%s2166_s0 + $0x3b8] sm:$0x1]  ;;  %v1675_v5 = vmul.f32 %v1064_v24, %v122_v13 }
  0x33   :  { %2231 = vst [vmem:[#allocation61_spill] sm:$0xff] %v1621_v61  ;;  %2233 = vst [vmem:[#allocation63_spill] sm:$0xff] %v1639_v4  ;;  %v1642_v61 = vmul.f32 %v1059_v23, %v117_v63  ;;  %v1660_v63 = vmul.f32 %v1042_v18, %v120_v6  ;;  %v137_v4 = vld [vmem:[%s2166_s0 + $0x3a8] sm:$0xff]  ;;  %v1678_v6 = vmul.f32 %v1069_v25, %v123_v12  ;;  %v142_v13 = vld [vmem:[%s2166_s0 + $0x3d0] sm:$0xff] }
  0x34   :  { %2235 = vst [vmem:[#allocation65_spill] sm:$0xff] %v1657_v62  ;;  %v141_v62 = vld [vmem:[%s2166_s0 + $0x3c8] sm:$0xff]  ;;  %v1696_v12 = vmul.f32 %v1064_v24, %v126_v29 }
  0x35   :  { %2234 = vst [vmem:[#allocation64_spill] sm:$0xff] %v1642_v61  ;;  %2236 = vst [vmem:[#allocation66_spill] sm:$0xff] %v1660_v63  ;;  %v1663_v61 = vmul.f32 %v1059_v23, %v121_v7  ;;  %v1681_v7 = vmul.f32 %v1042_v18, %v124_v14  ;;  %v140_v63 = vld [vmem:[%s2166_s0 + $0x3c0] sm:$0xff]  ;;  %v1699_v14 = vmul.f32 %v1069_v25, %v127_v28  ;;  %v145_v29 = vld [vmem:[%s2166_s0 + $0x3e8] sm:$0xff] }
  0x36   :  { %2238 = vst [vmem:[#allocation68_spill] sm:$0xff] %v1678_v6  ;;  %2241 = vst [vmem:[#allocation71_spill] sm:$0xff] %v1696_v12  ;;  %v144_v6 = vld [vmem:[%s2166_s0 + $0x3e0] sm:$0xff]  ;;  %v1717_v28 = vmul.f32 %v1064_v24, %v130_v45  ;;  %v1735_v12 = vmul.f32 %v1042_v18, %v136_v60  ;;  %v1738_v45 = vmul.f32 %v1059_v23, %v137_v4 }
  0x37   :  { %2237 = vst [vmem:[#allocation67_spill] sm:$0xff] %v1663_v61  ;;  %2239 = vst [vmem:[#allocation69_spill] sm:$0xff] %v1681_v7  ;;  %v1684_v61 = vmul.f32 %v1059_v23, %v125_v37  ;;  %v1702_v37 = vmul.f32 %v1042_v18, %v128_v39  ;;  %v143_v7 = vld [vmem:[%s2166_s0 + $0x3d8] sm:$0x1]  ;;  %v1720_v39 = vmul.f32 %v1069_v25, %v131_v53 }
  0x38   :  { %2242 = vst [vmem:[#allocation72_spill] sm:$0xff] %v1699_v14  ;;  %v1732_v14 = vmul.f32 %v1069_v25, %v135_v47  ;;  %v1741_v53 = vmul.f32 %v1064_v24, %v138_v54  ;;  %v1753_v47 = vmul.f32 %v1064_v24, %v142_v13  ;;  %v1756_v60 = vmul.f32 %v1069_v25, %v143_v7 }
  0x39   :  { %2240 = vst [vmem:[#allocation70_spill] sm:$0xff] %v1684_v61  ;;  %2243 = vst [vmem:[#allocation73_spill] sm:$0xff] %v1702_v37  ;;  %v1705_v61 = vmul.f32 %v1059_v23, %v129_v38  ;;  %v1723_v38 = vmul.f32 %v1042_v18, %v132_v30  ;;  %v1729_v37 = vmul.f32 %v1064_v24, %v134_v46  ;;  %v287_v13 = vsel %vm286_vm1, %v1114_v40, 0.0 }
  0x3a   :  { %v1744_v30 = vmul.f32 %v1069_v25, %v139_v36  ;;  %v1750_v46 = vmul.f32 %v1059_v23, %v141_v62  ;;  %v1759_v4 = vmul.f32 %v1042_v18, %v144_v6  ;;  %v1762_v54 = vmul.f32 %v1059_v23, %v145_v29 }
  0x3b   :  { %2244 = vst [vmem:[#allocation74_spill] sm:$0xff] %v1705_v61  ;;  %v1726_v61 = vmul.f32 %v1059_v23, %v133_v52  ;;  %v1747_v52 = vmul.f32 %v1042_v18, %v140_v63  ;;  %v281_v36 = vsel %vm280_vm0, %v1072_v26, 0.0  ;;  %v282_v63 = vsel %vm280_vm0, %v1090_v32, 0.0 }
  0x3c   :  { %v284_v62 = vsel %vm280_vm0, %v1093_v33, 0.0  ;;  %v283_v7 = vadd.f32 %v282_v63, %v281_v36  ;;  %v295_v18 = vsel %vm280_vm0, %v1075_v27, 0.0  ;;  %v296_v23 = vsel %vm280_vm0, %v1117_v41, 0.0 }
  0x3d   :  { %v298_v6 = vsel %vm280_vm0, %v1120_v42, 0.0  ;;  %v297_v26 = vadd.f32 %v296_v23, %v295_v18  ;;  %v300_v32 = vsel %vm286_vm1, %v1123_v43, 0.0  ;;  %v308_v33 = vsel %vm280_vm0, %v1096_v34, 0.0 }
  0x3e   :  { %v309_v40 = vsel %vm280_vm0, %v1138_v48, 0.0  ;;  %v285_v29 = vadd.f32 %v284_v62, %v283_v7  ;;  %v311_v27 = vsel %vm280_vm0, %v1141_v49, 0.0  ;;  %v313_v41 = vsel %vm286_vm1, %v1144_v50, 0.0 }
  0x3f   :  { %v310_v36 = vadd.f32 %v309_v40, %v308_v33  ;;  %v299_v63 = vadd.f32 %v298_v6, %v297_v26  ;;  %v321_v42 = vsel %vm280_vm0, %v1099_v35, 0.0  ;;  %v322_v43 = vsel %vm280_vm0, %v1147_v51, 0.0 }
  0x40   :  { %v324_v34 = vsel %vm280_vm0, %v1162_v56, 0.0  ;;  %v288_v18 = vadd.f32 %v287_v13, %v285_v29  ;;  %v323_v62 = vadd.f32 %v322_v43, %v321_v42  ;;  %v326_v7 = vsel %vm286_vm1, %v1165_v57, 0.0 }
  0x41   :  { %v312_v48 = vadd.f32 %v311_v27, %v310_v36  ;;  %v301_v49 = vadd.f32 %v300_v32, %v299_v63  ;;  %v334_v50 = vsel %vm280_vm0, %v1168_v58, 0.0  ;;  %v335_v23 = vsel %vm280_vm0, %v1171_v59, 0.0 }
  0x42   :  { %v337_v35 = vsel %vm280_vm0, %v1186_v0, 0.0  ;;  %v289_v51 = vrot.slane %v288_v18, 4  ;;  %v325_v26 = vadd.f32 %v324_v34, %v323_v62  ;;  %v336_v56 = vadd.f32 %v335_v23, %v334_v50 }
  0x43   :  { %v314_v6 = vadd.f32 %v313_v41, %v312_v48  ;;  %v302_v13 = vrot.slane %v301_v49, 4  ;;  %v339_v33 = vsel %vm286_vm1, %v1189_v1, 0.0  ;;  %v347_v57 = vsel %vm280_vm0, %v1192_v2, 0.0  ;;  %v146_v48 = vld [vmem:[%s2166_s0 + $0x3f0] sm:$0xff] }
  0x44   :  { %v348_v58 = vsel %vm280_vm0, %v1195_v3, 0.0  ;;  %v290_v32 = vadd.f32 %v289_v51, %v288_v18  ;;  %v327_v59 = vadd.f32 %v326_v7, %v325_v26  ;;  %v338_v29 = vadd.f32 %v337_v35, %v336_v56 }
  0x45   :  { %v315_v40 = vrot.slane %v314_v6, 4  ;;  %v303_v36 = vadd.f32 %v302_v13, %v301_v49  ;;  %v349_v0 = vadd.f32 %v348_v58, %v347_v57  ;;  %v350_v27 = vsel %vm280_vm0, %v1210_v8, 0.0  ;;  %v147_v49 = vld [vmem:[%s2166_s0 + $0x3f8] sm:$0x1] }
  0x46   :  { %v352_v41 = vsel %vm286_vm1, %v1213_v9, 0.0  ;;  %v291_v63 = vrot.slane %v290_v32, 2  ;;  %v328_v42 = vrot.slane %v327_v59, 4  ;;  %v340_v43 = vadd.f32 %v339_v33, %v338_v29 }
  0x47   :  { %v316_v1 = vadd.f32 %v315_v40, %v314_v6  ;;  %v304_v2 = vrot.slane %v303_v36, 2  ;;  %v351_v34 = vadd.f32 %v350_v27, %v349_v0  ;;  %v360_v3 = vsel %vm280_vm0, %v1216_v10, 0.0 }
  0x48   :  { %v361_v18 = vsel %vm280_vm0, %v1219_v11, 0.0  ;;  %v292_v8 = vadd.f32 %v291_v63, %v290_v32  ;;  %v329_v7 = vadd.f32 %v328_v42, %v327_v59  ;;  %v341_v9 = vrot.slane %v340_v43, 4  ;;  %v2245_v63 = vld [vmem:[#allocation2_spill] sm:$0xff] }
  0x49   :  { %v317_v62 = vrot.slane %v316_v1, 2  ;;  %v305_v50 = vadd.f32 %v304_v2, %v303_v36  ;;  %v353_v23 = vadd.f32 %v352_v41, %v351_v34  ;;  %v362_v35 = vadd.f32 %v361_v18, %v360_v3  ;;  %v2247_v18 = vld [vmem:[#allocation4_spill] sm:$0xff] }
  0x4a   :  { %v363_v10 = vsel %vm280_vm0, %v1234_v16, 0.0  ;;  %v293_v51 = vrot.slane %v292_v8, 1  ;;  %v330_v6 = vrot.slane %v329_v7, 2  ;;  %v342_v26 = vadd.f32 %v341_v9, %v340_v43  ;;  %v2246_v43 = vld [vmem:[#allocation3_spill] sm:$0xff] }
  0x4b   :  { %v318_v11 = vadd.f32 %v317_v62, %v316_v1  ;;  %v1825_v56 = vmul.f32 %v1064_v24, %v146_v48  ;;  %v354_v13 = vrot.slane %v353_v23, 4  ;;  %v364_v33 = vadd.f32 %v363_v10, %v362_v35 }
  0x4c   :  { %v365_v57 = vsel %vm286_vm1, %v1237_v17, 0.0  ;;  %v1830_v58 = vmul.f32 %v1069_v25, %v147_v49  ;;  %v306_v32 = vrot.slane %v305_v50, 1  ;;  %v331_v40 = vadd.f32 %v330_v6, %v329_v7  ;;  %v2249_v49 = vld [vmem:[#allocation6_spill] sm:$0xff] }
  0x4d   :  { %v343_v59 = vrot.slane %v342_v26, 2  ;;  %v319_v29 = vrot.slane %v318_v11, 1  ;;  %v355_v16 = vadd.f32 %v354_v13, %v353_v23  ;;  %v366_v36 = vadd.f32 %v365_v57, %v364_v33  ;;  %v2251_v33 = vld [vmem:[#allocation8_spill] sm:$0xff] }
  0x4e   :  { %v373_v0 = vsel %vm280_vm0, %v1240_v19, 0.0  ;;  %v1834_v27 = vadd.f32 %v293_v51, %v292_v8  ;;  %v332_v24 = vrot.slane %v331_v40, 1  ;;  %v374_v1 = vsel %vm280_vm0, %v2245_v63, 0.0  ;;  %v2248_v19 = vld [vmem:[#allocation5_spill] sm:$0xff] }
  0x4f   :  { %v344_v41 = vadd.f32 %v343_v59, %v342_v26  ;;  %v356_v17 = vrot.slane %v355_v16, 2  ;;  %v367_v42 = vrot.slane %v366_v36, 4  ;;  %v375_v25 = vadd.f32 %v374_v1, %v373_v0  ;;  %v2254_v0 = vld [vmem:[#allocation11_spill] sm:$0xff] }
  0x50   :  { %v376_v2 = vsel %vm280_vm0, %v2246_v43, 0.0  ;;  %v1840_v34 = vadd.f32 %v306_v32, %v305_v50  ;;  %v378_v48 = vsel %vm286_vm1, %v2247_v18, 0.0  ;;  %v386_v8 = vsel %vm280_vm0, %v2248_v19, 0.0  ;;  %v2250_v50 = vld [vmem:[#allocation7_spill] sm:$0xff]  ;;  %v2252_v32 = vld [vmem:[#allocation9_spill] sm:$0xff]  ;;  %v2257_v18 = vld [vmem:[#allocation14_spill] sm:$0xff] }
  0x51   :  { %v345_v3 = vrot.slane %v344_v41, 1  ;;  %v1846_v62 = vadd.f32 %v319_v29, %v318_v11  ;;  %v368_v7 = vadd.f32 %v367_v42, %v366_v36  ;;  %v377_v9 = vadd.f32 %v376_v2, %v375_v25  ;;  %v2253_v36 = vld [vmem:[#allocation10_spill] sm:$0xff]  ;;  %v2256_v43 = vld [vmem:[#allocation13_spill] sm:$0xff] }
  0x52   :  { %v387_v23 = vsel %vm280_vm0, %v2249_v49, 0.0  ;;  %v1850_v35 = vadd.f32 %v332_v24, %v331_v40  ;;  %v357_v10 = vadd.f32 %v356_v17, %v355_v16  ;;  %v389_v6 = vsel %vm280_vm0, %v2250_v50, 0.0  ;;  %v2255_v17 = vld [vmem:[#allocation12_spill] sm:$0xff]  ;;  %v2260_v50 = vld [vmem:[#allocation17_spill] sm:$0xff] }
  0x53   :  { %v388_v51 = vadd.f32 %v387_v23, %v386_v8  ;;  %v369_v26 = vrot.slane %v368_v7, 2  ;;  %v379_v13 = vadd.f32 %v378_v48, %v377_v9  ;;  %v391_v57 = vsel %vm286_vm1, %v2251_v33, 0.0  ;;  %v2259_v23 = vld [vmem:[#allocation16_spill] sm:$0xff] }
  0x54   :  { %v399_v11 = vsel %vm280_vm0, %v2252_v32, 0.0  ;;  %v1858_v59 = vadd.f32 %v345_v3, %v344_v41  ;;  %v400_v40 = vsel %vm280_vm0, %v2253_v36, 0.0  ;;  %v402_v16 = vsel %vm280_vm0, %v2254_v0, 0.0  ;;  %v2258_v3 = vld [vmem:[#allocation15_spill] sm:$0xff] }
  0x55   :  { %v390_v29 = vadd.f32 %v389_v6, %v388_v51  ;;  %v370_v24 = vadd.f32 %v369_v26, %v368_v7  ;;  %v380_v63 = vrot.slane %v379_v13, 4  ;;  %v401_v1 = vadd.f32 %v400_v40, %v399_v11  ;;  %v2261_v26 = vld [vmem:[#allocation18_spill] sm:$0xff]  ;;  %v2262_v0 = vld [vmem:[#allocation19_spill] sm:$0xff] }
  0x56   :  { %v404_v42 = vsel %vm286_vm1, %v2255_v17, 0.0  ;;  %v412_v2 = vsel %vm280_vm0, %v2256_v43, 0.0  ;;  %v413_v41 = vsel %vm280_vm0, %v2257_v18, 0.0  ;;  %v415_v48 = vsel %vm280_vm0, %v2258_v3, 0.0 }
  0x57   :  { %v392_v25 = vadd.f32 %v391_v57, %v390_v29  ;;  %v358_v19 = vrot.slane %v357_v10, 1  ;;  %v381_v8 = vadd.f32 %v380_v63, %v379_v13  ;;  %v403_v9 = vadd.f32 %v402_v16, %v401_v1  ;;  %v2263_v16 = vld [vmem:[#allocation20_spill] sm:$0xff] }
  0x58   :  { %v414_v49 = vadd.f32 %v413_v41, %v412_v2  ;;  %v417_v51 = vsel %vm286_vm1, %v2259_v23, 0.0  ;;  %v425_v6 = vsel %vm280_vm0, %v2260_v50, 0.0  ;;  %v426_v33 = vsel %vm280_vm0, %v2261_v26, 0.0  ;;  %v2264_v2 = vld [vmem:[#allocation21_spill] sm:$0xff]  ;;  %v2265_v23 = vld [vmem:[#allocation22_spill] sm:$0xff] }
  0x59   :  { %v393_v7 = vrot.slane %v392_v25, 4  ;;  %v371_v57 = vrot.slane %v370_v24, 1  ;;  %v382_v32 = vrot.slane %v381_v8, 2  ;;  %v405_v11 = vadd.f32 %v404_v42, %v403_v9 }
  0x5a   :  { %v416_v29 = vadd.f32 %v415_v48, %v414_v49  ;;  %v427_v40 = vadd.f32 %v426_v33, %v425_v6  ;;  %v428_v13 = vsel %vm280_vm0, %v2262_v0, 0.0  ;;  %v430_v63 = vsel %vm286_vm1, %v2263_v16, 0.0  ;;  %v2266_v48 = vld [vmem:[#allocation23_spill] sm:$0xff]  ;;  %v2268_v33 = vld [vmem:[#allocation25_spill] sm:$0xff] }
  0x5b   :  { %v394_v36 = vadd.f32 %v393_v7, %v392_v25  ;;  %v383_v1 = vadd.f32 %v382_v32, %v381_v8  ;;  %v406_v17 = vrot.slane %v405_v11, 4  ;;  %v438_v18 = vsel %vm280_vm0, %v2264_v2, 0.0  ;;  %v2267_v8 = vld [vmem:[#allocation24_spill] sm:$0xff] }
  0x5c   :  { %v418_v43 = vadd.f32 %v417_v51, %v416_v29  ;;  %v429_v3 = vadd.f32 %v428_v13, %v427_v40  ;;  %v439_v42 = vsel %vm280_vm0, %v2265_v23, 0.0  ;;  %v441_v25 = vsel %vm280_vm0, %v2266_v48, 0.0  ;;  %v2269_v23 = vld [vmem:[#allocation26_spill] sm:$0xff] }
  0x5d   :  { %v395_v41 = vrot.slane %v394_v36, 2  ;;  %v384_v9 = vrot.slane %v383_v1, 1  ;;  %v407_v49 = vadd.f32 %v406_v17, %v405_v11  ;;  %v440_v50 = vadd.f32 %v439_v42, %v438_v18  ;;  %v2270_v17 = vld [vmem:[#allocation27_spill] sm:$0xff] }
  0x5e   :  { %v419_v7 = vrot.slane %v418_v43, 4  ;;  %v431_v26 = vadd.f32 %v430_v63, %v429_v3  ;;  %v443_v51 = vsel %vm286_vm1, %v2267_v8, 0.0  ;;  %v451_v32 = vsel %vm280_vm0, %v2268_v33, 0.0  ;;  %v2274_v8 = vld [vmem:[#allocation29_spill] sm:$0xff] }
  0x5f   :  { %v396_v6 = vadd.f32 %v395_v41, %v394_v36  ;;  %v1892_v29 = vadd.f32 %v358_v19, %v357_v10  ;;  %v408_v40 = vrot.slane %v407_v49, 2  ;;  %v442_v13 = vadd.f32 %v441_v25, %v440_v50  ;;  %v2273_v19 = vld [vmem:[#allocation28_spill] sm:$0xff] }
  0x60   :  { %v420_v0 = vadd.f32 %v419_v7, %v418_v43  ;;  %v432_v2 = vrot.slane %v431_v26, 4  ;;  %v452_v11 = vsel %vm280_vm0, %v2269_v23, 0.0  ;;  %v454_v36 = vsel %vm280_vm0, %v2270_v17, 0.0 }
  0x61   :  { %v397_v16 = vrot.slane %v396_v6, 1  ;;  %v409_v63 = vadd.f32 %v408_v40, %v407_v49  ;;  %v444_v41 = vadd.f32 %v443_v51, %v442_v13  ;;  %v453_v3 = vadd.f32 %v452_v11, %v451_v32  ;;  %v2275_v51 = vld [vmem:[#allocation30_spill] sm:$0xff]  ;;  %v2277_v32 = vld [vmem:[#allocation32_spill] sm:$0xff]  ;;  %v2278_v11 = vld [vmem:[#allocation33_spill] sm:$0xff] }
  0x62   :  { %v421_v18 = vrot.slane %v420_v0, 2  ;;  %v1898_v42 = vadd.f32 %v371_v57, %v370_v24  ;;  %v1900_v48 = vadd.f32 %v384_v9, %v383_v1  ;;  %v433_v10 = vadd.f32 %v432_v2, %v431_v26  ;;  %v2276_v9 = vld [vmem:[#allocation31_spill] sm:$0xff] }
  0x63   :  { %v456_v43 = vsel %vm286_vm1, %v2273_v19, 0.0  ;;  %v445_v7 = vrot.slane %v444_v41, 4  ;;  %v455_v50 = vadd.f32 %v454_v36, %v453_v3  ;;  %v464_v33 = vsel %vm280_vm0, %v2274_v8, 0.0  ;;  %v2281_v8 = vld [vmem:[#allocation36_spill] sm:$0xff] }
  0x64   :  { %2271 = vst [vmem:[#allocation2_spill] sm:$0xff] %v1898_v42  ;;  %2272 = vst [vmem:[#allocation3_spill] sm:$0xff] %v1900_v48  ;;  %v422_v25 = vadd.f32 %v421_v18, %v420_v0  ;;  %v1906_v23 = vadd.f32 %v397_v16, %v396_v6  ;;  %v410_v49 = vrot.slane %v409_v63, 1  ;;  %v434_v40 = vrot.slane %v433_v10, 2  ;;  %v2279_v6 = vld [vmem:[#allocation34_spill] sm:$0xff]  ;;  %v2286_v48 = vld [vmem:[#allocation40_spill] sm:$0xff] }
  0x65   :  { %v465_v24 = vsel %vm280_vm0, %v2275_v51, 0.0  ;;  %v446_v57 = vadd.f32 %v445_v7, %v444_v41  ;;  %v457_v1 = vadd.f32 %v456_v43, %v455_v50  ;;  %v467_v26 = vsel %vm280_vm0, %v2276_v9, 0.0  ;;  %v2280_v7 = vld [vmem:[#allocation35_spill] sm:$0xff] }
  0x66   :  { %v469_v0 = vsel %vm286_vm1, %v2277_v32, 0.0  ;;  %v435_v13 = vadd.f32 %v434_v40, %v433_v10  ;;  %v466_v2 = vadd.f32 %v465_v24, %v464_v33  ;;  %v477_v17 = vsel %vm280_vm0, %v2278_v11, 0.0  ;;  %v2282_v24 = vld [vmem:[#allocation37_spill] sm:$0xff] }
  0x67   :  { %v478_v16 = vsel %vm280_vm0, %v2279_v6, 0.0  ;;  %v423_v36 = vrot.slane %v422_v25, 1  ;;  %v447_v18 = vrot.slane %v446_v57, 2  ;;  %v458_v3 = vrot.slane %v457_v1, 4  ;;  %v2283_v6 = vld [vmem:[#allocation38_spill] sm:$0xff] }
  0x68   :  { %v479_v19 = vadd.f32 %v478_v16, %v477_v17  ;;  %v1918_v41 = vadd.f32 %v410_v49, %v409_v63  ;;  %v468_v43 = vadd.f32 %v467_v26, %v466_v2  ;;  %v480_v50 = vsel %vm280_vm0, %v2280_v7, 0.0  ;;  %v2284_v63 = vld [vmem:[#allocation39_spill] sm:$0xff] }
  0x69   :  { %v482_v10 = vsel %vm286_vm1, %v2281_v8, 0.0  ;;  %v436_v33 = vrot.slane %v435_v13, 1  ;;  %v459_v40 = vadd.f32 %v458_v3, %v457_v1  ;;  %v490_v9 = vsel %vm280_vm0, %v2282_v24, 0.0  ;;  %v2287_v3 = vld [vmem:[#allocation41_spill] sm:$0xff] }
  0x6a   :  { %v481_v51 = vadd.f32 %v480_v50, %v479_v19  ;;  %v448_v32 = vadd.f32 %v447_v18, %v446_v57  ;;  %v470_v11 = vadd.f32 %v469_v0, %v468_v43  ;;  %v491_v17 = vsel %vm280_vm0, %v2283_v6, 0.0  ;;  %v2288_v57 = vld [vmem:[#allocation42_spill] sm:$0xff] }
  0x6b   :  { %v493_v49 = vsel %vm280_vm0, %v2284_v63, 0.0  ;;  %v1930_v26 = vadd.f32 %v423_v36, %v422_v25  ;;  %v460_v2 = vrot.slane %v459_v40, 2  ;;  %v492_v7 = vadd.f32 %v491_v17, %v490_v9 }
  0x6c   :  { %v483_v16 = vadd.f32 %v482_v10, %v481_v51  ;;  %v471_v8 = vrot.slane %v470_v11, 4  ;;  %v495_v1 = vsel %vm286_vm1, %v2286_v48, 0.0  ;;  %v503_v19 = vsel %vm280_vm0, %v2287_v3, 0.0  ;;  %v2290_v10 = vld [vmem:[#allocation43_spill] sm:$0xff]  ;;  %v2291_v48 = vld [vmem:[#allocation44_spill] sm:$0xff]  ;;  %v2292_v3 = vld [vmem:[#allocation45_spill] sm:$0xff] }
  0x6d   :  { %2285 = vst [vmem:[#allocation4_spill] sm:$0xff] %v1930_v26  ;;  %v504_v0 = vsel %vm280_vm0, %v2288_v57, 0.0  ;;  %v1938_v18 = vadd.f32 %v436_v33, %v435_v13  ;;  %v461_v43 = vadd.f32 %v460_v2, %v459_v40  ;;  %v494_v24 = vadd.f32 %v493_v49, %v492_v7  ;;  %v2293_v33 = vld [vmem:[#allocation46_spill] sm:$0xff]  ;;  %v2294_v49 = vld [vmem:[#allocation47_spill] sm:$0xff] }
  0x6e   :  { %v484_v50 = vrot.slane %v483_v16, 4  ;;  %v449_v25 = vrot.slane %v448_v32, 1  ;;  %v472_v36 = vadd.f32 %v471_v8, %v470_v11  ;;  %v505_v6 = vadd.f32 %v504_v0, %v503_v19  ;;  %v2295_v0 = vld [vmem:[#allocation48_spill] sm:$0xff] }
  0x6f   :  { %2289 = vst [vmem:[#allocation5_spill] sm:$0xff] %v1938_v18  ;;  %v506_v51 = vsel %vm280_vm0, %v2290_v10, 0.0  ;;  %v496_v17 = vadd.f32 %v495_v1, %v494_v24  ;;  %v508_v63 = vsel %vm286_vm1, %v2291_v48, 0.0  ;;  %v516_v26 = vsel %vm280_vm0, %v2292_v3, 0.0  ;;  %v2296_v24 = vld [vmem:[#allocation49_spill] sm:$0xff]  ;;  %v2297_v3 = vld [vmem:[#allocation50_spill] sm:$0xff] }
  0x70   :  { %v485_v9 = vadd.f32 %v484_v50, %v483_v16  ;;  %v473_v57 = vrot.slane %v472_v36, 2  ;;  %v507_v13 = vadd.f32 %v506_v51, %v505_v6  ;;  %v517_v40 = vsel %vm280_vm0, %v2293_v33, 0.0 }
  0x71   :  { %v519_v11 = vsel %vm280_vm0, %v2294_v49, 0.0  ;;  %v462_v2 = vrot.slane %v461_v43, 1  ;;  %v497_v8 = vrot.slane %v496_v17, 4  ;;  %v518_v19 = vadd.f32 %v517_v40, %v516_v26 }
  0x72   :  { %v486_v7 = vrot.slane %v485_v9, 2  ;;  %v474_v16 = vadd.f32 %v473_v57, %v472_v36  ;;  %v509_v1 = vadd.f32 %v508_v63, %v507_v13  ;;  %v521_v50 = vsel %vm286_vm1, %v2295_v0, 0.0 }
  0x73   :  { %v529_v10 = vsel %vm280_vm0, %v2296_v24, 0.0  ;;  %v498_v6 = vadd.f32 %v497_v8, %v496_v17  ;;  %v520_v51 = vadd.f32 %v519_v11, %v518_v19  ;;  %v530_v33 = vsel %vm280_vm0, %v2297_v3, 0.0  ;;  %v2298_v11 = vld [vmem:[#allocation51_spill] sm:$0xff]  ;;  %v2299_v19 = vld [vmem:[#allocation52_spill] sm:$0xff] }
  0x74   :  { %v487_v48 = vadd.f32 %v486_v7, %v485_v9  ;;  %v1956_v18 = vadd.f32 %v449_v25, %v448_v32  ;;  %v510_v49 = vrot.slane %v509_v1, 4  ;;  %v531_v42 = vadd.f32 %v530_v33, %v529_v10 }
  0x75   :  { %v532_v26 = vsel %vm280_vm0, %v1549_v21, 0.0  ;;  %v475_v36 = vrot.slane %v474_v16, 1  ;;  %v499_v63 = vrot.slane %v498_v6, 2  ;;  %v522_v57 = vadd.f32 %v521_v50, %v520_v51 }
  0x76   :  { %v534_v13 = vsel %vm286_vm1, %v1552_v22, 0.0  ;;  %v1962_v40 = vadd.f32 %v462_v2, %v461_v43  ;;  %v511_v9 = vadd.f32 %v510_v49, %v509_v1  ;;  %v533_v17 = vadd.f32 %v532_v26, %v531_v42  ;;  %v2300_v2 = vld [vmem:[#allocation53_spill] sm:$0xff]  ;;  %v2301_v1 = vld [vmem:[#allocation54_spill] sm:$0xff]  ;;  %v2302_v49 = vld [vmem:[#allocation55_spill] sm:$0xff] }
  0x77   :  { %v542_v7 = vsel %vm280_vm0, %v2298_v11, 0.0  ;;  %v488_v32 = vrot.slane %v487_v48, 1  ;;  %v500_v25 = vadd.f32 %v499_v63, %v498_v6  ;;  %v523_v8 = vrot.slane %v522_v57, 4  ;;  %v2303_v11 = vld [vmem:[#allocation56_spill] sm:$0xff] }
  0x78   :  { %v543_v0 = vsel %vm280_vm0, %v2299_v19, 0.0  ;;  %v512_v21 = vrot.slane %v511_v9, 2  ;;  %v535_v24 = vadd.f32 %v534_v13, %v533_v17  ;;  %v545_v50 = vsel %vm280_vm0, %v1570_v15, 0.0  ;;  %v2304_v19 = vld [vmem:[#allocation57_spill] sm:$0xff] }
  0x79   :  { %v544_v10 = vadd.f32 %v543_v0, %v542_v7  ;;  %v1970_v22 = vadd.f32 %v475_v36, %v474_v16  ;;  %v524_v43 = vadd.f32 %v523_v8, %v522_v57  ;;  %v547_v42 = vsel %vm286_vm1, %v2300_v2, 0.0 }
  0x7a   :  { %v555_v51 = vsel %vm280_vm0, %v2301_v1, 0.0  ;;  %v513_v6 = vadd.f32 %v512_v21, %v511_v9  ;;  %v536_v3 = vrot.slane %v535_v24, 4  ;;  %v556_v26 = vsel %vm280_vm0, %v2302_v49, 0.0  ;;  %v2305_v21 = vld [vmem:[#allocation58_spill] sm:$0xff]  ;;  %v2307_v49 = vld [vmem:[#allocation60_spill] sm:$0xff] }
  0x7b   :  { %v546_v33 = vadd.f32 %v545_v50, %v544_v10  ;;  %v501_v63 = vrot.slane %v500_v25, 1  ;;  %v525_v13 = vrot.slane %v524_v43, 2  ;;  %v557_v17 = vadd.f32 %v556_v26, %v555_v51 }
  0x7c   :  { %v558_v15 = vsel %vm280_vm0, %v1591_v31, 0.0  ;;  %v1980_v16 = vadd.f32 %v488_v32, %v487_v48  ;;  %v537_v36 = vadd.f32 %v536_v3, %v535_v24  ;;  %v560_v7 = vsel %vm286_vm1, %v2303_v11, 0.0  ;;  %v2306_v24 = vld [vmem:[#allocation59_spill] sm:$0xff] }
  0x7d   :  { %v548_v57 = vadd.f32 %v547_v42, %v546_v33  ;;  %v526_v8 = vadd.f32 %v525_v13, %v524_v43  ;;  %v559_v9 = vadd.f32 %v558_v15, %v557_v17  ;;  %v568_v0 = vsel %vm280_vm0, %v2304_v19, 0.0  ;;  %v2308_v15 = vld [vmem:[#allocation61_spill] sm:$0xff] }
  0x7e   :  { %v569_v10 = vsel %vm280_vm0, %v2305_v21, 0.0  ;;  %v514_v50 = vrot.slane %v513_v6, 1  ;;  %v538_v2 = vrot.slane %v537_v36, 2  ;;  %v1988_v31 = vadd.f32 %v501_v63, %v500_v25  ;;  %v2310_v21 = vld [vmem:[#allocation63_spill] sm:$0xff] }
  0x7f   :  { %v549_v1 = vrot.slane %v548_v57, 4  ;;  %v570_v51 = vadd.f32 %v569_v10, %v568_v0  ;;  %v561_v48 = vadd.f32 %v560_v7, %v559_v9  ;;  %v571_v32 = vsel %vm280_vm0, %v1612_v44, 0.0  ;;  %v2309_v0 = vld [vmem:[#allocation62_spill] sm:$0xff] }
  0x80   :  { %v573_v43 = vsel %vm286_vm1, %v2306_v24, 0.0  ;;  %v527_v42 = vrot.slane %v526_v8, 1  ;;  %v581_v26 = vsel %vm280_vm0, %v2307_v49, 0.0  ;;  %v539_v13 = vadd.f32 %v538_v2, %v537_v36  ;;  %v2311_v36 = vld [vmem:[#allocation64_spill] sm:$0xff]  ;;  %v2312_v49 = vld [vmem:[#allocation65_spill] sm:$0xff] }
  0x81   :  { %v550_v3 = vadd.f32 %v549_v1, %v548_v57  ;;  %v572_v33 = vadd.f32 %v571_v32, %v570_v51  ;;  %v562_v17 = vrot.slane %v561_v48, 4  ;;  %v582_v11 = vsel %vm280_vm0, %v2308_v15, 0.0 }
  0x82   :  { %v584_v25 = vsel %vm280_vm0, %v1633_v55, 0.0  ;;  %v2000_v63 = vadd.f32 %v514_v50, %v513_v6  ;;  %v583_v9 = vadd.f32 %v582_v11, %v581_v26  ;;  %v586_v57 = vsel %vm286_vm1, %v2309_v0, 0.0 }
  0x83   :  { %v551_v44 = vrot.slane %v550_v3, 2  ;;  %v574_v7 = vadd.f32 %v573_v43, %v572_v33  ;;  %v563_v19 = vadd.f32 %v562_v17, %v561_v48  ;;  %v594_v10 = vsel %vm280_vm0, %v2310_v21, 0.0  ;;  %v2313_v17 = vld [vmem:[#allocation66_spill] sm:$0xff]  ;;  %v2315_v21 = vld [vmem:[#allocation68_spill] sm:$0xff] }
  0x84   :  { %v595_v2 = vsel %vm280_vm0, %v2311_v36, 0.0  ;;  %v2008_v1 = vadd.f32 %v527_v42, %v526_v8  ;;  %v585_v55 = vadd.f32 %v584_v25, %v583_v9  ;;  %v540_v6 = vrot.slane %v539_v13, 1  ;;  %v2314_v42 = vld [vmem:[#allocation67_spill] sm:$0xff]  ;;  %v2316_v36 = vld [vmem:[#allocation69_spill] sm:$0xff] }
  0x85   :  { %v552_v51 = vadd.f32 %v551_v44, %v550_v3  ;;  %v575_v32 = vrot.slane %v574_v7, 4  ;;  %v564_v50 = vrot.slane %v563_v19, 2  ;;  %v596_v24 = vadd.f32 %v595_v2, %v594_v10 }
  0x86   :  { %v597_v48 = vsel %vm280_vm0, %v1654_v20, 0.0  ;;  %v587_v33 = vadd.f32 %v586_v57, %v585_v55  ;;  %v599_v26 = vsel %vm286_vm1, %v2312_v49, 0.0  ;;  %v607_v15 = vsel %vm280_vm0, %v2313_v17, 0.0  ;;  %v2318_v17 = vld [vmem:[#allocation71_spill] sm:$0xff] }
  0x87   :  { %v576_v43 = vadd.f32 %v575_v32, %v574_v7  ;;  %v553_v11 = vrot.slane %v552_v51, 1  ;;  %v598_v8 = vadd.f32 %v597_v48, %v596_v24  ;;  %v608_v3 = vsel %vm280_vm0, %v2314_v42, 0.0  ;;  %v2317_v48 = vld [vmem:[#allocation70_spill] sm:$0xff] }
  0x88   :  { %v610_v25 = vsel %vm280_vm0, %v1675_v5, 0.0  ;;  %v565_v44 = vadd.f32 %v564_v50, %v563_v19  ;;  %v588_v0 = vrot.slane %v587_v33, 4  ;;  %v609_v20 = vadd.f32 %v608_v3, %v607_v15 }
  0x89   :  { %v577_v9 = vrot.slane %v576_v43, 2  ;;  %v2020_v7 = vadd.f32 %v540_v6, %v539_v13  ;;  %v600_v57 = vadd.f32 %v599_v26, %v598_v8  ;;  %v612_v10 = vsel %vm286_vm1, %v2315_v21, 0.0  ;;  %v2319_v8 = vld [vmem:[#allocation72_spill] sm:$0xff] }
  0x8a   :  { %v620_v2 = vsel %vm280_vm0, %v2316_v36, 0.0  ;;  %v589_v55 = vadd.f32 %v588_v0, %v587_v33  ;;  %v611_v24 = vadd.f32 %v610_v25, %v609_v20  ;;  %v621_v49 = vsel %vm280_vm0, %v2317_v48, 0.0  ;;  %v2320_v33 = vld [vmem:[#allocation73_spill] sm:$0xff] }
  0x8b   :  { %v578_v32 = vadd.f32 %v577_v9, %v576_v43  ;;  %v2028_v5 = vadd.f32 %v553_v11, %v552_v51  ;;  %v601_v19 = vrot.slane %v600_v57, 4  ;;  %v622_v50 = vadd.f32 %v621_v49, %v620_v2  ;;  %v2321_v9 = vld [vmem:[#allocation74_spill] sm:$0xff] }
  0x8c   :  { %v623_v13 = vsel %vm280_vm0, %v2318_v17, 0.0  ;;  %v566_v6 = vrot.slane %v565_v44, 1  ;;  %v590_v26 = vrot.slane %v589_v55, 2  ;;  %v613_v15 = vadd.f32 %v612_v10, %v611_v24 }
  0x8d   :  { %v625_v42 = vsel %vm286_vm1, %v2319_v8, 0.0  ;;  %v602_v3 = vadd.f32 %v601_v19, %v600_v57  ;;  %v624_v43 = vadd.f32 %v623_v13, %v622_v50  ;;  %v633_v25 = vsel %vm280_vm0, %v2320_v33, 0.0 }
  0x8e   :  { %v634_v51 = vsel %vm280_vm0, %v2321_v9, 0.0  ;;  %v579_v11 = vrot.slane %v578_v32, 1  ;;  %v591_v0 = vadd.f32 %v590_v26, %v589_v55  ;;  %v614_v20 = vrot.slane %v613_v15, 4 }
  0x8f   :  { %v635_v21 = vadd.f32 %v634_v51, %v633_v25  ;;  %v603_v36 = vrot.slane %v602_v3, 2  ;;  %v626_v2 = vadd.f32 %v625_v42, %v624_v43  ;;  %v636_v10 = vsel %vm280_vm0, %v1717_v28, 0.0 }
  0x90   :  { %v638_v24 = vsel %vm286_vm1, %v1720_v39, 0.0  ;;  %v2042_v57 = vadd.f32 %v566_v6, %v565_v44  ;;  %v615_v48 = vadd.f32 %v614_v20, %v613_v15  ;;  %v646_v19 = vsel %vm280_vm0, %v1723_v38, 0.0 }
  0x91   :  { %v637_v49 = vadd.f32 %v636_v10, %v635_v21  ;;  %v604_v50 = vadd.f32 %v603_v36, %v602_v3  ;;  %v627_v17 = vrot.slane %v626_v2, 4  ;;  %v647_v55 = vsel %vm280_vm0, %v1726_v61, 0.0 }
  0x92   :  { %v649_v13 = vsel %vm280_vm0, %v1729_v37, 0.0  ;;  %v2050_v26 = vadd.f32 %v579_v11, %v578_v32  ;;  %v616_v28 = vrot.slane %v615_v48, 2  ;;  %v648_v39 = vadd.f32 %v647_v55, %v646_v19 }
  0x93   :  { %v639_v8 = vadd.f32 %v638_v24, %v637_v49  ;;  %v592_v44 = vrot.slane %v591_v0, 1  ;;  %v628_v6 = vadd.f32 %v627_v17, %v626_v2  ;;  %v651_v15 = vsel %vm286_vm1, %v1732_v14, 0.0 }
  0x94   :  { %v659_v38 = vsel %vm280_vm0, %v1735_v12, 0.0  ;;  %v617_v42 = vadd.f32 %v616_v28, %v615_v48  ;;  %v650_v43 = vadd.f32 %v649_v13, %v648_v39  ;;  %v660_v61 = vsel %vm280_vm0, %v1738_v45, 0.0 }
  0x95   :  { %v640_v3 = vrot.slane %v639_v8, 4  ;;  %v605_v37 = vrot.slane %v604_v50, 1  ;;  %v629_v32 = vrot.slane %v628_v6, 2  ;;  %v661_v33 = vadd.f32 %v660_v61, %v659_v38 }
  0x96   :  { %v662_v25 = vsel %vm280_vm0, %v1741_v53, 0.0  ;;  %v618_v9 = vrot.slane %v617_v42, 1  ;;  %v652_v11 = vadd.f32 %v651_v15, %v650_v43  ;;  %v664_v14 = vsel %vm286_vm1, %v1744_v30, 0.0 }
  0x97   :  { %v641_v51 = vadd.f32 %v640_v3, %v639_v8  ;;  %v630_v20 = vadd.f32 %v629_v32, %v628_v6  ;;  %v663_v12 = vadd.f32 %v662_v25, %v661_v33  ;;  %v672_v21 = vsel %vm280_vm0, %v1747_v52, 0.0 }
  0x98   :  { %v673_v45 = vsel %vm280_vm0, %v1750_v46, 0.0  ;;  %v2066_v36 = vadd.f32 %v592_v44, %v591_v0  ;;  %v653_v10 = vrot.slane %v652_v11, 4  ;;  %v606_v53 = vadd.f32 %v605_v37, %v604_v50 }
  0x99   :  { %v642_v2 = vrot.slane %v641_v51, 2  ;;  %v674_v24 = vadd.f32 %v673_v45, %v672_v21  ;;  %v665_v48 = vadd.f32 %v664_v14, %v663_v12  ;;  %v675_v49 = vsel %vm280_vm0, %v1753_v47, 0.0  ;;  %v2324_v45 = vld [vmem:[#allocation3_spill] sm:$0xff] }
  0x9a   :  { %v677_v30 = vsel %vm286_vm1, %v1756_v60, 0.0  ;;  %v631_v19 = vrot.slane %v630_v20, 1  ;;  %v654_v17 = vadd.f32 %v653_v10, %v652_v11  ;;  %v685_v52 = vsel %vm280_vm0, %v1759_v4, 0.0 }
  0x9b   :  { %v676_v55 = vadd.f32 %v675_v49, %v674_v24  ;;  %v619_v46 = vadd.f32 %v618_v9, %v617_v42  ;;  %v666_v0 = vrot.slane %v665_v48, 4  ;;  %v686_v13 = vsel %vm280_vm0, %v1762_v54, 0.0 }
  0x9c   :  { %v688_v50 = vsel %vm280_vm0, %v1825_v56, 0.0  ;;  %v643_v28 = vadd.f32 %v642_v2, %v641_v51  ;;  %v655_v8 = vrot.slane %v654_v17, 2  ;;  %v687_v39 = vadd.f32 %v686_v13, %v685_v52  ;;  %v2325_v2 = vld [vmem:[#allocation5_spill] sm:$0xff] }
  0x9d   :  { %v678_v47 = vadd.f32 %v677_v30, %v676_v55  ;;  %v667_v44 = vadd.f32 %v666_v0, %v665_v48  ;;  %v690_v60 = vsel %vm286_vm1, %v1830_v58, 0.0  ;;  %v632_v6 = vadd.f32 %v631_v19, %v630_v20  ;;  %v2323_v20 = vld [vmem:[#allocation4_spill] sm:$0xff] }
  0x9e   :  { %v656_v4 = vadd.f32 %v655_v8, %v654_v17  ;;  %v689_v38 = vadd.f32 %v688_v50, %v687_v39  ;;  %v732_v54 = vsel %vm731_vm2, %v1840_v34, %v1834_v27  ;;  %v644_v56 = vrot.slane %v643_v28, 1 }
  0x9f   :  { %v679_v15 = vrot.slane %v678_v47, 4  ;;  %v668_v42 = vrot.slane %v667_v44, 2  ;;  %v734_v61 = vsel %vm733_vm3, %v1846_v62, %v732_v54  ;;  %v745_v62 = vsel %vm731_vm2, %v1918_v41, %v1906_v23 }
  0xa0   :  { %v691_v43 = vadd.f32 %v690_v60, %v689_v38  ;;  %v736_v37 = vsel %vm735_vm4, %v1850_v35, %v734_v61  ;;  %v657_v32 = vrot.slane %v656_v4, 1  ;;  %v2322_v35 = vld [vmem:[#allocation2_spill] sm:$0xff]  ;;  %v746_v12 = vsel %vm733_vm3, %v2323_v20, %v745_v62 }
  0xa1   :  { %v680_v3 = vadd.f32 %v679_v15, %v678_v47  ;;  %v669_v58 = vadd.f32 %v668_v42, %v667_v44  ;;  %v738_v27 = vsel %vm737_vm5, %v1858_v59, %v736_v37  ;;  %v645_v21 = vadd.f32 %v644_v56, %v643_v28 }
  0xa2   :  { %v692_v25 = vrot.slane %v691_v43, 4  ;;  %v740_v9 = vsel %vm739_vm6, %v1892_v29, %v738_v27  ;;  %v747_v29 = vsel %vm735_vm4, %v2325_v2, %v746_v12  ;;  %v752_v10 = vsel %vm731_vm2, %v2000_v63, %v1988_v31 }
  0xa3   :  { %v681_v33 = vrot.slane %v680_v3, 2  ;;  %v670_v34 = vrot.slane %v669_v58, 1  ;;  %v742_v14 = vsel %vm741_vm7, %v2322_v35, %v740_v9  ;;  %v748_v24 = vsel %vm737_vm5, %v1956_v18, %v747_v29 }
  0xa4   :  { %v693_v11 = vadd.f32 %v692_v25, %v691_v43  ;;  %v744_v59 = vsel %vm743_vm8, %v2324_v45, %v742_v14  ;;  %v753_v48 = vsel %vm733_vm3, %v2008_v1, %v752_v10  ;;  %v658_v49 = vadd.f32 %v657_v32, %v656_v4 }
  0xa5   :  { %v682_v51 = vadd.f32 %v681_v33, %v680_v3  ;;  %945 = vmatprep.mubr.msk.f32.mxu0 %vm280_vm0, %v744_v59  ;;  %v749_v30 = vsel %vm739_vm6, %v1962_v40, %v748_v24  ;;  %v754_v19 = vsel %vm735_vm4, %v2020_v7, %v753_v48  ;;  %v759_v17 = vsel %vm731_vm2, %v619_v46, %v606_v53  ;;  %v936_v48 = vld [vmem:[%s2169_s3] ss:$0 sm:$0xff] }
  0xa6   :  { %v694_v41 = vrot.slane %v693_v11, 2  ;;  %v671_v31 = vadd.f32 %v670_v34, %v669_v58  ;;  %v750_v55 = vsel %vm741_vm7, %v1970_v22, %v749_v30  ;;  %v755_v18 = vsel %vm737_vm5, %v2028_v5, %v754_v19 }
  0xa7   :  { %v683_v23 = vrot.slane %v682_v51, 1  ;;  %v751_v52 = vsel %vm743_vm8, %v1980_v16, %v750_v55  ;;  %v756_v40 = vsel %vm739_vm6, %v2042_v57, %v755_v18  ;;  %v760_v0 = vsel %vm733_vm3, %v632_v6, %v759_v17 }
  0xa8   :  { %v695_v63 = vadd.f32 %v694_v41, %v693_v11  ;;  %v757_v53 = vsel %vm741_vm7, %v2050_v26, %v756_v40  ;;  %v761_v46 = vsel %vm735_vm4, %v645_v21, %v760_v0  ;;  %946 = vmatmul.mubr.msk.f32.vlgmr.msra.gmra.mxu0 %vm280_vm0, %v751_v52 }
  0xa9   :  { %v684_v1 = vadd.f32 %v683_v23, %v682_v51  ;;  %v758_v22 = vsel %vm743_vm8, %v2066_v36, %v757_v53  ;;  %v762_v5 = vsel %vm737_vm5, %v658_v49, %v761_v46 }
  0xaa   :  { %v696_v7 = vrot.slane %v695_v63, 1  ;;  %v763_v16 = vsel %vm739_vm6, %v671_v31, %v762_v5  ;;  %948 = vmatprep.mubr.msk.f32.mxu1 %vm280_vm0, %v758_v22  ;;  %v937_v31 = vld [vmem:[%s2170_s4] ss:$0 sm:$0xff] }
  0xab   :  { %v764_v57 = vsel %vm741_vm7, %v684_v1, %v763_v16 }
  0xac   :  { %v697_v13 = vadd.f32 %v696_v7, %v695_v63 }
  0xae   :  { %v765_v50 = vsel %vm743_vm8, %v697_v13, %v764_v57 }
  0xaf   :  { %949 = vmatmul.mubr.msk.f32.vlgmr.msra.gmra.mxu1 %vm280_vm0, %v765_v50 }
 0x168   :  { %v947_v26 = vpop.f32.mrf.mxu0 }
 0x169   :  { %v862_v47 = vsel %vm280_vm0, %v947_v26, 0.0 }
 0x16a   :  { %v840_v28 = vpop.f32.mrf.mxu0 }
 0x16b   :  { %v861_v8 = vsel %vm280_vm0, %v840_v28, 0.0 }
 0x16c   :  { %v863_v39 = vadd.f32 %v862_v47, %v861_v8 }
 0x16f   :  { %v950_v36 = vpop.f32.mrf.mxu1 }
 0x170   :  { %v866_v4 = vsel %vm280_vm0, %v950_v36, 0.0 }
 0x171   :  { %v850_v44 = vpop.f32.mrf.mxu1 }
 0x172   :  { %v864_v60 = vsel %vm280_vm0, %v850_v44, 0.0 }
 0x173   :  { %v865_v6 = vadd.f32 %v864_v60, %v863_v39 }
 0x175   :  { %v867_v15 = vadd.f32 %v866_v4, %v865_v6 }
 0x177   :  { %v868_v38 = vrot.slane %v867_v15, 4 }
 0x179   :  { %v869_v42 = vadd.f32 %v868_v38, %v867_v15 }
 0x17b   :  { %v870_v54 = vrot.slane %v869_v42, 2 }
 0x17d   :  { %v871_v56 = vadd.f32 %v870_v54, %v869_v42 }
 0x17f   :  { %v872_v3 = vrot.slane %v871_v56, 1 }
 0x181   :  { %v873_v43 = vadd.f32 %v872_v3, %v871_v56 }
 0x183   :  { %v875_v61 = vmul.f32 0.03125, %v873_v43 }
 0x185   :  { %v876_v58 = vsub.f32 %v840_v28, %v875_v61  ;;  %v877_v37 = vsub.f32 %v947_v26, %v875_v61  ;;  %v878_v32 = vsub.f32 %v850_v44, %v875_v61  ;;  %v879_v33 = vsub.f32 %v950_v36, %v875_v61 }
 0x187   :  { %v880_v25 = vmul.f32 %v876_v58, %v876_v58  ;;  %v881_v27 = vmul.f32 %v877_v37, %v877_v37  ;;  %v882_v34 = vmul.f32 %v878_v32, %v878_v32  ;;  %v883_v9 = vmul.f32 %v879_v33, %v879_v33 }
 0x189   :  { %v884_v62 = vsel %vm280_vm0, %v880_v25, 0.0  ;;  %v885_v51 = vsel %vm280_vm0, %v881_v27, 0.0  ;;  %v887_v35 = vsel %vm280_vm0, %v882_v34, 0.0  ;;  %v889_v20 = vsel %vm280_vm0, %v883_v9, 0.0 }
 0x18a   :  { %v886_v11 = vadd.f32 %v885_v51, %v884_v62 }
 0x18c   :  { %v888_v14 = vadd.f32 %v887_v35, %v886_v11 }
 0x18e   :  { %v890_v12 = vadd.f32 %v889_v20, %v888_v14 }
 0x190   :  { %v891_v21 = vrot.slane %v890_v12, 4 }
 0x192   :  { %v892_v45 = vadd.f32 %v891_v21, %v890_v12 }
 0x194   :  { %v893_v59 = vrot.slane %v892_v45, 2 }
 0x196   :  { %v894_v2 = vadd.f32 %v893_v59, %v892_v45 }
 0x198   :  { %v895_v29 = vrot.slane %v894_v2, 1 }
 0x19a   :  { %v896_v10 = vadd.f32 %v895_v29, %v894_v2 }
 0x19c   :  { %v897_v23 = vmul.f32 0.03125, %v896_v10 }
 0x19e   :  { %v898_v41 = vadd.f32 1e-05, %v897_v23 }
 0x1a0   :  { %953 = vrsqrt.f32 %v898_v41 }
 0x1ad   :  { %v954_v24 = vpop.eup %953 }
 0x1ae   :  { %v900_v49 = vmul.f32 %v954_v24, %v876_v58  ;;  %v901_v30 = vmul.f32 %v954_v24, %v877_v37  ;;  %v902_v19 = vmul.f32 %v954_v24, %v878_v32  ;;  %v903_v17 = vmul.f32 %v954_v24, %v879_v33 }
 0x1b0   :  { %v910_v63 = vmul.f32 %v936_v48, %v900_v49  ;;  %v911_v55 = vmul.f32 %v936_v48, %v901_v30  ;;  %v912_v18 = vmul.f32 %v936_v48, %v902_v19  ;;  %v913_v1 = vmul.f32 %v936_v48, %v903_v17 }
 0x1b2   :  { %v920_v52 = vadd.f32 %v937_v31, %v910_v63  ;;  %v921_v40 = vadd.f32 %v937_v31, %v911_v55  ;;  %v922_v0 = vadd.f32 %v937_v31, %v912_v18  ;;  %v923_v7 = vadd.f32 %v937_v31, %v913_v1 }
 0x1b4   :  { %924 = vst.msk [vmem:[%s2171_s5] sm:$0xff] %vm280_vm0, %v920_v52  ;;  %925 = vst.msk [vmem:[%s2171_s5 + $0x8] sm:$0xff] %vm280_vm0, %v921_v40 }
 0x1b5   :  { %926 = vst.msk [vmem:[%s2171_s5 + $0x10] sm:$0xff] %vm280_vm0, %v922_v0  ;;  %927 = vst.msk [vmem:[%s2171_s5 + $0x18] sm:$0xff] %vm280_vm0, %v923_v7 }

// kernel: _lambda_.107
= control target key start
LH: loop header
LB: loop body
LE: loop exit
PB: predicated region body
PF: predicated region fallthrough
CT: control target
= control target key end

     0   :  { %vm72_vm0 = vcmask 64512   ;;  %vm74_vm1 = vcmask 57344   ;;  %vm394_vm2 = vcmask 1041409   ;;  %vm396_vm3 = vcmask 1042434   ;;  %s817_s0 = inlined_call_operand.vmem [shape: f32[32,9,8], index: 0, kind: input, shape index: {}]   ;;  %s818_s1 = inlined_call_operand.vmem [shape: f32[32,8], index: 1, kind: output, shape index: {}]  }
   0x1   :  { %v8_v0 = vld [vmem:[%s817_s0] sm:$0xff]  ;;  %v9_v1 = vld [vmem:[%s817_s0 + $0x8] sm:$0x1]  ;;  %v10_v2 = vld [vmem:[%s817_s0 + $0x10] sm:$0xff]  ;;  %vm398_vm4 = vcmask 1043459   ;;  %vm400_vm5 = vcmask 1044484  }
   0x2   :  { %v11_v3 = vld [vmem:[%s817_s0 + $0x18] sm:$0x1]  ;;  %v12_v4 = vld [vmem:[%s817_s0 + $0x20] sm:$0xff]  ;;  %v13_v5 = vld [vmem:[%s817_s0 + $0x28] sm:$0x1]  ;;  %v73_v6 = vsel %vm72_vm0, %v8_v0, -inf }
   0x3   :  { %v75_v7 = vsel %vm74_vm1, %v9_v1, -inf  ;;  %v83_v8 = vsel %vm72_vm0, %v10_v2, -inf  ;;  %v14_v9 = vld [vmem:[%s817_s0 + $0x30] sm:$0xff]  ;;  %v84_v11 = vsel %vm74_vm1, %v11_v3, -inf  ;;  %v92_v13 = vsel %vm72_vm0, %v12_v4, -inf  ;;  %v16_v16 = vld [vmem:[%s817_s0 + $0x40] sm:$0xff] }
   0x4   :  { %v76_v10 = vmax.f32 %v73_v6, %v75_v7  ;;  %v85_v12 = vmax.f32 %v83_v8, %v84_v11  ;;  %v93_v14 = vsel %vm74_vm1, %v13_v5, -inf  ;;  %v15_v15 = vld [vmem:[%s817_s0 + $0x38] sm:$0x1]  ;;  %v101_v20 = vsel %vm72_vm0, %v14_v9, -inf  ;;  %v17_v21 = vld [vmem:[%s817_s0 + $0x48] sm:$0x1] }
   0x5   :  { %v94_v18 = vmax.f32 %v92_v13, %v93_v14  ;;  %v102_v25 = vsel %vm74_vm1, %v15_v15, -inf  ;;  %v110_v26 = vsel %vm72_vm0, %v16_v16, -inf  ;;  %v111_v31 = vsel %vm74_vm1, %v17_v21, -inf  ;;  %v18_v32 = vld [vmem:[%s817_s0 + $0x50] sm:$0xff]  ;;  %v19_v38 = vld [vmem:[%s817_s0 + $0x58] sm:$0x1] }
   0x6   :  { %v77_v17 = vrot.slane %v76_v10, 4  ;;  %v86_v19 = vrot.slane %v85_v12, 4  ;;  %v103_v29 = vmax.f32 %v101_v20, %v102_v25  ;;  %v112_v35 = vmax.f32 %v110_v26, %v111_v31  ;;  %v20_v41 = vld [vmem:[%s817_s0 + $0x60] sm:$0xff]  ;;  %v21_v46 = vld [vmem:[%s817_s0 + $0x68] sm:$0x1]  ;;  %v22_v53 = vld [vmem:[%s817_s0 + $0x70] sm:$0xff] }
   0x7   :  { %v95_v23 = vrot.slane %v94_v18, 4  ;;  %v119_v45 = vsel %vm72_vm0, %v18_v32, -inf  ;;  %v120_v52 = vsel %vm74_vm1, %v19_v38, -inf  ;;  %v128_v56 = vsel %vm72_vm0, %v20_v41, -inf  ;;  %v23_v57 = vld [vmem:[%s817_s0 + $0x78] sm:$0x1] }
   0x8   :  { %v78_v22 = vmax.f32 %v76_v10, %v77_v17  ;;  %v87_v24 = vmax.f32 %v85_v12, %v86_v19  ;;  %v104_v37 = vrot.slane %v103_v29, 4  ;;  %v113_v44 = vrot.slane %v112_v35, 4  ;;  %v24_v58 = vld [vmem:[%s817_s0 + $0x80] sm:$0xff]  ;;  %v25_v63 = vld [vmem:[%s817_s0 + $0x88] sm:$0x1]  ;;  %v26_v2 = vld [vmem:[%s817_s0 + $0x90] sm:$0xff] }
   0x9   :  { %v96_v28 = vmax.f32 %v94_v18, %v95_v23  ;;  %v121_v55 = vmax.f32 %v119_v45, %v120_v52  ;;  %v129_v61 = vsel %vm74_vm1, %v21_v46, -inf  ;;  %v137_v5 = vsel %vm72_vm0, %v22_v53, -inf  ;;  %v27_v7 = vld [vmem:[%s817_s0 + $0x98] sm:$0x1]  ;;  %v28_v8 = vld [vmem:[%s817_s0 + $0xa0] sm:$0xff]  ;;  %v30_v18 = vld [vmem:[%s817_s0 + $0xb0] sm:$0xff] }
   0xa   :  { %v79_v27 = vrot.slane %v78_v22, 2  ;;  %v88_v30 = vrot.slane %v87_v24, 2  ;;  %v105_v43 = vmax.f32 %v103_v29, %v104_v37  ;;  %v114_v51 = vmax.f32 %v112_v35, %v113_v44  ;;  %v29_v13 = vld [vmem:[%s817_s0 + $0xa8] sm:$0x1]  ;;  %v31_v19 = vld [vmem:[%s817_s0 + $0xb8] sm:$0x1] }
   0xb   :  { %v97_v34 = vrot.slane %v96_v28, 2  ;;  %v122_v0 = vrot.slane %v121_v55, 4  ;;  %v130_v1 = vmax.f32 %v128_v56, %v129_v61  ;;  %v138_v11 = vsel %vm74_vm1, %v23_v57, -inf  ;;  %v33_v37 = vld [vmem:[%s817_s0 + $0xc8] sm:$0x1]  ;;  %v34_v46 = vld [vmem:[%s817_s0 + $0xd0] sm:$0xff] }
   0xc   :  { %v80_v33 = vmax.f32 %v78_v22, %v79_v27  ;;  %v89_v36 = vmax.f32 %v87_v24, %v88_v30  ;;  %v106_v50 = vrot.slane %v105_v43, 2  ;;  %v115_v60 = vrot.slane %v114_v51, 2 }
   0xd   :  { %v98_v40 = vmax.f32 %v96_v28, %v97_v34  ;;  %v123_v9 = vmax.f32 %v121_v55, %v122_v0  ;;  %v131_v10 = vrot.slane %v130_v1, 4  ;;  %v146_v12 = vsel %vm72_vm0, %v24_v58, -inf  ;;  %v32_v28 = vld [vmem:[%s817_s0 + $0xc0] sm:$0xff] }
   0xe   :  { %v81_v39 = vrot.slane %v80_v33, 1  ;;  %v90_v42 = vrot.slane %v89_v36, 1  ;;  %v107_v59 = vmax.f32 %v105_v43, %v106_v50  ;;  %v116_v4 = vmax.f32 %v114_v51, %v115_v60  ;;  %v35_v51 = vld [vmem:[%s817_s0 + $0xd8] sm:$0x1]  ;;  %v36_v60 = vld [vmem:[%s817_s0 + $0xe0] sm:$0xff] }
   0xf   :  { %v99_v48 = vrot.slane %v98_v40, 1  ;;  %v139_v16 = vmax.f32 %v137_v5, %v138_v11  ;;  %v147_v17 = vsel %vm74_vm1, %v25_v63, -inf  ;;  %v124_v20 = vrot.slane %v123_v9, 2 }
  0x10   :  { %v82_v47 = vmax.f32 %v80_v33, %v81_v39  ;;  %v91_v49 = vmax.f32 %v89_v36, %v90_v42  ;;  %v108_v3 = vrot.slane %v107_v59, 1  ;;  %v117_v15 = vrot.slane %v116_v4, 1 }
  0x11   :  { %v100_v54 = vmax.f32 %v98_v40, %v99_v48  ;;  %v132_v21 = vmax.f32 %v130_v1, %v131_v10  ;;  %v148_v22 = vmax.f32 %v146_v12, %v147_v17  ;;  %v155_v23 = vsel %vm72_vm0, %v26_v2, -inf  ;;  %v37_v1 = vld [vmem:[%s817_s0 + $0xe8] sm:$0x1]  ;;  %v39_v12 = vld [vmem:[%s817_s0 + $0xf8] sm:$0x1] }
  0x12   :  { %v395_v62 = vsel %vm394_vm2, %v91_v49, %v82_v47  ;;  %v538_v14 = vmax.f32 %v107_v59, %v108_v3  ;;  %v548_v24 = vmax.f32 %v116_v4, %v117_v15  ;;  %v140_v25 = vrot.slane %v139_v16, 4 }
  0x13   :  { %v525_v6 = vsel %vm396_vm3, %v100_v54, %v395_v62  ;;  %v156_v26 = vsel %vm74_vm1, %v27_v7, -inf  ;;  %v164_v27 = vsel %vm72_vm0, %v28_v8, -inf  ;;  %v125_v29 = vmax.f32 %v123_v9, %v124_v20  ;;  %v38_v7 = vld [vmem:[%s817_s0 + $0xf0] sm:$0xff] }
  0x14   :  { %v133_v30 = vrot.slane %v132_v21, 2  ;;  %v149_v31 = vrot.slane %v148_v22, 4  ;;  %v157_v32 = vmax.f32 %v155_v23, %v156_v26  ;;  %v141_v33 = vmax.f32 %v139_v16, %v140_v25  ;;  %v41_v23 = vld [vmem:[%s817_s0 + $0x108] sm:$0x1] }
  0x15   :  { %v165_v34 = vsel %vm74_vm1, %v29_v13, -inf  ;;  %v173_v35 = vsel %vm72_vm0, %v30_v18, -inf  ;;  %v174_v36 = vsel %vm74_vm1, %v31_v19, -inf  ;;  %v126_v38 = vrot.slane %v125_v29, 1  ;;  %v40_v18 = vld [vmem:[%s817_s0 + $0x100] sm:$0xff] }
  0x16   :  { %v134_v39 = vmax.f32 %v132_v21, %v133_v30  ;;  %v150_v40 = vmax.f32 %v148_v22, %v149_v31  ;;  %v158_v41 = vrot.slane %v157_v32, 4  ;;  %v142_v42 = vrot.slane %v141_v33, 2 }
  0x17   :  { %v166_v43 = vmax.f32 %v164_v27, %v165_v34  ;;  %v175_v44 = vmax.f32 %v173_v35, %v174_v36  ;;  %v182_v45 = vsel %vm72_vm0, %v32_v28, -inf  ;;  %v565_v47 = vmax.f32 %v125_v29, %v126_v38  ;;  %v43_v34 = vld [vmem:[%s817_s0 + $0x118] sm:$0x1]  ;;  %v44_v35 = vld [vmem:[%s817_s0 + $0x120] sm:$0xff] }
  0x18   :  { %v135_v48 = vrot.slane %v134_v39, 1  ;;  %v151_v49 = vrot.slane %v150_v40, 2  ;;  %v159_v50 = vmax.f32 %v157_v32, %v158_v41  ;;  %v143_v52 = vmax.f32 %v141_v33, %v142_v42  ;;  %v42_v33 = vld [vmem:[%s817_s0 + $0x110] sm:$0xff] }
  0x19   :  { %v167_v53 = vrot.slane %v166_v43, 4  ;;  %v176_v54 = vrot.slane %v175_v44, 4  ;;  %v183_v55 = vsel %vm74_vm1, %v33_v37, -inf  ;;  %v191_v0 = vsel %vm72_vm0, %v34_v46, -inf }
  0x1a   :  { %v571_v56 = vmax.f32 %v134_v39, %v135_v48  ;;  %v152_v57 = vmax.f32 %v150_v40, %v151_v49  ;;  %v160_v58 = vrot.slane %v159_v50, 2  ;;  %v184_v59 = vmax.f32 %v182_v45, %v183_v55  ;;  %v46_v45 = vld [vmem:[%s817_s0 + $0x130] sm:$0xff]  ;;  %v47_v55 = vld [vmem:[%s817_s0 + $0x138] sm:$0x1] }
  0x1b   :  { %v144_v61 = vrot.slane %v143_v52, 1  ;;  %v168_v62 = vmax.f32 %v166_v43, %v167_v53  ;;  %v177_v63 = vmax.f32 %v175_v44, %v176_v54  ;;  %v192_v5 = vsel %vm74_vm1, %v35_v51, -inf  ;;  %v45_v44 = vld [vmem:[%s817_s0 + $0x128] sm:$0x1] }
  0x1c   :  { %v153_v2 = vrot.slane %v152_v57, 1  ;;  %v161_v3 = vmax.f32 %v159_v50, %v160_v58  ;;  %v185_v4 = vrot.slane %v184_v59, 4  ;;  %v193_v11 = vmax.f32 %v191_v0, %v192_v5 }
  0x1d   :  { %v584_v8 = vmax.f32 %v143_v52, %v144_v61  ;;  %v169_v9 = vrot.slane %v168_v62, 2  ;;  %v178_v10 = vrot.slane %v177_v63, 2  ;;  %v200_v17 = vsel %vm72_vm0, %v36_v60, -inf }
  0x1e   :  { %v589_v13 = vmax.f32 %v152_v57, %v153_v2  ;;  %v162_v15 = vrot.slane %v161_v3, 1  ;;  %v186_v16 = vmax.f32 %v184_v59, %v185_v4  ;;  %v194_v21 = vrot.slane %v193_v11, 4  ;;  %v48_v57 = vld [vmem:[%s817_s0 + $0x140] sm:$0xff]  ;;  %v49_v2 = vld [vmem:[%s817_s0 + $0x148] sm:$0x1] }
  0x1f   :  { %v170_v19 = vmax.f32 %v168_v62, %v169_v9  ;;  %v179_v20 = vmax.f32 %v177_v63, %v178_v10  ;;  %v201_v22 = vsel %vm74_vm1, %v37_v1, -inf  ;;  %v209_v28 = vsel %vm72_vm0, %v38_v7, -inf }
  0x20   :  { %v599_v25 = vmax.f32 %v161_v3, %v162_v15  ;;  %v187_v26 = vrot.slane %v186_v16, 2  ;;  %v202_v27 = vmax.f32 %v200_v17, %v201_v22  ;;  %v195_v31 = vmax.f32 %v193_v11, %v194_v21  ;;  %v50_v3 = vld [vmem:[%s817_s0 + $0x150] sm:$0xff] }
  0x21   :  { %v171_v29 = vrot.slane %v170_v19, 1  ;;  %v180_v30 = vrot.slane %v179_v20, 1  ;;  %v210_v32 = vsel %vm74_vm1, %v39_v12, -inf  ;;  %v218_v39 = vsel %vm72_vm0, %v40_v18, -inf }
  0x22   :  { %v188_v36 = vmax.f32 %v186_v16, %v187_v26  ;;  %v203_v37 = vrot.slane %v202_v27, 4  ;;  %v211_v38 = vmax.f32 %v209_v28, %v210_v32  ;;  %v196_v42 = vrot.slane %v195_v31, 2  ;;  %v51_v16 = vld [vmem:[%s817_s0 + $0x158] sm:$0x1]  ;;  %v53_v32 = vld [vmem:[%s817_s0 + $0x168] sm:$0x1] }
  0x23   :  { %v613_v40 = vmax.f32 %v170_v19, %v171_v29  ;;  %v615_v41 = vmax.f32 %v179_v20, %v180_v30  ;;  %v219_v43 = vsel %vm74_vm1, %v41_v23, -inf  ;;  %v227_v52 = vsel %vm72_vm0, %v42_v33, -inf }
  0x24   :  { %v189_v46 = vrot.slane %v188_v36, 1  ;;  %v204_v48 = vmax.f32 %v202_v27, %v203_v37  ;;  %v212_v49 = vrot.slane %v211_v38, 4  ;;  %v220_v50 = vmax.f32 %v218_v39, %v219_v43  ;;  %v52_v27 = vld [vmem:[%s817_s0 + $0x160] sm:$0xff]  ;;  %v54_v43 = vld [vmem:[%s817_s0 + $0x170] sm:$0xff] }
  0x25   :  { %v197_v51 = vmax.f32 %v195_v31, %v196_v42  ;;  %v228_v53 = vsel %vm74_vm1, %v43_v34, -inf  ;;  %v236_v54 = vsel %vm72_vm0, %v44_v35, -inf  ;;  %v237_v0 = vsel %vm74_vm1, %v45_v44, -inf  ;;  %v55_v44 = vld [vmem:[%s817_s0 + $0x178] sm:$0x1] }
  0x26   :  { %v633_v58 = vmax.f32 %v188_v36, %v189_v46  ;;  %v205_v59 = vrot.slane %v204_v48, 2  ;;  %v213_v60 = vmax.f32 %v211_v38, %v212_v49  ;;  %v221_v61 = vrot.slane %v220_v50, 4 }
  0x27   :  { %v198_v62 = vrot.slane %v197_v51, 1  ;;  %v229_v63 = vmax.f32 %v227_v52, %v228_v53  ;;  %v245_v1 = vsel %vm72_vm0, %v46_v45, -inf  ;;  %v238_v9 = vmax.f32 %v236_v54, %v237_v0  ;;  %v56_v54 = vld [vmem:[%s817_s0 + $0x180] sm:$0xff] }
  0x28   :  { %v206_v4 = vmax.f32 %v204_v48, %v205_v59  ;;  %v214_v5 = vrot.slane %v213_v60, 2  ;;  %v222_v7 = vmax.f32 %v220_v50, %v221_v61  ;;  %v246_v12 = vsel %vm74_vm1, %v47_v55, -inf  ;;  %v57_v61 = vld [vmem:[%s817_s0 + $0x188] sm:$0x1] }
  0x29   :  { %v643_v10 = vmax.f32 %v197_v51, %v198_v62  ;;  %v230_v11 = vrot.slane %v229_v63, 4  ;;  %v254_v15 = vsel %vm72_vm0, %v48_v57, -inf  ;;  %v239_v20 = vrot.slane %v238_v9, 4 }
  0x2a   :  { %v207_v17 = vrot.slane %v206_v4, 1  ;;  %v215_v18 = vmax.f32 %v213_v60, %v214_v5  ;;  %v223_v19 = vrot.slane %v222_v7, 2  ;;  %v247_v22 = vmax.f32 %v245_v1, %v246_v12 }
  0x2b   :  { %v231_v21 = vmax.f32 %v229_v63, %v230_v11  ;;  %v255_v23 = vsel %vm74_vm1, %v49_v2, -inf  ;;  %v263_v26 = vsel %vm72_vm0, %v50_v3, -inf  ;;  %v240_v31 = vmax.f32 %v238_v9, %v239_v20  ;;  %v58_v2 = vld [vmem:[%s817_s0 + $0x190] sm:$0xff]  ;;  %v59_v9 = vld [vmem:[%s817_s0 + $0x198] sm:$0x1] }
  0x2c   :  { %v655_v28 = vmax.f32 %v206_v4, %v207_v17  ;;  %v216_v29 = vrot.slane %v215_v18, 1  ;;  %v224_v30 = vmax.f32 %v222_v7, %v223_v19  ;;  %v248_v34 = vrot.slane %v247_v22, 4 }
  0x2d   :  { %v232_v33 = vrot.slane %v231_v21, 2  ;;  %v256_v35 = vmax.f32 %v254_v15, %v255_v23  ;;  %v264_v36 = vsel %vm74_vm1, %v51_v16, -inf  ;;  %v241_v39 = vrot.slane %v240_v31, 2 }
  0x2e   :  { %v661_v37 = vmax.f32 %v215_v18, %v216_v29  ;;  %v225_v38 = vrot.slane %v224_v30, 1  ;;  %v265_v42 = vmax.f32 %v263_v26, %v264_v36  ;;  %v249_v46 = vmax.f32 %v247_v22, %v248_v34  ;;  %v61_v22 = vld [vmem:[%s817_s0 + $0x1a8] sm:$0x1]  ;;  %v62_v34 = vld [vmem:[%s817_s0 + $0x1b0] sm:$0xff] }
  0x2f   :  { %v233_v45 = vmax.f32 %v231_v21, %v232_v33  ;;  %v257_v48 = vrot.slane %v256_v35, 4  ;;  %v272_v49 = vsel %vm72_vm0, %v52_v27, -inf  ;;  %v242_v51 = vmax.f32 %v240_v31, %v241_v39  ;;  %v60_v21 = vld [vmem:[%s817_s0 + $0x1a0] sm:$0xff] }
  0x30   :  { %v670_v50 = vmax.f32 %v224_v30, %v225_v38  ;;  %v266_v52 = vrot.slane %v265_v42, 4  ;;  %v273_v53 = vsel %vm74_vm1, %v53_v32, -inf  ;;  %v250_v57 = vrot.slane %v249_v46, 2 }
  0x31   :  { %v234_v55 = vrot.slane %v233_v45, 1  ;;  %v258_v59 = vmax.f32 %v256_v35, %v257_v48  ;;  %v274_v60 = vmax.f32 %v272_v49, %v273_v53  ;;  %v243_v62 = vrot.slane %v242_v51, 1  ;;  %v63_v35 = vld [vmem:[%s817_s0 + $0x1b8] sm:$0x1]  ;;  %v64_v48 = vld [vmem:[%s817_s0 + $0x1c0] sm:$0xff] }
  0x32   :  { %v267_v63 = vmax.f32 %v265_v42, %v266_v52  ;;  %v281_v0 = vsel %vm72_vm0, %v54_v43, -inf  ;;  %v282_v1 = vsel %vm74_vm1, %v55_v44, -inf  ;;  %v251_v4 = vmax.f32 %v249_v46, %v250_v57  ;;  %v65_v49 = vld [vmem:[%s817_s0 + $0x1c8] sm:$0x1] }
  0x33   :  { %v684_v3 = vmax.f32 %v233_v45, %v234_v55  ;;  %v259_v5 = vrot.slane %v258_v59, 2  ;;  %v275_v7 = vrot.slane %v274_v60, 4  ;;  %v689_v11 = vmax.f32 %v242_v51, %v243_v62  ;;  %v67_v62 = vld [vmem:[%s817_s0 + $0x1d8] sm:$0x1] }
  0x34   :  { %v268_v12 = vrot.slane %v267_v63, 2  ;;  %v283_v15 = vmax.f32 %v281_v0, %v282_v1  ;;  %v290_v16 = vsel %vm72_vm0, %v56_v54, -inf  ;;  %v252_v17 = vrot.slane %v251_v4, 1 }
  0x35   :  { %v260_v18 = vmax.f32 %v258_v59, %v259_v5  ;;  %v276_v19 = vmax.f32 %v274_v60, %v275_v7  ;;  %v291_v20 = vsel %vm74_vm1, %v57_v61, -inf  ;;  %v299_v29 = vsel %vm72_vm0, %v58_v2, -inf  ;;  %v66_v61 = vld [vmem:[%s817_s0 + $0x1d0] sm:$0xff] }
  0x36   :  { %v269_v23 = vmax.f32 %v267_v63, %v268_v12  ;;  %v284_v26 = vrot.slane %v283_v15, 4  ;;  %v292_v27 = vmax.f32 %v290_v16, %v291_v20  ;;  %v700_v30 = vmax.f32 %v251_v4, %v252_v17  ;;  %v68_v12 = vld [vmem:[%s817_s0 + $0x1e0] sm:$0xff] }
  0x37   :  { %v261_v31 = vrot.slane %v260_v18, 1  ;;  %v277_v32 = vrot.slane %v276_v19, 2  ;;  %v300_v33 = vsel %vm74_vm1, %v59_v9, -inf  ;;  %v308_v45 = vsel %vm72_vm0, %v60_v21, -inf }
  0x38   :  { %v270_v36 = vrot.slane %v269_v23, 1  ;;  %v285_v38 = vmax.f32 %v283_v15, %v284_v26  ;;  %v293_v39 = vrot.slane %v292_v27, 4  ;;  %v301_v42 = vmax.f32 %v299_v29, %v300_v33  ;;  %v71_v33 = vld [vmem:[%s817_s0 + $0x1f8] sm:$0x1] }
  0x39   :  { %v709_v43 = vmax.f32 %v260_v18, %v261_v31  ;;  %v278_v44 = vmax.f32 %v276_v19, %v277_v32  ;;  %v309_v46 = vsel %vm74_vm1, %v61_v22, -inf  ;;  %v317_v59 = vsel %vm72_vm0, %v62_v34, -inf  ;;  %v69_v19 = vld [vmem:[%s817_s0 + $0x1e8] sm:$0x1]  ;;  %v70_v32 = vld [vmem:[%s817_s0 + $0x1f0] sm:$0xff] }
  0x3a   :  { %v719_v51 = vmax.f32 %v269_v23, %v270_v36  ;;  %v286_v52 = vrot.slane %v285_v38, 2  ;;  %v294_v53 = vmax.f32 %v292_v27, %v293_v39  ;;  %v302_v54 = vrot.slane %v301_v42, 4 }
  0x3b   :  { %v279_v55 = vrot.slane %v278_v44, 1  ;;  %v310_v57 = vmax.f32 %v308_v45, %v309_v46  ;;  %v318_v60 = vsel %vm74_vm1, %v63_v35, -inf  ;;  %v326_v7 = vsel %vm72_vm0, %v64_v48, -inf }
  0x3c   :  { %v287_v63 = vmax.f32 %v285_v38, %v286_v52  ;;  %v295_v0 = vrot.slane %v294_v53, 2  ;;  %v303_v1 = vmax.f32 %v301_v42, %v302_v54  ;;  %v319_v2 = vmax.f32 %v317_v59, %v318_v60 }
  0x3d   :  { %v729_v4 = vmax.f32 %v278_v44, %v279_v55  ;;  %v311_v5 = vrot.slane %v310_v57, 4  ;;  %v327_v9 = vsel %vm74_vm1, %v65_v49, -inf  ;;  %v335_v22 = vsel %vm72_vm0, %v66_v61, -inf }
  0x3e   :  { %v288_v15 = vrot.slane %v287_v63, 1  ;;  %v296_v16 = vmax.f32 %v294_v53, %v295_v0  ;;  %v304_v17 = vrot.slane %v303_v1, 2  ;;  %v320_v18 = vrot.slane %v319_v2, 4 }
  0x3f   :  { %v312_v20 = vmax.f32 %v310_v57, %v311_v5  ;;  %v328_v21 = vmax.f32 %v326_v7, %v327_v9  ;;  %v336_v23 = vsel %vm74_vm1, %v67_v62, -inf  ;;  %v344_v38 = vsel %vm72_vm0, %v68_v12, -inf }
  0x40   :  { %v741_v26 = vmax.f32 %v287_v63, %v288_v15  ;;  %v297_v27 = vrot.slane %v296_v16, 1  ;;  %v305_v29 = vmax.f32 %v303_v1, %v304_v17  ;;  %v321_v31 = vmax.f32 %v319_v2, %v320_v18 }
  0x41   :  { %v313_v34 = vrot.slane %v312_v20, 2  ;;  %v329_v35 = vrot.slane %v328_v21, 4  ;;  %v337_v36 = vmax.f32 %v335_v22, %v336_v23  ;;  %v345_v45 = vsel %vm74_vm1, %v69_v19, -inf }
  0x42   :  { %v298_v39 = vmax.f32 %v296_v16, %v297_v27  ;;  %v306_v42 = vrot.slane %v305_v29, 1  ;;  %v322_v44 = vrot.slane %v321_v31, 2  ;;  %v346_v52 = vmax.f32 %v344_v38, %v345_v45 }
  0x43   :  { %v314_v46 = vmax.f32 %v312_v20, %v313_v34  ;;  %v330_v48 = vmax.f32 %v328_v21, %v329_v35  ;;  %v338_v49 = vrot.slane %v337_v36, 4  ;;  %v353_v55 = vsel %vm72_vm0, %v70_v32, -inf }
  0x44   :  { %v307_v53 = vmax.f32 %v305_v29, %v306_v42  ;;  %v323_v54 = vmax.f32 %v321_v31, %v322_v44  ;;  %v354_v57 = vsel %vm74_vm1, %v71_v33, -inf  ;;  %v347_v62 = vrot.slane %v346_v52, 4 }
  0x45   :  { %v315_v59 = vrot.slane %v314_v46, 1  ;;  %v331_v60 = vrot.slane %v330_v48, 2  ;;  %v339_v61 = vmax.f32 %v337_v36, %v338_v49  ;;  %v355_v0 = vmax.f32 %v353_v55, %v354_v57 }
  0x46   :  { %v324_v63 = vrot.slane %v323_v54, 1  ;;  %v399_v1 = vsel %vm398_vm4, %v538_v14, %v525_v6  ;;  %vm402_vm6 = vcmask 1045509   ;;  %v348_v9 = vmax.f32 %v346_v52, %v347_v62 }
  0x47   :  { %v316_v2 = vmax.f32 %v314_v46, %v315_v59  ;;  %v332_v5 = vmax.f32 %v330_v48, %v331_v60  ;;  %v340_v7 = vrot.slane %v339_v61, 2  ;;  %v356_v15 = vrot.slane %v355_v0, 4 }
  0x48   :  { %v325_v12 = vmax.f32 %v323_v54, %v324_v63  ;;  %v401_v16 = vsel %vm400_vm5, %v548_v24, %v399_v1  ;;  %vm404_vm7 = vcmask 1046534   ;;  %v349_v19 = vrot.slane %v348_v9, 2 }
  0x49   :  { %v333_v17 = vrot.slane %v332_v5, 1  ;;  %v341_v18 = vmax.f32 %v339_v61, %v340_v7  ;;  %v403_v20 = vsel %vm402_vm6, %v565_v47, %v401_v16  ;;  %v357_v21 = vmax.f32 %v355_v0, %v356_v15 }
  0x4a   :  { %v405_v6 = vsel %vm404_vm7, %v571_v56, %v403_v20  ;;  %vm406_vm8 = vcmask 1047559   ;;  %v408_v14 = vsel %vm394_vm2, %v599_v25, %v589_v13  ;;  %v350_v27 = vmax.f32 %v348_v9, %v349_v19 }
  0x4b   :  { %v334_v22 = vmax.f32 %v332_v5, %v333_v17  ;;  %v342_v23 = vrot.slane %v341_v18, 1  ;;  %v407_v24 = vsel %vm406_vm8, %v584_v8, %v405_v6  ;;  %v358_v29 = vrot.slane %v357_v21, 2 }
  0x4c   :  { %v409_v31 = vsel %vm396_vm3, %v613_v40, %v408_v14  ;;  %v415_v47 = vsel %vm394_vm2, %v684_v3, %v670_v50  ;;  %v422_v56 = vsel %vm394_vm2, %v307_v53, %v298_v39  ;;  %433 = vst.msk [vmem:[%s818_s1] sm:$0xff] %vm72_vm0, %v407_v24  ;;  %v351_v25 = vrot.slane %v350_v27, 1 }
  0x4d   :  { %v343_v13 = vmax.f32 %v341_v18, %v342_v23  ;;  %v410_v8 = vsel %vm398_vm4, %v615_v41, %v409_v31  ;;  %v416_v32 = vsel %vm396_vm3, %v689_v11, %v415_v47  ;;  %v359_v40 = vmax.f32 %v357_v21, %v358_v29 }
  0x4e   :  { %v411_v33 = vsel %vm400_vm5, %v633_v58, %v410_v8  ;;  %v417_v50 = vsel %vm398_vm4, %v700_v30, %v416_v32  ;;  %v423_v3 = vsel %vm396_vm3, %v316_v2, %v422_v56  ;;  %v352_v34 = vmax.f32 %v350_v27, %v351_v25 }
  0x4f   :  { %v412_v35 = vsel %vm402_vm6, %v643_v10, %v411_v33  ;;  %v418_v36 = vsel %vm400_vm5, %v709_v43, %v417_v50  ;;  %v424_v41 = vsel %vm398_vm4, %v325_v12, %v423_v3  ;;  %v360_v38 = vrot.slane %v359_v40, 1 }
  0x50   :  { %v413_v11 = vsel %vm404_vm7, %v655_v28, %v412_v35  ;;  %v419_v58 = vsel %vm402_vm6, %v719_v51, %v418_v36  ;;  %v425_v30 = vsel %vm400_vm5, %v334_v22, %v424_v41 }
  0x51   :  { %v414_v39 = vsel %vm406_vm8, %v661_v37, %v413_v11  ;;  %v420_v10 = vsel %vm404_vm7, %v729_v4, %v419_v58  ;;  %v426_v42 = vsel %vm402_vm6, %v343_v13, %v425_v30  ;;  %v361_v43 = vmax.f32 %v359_v40, %v360_v38 }
  0x52   :  { %v421_v44 = vsel %vm406_vm8, %v741_v26, %v420_v10  ;;  %v427_v45 = vsel %vm404_vm7, %v352_v34, %v426_v42  ;;  %434 = vst.msk [vmem:[%s818_s1 + $0x8] sm:$0xff] %vm72_vm0, %v414_v39 }
  0x53   :  { %435 = vst.msk [vmem:[%s818_s1 + $0x10] sm:$0xff] %vm72_vm0, %v421_v44  ;;  %v428_v28 = vsel %vm406_vm8, %v361_v43, %v427_v45 }
  0x54   :  { %436 = vst.msk [vmem:[%s818_s1 + $0x18] sm:$0xff] %vm72_vm0, %v428_v28 }

// kernel: _lambda_.108
= control target key start
LH: loop header
LB: loop body
LE: loop exit
PB: predicated region body
PF: predicated region fallthrough
CT: control target
= control target key end

     0   :  { %v683_v0 = vmov 0   ;;  %vm75_vm0 = vcmask 64512   ;;  %vm77_vm1 = vcmask 57344   ;;  %vm542_vm2 = vcmask 1041409   ;;  %s1156_s1 = inlined_call_operand.vmem [shape: f32[32,1], index: 1, kind: input, shape index: {}]   ;;  %s1157_s0 = inlined_call_operand.vmem [shape: f32[32,9,8], index: 0, kind: input, shape index: {}]   ;;  %s1158_s2 = inlined_call_operand.vmem [shape: f32[32,8], index: 2, kind: output, shape index: {}]  }
   0x1   :  { %618 = vset.pattern.permute.xlu1 %v683_v0  ;;  %617 = vset.pattern.permute.xlu0 %v683_v0  ;;  %v367_v1 = vld [vmem:[%s1156_s1 + $0x10] sm:$0xff]  ;;  %v365_v2 = vld [vmem:[%s1156_s1] sm:$0xff]  ;;  %v368_v3 = vld [vmem:[%s1156_s1 + $0x18] sm:$0xff]  ;;  %vm545_vm3 = vcmask 1042434   ;;  %vm548_vm4 = vcmask 1043459   ;;  %vm551_vm5 = vcmask 1044484  }
   0x2   :  { %379 = vperm.xlu1 %618, %v367_v1   ;;  %371 = vperm.xlu0 %617, %v365_v2   ;;  %v366_v4 = vld [vmem:[%s1156_s1 + $0x8] sm:$0xff]  ;;  %v43_v5 = vld [vmem:[%s1157_s0 + $0x100] sm:$0xff]  ;;  %v45_v7 = vld [vmem:[%s1157_s0 + $0x110] sm:$0xff]  ;;  %vm554_vm6 = vcmask 1045509   ;;  %vm557_vm7 = vcmask 1046534   ;;  %vm560_vm8 = vcmask 1047559  }
   0x3   :  { %v44_v6 = vld [vmem:[%s1157_s0 + $0x108] sm:$0x1]  ;;  %v46_v8 = vld [vmem:[%s1157_s0 + $0x118] sm:$0x1]  ;;  %v47_v9 = vld [vmem:[%s1157_s0 + $0x120] sm:$0xff]  ;;  %v221_v16 = vsel %vm75_vm0, %v43_v5, 0.0 }
   0x4   :  { %v48_v10 = vld [vmem:[%s1157_s0 + $0x128] sm:$0x1]  ;;  %v49_v11 = vld [vmem:[%s1157_s0 + $0x130] sm:$0xff]  ;;  %v50_v12 = vld [vmem:[%s1157_s0 + $0x138] sm:$0x1]  ;;  %v222_v17 = vsel %vm77_vm1, %v44_v6, 0.0 }
   0x5   :  { %v51_v13 = vld [vmem:[%s1157_s0 + $0x140] sm:$0xff]  ;;  %v52_v14 = vld [vmem:[%s1157_s0 + $0x148] sm:$0x1]  ;;  %v53_v15 = vld [vmem:[%s1157_s0 + $0x150] sm:$0xff]  ;;  %v230_v18 = vsel %vm75_vm0, %v45_v7, 0.0  ;;  %v231_v19 = vsel %vm77_vm1, %v46_v8, 0.0  ;;  %v223_v29 = vadd.f32 %v222_v17, %v221_v16 }
   0x6   :  { %383 = vperm.xlu1 %618, %v368_v3   ;;  %375 = vperm.xlu0 %617, %v366_v4   ;;  %v54_v20 = vld [vmem:[%s1157_s0 + $0x158] sm:$0x1]  ;;  %v239_v21 = vsel %vm75_vm0, %v47_v9, 0.0  ;;  %v240_v22 = vsel %vm77_vm1, %v48_v10, 0.0  ;;  %v248_v23 = vsel %vm75_vm0, %v49_v11, 0.0  ;;  %v249_v24 = vsel %vm77_vm1, %v50_v12, 0.0 }
   0x7   :  { %v55_v25 = vld [vmem:[%s1157_s0 + $0x160] sm:$0xff]  ;;  %v56_v26 = vld [vmem:[%s1157_s0 + $0x168] sm:$0x1]  ;;  %v257_v27 = vsel %vm75_vm0, %v51_v13, 0.0  ;;  %v258_v28 = vsel %vm77_vm1, %v52_v14, 0.0  ;;  %v232_v30 = vadd.f32 %v231_v19, %v230_v18  ;;  %v241_v31 = vadd.f32 %v240_v22, %v239_v21  ;;  %v57_v38 = vld [vmem:[%s1157_s0 + $0x170] sm:$0xff] }
   0x8   :  { %v250_v32 = vadd.f32 %v249_v24, %v248_v23  ;;  %v266_v33 = vsel %vm75_vm0, %v53_v15, 0.0  ;;  %v259_v34 = vadd.f32 %v258_v28, %v257_v27  ;;  %v267_v35 = vsel %vm77_vm1, %v54_v20, 0.0  ;;  %v58_v39 = vld [vmem:[%s1157_s0 + $0x178] sm:$0x1]  ;;  %v11_v50 = vld [vmem:[%s1157_s0] sm:$0xff]  ;;  %v13_v59 = vld [vmem:[%s1157_s0 + $0x10] sm:$0xff] }
   0x9   :  { %v275_v36 = vsel %vm75_vm0, %v55_v25, 0.0  ;;  %v276_v37 = vsel %vm77_vm1, %v56_v26, 0.0  ;;  %v224_v40 = vrot.slane %v223_v29, 4  ;;  %v233_v41 = vrot.slane %v232_v30, 4  ;;  %v12_v51 = vld [vmem:[%s1157_s0 + $0x8] sm:$0x1] }
   0xa   :  { %v242_v42 = vrot.slane %v241_v31, 4  ;;  %v268_v43 = vadd.f32 %v267_v35, %v266_v33  ;;  %v277_v44 = vadd.f32 %v276_v37, %v275_v36  ;;  %v251_v45 = vrot.slane %v250_v32, 4  ;;  %v14_v63 = vld [vmem:[%s1157_s0 + $0x18] sm:$0x1]  ;;  %v15_v0 = vld [vmem:[%s1157_s0 + $0x20] sm:$0xff]  ;;  %v17_v15 = vld [vmem:[%s1157_s0 + $0x30] sm:$0xff] }
   0xb   :  { %v260_v46 = vrot.slane %v259_v34, 4  ;;  %v284_v47 = vsel %vm75_vm0, %v57_v38, 0.0  ;;  %v285_v48 = vsel %vm77_vm1, %v58_v39, 0.0  ;;  %v225_v49 = vadd.f32 %v224_v40, %v223_v29  ;;  %v16_v1 = vld [vmem:[%s1157_s0 + $0x28] sm:$0x1]  ;;  %v19_v22 = vld [vmem:[%s1157_s0 + $0x40] sm:$0xff] }
   0xc   :  { %v234_v52 = vadd.f32 %v233_v41, %v232_v30  ;;  %v243_v53 = vadd.f32 %v242_v42, %v241_v31  ;;  %v269_v54 = vrot.slane %v268_v43, 4  ;;  %v278_v55 = vrot.slane %v277_v44, 4  ;;  %v18_v16 = vld [vmem:[%s1157_s0 + $0x38] sm:$0x1]  ;;  %v20_v17 = vld [vmem:[%s1157_s0 + $0x48] sm:$0x1] }
   0xd   :  { %v252_v56 = vadd.f32 %v251_v45, %v250_v32  ;;  %v261_v57 = vadd.f32 %v260_v46, %v259_v34  ;;  %v286_v58 = vadd.f32 %v285_v48, %v284_v47  ;;  %v76_v60 = vsel %vm75_vm0, %v11_v50, 0.0  ;;  %v21_v23 = vld [vmem:[%s1157_s0 + $0x50] sm:$0xff]  ;;  %v22_v24 = vld [vmem:[%s1157_s0 + $0x58] sm:$0x1] }
   0xe   :  { %v78_v61 = vsel %vm77_vm1, %v12_v51, 0.0  ;;  %v226_v62 = vrot.slane %v225_v49, 2  ;;  %v235_v2 = vrot.slane %v234_v52, 2  ;;  %v244_v3 = vrot.slane %v243_v53, 2 }
   0xf   :  { %v270_v4 = vadd.f32 %v269_v54, %v268_v43  ;;  %v279_v5 = vadd.f32 %v278_v55, %v277_v44  ;;  %v253_v6 = vrot.slane %v252_v56, 2  ;;  %v262_v7 = vrot.slane %v261_v57, 2  ;;  %v23_v54 = vld [vmem:[%s1157_s0 + $0x60] sm:$0xff]  ;;  %v24_v55 = vld [vmem:[%s1157_s0 + $0x68] sm:$0x1] }
  0x10   :  { %v287_v8 = vrot.slane %v286_v58, 4  ;;  %v79_v9 = vadd.f32 %v78_v61, %v76_v60  ;;  %v86_v10 = vsel %vm75_vm0, %v13_v59, 0.0  ;;  %v87_v11 = vsel %vm77_vm1, %v14_v63, 0.0  ;;  %v26_v61 = vld [vmem:[%s1157_s0 + $0x78] sm:$0x1] }
  0x11   :  { %v95_v12 = vsel %vm75_vm0, %v15_v0, 0.0  ;;  %v96_v13 = vsel %vm77_vm1, %v16_v1, 0.0  ;;  %v227_v14 = vadd.f32 %v226_v62, %v225_v49  ;;  %v236_v18 = vadd.f32 %v235_v2, %v234_v52  ;;  %v59_v1 = vld [vmem:[%s1157_s0 + $0x180] sm:$0xff] }
  0x12   :  { %v245_v19 = vadd.f32 %v244_v3, %v243_v53  ;;  %v271_v20 = vrot.slane %v270_v4, 2  ;;  %v280_v21 = vrot.slane %v279_v5, 2  ;;  %v288_v25 = vadd.f32 %v287_v8, %v286_v58  ;;  %v62_v8 = vld [vmem:[%s1157_s0 + $0x198] sm:$0x1] }
  0x13   :  { %v80_v26 = vrot.slane %v79_v9, 4  ;;  %v88_v27 = vadd.f32 %v87_v11, %v86_v10  ;;  %v97_v28 = vadd.f32 %v96_v13, %v95_v12  ;;  %v254_v29 = vadd.f32 %v253_v6, %v252_v56  ;;  %v25_v56 = vld [vmem:[%s1157_s0 + $0x70] sm:$0xff]  ;;  %v60_v6 = vld [vmem:[%s1157_s0 + $0x188] sm:$0x1]  ;;  %v63_v13 = vld [vmem:[%s1157_s0 + $0x1a0] sm:$0xff] }
  0x14   :  { %v263_v30 = vadd.f32 %v262_v7, %v261_v57  ;;  %v104_v31 = vsel %vm75_vm0, %v17_v15, 0.0  ;;  %v105_v32 = vsel %vm77_vm1, %v18_v16, 0.0  ;;  %v113_v33 = vsel %vm75_vm0, %v19_v22, 0.0  ;;  %v61_v7 = vld [vmem:[%s1157_s0 + $0x190] sm:$0xff] }
  0x15   :  { %v114_v34 = vsel %vm77_vm1, %v20_v17, 0.0  ;;  %v122_v35 = vsel %vm75_vm0, %v21_v23, 0.0  ;;  %v123_v36 = vsel %vm77_vm1, %v22_v24, 0.0  ;;  %v272_v37 = vadd.f32 %v271_v20, %v270_v4  ;;  %v65_v15 = vld [vmem:[%s1157_s0 + $0x1b0] sm:$0xff]  ;;  %v66_v20 = vld [vmem:[%s1157_s0 + $0x1b8] sm:$0x1] }
  0x16   :  { %v281_v38 = vadd.f32 %v280_v21, %v279_v5  ;;  %v289_v39 = vrot.slane %v288_v25, 2  ;;  %v81_v40 = vadd.f32 %v80_v26, %v79_v9  ;;  %v89_v41 = vrot.slane %v88_v27, 4  ;;  %v67_v21 = vld [vmem:[%s1157_s0 + $0x1c0] sm:$0xff]  ;;  %v68_v26 = vld [vmem:[%s1157_s0 + $0x1c8] sm:$0x1] }
  0x17   :  { %v98_v42 = vrot.slane %v97_v28, 4  ;;  %v228_v43 = vrot.slane %v227_v14, 1  ;;  %v106_v44 = vadd.f32 %v105_v32, %v104_v31  ;;  %v115_v45 = vadd.f32 %v114_v34, %v113_v33  ;;  %v71_v31 = vld [vmem:[%s1157_s0 + $0x1e0] sm:$0xff]  ;;  %v72_v32 = vld [vmem:[%s1157_s0 + $0x1e8] sm:$0x1] }
  0x18   :  { %v124_v46 = vadd.f32 %v123_v36, %v122_v35  ;;  %v237_v47 = vrot.slane %v236_v18, 1  ;;  %v246_v48 = vrot.slane %v245_v19, 1  ;;  %v255_v49 = vrot.slane %v254_v29, 1 }
  0x19   :  { %v264_v50 = vrot.slane %v263_v30, 1  ;;  %v273_v51 = vrot.slane %v272_v37, 1  ;;  %v282_v52 = vrot.slane %v281_v38, 1  ;;  %v823_v53 = vadd.f32 %v289_v39, %v288_v25 }
  0x1a   :  { %v82_v57 = vrot.slane %v81_v40, 2  ;;  %v90_v58 = vadd.f32 %v89_v41, %v88_v27  ;;  %v99_v59 = vadd.f32 %v98_v42, %v97_v28  ;;  %v834_v60 = vadd.f32 %v228_v43, %v227_v14  ;;  %v64_v14 = vld [vmem:[%s1157_s0 + $0x1a8] sm:$0x1]  ;;  %v69_v27 = vld [vmem:[%s1157_s0 + $0x1d0] sm:$0xff]  ;;  %v70_v28 = vld [vmem:[%s1157_s0 + $0x1d8] sm:$0x1] }
  0x1b   :  { %v107_v62 = vrot.slane %v106_v44, 4  ;;  %v116_v63 = vrot.slane %v115_v45, 4  ;;  %v125_v0 = vrot.slane %v124_v46, 4  ;;  %v842_v2 = vadd.f32 %v237_v47, %v236_v18 }
  0x1c   :  { %v844_v3 = vadd.f32 %v246_v48, %v245_v19  ;;  %v846_v4 = vadd.f32 %v255_v49, %v254_v29  ;;  %v848_v5 = vadd.f32 %v264_v50, %v263_v30  ;;  %v859_v9 = vadd.f32 %v273_v51, %v272_v37 }
  0x1d   :  { %v861_v10 = vadd.f32 %v282_v52, %v281_v38  ;;  %v131_v11 = vsel %vm75_vm0, %v23_v54, 0.0  ;;  %v132_v12 = vsel %vm77_vm1, %v24_v55, 0.0  ;;  %v291_v16 = vrot.slane %v823_v53, 1 }
  0x1e   :  { %v875_v17 = vadd.f32 %v82_v57, %v81_v40  ;;  %v91_v18 = vrot.slane %v90_v58, 2  ;;  %v100_v19 = vrot.slane %v99_v59, 2  ;;  %v108_v22 = vadd.f32 %v107_v62, %v106_v44 }
  0x1f   :  { %v117_v23 = vadd.f32 %v116_v63, %v115_v45  ;;  %v126_v24 = vadd.f32 %v125_v0, %v124_v46  ;;  %v140_v25 = vsel %vm75_vm0, %v25_v56, 0.0  ;;  %v133_v29 = vadd.f32 %v132_v12, %v131_v11 }
  0x20   :  { %v141_v30 = vsel %vm77_vm1, %v26_v61, 0.0  ;;  %v293_v33 = vsel %vm75_vm0, %v59_v1, 0.0  ;;  %v294_v34 = vsel %vm77_vm1, %v60_v6, 0.0  ;;  %v302_v35 = vsel %vm75_vm0, %v61_v7, 0.0 }
  0x21   :  { %v303_v36 = vsel %vm77_vm1, %v62_v8, 0.0  ;;  %v311_v37 = vsel %vm75_vm0, %v63_v13, 0.0  ;;  %v312_v38 = vsel %vm77_vm1, %v64_v14, 0.0  ;;  %v320_v39 = vsel %vm75_vm0, %v65_v15, 0.0 }
  0x22   :  { %v321_v40 = vsel %vm77_vm1, %v66_v20, 0.0  ;;  %v329_v41 = vsel %vm75_vm0, %v67_v21, 0.0  ;;  %v330_v42 = vsel %vm77_vm1, %v68_v26, 0.0  ;;  %v338_v43 = vsel %vm75_vm0, %v69_v27, 0.0 }
  0x23   :  { %v339_v44 = vsel %vm77_vm1, %v70_v28, 0.0  ;;  %v347_v45 = vsel %vm75_vm0, %v71_v31, 0.0  ;;  %v348_v46 = vsel %vm77_vm1, %v72_v32, 0.0  ;;  %v134_v47 = vrot.slane %v133_v29, 4 }
  0x24   :  { %v142_v48 = vadd.f32 %v141_v30, %v140_v25  ;;  %v295_v49 = vadd.f32 %v294_v34, %v293_v33  ;;  %v304_v50 = vadd.f32 %v303_v36, %v302_v35  ;;  %v92_v51 = vadd.f32 %v91_v18, %v90_v58  ;;  %v73_v58 = vld [vmem:[%s1157_s0 + $0x1f0] sm:$0xff] }
  0x25   :  { %v101_v52 = vadd.f32 %v100_v19, %v99_v59  ;;  %v313_v54 = vadd.f32 %v312_v38, %v311_v37  ;;  %v322_v55 = vadd.f32 %v321_v40, %v320_v39  ;;  %v109_v56 = vrot.slane %v108_v22, 2  ;;  %v74_v59 = vld [vmem:[%s1157_s0 + $0x1f8] sm:$0x1]  ;;  %v28_v38 = vld [vmem:[%s1157_s0 + $0x88] sm:$0x1] }
  0x26   :  { %v331_v57 = vadd.f32 %v330_v42, %v329_v41  ;;  %v340_v61 = vadd.f32 %v339_v44, %v338_v43  ;;  %v349_v62 = vadd.f32 %v348_v46, %v347_v45  ;;  %v915_v63 = vadd.f32 %v291_v16, %v823_v53  ;;  %v29_v42 = vld [vmem:[%s1157_s0 + $0x90] sm:$0xff]  ;;  %v30_v43 = vld [vmem:[%s1157_s0 + $0x98] sm:$0x1] }
  0x27   :  { %v84_v0 = vrot.slane %v875_v17, 1  ;;  %v118_v1 = vrot.slane %v117_v23, 2  ;;  %v127_v6 = vrot.slane %v126_v24, 2  ;;  %v135_v7 = vadd.f32 %v134_v47, %v133_v29 }
  0x28   :  { %v143_v8 = vrot.slane %v142_v48, 4  ;;  %v296_v11 = vrot.slane %v295_v49, 4  ;;  %v305_v12 = vrot.slane %v304_v50, 4  ;;  %v93_v13 = vrot.slane %v92_v51, 1 }
  0x29   :  { %v102_v14 = vrot.slane %v101_v52, 1  ;;  %v314_v53 = vrot.slane %v313_v54, 4  ;;  %v323_v15 = vrot.slane %v322_v55, 4  ;;  %v110_v16 = vadd.f32 %v109_v56, %v108_v22 }
  0x2a   :  { %v332_v18 = vrot.slane %v331_v57, 4  ;;  %v341_v19 = vrot.slane %v340_v61, 4  ;;  %v350_v20 = vrot.slane %v349_v62, 4  ;;  %v119_v21 = vadd.f32 %v118_v1, %v117_v23 }
  0x2b   :  { %v128_v25 = vadd.f32 %v127_v6, %v126_v24  ;;  %v356_v26 = vsel %vm75_vm0, %v73_v58, 0.0  ;;  %v357_v27 = vsel %vm77_vm1, %v74_v59, 0.0  ;;  %v136_v28 = vrot.slane %v135_v7, 2  ;;  %v27_v24 = vld [vmem:[%s1157_s0 + $0x80] sm:$0xff] }
  0x2c   :  { %v144_v29 = vadd.f32 %v143_v8, %v142_v48  ;;  %v297_v30 = vadd.f32 %v296_v11, %v295_v49  ;;  %v306_v31 = vadd.f32 %v305_v12, %v304_v50  ;;  %v927_v32 = vadd.f32 %v84_v0, %v875_v17  ;;  %v31_v48 = vld [vmem:[%s1157_s0 + $0xa0] sm:$0xff]  ;;  %v32_v49 = vld [vmem:[%s1157_s0 + $0xa8] sm:$0x1] }
  0x2d   :  { %v929_v33 = vadd.f32 %v93_v13, %v92_v51  ;;  %v315_v34 = vadd.f32 %v314_v53, %v313_v54  ;;  %v324_v22 = vadd.f32 %v323_v15, %v322_v55  ;;  %v333_v35 = vadd.f32 %v332_v18, %v331_v57  ;;  %v33_v18 = vld [vmem:[%s1157_s0 + $0xb0] sm:$0xff] }
  0x2e   :  { %v342_v36 = vadd.f32 %v341_v19, %v340_v61  ;;  %v351_v37 = vadd.f32 %v350_v20, %v349_v62  ;;  %v358_v23 = vadd.f32 %v357_v27, %v356_v26  ;;  %v937_v39 = vadd.f32 %v102_v14, %v101_v52  ;;  %v34_v19 = vld [vmem:[%s1157_s0 + $0xb8] sm:$0x1] }
  0x2f   :  { %v111_v17 = vrot.slane %v110_v16, 1  ;;  %v120_v40 = vrot.slane %v119_v21, 1  ;;  %v129_v41 = vrot.slane %v128_v25, 1  ;;  %v137_v44 = vadd.f32 %v136_v28, %v135_v7 }
  0x30   :  { %v145_v45 = vrot.slane %v144_v29, 2  ;;  %v298_v46 = vrot.slane %v297_v30, 2  ;;  %v307_v47 = vrot.slane %v306_v31, 2  ;;  %v316_v50 = vrot.slane %v315_v34, 2 }
  0x31   :  { %v325_v51 = vrot.slane %v324_v22, 2  ;;  %v149_v52 = vsel %vm75_vm0, %v27_v24, 0.0  ;;  %v150_v54 = vsel %vm77_vm1, %v28_v38, 0.0  ;;  %v334_v55 = vrot.slane %v333_v35, 2 }
  0x32   :  { %v343_v56 = vrot.slane %v342_v36, 2  ;;  %v352_v57 = vrot.slane %v351_v37, 2  ;;  %v359_v61 = vrot.slane %v358_v23, 4  ;;  %v158_v62 = vsel %vm75_vm0, %v29_v42, 0.0 }
  0x33   :  { %v159_v0 = vsel %vm77_vm1, %v30_v43, 0.0  ;;  %v167_v1 = vsel %vm75_vm0, %v31_v48, 0.0  ;;  %v168_v6 = vsel %vm77_vm1, %v32_v49, 0.0  ;;  %v146_v7 = vadd.f32 %v145_v45, %v144_v29  ;;  %v36_v29 = vld [vmem:[%s1157_s0 + $0xc8] sm:$0x1] }
  0x34   :  { %v299_v8 = vadd.f32 %v298_v46, %v297_v30  ;;  %v308_v58 = vadd.f32 %v307_v47, %v306_v31  ;;  %v151_v59 = vadd.f32 %v150_v54, %v149_v52  ;;  %v957_v11 = vadd.f32 %v111_v17, %v110_v16 }
  0x35   :  { %v959_v12 = vadd.f32 %v120_v40, %v119_v21  ;;  %v317_v13 = vadd.f32 %v316_v50, %v315_v34  ;;  %v326_v14 = vadd.f32 %v325_v51, %v324_v22  ;;  %v335_v53 = vadd.f32 %v334_v55, %v333_v35  ;;  %v35_v22 = vld [vmem:[%s1157_s0 + $0xc0] sm:$0xff]  ;;  %v37_v35 = vld [vmem:[%s1157_s0 + $0xd0] sm:$0xff] }
  0x36   :  { %v360_v15 = vadd.f32 %v359_v61, %v358_v23  ;;  %v160_v20 = vadd.f32 %v159_v0, %v158_v62  ;;  %v169_v26 = vadd.f32 %v168_v6, %v167_v1  ;;  %v967_v27 = vadd.f32 %v129_v41, %v128_v25  ;;  %v40_v62 = vld [vmem:[%s1157_s0 + $0xe8] sm:$0x1]  ;;  %v42_v0 = vld [vmem:[%s1157_s0 + $0xf8] sm:$0x1] }
  0x37   :  { %v138_v16 = vrot.slane %v137_v44, 1  ;;  %v344_v28 = vadd.f32 %v343_v56, %v342_v36  ;;  %v353_v21 = vadd.f32 %v352_v57, %v351_v37  ;;  %v147_v30 = vrot.slane %v146_v7, 1  ;;  %v38_v36 = vld [vmem:[%s1157_s0 + $0xd8] sm:$0x1]  ;;  %v39_v57 = vld [vmem:[%s1157_s0 + $0xe0] sm:$0xff] }
  0x38   :  { %v300_v31 = vrot.slane %v299_v8, 1  ;;  %v309_v34 = vrot.slane %v308_v58, 1  ;;  %v152_v25 = vrot.slane %v151_v59, 4  ;;  %v318_v23 = vrot.slane %v317_v13, 1 }
  0x39   :  { %v327_v24 = vrot.slane %v326_v14, 1  ;;  %v176_v37 = vsel %vm75_vm0, %v33_v18, 0.0  ;;  %v177_v38 = vsel %vm77_vm1, %v34_v19, 0.0  ;;  %v336_v17 = vrot.slane %v335_v53, 1 }
  0x3a   :  { %v361_v40 = vrot.slane %v360_v15, 2  ;;  %v161_v41 = vrot.slane %v160_v20, 4  ;;  %v170_v42 = vrot.slane %v169_v26, 4  ;;  %v345_v43 = vrot.slane %v344_v28, 1 }
  0x3b   :  { %v354_v45 = vrot.slane %v353_v21, 1  ;;  %v185_v46 = vsel %vm75_vm0, %v35_v22, 0.0  ;;  %v186_v47 = vsel %vm77_vm1, %v36_v29, 0.0  ;;  %v153_v48 = vadd.f32 %v152_v25, %v151_v59 }
  0x3c   :  { %v178_v49 = vadd.f32 %v177_v38, %v176_v37  ;;  %v194_v50 = vsel %vm75_vm0, %v37_v35, 0.0  ;;  %v195_v51 = vsel %vm77_vm1, %v38_v36, 0.0  ;;  %v987_v52 = vadd.f32 %v138_v16, %v137_v44  ;;  %v41_v44 = vld [vmem:[%s1157_s0 + $0xf0] sm:$0xff] }
  0x3d   :  { %v989_v54 = vadd.f32 %v147_v30, %v146_v7  ;;  %v991_v55 = vadd.f32 %v300_v31, %v299_v8  ;;  %v993_v56 = vadd.f32 %v309_v34, %v308_v58  ;;  %v362_v61 = vadd.f32 %v361_v40, %v360_v15 }
  0x3e   :  { %v162_v1 = vadd.f32 %v161_v41, %v160_v20  ;;  %v171_v6 = vadd.f32 %v170_v42, %v169_v26  ;;  %v187_v7 = vadd.f32 %v186_v47, %v185_v46  ;;  %v1007_v8 = vadd.f32 %v318_v23, %v317_v13 }
  0x3f   :  { %v1009_v58 = vadd.f32 %v327_v24, %v326_v14  ;;  %v1011_v59 = vadd.f32 %v336_v17, %v335_v53  ;;  %v196_v15 = vadd.f32 %v195_v51, %v194_v50  ;;  %v1013_v18 = vadd.f32 %v345_v43, %v344_v28 }
  0x40   :  { %v1015_v19 = vadd.f32 %v354_v45, %v353_v21  ;;  %v154_v16 = vrot.slane %v153_v48, 2  ;;  %v179_v29 = vrot.slane %v178_v49, 4  ;;  %v203_v30 = vsel %vm75_vm0, %v39_v57, 0.0 }
  0x41   :  { %v204_v31 = vsel %vm77_vm1, %v40_v62, 0.0  ;;  %v212_v20 = vsel %vm75_vm0, %v41_v44, 0.0  ;;  %v213_v13 = vsel %vm77_vm1, %v42_v0, 0.0  ;;  %v363_v14 = vrot.slane %v362_v61, 1 }
  0x42   :  { %v163_v34 = vrot.slane %v162_v1, 2  ;;  %v172_v53 = vrot.slane %v171_v6, 2  ;;  %v188_v22 = vrot.slane %v187_v7, 4  ;;  %v197_v21 = vrot.slane %v196_v15, 4 }
  0x43   :  { %v205_v24 = vadd.f32 %v204_v31, %v203_v30  ;;  %v214_v36 = vadd.f32 %v213_v13, %v212_v20  ;;  %v155_v38 = vadd.f32 %v154_v16, %v153_v48  ;;  %v180_v17 = vadd.f32 %v179_v29, %v178_v49 }
  0x44   :  { %v164_v42 = vadd.f32 %v163_v34, %v162_v1  ;;  %v173_v43 = vadd.f32 %v172_v53, %v171_v6  ;;  %v189_v46 = vadd.f32 %v188_v22, %v187_v7  ;;  %v198_v47 = vadd.f32 %v197_v21, %v196_v15 }
  0x45   :  { %v1023_v50 = vadd.f32 %v363_v14, %v362_v61  ;;  %v206_v51 = vrot.slane %v205_v24, 4  ;;  %v215_v57 = vrot.slane %v214_v36, 4  ;;  %v156_v48 = vrot.slane %v155_v38, 1 }
  0x46   :  { %v181_v49 = vrot.slane %v180_v17, 2  ;;  %v165_v0 = vrot.slane %v164_v42, 1  ;;  %v174_v1 = vrot.slane %v173_v43, 1  ;;  %v190_v7 = vrot.slane %v189_v46, 2 }
  0x47   :  { %v199_v15 = vrot.slane %v198_v47, 2  ;;  %v1030_v16 = vadd.f32 %v206_v51, %v205_v24  ;;  %v1032_v29 = vadd.f32 %v215_v57, %v214_v36  ;;  %v1037_v20 = vadd.f32 %v156_v48, %v155_v38 }
  0x48   :  { %v1039_v13 = vadd.f32 %v181_v49, %v180_v17  ;;  %v1042_v14 = vadd.f32 %v165_v0, %v164_v42  ;;  %v1044_v34 = vadd.f32 %v174_v1, %v173_v43  ;;  %v1047_v22 = vadd.f32 %v190_v7, %v189_v46 }
  0x49   :  { %v208_v21 = vrot.slane %v1030_v16, 2 }
  0x7d   :  { %v380_v26 = vpop.permute.xlu1 %379  ;;  %v1021_v41 = vpop.permute.xlu0 %371 }
  0x7e   :  { %v399_v35 = vrot.slane %v380_v26, 1  ;;  %v400_v28 = vrot.slane %v380_v26, 2  ;;  %v401_v25 = vrot.slane %v380_v26, 3  ;;  %v402_v23 = vrot.slane %v380_v26, 4 }
  0x7f   :  { %619 = vrcp.f32 %v380_v26  ;;  %v403_v37 = vrot.slane %v380_v26, 5  ;;  %v404_v40 = vrot.slane %v380_v26, 6  ;;  %v405_v45 = vrot.slane %v380_v26, 7 }
  0x80   :  { %621 = vrcp.f32 %v399_v35  ;;  %v385_v62 = vrot.slane %v1021_v41, 1  ;;  %v386_v44 = vrot.slane %v1021_v41, 2  ;;  %v387_v6 = vrot.slane %v1021_v41, 3 }
  0x81   :  { %623 = vrcp.f32 %v400_v28  ;;  %v388_v61 = vrot.slane %v1021_v41, 4  ;;  %v389_v30 = vrot.slane %v1021_v41, 5  ;;  %v1035_v31 = vpop.permute.xlu1 %383  ;;  %v390_v26 = vrot.slane %v1021_v41, 6 }
  0x82   :  { %625 = vrcp.f32 %v401_v25  ;;  %v391_v53 = vrot.slane %v1021_v41, 7  ;;  %v1049_v35 = vadd.f32 %v199_v15, %v198_v47  ;;  %v406_v28 = vrot.slane %v1035_v31, 1  ;;  %v1052_v25 = vpop.permute.xlu0 %375 }
  0x83   :  { %627 = vrcp.f32 %v402_v23  ;;  %v217_v23 = vrot.slane %v1032_v29, 2  ;;  %v407_v36 = vrot.slane %v1035_v31, 2  ;;  %v409_v38 = vrot.slane %v1035_v31, 4 }
  0x84   :  { %629 = vrcp.f32 %v403_v37  ;;  %v408_v37 = vrot.slane %v1035_v31, 3  ;;  %v412_v42 = vrot.slane %v1035_v31, 7  ;;  %v392_v46 = vrot.slane %v1052_v25, 1 }
  0x85   :  { %631 = vrcp.f32 %v404_v40  ;;  %v410_v40 = vrot.slane %v1035_v31, 5  ;;  %v393_v47 = vrot.slane %v1052_v25, 2  ;;  %v395_v48 = vrot.slane %v1052_v25, 4 }
  0x86   :  { %633 = vrcp.f32 %v405_v45 }
  0x87   :  { %635 = vrcp.f32 %v1021_v41  ;;  %v411_v41 = vrot.slane %v1035_v31, 6 }
  0x88   :  { %637 = vrcp.f32 %v385_v62  ;;  %v394_v62 = vrot.slane %v1052_v25, 3 }
  0x89   :  { %639 = vrcp.f32 %v386_v44 }
  0x8a   :  { %641 = vrcp.f32 %v387_v6 }
  0x8b   :  { %643 = vrcp.f32 %v388_v61 }
  0x8c   :  { %v620_v24 = vpop.eup %619  ;;  %645 = vrcp.f32 %v389_v30 }
  0x8d   :  { %v622_v17 = vpop.eup %621  ;;  %647 = vrcp.f32 %v390_v26  ;;  %v478_v44 = vmul.f32 %v620_v24, %v834_v60 }
  0x8e   :  { %v624_v43 = vpop.eup %623  ;;  %v480_v45 = vmul.f32 %v622_v17, %v842_v2  ;;  %649 = vrcp.f32 %v391_v53 }
  0x8f   :  { %v626_v51 = vpop.eup %625  ;;  %v482_v57 = vmul.f32 %v624_v43, %v844_v3  ;;  %651 = vrcp.f32 %v1035_v31  ;;  %v396_v3 = vrot.slane %v1052_v25, 5  ;;  %v397_v43 = vrot.slane %v1052_v25, 6 }
  0x90   :  { %v628_v49 = vpop.eup %627  ;;  %v484_v0 = vmul.f32 %v626_v51, %v846_v4  ;;  %v576_v2 = vrot.slane %v480_v45, 7  ;;  %653 = vrcp.f32 %v406_v28 }
  0x91   :  { %v630_v1 = vpop.eup %629  ;;  %v486_v6 = vmul.f32 %v628_v49, %v848_v5  ;;  %v578_v7 = vrot.slane %v482_v57, 6  ;;  %655 = vrcp.f32 %v407_v36 }
  0x92   :  { %v632_v15 = vpop.eup %631  ;;  %v488_v61 = vmul.f32 %v630_v1, %v859_v9  ;;  %v580_v30 = vrot.slane %v484_v0, 5  ;;  %657 = vrcp.f32 %v408_v37  ;;  %v577_v31 = vsel %vm542_vm2, %v576_v2, %v478_v44 }
  0x93   :  { %v634_v26 = vpop.eup %633  ;;  %v490_v60 = vmul.f32 %v632_v15, %v861_v10  ;;  %v582_v4 = vrot.slane %v486_v6, 4  ;;  %659 = vrcp.f32 %v409_v38  ;;  %v579_v53 = vsel %vm545_vm3, %v578_v7, %v577_v31 }
  0x94   :  { %v636_v28 = vpop.eup %635  ;;  %v492_v5 = vmul.f32 %v634_v26, %v915_v63  ;;  %v584_v24 = vrot.slane %v488_v61, 3  ;;  %661 = vrcp.f32 %v410_v40  ;;  %v581_v36 = vsel %vm548_vm4, %v580_v30, %v579_v53 }
  0x95   :  { %v638_v17 = vpop.eup %637  ;;  %v586_v9 = vrot.slane %v490_v60, 2  ;;  %663 = vrcp.f32 %v411_v41  ;;  %v583_v37 = vsel %vm551_vm5, %v582_v4, %v581_v36  ;;  %v446_v63 = vmul.f32 %v636_v28, %v927_v32 }
  0x96   :  { %v640_v45 = vpop.eup %639  ;;  %v588_v10 = vrot.slane %v492_v5, 1  ;;  %v448_v38 = vmul.f32 %v638_v17, %v929_v33  ;;  %665 = vrcp.f32 %v412_v42  ;;  %v585_v51 = vsel %vm554_vm6, %v584_v24, %v583_v37 }
  0x97   :  { %v642_v57 = vpop.eup %641  ;;  %v450_v40 = vmul.f32 %v640_v45, %v937_v39  ;;  %v587_v49 = vsel %vm557_vm7, %v586_v9, %v585_v51  ;;  %667 = vrcp.f32 %v1052_v25  ;;  %v398_v32 = vrot.slane %v1052_v25, 7 }
  0x98   :  { %v644_v41 = vpop.eup %643  ;;  %v452_v44 = vmul.f32 %v642_v57, %v957_v11  ;;  %v541_v0 = vrot.slane %v448_v38, 7  ;;  %v589_v2 = vsel %vm560_vm8, %v588_v10, %v587_v49  ;;  %669 = vrcp.f32 %v392_v46 }
  0x99   :  { %v646_v33 = vpop.eup %645  ;;  %v454_v42 = vmul.f32 %v644_v41, %v959_v12  ;;  %v544_v1 = vrot.slane %v450_v40, 6  ;;  %610 = vst.msk [vmem:[%s1158_s2 + $0x10] sm:$0xff] %vm75_vm0, %v589_v2  ;;  %671 = vrcp.f32 %v393_v47  ;;  %v183_v5 = vrot.slane %v1039_v13, 1 }
  0x9a   :  { %v648_v39 = vpop.eup %647  ;;  %v456_v6 = vmul.f32 %v646_v33, %v967_v27  ;;  %v547_v11 = vrot.slane %v452_v44, 5  ;;  %v543_v7 = vsel %vm542_vm2, %v541_v0, %v446_v63  ;;  %673 = vrcp.f32 %v394_v62 }
  0x9b   :  { %v650_v46 = vpop.eup %649  ;;  %v458_v15 = vmul.f32 %v648_v39, %v987_v52  ;;  %v550_v12 = vrot.slane %v454_v42, 4  ;;  %v546_v61 = vsel %vm545_vm3, %v544_v1, %v543_v7  ;;  %675 = vrcp.f32 %v395_v48 }
  0x9c   :  { %v652_v30 = vpop.eup %651  ;;  %v460_v31 = vmul.f32 %v650_v46, %v989_v54  ;;  %v553_v47 = vrot.slane %v456_v6, 3  ;;  %v549_v26 = vsel %vm548_vm4, %v547_v11, %v546_v61  ;;  %677 = vrcp.f32 %v396_v3 }
  0x9d   :  { %v654_v27 = vpop.eup %653  ;;  %v556_v60 = vrot.slane %v458_v15, 2  ;;  %v552_v62 = vsel %vm551_vm5, %v550_v12, %v549_v26  ;;  %v209_v52 = vadd.f32 %v208_v21, %v1030_v16  ;;  %679 = vrcp.f32 %v397_v43 }
  0x9e   :  { %v656_v4 = vpop.eup %655  ;;  %v559_v53 = vrot.slane %v460_v31, 1  ;;  %v496_v25 = vmul.f32 %v654_v27, %v993_v56  ;;  %v555_v48 = vsel %vm554_vm6, %v553_v47, %v552_v62  ;;  %681 = vrcp.f32 %v398_v32 }
  0x9f   :  { %v658_v54 = vpop.eup %657  ;;  %v498_v28 = vmul.f32 %v656_v4, %v1007_v8  ;;  %v558_v3 = vsel %vm557_vm7, %v556_v60, %v555_v48  ;;  %v218_v24 = vadd.f32 %v217_v23, %v1032_v29  ;;  %v494_v21 = vmul.f32 %v652_v30, %v991_v55 }
  0xa0   :  { %v660_v16 = vpop.eup %659  ;;  %v500_v36 = vmul.f32 %v658_v54, %v1009_v58  ;;  %v561_v56 = vsel %vm560_vm8, %v559_v53, %v558_v3  ;;  %v590_v17 = vrot.slane %v496_v25, 7  ;;  %v192_v43 = vrot.slane %v1047_v22, 1 }
  0xa1   :  { %v662_v9 = vpop.eup %661  ;;  %v502_v37 = vmul.f32 %v660_v16, %v1011_v59  ;;  %v592_v8 = vrot.slane %v498_v28, 6  ;;  %608 = vst.msk [vmem:[%s1158_s2] sm:$0xff] %vm75_vm0, %v561_v56  ;;  %v201_v29 = vrot.slane %v1049_v35, 1  ;;  %v210_v10 = vrot.slane %v209_v52, 1 }
  0xa2   :  { %v664_v23 = vpop.eup %663  ;;  %v504_v55 = vmul.f32 %v662_v9, %v1013_v18  ;;  %v591_v58 = vsel %vm542_vm2, %v590_v17, %v494_v21  ;;  %v594_v45 = vrot.slane %v500_v36, 5  ;;  %v219_v63 = vrot.slane %v218_v24, 1 }
  0xa3   :  { %v666_v38 = vpop.eup %665  ;;  %v506_v59 = vmul.f32 %v664_v23, %v1015_v19  ;;  %v593_v51 = vsel %vm545_vm3, %v592_v8, %v591_v58  ;;  %v596_v57 = vrot.slane %v502_v37, 4  ;;  %v184_v0 = vadd.f32 %v183_v5, %v1039_v13 }
  0xa4   :  { %v668_v40 = vpop.eup %667  ;;  %v508_v49 = vmul.f32 %v666_v38, %v1023_v50  ;;  %v595_v41 = vsel %vm548_vm4, %v594_v45, %v593_v51  ;;  %v598_v44 = vrot.slane %v504_v55, 3  ;;  %v193_v42 = vadd.f32 %v192_v43, %v1047_v22 }
  0xa5   :  { %v670_v18 = vpop.eup %669  ;;  %v597_v2 = vsel %vm551_vm5, %v596_v57, %v595_v41  ;;  %v600_v33 = vrot.slane %v506_v59, 2  ;;  %v202_v39 = vadd.f32 %v201_v29, %v1049_v35  ;;  %v211_v7 = vadd.f32 %v210_v10, %v209_v52 }
  0xa6   :  { %v672_v1 = vpop.eup %671  ;;  %v599_v19 = vsel %vm554_vm6, %v598_v44, %v597_v2  ;;  %v602_v32 = vrot.slane %v508_v49, 1  ;;  %v464_v6 = vmul.f32 %v670_v18, %v1042_v14  ;;  %v220_v46 = vadd.f32 %v219_v63, %v218_v24 }
  0xa7   :  { %v674_v50 = vpop.eup %673  ;;  %v601_v11 = vsel %vm557_vm7, %v600_v33, %v599_v19  ;;  %v466_v13 = vmul.f32 %v672_v1, %v1044_v34  ;;  %v462_v22 = vmul.f32 %v668_v40, %v1037_v20 }
  0xa8   :  { %v676_v15 = vpop.eup %675  ;;  %v603_v12 = vsel %vm560_vm8, %v602_v32, %v601_v11  ;;  %v468_v61 = vmul.f32 %v674_v50, %v184_v0  ;;  %v562_v30 = vrot.slane %v464_v6, 7 }
  0xa9   :  { %v678_v31 = vpop.eup %677  ;;  %611 = vst.msk [vmem:[%s1158_s2 + $0x18] sm:$0xff] %vm75_vm0, %v603_v12  ;;  %v470_v14 = vmul.f32 %v676_v15, %v193_v42  ;;  %v564_v35 = vrot.slane %v466_v13, 6 }
  0xaa   :  { %v680_v47 = vpop.eup %679  ;;  %v472_v26 = vmul.f32 %v678_v31, %v202_v39  ;;  %v563_v27 = vsel %vm542_vm2, %v562_v30, %v462_v22  ;;  %v566_v34 = vrot.slane %v468_v61, 5 }
  0xab   :  { %v682_v60 = vpop.eup %681  ;;  %v474_v62 = vmul.f32 %v680_v47, %v211_v7  ;;  %v565_v52 = vsel %vm545_vm3, %v564_v35, %v563_v27  ;;  %v568_v20 = vrot.slane %v470_v14, 4 }
  0xac   :  { %v476_v4 = vmul.f32 %v682_v60, %v220_v46  ;;  %v567_v53 = vsel %vm548_vm4, %v566_v34, %v565_v52  ;;  %v570_v25 = vrot.slane %v472_v26, 3 }
  0xad   :  { %v569_v48 = vsel %vm551_vm5, %v568_v20, %v567_v53  ;;  %v572_v54 = vrot.slane %v474_v62, 2 }
  0xae   :  { %v571_v28 = vsel %vm554_vm6, %v570_v25, %v569_v48  ;;  %v574_v3 = vrot.slane %v476_v4, 1 }
  0xaf   :  { %v573_v5 = vsel %vm557_vm7, %v572_v54, %v571_v28 }
  0xb0   :  { %v575_v24 = vsel %vm560_vm8, %v574_v3, %v573_v5 }
  0xb1   :  { %609 = vst.msk [vmem:[%s1158_s2 + $0x8] sm:$0xff] %vm75_vm0, %v575_v24 }

// kernel: _lambda_.134
= control target key start
LH: loop header
LB: loop body
LE: loop exit
PB: predicated region body
PF: predicated region fallthrough
CT: control target
= control target key end

     0   :  { %13 = vsyncpa [#allocation3], 0  ;;  %s176_s0 = inlined_call_operand.vmem [shape: f32[7], index: 0, kind: input, shape index: {}]   ;;  %s177_s1 = inlined_call_operand.vmem [shape: f32[2,128], index: 1, kind: input, shape index: {}]   ;;  %s178_s2 = inlined_call_operand.vmem [shape: f32[2,128], index: 2, kind: input, shape index: {}]   ;;  %s179_s3 = inlined_call_operand.vmem [shape: f32[2,128], index: 3, kind: input, shape index: {}]   ;;  %s180_s4 = inlined_call_operand.vmem [shape: f32[2,128], index: 4, kind: input, shape index: {}]   ;;  %s181_s5 = inlined_call_operand.vmem [shape: f32[2,128], index: 5, kind: input, shape index: {}]   ;;  %s182_s6 = inlined_call_operand.vmem [shape: f32[2,128], index: 6, kind: input, shape index: {}]   ;;  %s183_s7 = inlined_call_operand.vmem [shape: f32[2,128], index: 7, kind: input, shape index: {}]   ;;  %s184_s8 = inlined_call_operand.vmem [shape: f32[2,128], index: 8, kind: output, shape index: {}]  }
   0x1   :  { %s20_s29 = sshll.u32 %s176_s0, 4  ;;  %s21_s29 = int_to_ptr.vmem [resolvable:$true] %s20_s29 }
   0x2   :  { %s89_s30 = scalar_lea.vmem %s21_s29, 16  ;;  %p94_p1 = scmp.lt.s32.totalorder %s21_s29, %s21_s29 }
   0x3   :  { %p90_p0 = scmp.ne.s32.totalorder %s21_s29, %s89_s30  ;;  %p95_p2 = scmp.lt.s32.totalorder %s89_s30, %s89_s30 }
   0x5   :  { %p96_p3 = por %p95_p2, %p94_p1 }
   0x7   :  { %p97_p4 = pnand %p96_p3, %p90_p0 }
   0x9   :  { %100 = shalt.err (!%p97_p4)
}
   0xa   :  { %s103_s9 = smov [#allocation2]  }
   0xb   :  { %23 = dma.vmem_to_smem %s21_s29, 16, %s103_s9, [#allocation3]  }
   0xc   :  { %101 = dma.done.wait [#allocation3], 16  }
   0xd   :  { %102 = vsyncadd [#allocation3], 4294967280 }
   0xe   :  { %41 = sfence }
   0xf   :  { %s42_s10 = sld [smem:[#allocation2]]  ;;  %v43_v0 = vld [vmem:[%s177_s1] sm:$0x3] }
  0x10   :  { %s82_s11 = sld [smem:[#allocation2 + $0x1]]  ;;  %v47_v1 = vld [vmem:[%s178_s2] sm:$0x3] }
  0x11   :  { %s83_s12 = sld [smem:[#allocation2 + $0x2]]  ;;  %v52_v3 = vld [vmem:[%s179_s3] sm:$0x3] }
  0x12   :  { %s84_s13 = sld [smem:[#allocation2 + $0x3]]  ;;  %v57_v6 = vld [vmem:[%s180_s4] sm:$0x3] }
  0x13   :  { %s85_s0 = sld [smem:[#allocation2 + $0x4]]  ;;  %v62_v11 = vld [vmem:[%s181_s5] sm:$0x3] }
  0x14   :  { %s86_s18 = sld [smem:[#allocation2 + $0x5]]  ;;  %v67_v15 = vld [vmem:[%s182_s6] sm:$0x3] }
  0x15   :  { %v44_v2 = vstv %s42_s10  ;;  %s87_s21 = sld [smem:[#allocation2 + $0x6]]  ;;  %v72_v19 = vld [vmem:[%s183_s7] sm:$0x3] }
  0x16   :  { %v45_v4 = vmul.f32 %v44_v2, %v43_v0  ;;  %v48_v5 = vstv %s82_s11 }
  0x17   :  { %v49_v7 = vmul.f32 %v48_v5, %v47_v1  ;;  %v53_v8 = vstv %s83_s12 }
  0x18   :  { %v54_v9 = vmul.f32 %v53_v8, %v52_v3  ;;  %v58_v10 = vstv %s84_s13 }
  0x19   :  { %v50_v12 = vadd.f32 %v49_v7, %v45_v4  ;;  %v59_v13 = vmul.f32 %v58_v10, %v57_v6  ;;  %v63_v14 = vstv %s85_s0 }
  0x1a   :  { %v68_v16 = vstv %s86_s18  ;;  %v64_v18 = vmul.f32 %v63_v14, %v62_v11 }
  0x1b   :  { %v55_v17 = vadd.f32 %v54_v9, %v50_v12  ;;  %v73_v20 = vstv %s87_s21  ;;  %v69_v22 = vmul.f32 %v68_v16, %v67_v15 }
  0x1c   :  { %v74_v24 = vmul.f32 %v73_v20, %v72_v19 }
  0x1d   :  { %v60_v21 = vadd.f32 %v59_v13, %v55_v17 }
  0x1f   :  { %v65_v23 = vadd.f32 %v64_v18, %v60_v21 }
  0x21   :  { %v70_v25 = vadd.f32 %v69_v22, %v65_v23 }
  0x23   :  { %v75_v26 = vadd.f32 %v74_v24, %v70_v25 }
  0x25   :  { %76 = vst [vmem:[%s184_s8] sm:$0x3] %v75_v26 }
  0x26   :  { %81 = vsyncpa [#allocation3], 1 }

// kernel: _lambda_.153
= control target key start
LH: loop header
LB: loop body
LE: loop exit
PB: predicated region body
PF: predicated region fallthrough
CT: control target
= control target key end

     0   :  { %vm27_vm0 = vcmask 130048   ;;  %s303_s1 = inlined_call_operand.vmem [shape: f32[16,16], index: 1, kind: input, shape index: {}]   ;;  %s304_s0 = inlined_call_operand.vmem [shape: f32[32,16], index: 0, kind: input, shape index: {}]   ;;  %s305_s2 = inlined_call_operand.vmem [shape: f32[1,16], index: 2, kind: input, shape index: {}]   ;;  %s306_s3 = inlined_call_operand.vmem [shape: f32[1,16], index: 3, kind: input, shape index: {}]   ;;  %s307_s4 = inlined_call_operand.vmem [shape: f32[32,16], index: 4, kind: output, shape index: {}]  }
   0x1   :  { %v26_v0 = vld [vmem:[%s303_s1 + $0x8] sm:$0xff]  ;;  %v25_v1 = vld [vmem:[%s303_s1] sm:$0xff]  ;;  %v19_v4 = vld [vmem:[%s304_s0 + $0x10] sm:$0xff] }
   0x2   :  { %v17_v2 = vld [vmem:[%s304_s0] sm:$0xff]  ;;  %210 = vmatprep.subr.mxu0 %v26_v0  ;;  %220 = vmatprep.subr.mxu1 %v26_v0  ;;  %v18_v5 = vld [vmem:[%s304_s0 + $0x8] sm:$0xff]  ;;  %v20_v6 = vld [vmem:[%s304_s0 + $0x18] sm:$0xff]  ;;  %v23_v7 = vmax.f32 %v19_v4, 0.0 }
   0x3   :  { %v21_v3 = vmax.f32 %v17_v2, 0.0  ;;  %211 = vmatpush3.msra.mxu0 %v26_v0  ;;  %222 = vmatpush3.msra.mxu1 %v26_v0  ;;  %v22_v8 = vmax.f32 %v18_v5, 0.0  ;;  %v24_v9 = vmax.f32 %v20_v6, 0.0  ;;  %v202_v52 = vld [vmem:[%s305_s2] ss:$0 sm:$0xff] }
   0x4   :  { %212 = vmatprep.subr.mxu0 %v25_v1  ;;  %221 = vmatprep.subr.mxu1 %v25_v1  ;;  %v203_v57 = vld [vmem:[%s306_s3] ss:$0 sm:$0xff] }
   0x5   :  { %213 = vmatpush3.msra.mxu0 %v25_v1  ;;  %223 = vmatpush3.msra.mxu1 %v25_v1 }
   0x6   :  { %214 = vmatprep.mubr.msk.f32.mxu0 %vm27_vm0, %v21_v3  ;;  %217 = vmatprep.mubr.msk.f32.mxu1 %vm27_vm0, %v23_v7 }
   0x7   :  { %215 = vmatmul.mubr.msk.f32.vlgmr.msra.gmra.mxu0 %vm27_vm0, %v22_v8  ;;  %218 = vmatmul.mubr.msk.f32.vlgmr.msra.gmra.mxu1 %vm27_vm0, %v24_v9 }
  0xc7   :  { %v216_v10 = vpop.f32.mrf.mxu0  ;;  %v219_v11 = vpop.f32.mrf.mxu1 }
  0xc8   :  { %v128_v14 = vsel %vm27_vm0, %v216_v10, 0.0  ;;  %v132_v19 = vsel %vm27_vm0, %v219_v11, 0.0 }
  0xc9   :  { %v106_v12 = vpop.f32.mrf.mxu0  ;;  %v116_v13 = vpop.f32.mrf.mxu1 }
  0xca   :  { %v127_v15 = vsel %vm27_vm0, %v106_v12, 0.0  ;;  %v130_v17 = vsel %vm27_vm0, %v116_v13, 0.0 }
  0xcb   :  { %v129_v16 = vadd.f32 %v128_v14, %v127_v15 }
  0xcd   :  { %v131_v18 = vadd.f32 %v130_v17, %v129_v16 }
  0xcf   :  { %v133_v20 = vadd.f32 %v132_v19, %v131_v18 }
  0xd1   :  { %v134_v21 = vrot.slane %v133_v20, 4 }
  0xd3   :  { %v135_v22 = vadd.f32 %v134_v21, %v133_v20 }
  0xd5   :  { %v136_v23 = vrot.slane %v135_v22, 2 }
  0xd7   :  { %v137_v24 = vadd.f32 %v136_v23, %v135_v22 }
  0xd9   :  { %v138_v25 = vrot.slane %v137_v24, 1 }
  0xdb   :  { %v139_v26 = vadd.f32 %v138_v25, %v137_v24 }
  0xdd   :  { %v141_v27 = vmul.f32 0.03125, %v139_v26 }
  0xdf   :  { %v142_v28 = vsub.f32 %v106_v12, %v141_v27  ;;  %v143_v29 = vsub.f32 %v216_v10, %v141_v27  ;;  %v144_v30 = vsub.f32 %v116_v13, %v141_v27  ;;  %v145_v31 = vsub.f32 %v219_v11, %v141_v27 }
  0xe1   :  { %v146_v32 = vmul.f32 %v142_v28, %v142_v28  ;;  %v147_v33 = vmul.f32 %v143_v29, %v143_v29  ;;  %v148_v34 = vmul.f32 %v144_v30, %v144_v30  ;;  %v149_v35 = vmul.f32 %v145_v31, %v145_v31 }
  0xe3   :  { %v150_v36 = vsel %vm27_vm0, %v146_v32, 0.0  ;;  %v151_v37 = vsel %vm27_vm0, %v147_v33, 0.0  ;;  %v153_v39 = vsel %vm27_vm0, %v148_v34, 0.0  ;;  %v155_v41 = vsel %vm27_vm0, %v149_v35, 0.0 }
  0xe4   :  { %v152_v38 = vadd.f32 %v151_v37, %v150_v36 }
  0xe6   :  { %v154_v40 = vadd.f32 %v153_v39, %v152_v38 }
  0xe8   :  { %v156_v42 = vadd.f32 %v155_v41, %v154_v40 }
  0xea   :  { %v157_v43 = vrot.slane %v156_v42, 4 }
  0xec   :  { %v158_v44 = vadd.f32 %v157_v43, %v156_v42 }
  0xee   :  { %v159_v45 = vrot.slane %v158_v44, 2 }
  0xf0   :  { %v160_v46 = vadd.f32 %v159_v45, %v158_v44 }
  0xf2   :  { %v161_v47 = vrot.slane %v160_v46, 1 }
  0xf4   :  { %v162_v48 = vadd.f32 %v161_v47, %v160_v46 }
  0xf6   :  { %v163_v49 = vmul.f32 0.03125, %v162_v48 }
  0xf8   :  { %v164_v50 = vadd.f32 1e-05, %v163_v49 }
  0xfa   :  { %224 = vrsqrt.f32 %v164_v50 }
 0x107   :  { %v225_v51 = vpop.eup %224 }
 0x108   :  { %v166_v53 = vmul.f32 %v225_v51, %v142_v28  ;;  %v167_v54 = vmul.f32 %v225_v51, %v143_v29  ;;  %v168_v55 = vmul.f32 %v225_v51, %v144_v30  ;;  %v169_v56 = vmul.f32 %v225_v51, %v145_v31 }
 0x10a   :  { %v176_v58 = vmul.f32 %v202_v52, %v166_v53  ;;  %v177_v59 = vmul.f32 %v202_v52, %v167_v54  ;;  %v178_v60 = vmul.f32 %v202_v52, %v168_v55  ;;  %v179_v61 = vmul.f32 %v202_v52, %v169_v56 }
 0x10c   :  { %v186_v62 = vadd.f32 %v203_v57, %v176_v58  ;;  %v187_v63 = vadd.f32 %v203_v57, %v177_v59  ;;  %v188_v0 = vadd.f32 %v203_v57, %v178_v60  ;;  %v189_v1 = vadd.f32 %v203_v57, %v179_v61 }
 0x10e   :  { %190 = vst.msk [vmem:[%s307_s4] sm:$0xff] %vm27_vm0, %v186_v62  ;;  %191 = vst.msk [vmem:[%s307_s4 + $0x8] sm:$0xff] %vm27_vm0, %v187_v63 }
 0x10f   :  { %192 = vst.msk [vmem:[%s307_s4 + $0x10] sm:$0xff] %vm27_vm0, %v188_v0  ;;  %193 = vst.msk [vmem:[%s307_s4 + $0x18] sm:$0xff] %vm27_vm0, %v189_v1 }

// kernel: _lambda_.199
= control target key start
LH: loop header
LB: loop body
LE: loop exit
PB: predicated region body
PF: predicated region fallthrough
CT: control target
= control target key end

     0   :  { %vm17_vm0 = vcmask 257024   ;;  %v182_v1 = vmov 0.0   ;;  %vm183_vm1 = vmmov 0   ;;  %s229_s0 = inlined_call_operand.vmem [shape: f32[2,4,32], index: 0, kind: input, shape index: {}]   ;;  %s230_s1 = inlined_call_operand.vmem [shape: f32[32,10], index: 1, kind: input, shape index: {}]   ;;  %s231_s2 = inlined_call_operand.vmem [shape: f32[1,10], index: 2, kind: input, shape index: {}]   ;;  %s232_s3 = inlined_call_operand.hbm [shape: f32[2,10], index: 3, kind: output, shape index: {}]  }
   0x1   :  { %v38_v0 = vld [vmem:[%s230_s1 + $0x18] sm:$0xff]  ;;  %146 = vmatprep.subr.mxu0 %v182_v1  ;;  %v37_v2 = vld [vmem:[%s230_s1 + $0x10] sm:$0xff]  ;;  %154 = vmatprep.mubr.msk.f32.mxu0 %vm183_vm1, %v182_v1  ;;  %v15_v3 = vld [vmem:[%s229_s0] sm:$0xf] }
   0x2   :  { %v16_v4 = vld [vmem:[%s229_s0 + $0x4] sm:$0xf]  ;;  %147 = vmatpush3.msra.mxu0 %v38_v0  ;;  %v18_v5 = vsel %vm17_vm0, %v15_v3, 0.0  ;;  %v36_v7 = vld [vmem:[%s230_s1 + $0x8] sm:$0xff] }
   0x3   :  { %v25_v6 = vsel %vm17_vm0, %v16_v4, 0.0  ;;  %148 = vmatprep.subr.mxu0 %v182_v1  ;;  %v19_v8 = vrot.slane %v18_v5, 4 }
   0x4   :  { %v26_v9 = vrot.slane %v25_v6, 4 }
   0x5   :  { %8 = vsyncpa [#allocation3], 0  ;;  %149 = vmatpush3.msra.mxu0 %v37_v2  ;;  %v35_v10 = vld [vmem:[%s230_s1] sm:$0xff]  ;;  %v20_v11 = vadd.f32 %v19_v8, %v18_v5  ;;  %vm48_vm2 = vcmask 1041409   ;;  %vm50_vm3 = vcmask 261120   ;;  %s184_s24 = smov [#allocation2]  }
   0x6   :  { %150 = vmatprep.subr.mxu0 %v182_v1  ;;  %v27_v12 = vadd.f32 %v26_v9, %v25_v6  ;;  %v139_v24 = vld [vmem:[%s231_s2] ss:$0 sm:$0xff]  ;;  %s131_s25 = sshll.u32 %s184_s24, 4  ;;  %vm123_vm4 = vcmask 74752   ;;  %s132_s25 = int_to_ptr.vmem [resolvable:$true] %s131_s25 }
   0x7   :  { %151 = vmatpush3.msra.mxu0 %v36_v7  ;;  %v21_v13 = vrot.slane %v20_v11, 2  ;;  %s160_s26 = scalar_lea.vmem %s132_s25, 32  ;;  %p165_p1 = scmp.lt.s32.totalorder %s132_s25, %s132_s25 }
   0x8   :  { %152 = vmatprep.subr.mxu0 %v182_v1  ;;  %v28_v14 = vrot.slane %v27_v12, 2  ;;  %p161_p0 = scmp.ne.s32.totalorder %s132_s25, %s160_s26  ;;  %p166_p2 = scmp.lt.s32.totalorder %s160_s26, %s160_s26 }
   0x9   :  { %153 = vmatpush3.msra.mxu0 %v35_v10  ;;  %v22_v15 = vadd.f32 %v21_v13, %v20_v11 }
   0xa   :  { %v29_v16 = vadd.f32 %v28_v14, %v27_v12  ;;  %p167_p3 = por %p166_p2, %p165_p1 }
   0xb   :  { %v23_v17 = vrot.slane %v22_v15, 1 }
   0xc   :  { %v30_v18 = vrot.slane %v29_v16, 1  ;;  %p168_p4 = pnand %p167_p3, %p161_p0 }
   0xd   :  { %v24_v19 = vadd.f32 %v23_v17, %v22_v15 }
   0xe   :  { %v31_v20 = vadd.f32 %v30_v18, %v29_v16 }
   0xf   :  { %v33_v21 = vmul.f32 0.25, %v24_v19 }
  0x10   :  { %v34_v22 = vmul.f32 0.25, %v31_v20 }
  0x12   :  { %v49_v23 = vsel %vm48_vm2, %v34_v22, %v33_v21 }
  0x13   :  { %155 = vmatmul.mubr.msk.f32.vlgmr.msra.gmra.mxu0 %vm50_vm3, %v49_v23 }
  0xd3   :  { %v119_v25 = vpop.f32.mrf.mxu0 }
  0xd4   :  { %v120_v26 = vadd.f32 %v139_v24, %v119_v25 }
  0xd5   :  { %v156_v27 = vpop.f32.mrf.mxu0 }
  0xd6   :  { %124 = vst.msk [vmem:[#allocation2] sm:$0x3] %vm123_vm4, %v120_v26 }
  0xd7   :  { %171 = shalt.err (!%p168_p4)
}
  0xd8   :  { %134 = dma.vmem_to_hbm [thread:$0]  %s132_s25, 32, %s232_s3, [#allocation3]  }
  0xd9   :  { %180 = dma.done.wait [#allocation3], 32  }
  0xda   :  { %181 = vsyncadd [#allocation3], 4294967264 }
  0xdb   :  { %138 = vsyncpa [#allocation3], 1 }

</bundles_post_ra>
